<compile_context>
chip_gen: v5e
topology: v5e:2x2
jax: 0.10.0
libtpu: 0.0.40
codegen_flags: <defaults>
</compile_context>

<pallas_src>
import functools

import numpy as np
import jax
import jax.numpy as jnp
from jax.experimental import pallas as pl
from jax.experimental.pallas import tpu as pltpu


# ------------------------------ fused kernel --------------------------------

def cnn_fused_kernel(xle_ref, xlo_ref, s_ref, b1_ref, w2_ref, b2_ref,
                     wfc_ref, bfc_ref, o_ref, a1_ref, patch_ref, flat_ref,
                     *, B):
    f32 = jnp.float32
    bf16 = jnp.bfloat16

    # ---- stage 1: conv1 (3x3, 1->32) + ReLU + 2x2 max-pool, all on the MXU ---
    # xle/xlo rows are ordered (pooled-row p, sample s) and hold the 3 input-row
    # taps of conv rows 2p / 2p+1 concatenated (K = 3*28 = 84).  The banded
    # weight s_ref emits conv1 columns ordered (w-parity half, pooled-col q, c),
    # so pooling over w is max of the two aligned 512-lane halves and pooling
    # over h is max of the even/odd-row matmul results.
    xle = xle_ref[0]                               # (13B, 84) bf16, conv rows 2p
    xlo = xlo_ref[0]                               # (13B, 84) bf16, conv rows 2p+1
    for col in range(2):                           # 256-lane chunks of each half
        lo = col * 256
        m = jnp.dot(xle, s_ref[:, lo:lo + 256], preferred_element_type=f32)
        m = jnp.maximum(m, jnp.dot(xle, s_ref[:, 512 + lo:512 + lo + 256],
                                   preferred_element_type=f32))
        m = jnp.maximum(m, jnp.dot(xlo, s_ref[:, lo:lo + 256],
                                   preferred_element_type=f32))
        m = jnp.maximum(m, jnp.dot(xlo, s_ref[:, 512 + lo:512 + lo + 256],
                                   preferred_element_type=f32))
        # per-channel bias + monotone ReLU commute with the pooling max
        a1_ref[:, lo:lo + 256] = jnp.maximum(
            m + b1_ref[:, lo:lo + 256], 0.0).astype(bf16)
    # a1_ref: (13B, 512) bf16, rows (p, s), lanes q*32 + c  (q = 0..12 valid)

    # ---- stage 2: conv2 (4x4, 32->64) + ReLU + 2x2 max-pool ------------------
    # im2col: 40 large (10B, 128) block copies per grid step.  Patch rows are
    # ordered (j, i, s), K columns ordered (dy, dx, cin) -- each (j, dy) pair is
    # one contiguous row-block and one 128-lane window of a1.
    for j in range(10):
        for dy in range(4):
            patch_ref[j * 10 * B:(j + 1) * 10 * B, dy * 128:(dy + 1) * 128] = \
                a1_ref[dy * B:dy * B + 10 * B, j * 32:j * 32 + 128]

    w2 = w2_ref[...]                               # (512, 64) bf16
    b2row = b2_ref[...]                            # (1, 64) f32
    for q2 in range(5):                            # pooled output column
        r0 = (2 * q2) * 10 * B
        c2a = jnp.dot(patch_ref[r0:r0 + 10 * B, :], w2,
                      preferred_element_type=f32)              # conv cols j = 2*q2
        c2b = jnp.dot(patch_ref[r0 + 10 * B:r0 + 20 * B, :], w2,
                      preferred_element_type=f32)              # conv cols j = 2*q2+1
        zj = jnp.maximum(c2a, c2b)                             # (10B, 64), rows (i, s)
        for p2 in range(5):                        # pooled output row
            zz = jnp.maximum(zj[(2 * p2) * B:(2 * p2) * B + B],
                             zj[(2 * p2 + 1) * B:(2 * p2 + 1) * B + B])  # (B, 64)
            act = jnp.maximum(zz + b2row, 0.0)
            c0 = (q2 * 5 + p2) * 64
            flat_ref[:, c0:c0 + 64] = act.astype(bf16)

    # ---- stage 3: composed fc1 @ fc2 @ fc3 (no nonlinearity between FCs) -----
    # TODO(synk): training-mode dropout (RNG masking) not implemented; identity
    # at inference matches the reference eval behaviour and makes the FC
    # pre-composition exact.
    logits = jnp.dot(flat_ref[...], wfc_ref[...], preferred_element_type=f32)
    o_ref[...] = logits + bfc_ref[...]             # (B, 128) lane-dense store


# ------------------------------- wrapper -------------------------------------

def _resident(shape):
    zeros = (0,) * len(shape)
    return pl.BlockSpec(shape, lambda g, _z=zeros: _z)


def cnn_forward(x_nchw, prepped, *, block_b=8):
    (sband, b1, w2, b2, wfc, bfc) = prepped
    B = block_b
    assert B % 8 == 0, "block_b must be a multiple of 8 (sublane alignment)"
    N = x_nchw.shape[0]
    n_pad = (-N) % B
    if n_pad:
        x_nchw = jnp.concatenate(
            [x_nchw, jnp.zeros((n_pad,) + x_nchw.shape[1:], x_nchw.dtype)], axis=0)
    n_tot = N + n_pad
    n_g = n_tot // B

    # Input relayout only (~2x of the 3 KB/sample input, done by XLA once):
    # split input rows by parity and concatenate the 3 conv1 row-taps along the
    # feature axis so the kernel's conv1 LHS is a dense (13B, 84) bf16 matrix
    # per row-parity, with rows pre-ordered (pooled-row, sample).
    x2 = x_nchw[:, 0].astype(jnp.float32)                       # (n_tot, 28, 28)

    def make_slab(off):
        rows = jnp.stack([x2[:, off + 0:off + 26:2, :],         # rows 2p+off
                          x2[:, off + 1:off + 27:2, :],         # rows 2p+off+1
                          x2[:, off + 2:off + 28:2, :]],        # rows 2p+off+2
                         axis=-2)                                # (n, 13, 3, 28)
        rows = rows.reshape(n_tot, 13, 84)
        rows = rows.reshape(n_g, B, 13, 84).transpose(0, 2, 1, 3)
        return rows.reshape(n_g, 13 * B, 84).astype(jnp.bfloat16)

    xle = make_slab(0)                                          # conv rows 2p
    xlo = make_slab(1)                                          # conv rows 2p+1

    flops = n_tot * 2 * (2 * 13 * 84 * 1024 + 100 * 512 * 64 + 1600 * 128)
    bytes_accessed = (xle.size * 2 + xlo.size * 2 + sband.size * 2
                      + w2.size * 2 + wfc.size * 2
                      + 4 * (512 + 64 + 128) + n_tot * 128 * 4)

    kernel = functools.partial(cnn_fused_kernel, B=B)
    out = pl.pallas_call(
        kernel,
        grid=(n_g,),
        in_specs=[
            pl.BlockSpec((1, 13 * B, 84), lambda g: (g, 0, 0)),  # conv1 LHS, even rows
            pl.BlockSpec((1, 13 * B, 84), lambda g: (g, 0, 0)),  # conv1 LHS, odd rows
            _resident((84, 1024)),    # conv1 banded weights (pool-friendly col order)
            _resident((1, 512)),      # conv1 bias tiled over q
            _resident((512, 64)),     # conv2 weights, rows = (dy, dx, cin)
            _resident((1, 64)),       # conv2 bias
            _resident((1600, 128)),   # composed fc1@fc2@fc3, rows = (q2, p2, c), padded
            _resident((1, 128)),      # composed fc bias (padded to 128 lanes)
        ],
        out_specs=pl.BlockSpec((B, 128), lambda g: (g, 0)),
        out_shape=jax.ShapeDtypeStruct((n_tot, 128), jnp.float32),
        scratch_shapes=[
            pltpu.VMEM((13 * B, 512), jnp.bfloat16),    # pool1 output
            pltpu.VMEM((100 * B, 512), jnp.bfloat16),   # conv2 im2col patches
            pltpu.VMEM((B, 1600), jnp.bfloat16),        # flattened pool2 output
        ],
        compiler_params=pltpu.CompilerParams(
            dimension_semantics=("parallel",),          # megacore sharding on v7x
            vmem_limit_bytes=32 * 1024 * 1024,
        ),
        cost_estimate=pl.CostEstimate(
            flops=flops, transcendentals=0, bytes_accessed=bytes_accessed),
    )(xle, xlo, sband, b1, w2, b2, wfc, bfc)

    return out[:N, :10]


# ------------------------------ parameters -----------------------------------

def init_params(key):
    ks = jax.random.split(key, 10)

    def w(k, shape, scale=0.05):
        return scale * jax.random.normal(k, shape, dtype=jnp.float32)

    cw1 = w(ks[0], (32, 1, 3, 3));     cb1 = w(ks[1], (32,))       # conv1
    cw2 = w(ks[2], (64, 32, 4, 4));    cb2 = w(ks[3], (64,))       # conv2
    fw1 = w(ks[4], (128, 64 * 5 * 5)); fb1 = w(ks[5], (128,))      # fc1
    fw2 = w(ks[6], (64, 128));         fb2 = w(ks[7], (64,))       # fc2
    fw3 = w(ks[8], (10, 64));          fb3 = w(ks[9], (10,))       # fc3
    return (cw1, cb1, cw2, cb2, fw1, fb1, fw2, fb2, fw3, fb3)


def prepare_params(params):
    """One-time weight relayout / composition (done at init, NOT per forward)."""
    (cw1, cb1, cw2, cb2, fw1, fb1, fw2, fb2, fw3, fb3) = params

    # conv1 as a banded matrix: row k = dy*28 + u (u = input column of the
    # dy-th row-tap), column = half*512 + q*32 + c, emitting conv1 output
    # column w = 2*q + half.  Splitting w by parity into two aligned 512-lane
    # halves lets the kernel do the w-pooling with a whole-tile maximum.
    w1 = np.asarray(cw1)                                        # (32, 1, 3, 3)
    sband = np.zeros((84, 1024), np.float32)
    for dy in range(3):
        for dx in range(3):
            for half in range(2):
                for q in range(13):
                    u = 2 * q + half + dx
                    col = half * 512 + q * 32
                    sband[dy * 28 + u, col:col + 32] = w1[:, 0, dy, dx]
    sband = jnp.asarray(sband).astype(jnp.bfloat16)
    b1 = jnp.tile(cb1, 16).reshape(1, 512).astype(jnp.float32)

    # conv2: (Cout, Cin, 4, 4) -> (512, 64), rows ordered (dy, dx, cin); bf16.
    w2 = jnp.transpose(cw2, (2, 3, 1, 0)).reshape(512, 64).astype(jnp.bfloat16)
    b2 = cb2.reshape(1, 64).astype(jnp.float32)

    # fc1 -> fc2 -> fc3 have no nonlinearity between them in the reference
    # (dropout = identity at inference): compose once in f32.
    wc = fw1.T @ fw2.T @ fw3.T                                  # (1600, 10)
    bc = (fb1 @ fw2.T + fb2) @ fw3.T + fb3                      # (10,)
    # PyTorch flatten order is f = c*25 + p2*5 + q2; kernel flatten order is
    # (q2, p2, c) -> permute rows, then pad outputs to 128 lanes.
    wc = jnp.transpose(wc.reshape(64, 5, 5, 10), (2, 1, 0, 3)).reshape(1600, 10)
    wfc = jnp.zeros((1600, 128), jnp.float32).at[:, :10].set(wc).astype(jnp.bfloat16)
    bfc = jnp.zeros((1, 128), jnp.float32).at[0, :10].set(bc)

    return (sband, b1, w2, b2, wfc, bfc)


# ------------------------- pure-JAX reference (f32) ---------------------------

def reference_forward(x, params):
    (cw1, cb1, cw2, cb2, fw1, fb1, fw2, fb2, fw3, fb3) = params
    dn = ('NCHW', 'OIHW', 'NCHW')
    y = jax.lax.conv_general_dilated(x, cw1, (1, 1), 'VALID', dimension_numbers=dn)
    y = jax.nn.relu(y + cb1[None, :, None, None])
    y = jax.lax.reduce_window(y, -jnp.inf, jax.lax.max, (1, 1, 2, 2), (1, 1, 2, 2), 'VALID')
    y = jax.lax.conv_general_dilated(y, cw2, (1, 1), 'VALID', dimension_numbers=dn)
    y = jax.nn.relu(y + cb2[None, :, None, None])
    y = jax.lax.reduce_window(y, -jnp.inf, jax.lax.max, (1, 1, 2, 2), (1, 1, 2, 2), 'VALID')
    y = y.reshape(y.shape[0], -1)
    y = y @ fw1.T + fb1
    y = y @ fw2.T + fb2
    return y @ fw3.T + fb3


if __name__ == "__main__":
    key = jax.random.PRNGKey(0)
    pkey, xkey = jax.random.split(key)
    params = init_params(pkey)
    prepped = prepare_params(params)                 # one-time weight prep
    prepped = jax.tree_util.tree_map(jax.block_until_ready, prepped)

    # 28x28 input is what the reference's 64*5*5 flatten implies; batch 16 =
    # 2 grid blocks of B=8 samples so both v7x TensorCores get a block.
    x = jax.random.normal(xkey, (16, 1, 28, 28), dtype=jnp.float32)  # NCHW like PyTorch

    out = jax.jit(cnn_forward)(x, prepped)
    out = jax.block_until_ready(out)
    assert out.shape == (16, 10) and bool(jnp.all(jnp.isfinite(out)))

    ref = reference_forward(x, params)
    err = float(jnp.max(jnp.abs(out - ref)))
    assert err < 2e-2, f"kernel vs reference mismatch: max abs err {err}"
    print("KERNEL_OK")
</pallas_src>

<mosaic_0001>
module attributes {stable_mosaic.version = 11 : i64} {
  func.func @cnn_fused_kernel(%arg0: i32, %arg1: memref<1x104x84xbf16, #tpu.memory_space<vmem>>, %arg2: memref<1x104x84xbf16, #tpu.memory_space<vmem>>, %arg3: memref<84x1024xbf16, #tpu.memory_space<vmem>>, %arg4: memref<1x512xf32, #tpu.memory_space<vmem>>, %arg5: memref<512x64xbf16, #tpu.memory_space<vmem>>, %arg6: memref<1x64xf32, #tpu.memory_space<vmem>>, %arg7: memref<1600x128xbf16, #tpu.memory_space<vmem>>, %arg8: memref<1x128xf32, #tpu.memory_space<vmem>>, %arg9: memref<8x128xf32, #tpu.memory_space<vmem>>, %arg10: memref<104x512xbf16, #tpu.memory_space<vmem>>, %arg11: memref<800x512xbf16, #tpu.memory_space<vmem>>, %arg12: memref<8x1600xbf16, #tpu.memory_space<vmem>>) attributes {dimension_semantics = [#tpu.dimension_semantics<parallel>], iteration_bounds = array<i64: 2>, scalar_prefetch = 0 : i64, scratch_operands = 3 : i64, tpu.core_type = #tpu.core_type<tc>, window_params = [{transform_indices = @transform_0, window_bounds = array<i64: 1, 104, 84>}, {transform_indices = @transform_1, window_bounds = array<i64: 1, 104, 84>}, {pipeline_mode = #tpu.pipeline_mode<synchronous>, transform_indices = @transform_2, window_bounds = array<i64: 84, 1024>}, {pipeline_mode = #tpu.pipeline_mode<synchronous>, transform_indices = @transform_3, window_bounds = array<i64: 1, 512>}, {pipeline_mode = #tpu.pipeline_mode<synchronous>, transform_indices = @transform_4, window_bounds = array<i64: 512, 64>}, {pipeline_mode = #tpu.pipeline_mode<synchronous>, transform_indices = @transform_5, window_bounds = array<i64: 1, 64>}, {pipeline_mode = #tpu.pipeline_mode<synchronous>, transform_indices = @transform_6, window_bounds = array<i64: 1600, 128>}, {pipeline_mode = #tpu.pipeline_mode<synchronous>, transform_indices = @transform_7, window_bounds = array<i64: 1, 128>}, {transform_indices = @transform_8, window_bounds = array<i64: 8, 128>}]} {
    %c0 = arith.constant 0 : index
    %c0_0 = arith.constant 0 : index
    %c0_1 = arith.constant 0 : index
    %0 = vector.load %arg1[%c0, %c0_0, %c0_1] : memref<1x104x84xbf16, #tpu.memory_space<vmem>>, vector<1x104x84xbf16>
    %1 = vector.shape_cast %0 : vector<1x104x84xbf16> to vector<104x84xbf16>
    %c0_2 = arith.constant 0 : index
    %c0_3 = arith.constant 0 : index
    %c0_4 = arith.constant 0 : index
    %2 = vector.load %arg2[%c0_2, %c0_3, %c0_4] : memref<1x104x84xbf16, #tpu.memory_space<vmem>>, vector<1x104x84xbf16>
    %3 = vector.shape_cast %2 : vector<1x104x84xbf16> to vector<104x84xbf16>
    %c0_5 = arith.constant 0 : index
    %c0_6 = arith.constant 0 : index
    %4 = vector.load %arg3[%c0_5, %c0_6] : memref<84x1024xbf16, #tpu.memory_space<vmem>>, vector<84x256xbf16>
    %cst = arith.constant dense<0.000000e+00> : vector<104x256xf32>
    %5 = tpu.matmul %1, %4, %cst {dimension_numbers = #tpu.dot_dimension_numbers<[1], [0], [0], [1], [0, 0, 1, 1], [], []>} : vector<104x84xbf16>, vector<84x256xbf16>, vector<104x256xf32> -> vector<104x256xf32>
    %c0_7 = arith.constant 0 : index
    %c512 = arith.constant 512 : index
    %6 = vector.load %arg3[%c0_7, %c512] : memref<84x1024xbf16, #tpu.memory_space<vmem>>, vector<84x256xbf16>
    %cst_8 = arith.constant dense<0.000000e+00> : vector<104x256xf32>
    %7 = tpu.matmul %1, %6, %cst_8 {dimension_numbers = #tpu.dot_dimension_numbers<[1], [0], [0], [1], [0, 0, 1, 1], [], []>} : vector<104x84xbf16>, vector<84x256xbf16>, vector<104x256xf32> -> vector<104x256xf32>
    %8 = arith.maximumf %5, %7 : vector<104x256xf32>
    %c0_9 = arith.constant 0 : index
    %c0_10 = arith.constant 0 : index
    %9 = vector.load %arg3[%c0_9, %c0_10] : memref<84x1024xbf16, #tpu.memory_space<vmem>>, vector<84x256xbf16>
    %cst_11 = arith.constant dense<0.000000e+00> : vector<104x256xf32>
    %10 = tpu.matmul %3, %9, %cst_11 {dimension_numbers = #tpu.dot_dimension_numbers<[1], [0], [0], [1], [0, 0, 1, 1], [], []>} : vector<104x84xbf16>, vector<84x256xbf16>, vector<104x256xf32> -> vector<104x256xf32>
    %11 = arith.maximumf %8, %10 : vector<104x256xf32>
    %c0_12 = arith.constant 0 : index
    %c512_13 = arith.constant 512 : index
    %12 = vector.load %arg3[%c0_12, %c512_13] : memref<84x1024xbf16, #tpu.memory_space<vmem>>, vector<84x256xbf16>
    %cst_14 = arith.constant dense<0.000000e+00> : vector<104x256xf32>
    %13 = tpu.matmul %3, %12, %cst_14 {dimension_numbers = #tpu.dot_dimension_numbers<[1], [0], [0], [1], [0, 0, 1, 1], [], []>} : vector<104x84xbf16>, vector<84x256xbf16>, vector<104x256xf32> -> vector<104x256xf32>
    %14 = arith.maximumf %11, %13 : vector<104x256xf32>
    %c0_15 = arith.constant 0 : index
    %c0_16 = arith.constant 0 : index
    %15 = vector.load %arg4[%c0_15, %c0_16] : memref<1x512xf32, #tpu.memory_space<vmem>>, vector<1x256xf32>
    %16 = vector.broadcast %15 : vector<1x256xf32> to vector<104x256xf32>
    %17 = arith.addf %14, %16 : vector<104x256xf32>
    %cst_17 = arith.constant 0.000000e+00 : f32
    %18 = vector.broadcast %cst_17 : f32 to vector<104x256xf32>
    %19 = arith.maximumf %17, %18 : vector<104x256xf32>
    %20 = arith.truncf %19 : vector<104x256xf32> to vector<104x256xbf16>
    %c0_18 = arith.constant 0 : index
    %c0_19 = arith.constant 0 : index
    %21 = vector.load %arg10[%c0_18, %c0_19] : memref<104x512xbf16, #tpu.memory_space<vmem>>, vector<104x256xbf16>
    tpu.vector_store %arg10[%c0_18, %c0_19], %20 {strides = array<i32>} : memref<104x512xbf16, #tpu.memory_space<vmem>>, vector<104x256xbf16>,
    %c0_20 = arith.constant 0 : index
    %c256 = arith.constant 256 : index
    %22 = vector.load %arg3[%c0_20, %c256] : memref<84x1024xbf16, #tpu.memory_space<vmem>>, vector<84x256xbf16>
    %cst_21 = arith.constant dense<0.000000e+00> : vector<104x256xf32>
    %23 = tpu.matmul %1, %22, %cst_21 {dimension_numbers = #tpu.dot_dimension_numbers<[1], [0], [0], [1], [0, 0, 1, 1], [], []>} : vector<104x84xbf16>, vector<84x256xbf16>, vector<104x256xf32> -> vector<104x256xf32>
    %c0_22 = arith.constant 0 : index
    %c768 = arith.constant 768 : index
    %24 = vector.load %arg3[%c0_22, %c768] : memref<84x1024xbf16, #tpu.memory_space<vmem>>, vector<84x256xbf16>
    %cst_23 = arith.constant dense<0.000000e+00> : vector<104x256xf32>
    %25 = tpu.matmul %1, %24, %cst_23 {dimension_numbers = #tpu.dot_dimension_numbers<[1], [0], [0], [1], [0, 0, 1, 1], [], []>} : vector<104x84xbf16>, vector<84x256xbf16>, vector<104x256xf32> -> vector<104x256xf32>
    %26 = arith.maximumf %23, %25 : vector<104x256xf32>
    %c0_24 = arith.constant 0 : index
    %c256_25 = arith.constant 256 : index
    %27 = vector.load %arg3[%c0_24, %c256_25] : memref<84x1024xbf16, #tpu.memory_space<vmem>>, vector<84x256xbf16>
    %cst_26 = arith.constant dense<0.000000e+00> : vector<104x256xf32>
    %28 = tpu.matmul %3, %27, %cst_26 {dimension_numbers = #tpu.dot_dimension_numbers<[1], [0], [0], [1], [0, 0, 1, 1], [], []>} : vector<104x84xbf16>, vector<84x256xbf16>, vector<104x256xf32> -> vector<104x256xf32>
    %29 = arith.maximumf %26, %28 : vector<104x256xf32>
    %c0_27 = arith.constant 0 : index
    %c768_28 = arith.constant 768 : index
    %30 = vector.load %arg3[%c0_27, %c768_28] : memref<84x1024xbf16, #tpu.memory_space<vmem>>, vector<84x256xbf16>
    %cst_29 = arith.constant dense<0.000000e+00> : vector<104x256xf32>
    %31 = tpu.matmul %3, %30, %cst_29 {dimension_numbers = #tpu.dot_dimension_numbers<[1], [0], [0], [1], [0, 0, 1, 1], [], []>} : vector<104x84xbf16>, vector<84x256xbf16>, vector<104x256xf32> -> vector<104x256xf32>
    %32 = arith.maximumf %29, %31 : vector<104x256xf32>
    %c0_30 = arith.constant 0 : index
    %c256_31 = arith.constant 256 : index
    %33 = vector.load %arg4[%c0_30, %c256_31] : memref<1x512xf32, #tpu.memory_space<vmem>>, vector<1x256xf32>
    %34 = vector.broadcast %33 : vector<1x256xf32> to vector<104x256xf32>
    %35 = arith.addf %32, %34 : vector<104x256xf32>
    %cst_32 = arith.constant 0.000000e+00 : f32
    %36 = vector.broadcast %cst_32 : f32 to vector<104x256xf32>
    %37 = arith.maximumf %35, %36 : vector<104x256xf32>
    %38 = arith.truncf %37 : vector<104x256xf32> to vector<104x256xbf16>
    %c0_33 = arith.constant 0 : index
    %c256_34 = arith.constant 256 : index
    %39 = vector.load %arg10[%c0_33, %c256_34] : memref<104x512xbf16, #tpu.memory_space<vmem>>, vector<104x256xbf16>
    tpu.vector_store %arg10[%c0_33, %c256_34], %38 {strides = array<i32>} : memref<104x512xbf16, #tpu.memory_space<vmem>>, vector<104x256xbf16>,
    %c0_35 = arith.constant 0 : index
    %c0_36 = arith.constant 0 : index
    %40 = vector.load %arg10[%c0_35, %c0_36] : memref<104x512xbf16, #tpu.memory_space<vmem>>, vector<80x128xbf16>
    %c0_37 = arith.constant 0 : index
    %c0_38 = arith.constant 0 : index
    %41 = vector.load %arg11[%c0_37, %c0_38] : memref<800x512xbf16, #tpu.memory_space<vmem>>, vector<80x128xbf16>
    tpu.vector_store %arg11[%c0_37, %c0_38], %40 {strides = array<i32>} : memref<800x512xbf16, #tpu.memory_space<vmem>>, vector<80x128xbf16>,
    %c8 = arith.constant 8 : index
    %c0_39 = arith.constant 0 : index
    %42 = vector.load %arg10[%c8, %c0_39] : memref<104x512xbf16, #tpu.memory_space<vmem>>, vector<80x128xbf16>
    %c0_40 = arith.constant 0 : index
    %c128 = arith.constant 128 : index
    %43 = vector.load %arg11[%c0_40, %c128] : memref<800x512xbf16, #tpu.memory_space<vmem>>, vector<80x128xbf16>
    tpu.vector_store %arg11[%c0_40, %c128], %42 {strides = array<i32>} : memref<800x512xbf16, #tpu.memory_space<vmem>>, vector<80x128xbf16>,
    %c16 = arith.constant 16 : index
    %c0_41 = arith.constant 0 : index
    %44 = vector.load %arg10[%c16, %c0_41] : memref<104x512xbf16, #tpu.memory_space<vmem>>, vector<80x128xbf16>
    %c0_42 = arith.constant 0 : index
    %c256_43 = arith.constant 256 : index
    %45 = vector.load %arg11[%c0_42, %c256_43] : memref<800x512xbf16, #tpu.memory_space<vmem>>, vector<80x128xbf16>
    tpu.vector_store %arg11[%c0_42, %c256_43], %44 {strides = array<i32>} : memref<800x512xbf16, #tpu.memory_space<vmem>>, vector<80x128xbf16>,
    %c24 = arith.constant 24 : index
    %c0_44 = arith.constant 0 : index
    %46 = vector.load %arg10[%c24, %c0_44] : memref<104x512xbf16, #tpu.memory_space<vmem>>, vector<80x128xbf16>
    %c0_45 = arith.constant 0 : index
    %c384 = arith.constant 384 : index
    %47 = vector.load %arg11[%c0_45, %c384] : memref<800x512xbf16, #tpu.memory_space<vmem>>, vector<80x128xbf16>
    tpu.vector_store %arg11[%c0_45, %c384], %46 {strides = array<i32>} : memref<800x512xbf16, #tpu.memory_space<vmem>>, vector<80x128xbf16>,
    %c0_46 = arith.constant 0 : index
    %c32 = arith.constant 32 : index
    %48 = vector.load %arg10[%c0_46, %c32] : memref<104x512xbf16, #tpu.memory_space<vmem>>, vector<80x128xbf16>
    %c80 = arith.constant 80 : index
    %c0_47 = arith.constant 0 : index
    %49 = vector.load %arg11[%c80, %c0_47] : memref<800x512xbf16, #tpu.memory_space<vmem>>, vector<80x128xbf16>
    tpu.vector_store %arg11[%c80, %c0_47], %48 {strides = array<i32>} : memref<800x512xbf16, #tpu.memory_space<vmem>>, vector<80x128xbf16>,
    %c8_48 = arith.constant 8 : index
    %c32_49 = arith.constant 32 : index
    %50 = vector.load %arg10[%c8_48, %c32_49] : memref<104x512xbf16, #tpu.memory_space<vmem>>, vector<80x128xbf16>
    %c80_50 = arith.constant 80 : index
    %c128_51 = arith.constant 128 : index
    %51 = vector.load %arg11[%c80_50, %c128_51] : memref<800x512xbf16, #tpu.memory_space<vmem>>, vector<80x128xbf16>
    tpu.vector_store %arg11[%c80_50, %c128_51], %50 {strides = array<i32>} : memref<800x512xbf16, #tpu.memory_space<vmem>>, vector<80x128xbf16>,
    %c16_52 = arith.constant 16 : index
    %c32_53 = arith.constant 32 : index
    %52 = vector.load %arg10[%c16_52, %c32_53] : memref<104x512xbf16, #tpu.memory_space<vmem>>, vector<80x128xbf16>
    %c80_54 = arith.constant 80 : index
    %c256_55 = arith.constant 256 : index
    %53 = vector.load %arg11[%c80_54, %c256_55] : memref<800x512xbf16, #tpu.memory_space<vmem>>, vector<80x128xbf16>
    tpu.vector_store %arg11[%c80_54, %c256_55], %52 {strides = array<i32>} : memref<800x512xbf16, #tpu.memory_space<vmem>>, vector<80x128xbf16>,
    %c24_56 = arith.constant 24 : index
    %c32_57 = arith.constant 32 : index
    %54 = vector.load %arg10[%c24_56, %c32_57] : memref<104x512xbf16, #tpu.memory_space<vmem>>, vector<80x128xbf16>
    %c80_58 = arith.constant 80 : index
    %c384_59 = arith.constant 384 : index
    %55 = vector.load %arg11[%c80_58, %c384_59] : memref<800x512xbf16, #tpu.memory_space<vmem>>, vector<80x128xbf16>
    tpu.vector_store %arg11[%c80_58, %c384_59], %54 {strides = array<i32>} : memref<800x512xbf16, #tpu.memory_space<vmem>>, vector<80x128xbf16>,
    %c0_60 = arith.constant 0 : index
    %c64 = arith.constant 64 : index
    %56 = vector.load %arg10[%c0_60, %c64] : memref<104x512xbf16, #tpu.memory_space<vmem>>, vector<80x128xbf16>
    %c160 = arith.constant 160 : index
    %c0_61 = arith.constant 0 : index
    %57 = vector.load %arg11[%c160, %c0_61] : memref<800x512xbf16, #tpu.memory_space<vmem>>, vector<80x128xbf16>
    tpu.vector_store %arg11[%c160, %c0_61], %56 {strides = array<i32>} : memref<800x512xbf16, #tpu.memory_space<vmem>>, vector<80x128xbf16>,
    %c8_62 = arith.constant 8 : index
    %c64_63 = arith.constant 64 : index
    %58 = vector.load %arg10[%c8_62, %c64_63] : memref<104x512xbf16, #tpu.memory_space<vmem>>, vector<80x128xbf16>
    %c160_64 = arith.constant 160 : index
    %c128_65 = arith.constant 128 : index
    %59 = vector.load %arg11[%c160_64, %c128_65] : memref<800x512xbf16, #tpu.memory_space<vmem>>, vector<80x128xbf16>
    tpu.vector_store %arg11[%c160_64, %c128_65], %58 {strides = array<i32>} : memref<800x512xbf16, #tpu.memory_space<vmem>>, vector<80x128xbf16>,
    %c16_66 = arith.constant 16 : index
    %c64_67 = arith.constant 64 : index
    %60 = vector.load %arg10[%c16_66, %c64_67] : memref<104x512xbf16, #tpu.memory_space<vmem>>, vector<80x128xbf16>
    %c160_68 = arith.constant 160 : index
    %c256_69 = arith.constant 256 : index
    %61 = vector.load %arg11[%c160_68, %c256_69] : memref<800x512xbf16, #tpu.memory_space<vmem>>, vector<80x128xbf16>
    tpu.vector_store %arg11[%c160_68, %c256_69], %60 {strides = array<i32>} : memref<800x512xbf16, #tpu.memory_space<vmem>>, vector<80x128xbf16>,
    %c24_70 = arith.constant 24 : index
    %c64_71 = arith.constant 64 : index
    %62 = vector.load %arg10[%c24_70, %c64_71] : memref<104x512xbf16, #tpu.memory_space<vmem>>, vector<80x128xbf16>
    %c160_72 = arith.constant 160 : index
    %c384_73 = arith.constant 384 : index
    %63 = vector.load %arg11[%c160_72, %c384_73] : memref<800x512xbf16, #tpu.memory_space<vmem>>, vector<80x128xbf16>
    tpu.vector_store %arg11[%c160_72, %c384_73], %62 {strides = array<i32>} : memref<800x512xbf16, #tpu.memory_space<vmem>>, vector<80x128xbf16>,
    %c0_74 = arith.constant 0 : index
    %c96 = arith.constant 96 : index
    %64 = vector.load %arg10[%c0_74, %c96] : memref<104x512xbf16, #tpu.memory_space<vmem>>, vector<80x128xbf16>
    %c240 = arith.constant 240 : index
    %c0_75 = arith.constant 0 : index
    %65 = vector.load %arg11[%c240, %c0_75] : memref<800x512xbf16, #tpu.memory_space<vmem>>, vector<80x128xbf16>
    tpu.vector_store %arg11[%c240, %c0_75], %64 {strides = array<i32>} : memref<800x512xbf16, #tpu.memory_space<vmem>>, vector<80x128xbf16>,
    %c8_76 = arith.constant 8 : index
    %c96_77 = arith.constant 96 : index
    %66 = vector.load %arg10[%c8_76, %c96_77] : memref<104x512xbf16, #tpu.memory_space<vmem>>, vector<80x128xbf16>
    %c240_78 = arith.constant 240 : index
    %c128_79 = arith.constant 128 : index
    %67 = vector.load %arg11[%c240_78, %c128_79] : memref<800x512xbf16, #tpu.memory_space<vmem>>, vector<80x128xbf16>
    tpu.vector_store %arg11[%c240_78, %c128_79], %66 {strides = array<i32>} : memref<800x512xbf16, #tpu.memory_space<vmem>>, vector<80x128xbf16>,
    %c16_80 = arith.constant 16 : index
    %c96_81 = arith.constant 96 : index
    %68 = vector.load %arg10[%c16_80, %c96_81] : memref<104x512xbf16, #tpu.memory_space<vmem>>, vector<80x128xbf16>
    %c240_82 = arith.constant 240 : index
    %c256_83 = arith.constant 256 : index
    %69 = vector.load %arg11[%c240_82, %c256_83] : memref<800x512xbf16, #tpu.memory_space<vmem>>, vector<80x128xbf16>
    tpu.vector_store %arg11[%c240_82, %c256_83], %68 {strides = array<i32>} : memref<800x512xbf16, #tpu.memory_space<vmem>>, vector<80x128xbf16>,
    %c24_84 = arith.constant 24 : index
    %c96_85 = arith.constant 96 : index
    %70 = vector.load %arg10[%c24_84, %c96_85] : memref<104x512xbf16, #tpu.memory_space<vmem>>, vector<80x128xbf16>
    %c240_86 = arith.constant 240 : index
    %c384_87 = arith.constant 384 : index
    %71 = vector.load %arg11[%c240_86, %c384_87] : memref<800x512xbf16, #tpu.memory_space<vmem>>, vector<80x128xbf16>
    tpu.vector_store %arg11[%c240_86, %c384_87], %70 {strides = array<i32>} : memref<800x512xbf16, #tpu.memory_space<vmem>>, vector<80x128xbf16>,
    %c0_88 = arith.constant 0 : index
    %c128_89 = arith.constant 128 : index
    %72 = vector.load %arg10[%c0_88, %c128_89] : memref<104x512xbf16, #tpu.memory_space<vmem>>, vector<80x128xbf16>
    %c320 = arith.constant 320 : index
    %c0_90 = arith.constant 0 : index
    %73 = vector.load %arg11[%c320, %c0_90] : memref<800x512xbf16, #tpu.memory_space<vmem>>, vector<80x128xbf16>
    tpu.vector_store %arg11[%c320, %c0_90], %72 {strides = array<i32>} : memref<800x512xbf16, #tpu.memory_space<vmem>>, vector<80x128xbf16>,
    %c8_91 = arith.constant 8 : index
    %c128_92 = arith.constant 128 : index
    %74 = vector.load %arg10[%c8_91, %c128_92] : memref<104x512xbf16, #tpu.memory_space<vmem>>, vector<80x128xbf16>
    %c320_93 = arith.constant 320 : index
    %c128_94 = arith.constant 128 : index
    %75 = vector.load %arg11[%c320_93, %c128_94] : memref<800x512xbf16, #tpu.memory_space<vmem>>, vector<80x128xbf16>
    tpu.vector_store %arg11[%c320_93, %c128_94], %74 {strides = array<i32>} : memref<800x512xbf16, #tpu.memory_space<vmem>>, vector<80x128xbf16>,
    %c16_95 = arith.constant 16 : index
    %c128_96 = arith.constant 128 : index
    %76 = vector.load %arg10[%c16_95, %c128_96] : memref<104x512xbf16, #tpu.memory_space<vmem>>, vector<80x128xbf16>
    %c320_97 = arith.constant 320 : index
    %c256_98 = arith.constant 256 : index
    %77 = vector.load %arg11[%c320_97, %c256_98] : memref<800x512xbf16, #tpu.memory_space<vmem>>, vector<80x128xbf16>
    tpu.vector_store %arg11[%c320_97, %c256_98], %76 {strides = array<i32>} : memref<800x512xbf16, #tpu.memory_space<vmem>>, vector<80x128xbf16>,
    %c24_99 = arith.constant 24 : index
    %c128_100 = arith.constant 128 : index
    %78 = vector.load %arg10[%c24_99, %c128_100] : memref<104x512xbf16, #tpu.memory_space<vmem>>, vector<80x128xbf16>
    %c320_101 = arith.constant 320 : index
    %c384_102 = arith.constant 384 : index
    %79 = vector.load %arg11[%c320_101, %c384_102] : memref<800x512xbf16, #tpu.memory_space<vmem>>, vector<80x128xbf16>
    tpu.vector_store %arg11[%c320_101, %c384_102], %78 {strides = array<i32>} : memref<800x512xbf16, #tpu.memory_space<vmem>>, vector<80x128xbf16>,
    %c0_103 = arith.constant 0 : index
    %c160_104 = arith.constant 160 : index
    %80 = vector.load %arg10[%c0_103, %c160_104] : memref<104x512xbf16, #tpu.memory_space<vmem>>, vector<80x128xbf16>
    %c400 = arith.constant 400 : index
    %c0_105 = arith.constant 0 : index
    %81 = vector.load %arg11[%c400, %c0_105] : memref<800x512xbf16, #tpu.memory_space<vmem>>, vector<80x128xbf16>
    tpu.vector_store %arg11[%c400, %c0_105], %80 {strides = array<i32>} : memref<800x512xbf16, #tpu.memory_space<vmem>>, vector<80x128xbf16>,
    %c8_106 = arith.constant 8 : index
    %c160_107 = arith.constant 160 : index
    %82 = vector.load %arg10[%c8_106, %c160_107] : memref<104x512xbf16, #tpu.memory_space<vmem>>, vector<80x128xbf16>
    %c400_108 = arith.constant 400 : index
    %c128_109 = arith.constant 128 : index
    %83 = vector.load %arg11[%c400_108, %c128_109] : memref<800x512xbf16, #tpu.memory_space<vmem>>, vector<80x128xbf16>
    tpu.vector_store %arg11[%c400_108, %c128_109], %82 {strides = array<i32>} : memref<800x512xbf16, #tpu.memory_space<vmem>>, vector<80x128xbf16>,
    %c16_110 = arith.constant 16 : index
    %c160_111 = arith.constant 160 : index
    %84 = vector.load %arg10[%c16_110, %c160_111] : memref<104x512xbf16, #tpu.memory_space<vmem>>, vector<80x128xbf16>
    %c400_112 = arith.constant 400 : index
    %c256_113 = arith.constant 256 : index
    %85 = vector.load %arg11[%c400_112, %c256_113] : memref<800x512xbf16, #tpu.memory_space<vmem>>, vector<80x128xbf16>
    tpu.vector_store %arg11[%c400_112, %c256_113], %84 {strides = array<i32>} : memref<800x512xbf16, #tpu.memory_space<vmem>>, vector<80x128xbf16>,
    %c24_114 = arith.constant 24 : index
    %c160_115 = arith.constant 160 : index
    %86 = vector.load %arg10[%c24_114, %c160_115] : memref<104x512xbf16, #tpu.memory_space<vmem>>, vector<80x128xbf16>
    %c400_116 = arith.constant 400 : index
    %c384_117 = arith.constant 384 : index
    %87 = vector.load %arg11[%c400_116, %c384_117] : memref<800x512xbf16, #tpu.memory_space<vmem>>, vector<80x128xbf16>
    tpu.vector_store %arg11[%c400_116, %c384_117], %86 {strides = array<i32>} : memref<800x512xbf16, #tpu.memory_space<vmem>>, vector<80x128xbf16>,
    %c0_118 = arith.constant 0 : index
    %c192 = arith.constant 192 : index
    %88 = vector.load %arg10[%c0_118, %c192] : memref<104x512xbf16, #tpu.memory_space<vmem>>, vector<80x128xbf16>
    %c480 = arith.constant 480 : index
    %c0_119 = arith.constant 0 : index
    %89 = vector.load %arg11[%c480, %c0_119] : memref<800x512xbf16, #tpu.memory_space<vmem>>, vector<80x128xbf16>
    tpu.vector_store %arg11[%c480, %c0_119], %88 {strides = array<i32>} : memref<800x512xbf16, #tpu.memory_space<vmem>>, vector<80x128xbf16>,
    %c8_120 = arith.constant 8 : index
    %c192_121 = arith.constant 192 : index
    %90 = vector.load %arg10[%c8_120, %c192_121] : memref<104x512xbf16, #tpu.memory_space<vmem>>, vector<80x128xbf16>
    %c480_122 = arith.constant 480 : index
    %c128_123 = arith.constant 128 : index
    %91 = vector.load %arg11[%c480_122, %c128_123] : memref<800x512xbf16, #tpu.memory_space<vmem>>, vector<80x128xbf16>
    tpu.vector_store %arg11[%c480_122, %c128_123], %90 {strides = array<i32>} : memref<800x512xbf16, #tpu.memory_space<vmem>>, vector<80x128xbf16>,
    %c16_124 = arith.constant 16 : index
    %c192_125 = arith.constant 192 : index
    %92 = vector.load %arg10[%c16_124, %c192_125] : memref<104x512xbf16, #tpu.memory_space<vmem>>, vector<80x128xbf16>
    %c480_126 = arith.constant 480 : index
    %c256_127 = arith.constant 256 : index
    %93 = vector.load %arg11[%c480_126, %c256_127] : memref<800x512xbf16, #tpu.memory_space<vmem>>, vector<80x128xbf16>
    tpu.vector_store %arg11[%c480_126, %c256_127], %92 {strides = array<i32>} : memref<800x512xbf16, #tpu.memory_space<vmem>>, vector<80x128xbf16>,
    %c24_128 = arith.constant 24 : index
    %c192_129 = arith.constant 192 : index
    %94 = vector.load %arg10[%c24_128, %c192_129] : memref<104x512xbf16, #tpu.memory_space<vmem>>, vector<80x128xbf16>
    %c480_130 = arith.constant 480 : index
    %c384_131 = arith.constant 384 : index
    %95 = vector.load %arg11[%c480_130, %c384_131] : memref<800x512xbf16, #tpu.memory_space<vmem>>, vector<80x128xbf16>
    tpu.vector_store %arg11[%c480_130, %c384_131], %94 {strides = array<i32>} : memref<800x512xbf16, #tpu.memory_space<vmem>>, vector<80x128xbf16>,
    %c0_132 = arith.constant 0 : index
    %c224 = arith.constant 224 : index
    %96 = vector.load %arg10[%c0_132, %c224] : memref<104x512xbf16, #tpu.memory_space<vmem>>, vector<80x128xbf16>
    %c560 = arith.constant 560 : index
    %c0_133 = arith.constant 0 : index
    %97 = vector.load %arg11[%c560, %c0_133] : memref<800x512xbf16, #tpu.memory_space<vmem>>, vector<80x128xbf16>
    tpu.vector_store %arg11[%c560, %c0_133], %96 {strides = array<i32>} : memref<800x512xbf16, #tpu.memory_space<vmem>>, vector<80x128xbf16>,
    %c8_134 = arith.constant 8 : index
    %c224_135 = arith.constant 224 : index
    %98 = vector.load %arg10[%c8_134, %c224_135] : memref<104x512xbf16, #tpu.memory_space<vmem>>, vector<80x128xbf16>
    %c560_136 = arith.constant 560 : index
    %c128_137 = arith.constant 128 : index
    %99 = vector.load %arg11[%c560_136, %c128_137] : memref<800x512xbf16, #tpu.memory_space<vmem>>, vector<80x128xbf16>
    tpu.vector_store %arg11[%c560_136, %c128_137], %98 {strides = array<i32>} : memref<800x512xbf16, #tpu.memory_space<vmem>>, vector<80x128xbf16>,
    %c16_138 = arith.constant 16 : index
    %c224_139 = arith.constant 224 : index
    %100 = vector.load %arg10[%c16_138, %c224_139] : memref<104x512xbf16, #tpu.memory_space<vmem>>, vector<80x128xbf16>
    %c560_140 = arith.constant 560 : index
    %c256_141 = arith.constant 256 : index
    %101 = vector.load %arg11[%c560_140, %c256_141] : memref<800x512xbf16, #tpu.memory_space<vmem>>, vector<80x128xbf16>
    tpu.vector_store %arg11[%c560_140, %c256_141], %100 {strides = array<i32>} : memref<800x512xbf16, #tpu.memory_space<vmem>>, vector<80x128xbf16>,
    %c24_142 = arith.constant 24 : index
    %c224_143 = arith.constant 224 : index
    %102 = vector.load %arg10[%c24_142, %c224_143] : memref<104x512xbf16, #tpu.memory_space<vmem>>, vector<80x128xbf16>
    %c560_144 = arith.constant 560 : index
    %c384_145 = arith.constant 384 : index
    %103 = vector.load %arg11[%c560_144, %c384_145] : memref<800x512xbf16, #tpu.memory_space<vmem>>, vector<80x128xbf16>
    tpu.vector_store %arg11[%c560_144, %c384_145], %102 {strides = array<i32>} : memref<800x512xbf16, #tpu.memory_space<vmem>>, vector<80x128xbf16>,
    %c0_146 = arith.constant 0 : index
    %c256_147 = arith.constant 256 : index
    %104 = vector.load %arg10[%c0_146, %c256_147] : memref<104x512xbf16, #tpu.memory_space<vmem>>, vector<80x128xbf16>
    %c640 = arith.constant 640 : index
    %c0_148 = arith.constant 0 : index
    %105 = vector.load %arg11[%c640, %c0_148] : memref<800x512xbf16, #tpu.memory_space<vmem>>, vector<80x128xbf16>
    tpu.vector_store %arg11[%c640, %c0_148], %104 {strides = array<i32>} : memref<800x512xbf16, #tpu.memory_space<vmem>>, vector<80x128xbf16>,
    %c8_149 = arith.constant 8 : index
    %c256_150 = arith.constant 256 : index
    %106 = vector.load %arg10[%c8_149, %c256_150] : memref<104x512xbf16, #tpu.memory_space<vmem>>, vector<80x128xbf16>
    %c640_151 = arith.constant 640 : index
    %c128_152 = arith.constant 128 : index
    %107 = vector.load %arg11[%c640_151, %c128_152] : memref<800x512xbf16, #tpu.memory_space<vmem>>, vector<80x128xbf16>
    tpu.vector_store %arg11[%c640_151, %c128_152], %106 {strides = array<i32>} : memref<800x512xbf16, #tpu.memory_space<vmem>>, vector<80x128xbf16>,
    %c16_153 = arith.constant 16 : index
    %c256_154 = arith.constant 256 : index
    %108 = vector.load %arg10[%c16_153, %c256_154] : memref<104x512xbf16, #tpu.memory_space<vmem>>, vector<80x128xbf16>
    %c640_155 = arith.constant 640 : index
    %c256_156 = arith.constant 256 : index
    %109 = vector.load %arg11[%c640_155, %c256_156] : memref<800x512xbf16, #tpu.memory_space<vmem>>, vector<80x128xbf16>
    tpu.vector_store %arg11[%c640_155, %c256_156], %108 {strides = array<i32>} : memref<800x512xbf16, #tpu.memory_space<vmem>>, vector<80x128xbf16>,
    %c24_157 = arith.constant 24 : index
    %c256_158 = arith.constant 256 : index
    %110 = vector.load %arg10[%c24_157, %c256_158] : memref<104x512xbf16, #tpu.memory_space<vmem>>, vector<80x128xbf16>
    %c640_159 = arith.constant 640 : index
    %c384_160 = arith.constant 384 : index
    %111 = vector.load %arg11[%c640_159, %c384_160] : memref<800x512xbf16, #tpu.memory_space<vmem>>, vector<80x128xbf16>
    tpu.vector_store %arg11[%c640_159, %c384_160], %110 {strides = array<i32>} : memref<800x512xbf16, #tpu.memory_space<vmem>>, vector<80x128xbf16>,
    %c0_161 = arith.constant 0 : index
    %c288 = arith.constant 288 : index
    %112 = vector.load %arg10[%c0_161, %c288] : memref<104x512xbf16, #tpu.memory_space<vmem>>, vector<80x128xbf16>
    %c720 = arith.constant 720 : index
    %c0_162 = arith.constant 0 : index
    %113 = vector.load %arg11[%c720, %c0_162] : memref<800x512xbf16, #tpu.memory_space<vmem>>, vector<80x128xbf16>
    tpu.vector_store %arg11[%c720, %c0_162], %112 {strides = array<i32>} : memref<800x512xbf16, #tpu.memory_space<vmem>>, vector<80x128xbf16>,
    %c8_163 = arith.constant 8 : index
    %c288_164 = arith.constant 288 : index
    %114 = vector.load %arg10[%c8_163, %c288_164] : memref<104x512xbf16, #tpu.memory_space<vmem>>, vector<80x128xbf16>
    %c720_165 = arith.constant 720 : index
    %c128_166 = arith.constant 128 : index
    %115 = vector.load %arg11[%c720_165, %c128_166] : memref<800x512xbf16, #tpu.memory_space<vmem>>, vector<80x128xbf16>
    tpu.vector_store %arg11[%c720_165, %c128_166], %114 {strides = array<i32>} : memref<800x512xbf16, #tpu.memory_space<vmem>>, vector<80x128xbf16>,
    %c16_167 = arith.constant 16 : index
    %c288_168 = arith.constant 288 : index
    %116 = vector.load %arg10[%c16_167, %c288_168] : memref<104x512xbf16, #tpu.memory_space<vmem>>, vector<80x128xbf16>
    %c720_169 = arith.constant 720 : index
    %c256_170 = arith.constant 256 : index
    %117 = vector.load %arg11[%c720_169, %c256_170] : memref<800x512xbf16, #tpu.memory_space<vmem>>, vector<80x128xbf16>
    tpu.vector_store %arg11[%c720_169, %c256_170], %116 {strides = array<i32>} : memref<800x512xbf16, #tpu.memory_space<vmem>>, vector<80x128xbf16>,
    %c24_171 = arith.constant 24 : index
    %c288_172 = arith.constant 288 : index
    %118 = vector.load %arg10[%c24_171, %c288_172] : memref<104x512xbf16, #tpu.memory_space<vmem>>, vector<80x128xbf16>
    %c720_173 = arith.constant 720 : index
    %c384_174 = arith.constant 384 : index
    %119 = vector.load %arg11[%c720_173, %c384_174] : memref<800x512xbf16, #tpu.memory_space<vmem>>, vector<80x128xbf16>
    tpu.vector_store %arg11[%c720_173, %c384_174], %118 {strides = array<i32>} : memref<800x512xbf16, #tpu.memory_space<vmem>>, vector<80x128xbf16>,
    %c0_175 = arith.constant 0 : index
    %c0_176 = arith.constant 0 : index
    %120 = vector.load %arg5[%c0_175, %c0_176] : memref<512x64xbf16, #tpu.memory_space<vmem>>, vector<512x64xbf16>
    %c0_177 = arith.constant 0 : index
    %c0_178 = arith.constant 0 : index
    %121 = vector.load %arg6[%c0_177, %c0_178] : memref<1x64xf32, #tpu.memory_space<vmem>>, vector<1x64xf32>
    %c0_179 = arith.constant 0 : index
    %c0_180 = arith.constant 0 : index
    %122 = vector.load %arg11[%c0_179, %c0_180] : memref<800x512xbf16, #tpu.memory_space<vmem>>, vector<80x512xbf16>
    %cst_181 = arith.constant dense<0.000000e+00> : vector<80x64xf32>
    %123 = tpu.matmul %122, %120, %cst_181 {dimension_numbers = #tpu.dot_dimension_numbers<[1], [0], [0], [1], [0, 0, 1, 1], [], []>} : vector<80x512xbf16>, vector<512x64xbf16>, vector<80x64xf32> -> vector<80x64xf32>
    %c80_182 = arith.constant 80 : index
    %c0_183 = arith.constant 0 : index
    %124 = vector.load %arg11[%c80_182, %c0_183] : memref<800x512xbf16, #tpu.memory_space<vmem>>, vector<80x512xbf16>
    %cst_184 = arith.constant dense<0.000000e+00> : vector<80x64xf32>
    %125 = tpu.matmul %124, %120, %cst_184 {dimension_numbers = #tpu.dot_dimension_numbers<[1], [0], [0], [1], [0, 0, 1, 1], [], []>} : vector<80x512xbf16>, vector<512x64xbf16>, vector<80x64xf32> -> vector<80x64xf32>
    %126 = arith.maximumf %123, %125 : vector<80x64xf32>
    %127 = vector.extract_strided_slice %126 {offsets = [0, 0], sizes = [8, 64], strides = [1, 1]} : vector<80x64xf32> to vector<8x64xf32>
    %128 = vector.extract_strided_slice %126 {offsets = [8, 0], sizes = [8, 64], strides = [1, 1]} : vector<80x64xf32> to vector<8x64xf32>
    %129 = arith.maximumf %127, %128 : vector<8x64xf32>
    %130 = vector.broadcast %121 : vector<1x64xf32> to vector<8x64xf32>
    %131 = arith.addf %129, %130 : vector<8x64xf32>
    %cst_185 = arith.constant 0.000000e+00 : f32
    %132 = vector.broadcast %cst_185 : f32 to vector<8x64xf32>
    %133 = arith.maximumf %131, %132 : vector<8x64xf32>
    %134 = arith.truncf %133 : vector<8x64xf32> to vector<8x64xbf16>
    %c0_186 = arith.constant 0 : index
    %c0_187 = arith.constant 0 : index
    %135 = vector.load %arg12[%c0_186, %c0_187] : memref<8x1600xbf16, #tpu.memory_space<vmem>>, vector<8x64xbf16>
    tpu.vector_store %arg12[%c0_186, %c0_187], %134 {strides = array<i32>} : memref<8x1600xbf16, #tpu.memory_space<vmem>>, vector<8x64xbf16>,
    %136 = vector.extract_strided_slice %126 {offsets = [16, 0], sizes = [8, 64], strides = [1, 1]} : vector<80x64xf32> to vector<8x64xf32>
    %137 = vector.extract_strided_slice %126 {offsets = [24, 0], sizes = [8, 64], strides = [1, 1]} : vector<80x64xf32> to vector<8x64xf32>
    %138 = arith.maximumf %136, %137 : vector<8x64xf32>
    %139 = vector.broadcast %121 : vector<1x64xf32> to vector<8x64xf32>
    %140 = arith.addf %138, %139 : vector<8x64xf32>
    %cst_188 = arith.constant 0.000000e+00 : f32
    %141 = vector.broadcast %cst_188 : f32 to vector<8x64xf32>
    %142 = arith.maximumf %140, %141 : vector<8x64xf32>
    %143 = arith.truncf %142 : vector<8x64xf32> to vector<8x64xbf16>
    %c0_189 = arith.constant 0 : index
    %c64_190 = arith.constant 64 : index
    %144 = vector.load %arg12[%c0_189, %c64_190] : memref<8x1600xbf16, #tpu.memory_space<vmem>>, vector<8x64xbf16>
    tpu.vector_store %arg12[%c0_189, %c64_190], %143 {strides = array<i32>} : memref<8x1600xbf16, #tpu.memory_space<vmem>>, vector<8x64xbf16>,
    %145 = vector.extract_strided_slice %126 {offsets = [32, 0], sizes = [8, 64], strides = [1, 1]} : vector<80x64xf32> to vector<8x64xf32>
    %146 = vector.extract_strided_slice %126 {offsets = [40, 0], sizes = [8, 64], strides = [1, 1]} : vector<80x64xf32> to vector<8x64xf32>
    %147 = arith.maximumf %145, %146 : vector<8x64xf32>
    %148 = vector.broadcast %121 : vector<1x64xf32> to vector<8x64xf32>
    %149 = arith.addf %147, %148 : vector<8x64xf32>
    %cst_191 = arith.constant 0.000000e+00 : f32
    %150 = vector.broadcast %cst_191 : f32 to vector<8x64xf32>
    %151 = arith.maximumf %149, %150 : vector<8x64xf32>
    %152 = arith.truncf %151 : vector<8x64xf32> to vector<8x64xbf16>
    %c0_192 = arith.constant 0 : index
    %c128_193 = arith.constant 128 : index
    %153 = vector.load %arg12[%c0_192, %c128_193] : memref<8x1600xbf16, #tpu.memory_space<vmem>>, vector<8x64xbf16>
    tpu.vector_store %arg12[%c0_192, %c128_193], %152 {strides = array<i32>} : memref<8x1600xbf16, #tpu.memory_space<vmem>>, vector<8x64xbf16>,
    %154 = vector.extract_strided_slice %126 {offsets = [48, 0], sizes = [8, 64], strides = [1, 1]} : vector<80x64xf32> to vector<8x64xf32>
    %155 = vector.extract_strided_slice %126 {offsets = [56, 0], sizes = [8, 64], strides = [1, 1]} : vector<80x64xf32> to vector<8x64xf32>
    %156 = arith.maximumf %154, %155 : vector<8x64xf32>
    %157 = vector.broadcast %121 : vector<1x64xf32> to vector<8x64xf32>
    %158 = arith.addf %156, %157 : vector<8x64xf32>
    %cst_194 = arith.constant 0.000000e+00 : f32
    %159 = vector.broadcast %cst_194 : f32 to vector<8x64xf32>
    %160 = arith.maximumf %158, %159 : vector<8x64xf32>
    %161 = arith.truncf %160 : vector<8x64xf32> to vector<8x64xbf16>
    %c0_195 = arith.constant 0 : index
    %c192_196 = arith.constant 192 : index
    %162 = vector.load %arg12[%c0_195, %c192_196] : memref<8x1600xbf16, #tpu.memory_space<vmem>>, vector<8x64xbf16>
    tpu.vector_store %arg12[%c0_195, %c192_196], %161 {strides = array<i32>} : memref<8x1600xbf16, #tpu.memory_space<vmem>>, vector<8x64xbf16>,
    %163 = vector.extract_strided_slice %126 {offsets = [64, 0], sizes = [8, 64], strides = [1, 1]} : vector<80x64xf32> to vector<8x64xf32>
    %164 = vector.extract_strided_slice %126 {offsets = [72, 0], sizes = [8, 64], strides = [1, 1]} : vector<80x64xf32> to vector<8x64xf32>
    %165 = arith.maximumf %163, %164 : vector<8x64xf32>
    %166 = vector.broadcast %121 : vector<1x64xf32> to vector<8x64xf32>
    %167 = arith.addf %165, %166 : vector<8x64xf32>
    %cst_197 = arith.constant 0.000000e+00 : f32
    %168 = vector.broadcast %cst_197 : f32 to vector<8x64xf32>
    %169 = arith.maximumf %167, %168 : vector<8x64xf32>
    %170 = arith.truncf %169 : vector<8x64xf32> to vector<8x64xbf16>
    %c0_198 = arith.constant 0 : index
    %c256_199 = arith.constant 256 : index
    %171 = vector.load %arg12[%c0_198, %c256_199] : memref<8x1600xbf16, #tpu.memory_space<vmem>>, vector<8x64xbf16>
    tpu.vector_store %arg12[%c0_198, %c256_199], %170 {strides = array<i32>} : memref<8x1600xbf16, #tpu.memory_space<vmem>>, vector<8x64xbf16>,
    %c160_200 = arith.constant 160 : index
    %c0_201 = arith.constant 0 : index
    %172 = vector.load %arg11[%c160_200, %c0_201] : memref<800x512xbf16, #tpu.memory_space<vmem>>, vector<80x512xbf16>
    %cst_202 = arith.constant dense<0.000000e+00> : vector<80x64xf32>
    %173 = tpu.matmul %172, %120, %cst_202 {dimension_numbers = #tpu.dot_dimension_numbers<[1], [0], [0], [1], [0, 0, 1, 1], [], []>} : vector<80x512xbf16>, vector<512x64xbf16>, vector<80x64xf32> -> vector<80x64xf32>
    %c240_203 = arith.constant 240 : index
    %c0_204 = arith.constant 0 : index
    %174 = vector.load %arg11[%c240_203, %c0_204] : memref<800x512xbf16, #tpu.memory_space<vmem>>, vector<80x512xbf16>
    %cst_205 = arith.constant dense<0.000000e+00> : vector<80x64xf32>
    %175 = tpu.matmul %174, %120, %cst_205 {dimension_numbers = #tpu.dot_dimension_numbers<[1], [0], [0], [1], [0, 0, 1, 1], [], []>} : vector<80x512xbf16>, vector<512x64xbf16>, vector<80x64xf32> -> vector<80x64xf32>
    %176 = arith.maximumf %173, %175 : vector<80x64xf32>
    %177 = vector.extract_strided_slice %176 {offsets = [0, 0], sizes = [8, 64], strides = [1, 1]} : vector<80x64xf32> to vector<8x64xf32>
    %178 = vector.extract_strided_slice %176 {offsets = [8, 0], sizes = [8, 64], strides = [1, 1]} : vector<80x64xf32> to vector<8x64xf32>
    %179 = arith.maximumf %177, %178 : vector<8x64xf32>
    %180 = vector.broadcast %121 : vector<1x64xf32> to vector<8x64xf32>
    %181 = arith.addf %179, %180 : vector<8x64xf32>
    %cst_206 = arith.constant 0.000000e+00 : f32
    %182 = vector.broadcast %cst_206 : f32 to vector<8x64xf32>
    %183 = arith.maximumf %181, %182 : vector<8x64xf32>
    %184 = arith.truncf %183 : vector<8x64xf32> to vector<8x64xbf16>
    %c0_207 = arith.constant 0 : index
    %c320_208 = arith.constant 320 : index
    %185 = vector.load %arg12[%c0_207, %c320_208] : memref<8x1600xbf16, #tpu.memory_space<vmem>>, vector<8x64xbf16>
    tpu.vector_store %arg12[%c0_207, %c320_208], %184 {strides = array<i32>} : memref<8x1600xbf16, #tpu.memory_space<vmem>>, vector<8x64xbf16>,
    %186 = vector.extract_strided_slice %176 {offsets = [16, 0], sizes = [8, 64], strides = [1, 1]} : vector<80x64xf32> to vector<8x64xf32>
    %187 = vector.extract_strided_slice %176 {offsets = [24, 0], sizes = [8, 64], strides = [1, 1]} : vector<80x64xf32> to vector<8x64xf32>
    %188 = arith.maximumf %186, %187 : vector<8x64xf32>
    %189 = vector.broadcast %121 : vector<1x64xf32> to vector<8x64xf32>
    %190 = arith.addf %188, %189 : vector<8x64xf32>
    %cst_209 = arith.constant 0.000000e+00 : f32
    %191 = vector.broadcast %cst_209 : f32 to vector<8x64xf32>
    %192 = arith.maximumf %190, %191 : vector<8x64xf32>
    %193 = arith.truncf %192 : vector<8x64xf32> to vector<8x64xbf16>
    %c0_210 = arith.constant 0 : index
    %c384_211 = arith.constant 384 : index
    %194 = vector.load %arg12[%c0_210, %c384_211] : memref<8x1600xbf16, #tpu.memory_space<vmem>>, vector<8x64xbf16>
    tpu.vector_store %arg12[%c0_210, %c384_211], %193 {strides = array<i32>} : memref<8x1600xbf16, #tpu.memory_space<vmem>>, vector<8x64xbf16>,
    %195 = vector.extract_strided_slice %176 {offsets = [32, 0], sizes = [8, 64], strides = [1, 1]} : vector<80x64xf32> to vector<8x64xf32>
    %196 = vector.extract_strided_slice %176 {offsets = [40, 0], sizes = [8, 64], strides = [1, 1]} : vector<80x64xf32> to vector<8x64xf32>
    %197 = arith.maximumf %195, %196 : vector<8x64xf32>
    %198 = vector.broadcast %121 : vector<1x64xf32> to vector<8x64xf32>
    %199 = arith.addf %197, %198 : vector<8x64xf32>
    %cst_212 = arith.constant 0.000000e+00 : f32
    %200 = vector.broadcast %cst_212 : f32 to vector<8x64xf32>
    %201 = arith.maximumf %199, %200 : vector<8x64xf32>
    %202 = arith.truncf %201 : vector<8x64xf32> to vector<8x64xbf16>
    %c0_213 = arith.constant 0 : index
    %c448 = arith.constant 448 : index
    %203 = vector.load %arg12[%c0_213, %c448] : memref<8x1600xbf16, #tpu.memory_space<vmem>>, vector<8x64xbf16>
    tpu.vector_store %arg12[%c0_213, %c448], %202 {strides = array<i32>} : memref<8x1600xbf16, #tpu.memory_space<vmem>>, vector<8x64xbf16>,
    %204 = vector.extract_strided_slice %176 {offsets = [48, 0], sizes = [8, 64], strides = [1, 1]} : vector<80x64xf32> to vector<8x64xf32>
    %205 = vector.extract_strided_slice %176 {offsets = [56, 0], sizes = [8, 64], strides = [1, 1]} : vector<80x64xf32> to vector<8x64xf32>
    %206 = arith.maximumf %204, %205 : vector<8x64xf32>
    %207 = vector.broadcast %121 : vector<1x64xf32> to vector<8x64xf32>
    %208 = arith.addf %206, %207 : vector<8x64xf32>
    %cst_214 = arith.constant 0.000000e+00 : f32
    %209 = vector.broadcast %cst_214 : f32 to vector<8x64xf32>
    %210 = arith.maximumf %208, %209 : vector<8x64xf32>
    %211 = arith.truncf %210 : vector<8x64xf32> to vector<8x64xbf16>
    %c0_215 = arith.constant 0 : index
    %c512_216 = arith.constant 512 : index
    %212 = vector.load %arg12[%c0_215, %c512_216] : memref<8x1600xbf16, #tpu.memory_space<vmem>>, vector<8x64xbf16>
    tpu.vector_store %arg12[%c0_215, %c512_216], %211 {strides = array<i32>} : memref<8x1600xbf16, #tpu.memory_space<vmem>>, vector<8x64xbf16>,
    %213 = vector.extract_strided_slice %176 {offsets = [64, 0], sizes = [8, 64], strides = [1, 1]} : vector<80x64xf32> to vector<8x64xf32>
    %214 = vector.extract_strided_slice %176 {offsets = [72, 0], sizes = [8, 64], strides = [1, 1]} : vector<80x64xf32> to vector<8x64xf32>
    %215 = arith.maximumf %213, %214 : vector<8x64xf32>
    %216 = vector.broadcast %121 : vector<1x64xf32> to vector<8x64xf32>
    %217 = arith.addf %215, %216 : vector<8x64xf32>
    %cst_217 = arith.constant 0.000000e+00 : f32
    %218 = vector.broadcast %cst_217 : f32 to vector<8x64xf32>
    %219 = arith.maximumf %217, %218 : vector<8x64xf32>
    %220 = arith.truncf %219 : vector<8x64xf32> to vector<8x64xbf16>
    %c0_218 = arith.constant 0 : index
    %c576 = arith.constant 576 : index
    %221 = vector.load %arg12[%c0_218, %c576] : memref<8x1600xbf16, #tpu.memory_space<vmem>>, vector<8x64xbf16>
    tpu.vector_store %arg12[%c0_218, %c576], %220 {strides = array<i32>} : memref<8x1600xbf16, #tpu.memory_space<vmem>>, vector<8x64xbf16>,
    %c320_219 = arith.constant 320 : index
    %c0_220 = arith.constant 0 : index
    %222 = vector.load %arg11[%c320_219, %c0_220] : memref<800x512xbf16, #tpu.memory_space<vmem>>, vector<80x512xbf16>
    %cst_221 = arith.constant dense<0.000000e+00> : vector<80x64xf32>
    %223 = tpu.matmul %222, %120, %cst_221 {dimension_numbers = #tpu.dot_dimension_numbers<[1], [0], [0], [1], [0, 0, 1, 1], [], []>} : vector<80x512xbf16>, vector<512x64xbf16>, vector<80x64xf32> -> vector<80x64xf32>
    %c400_222 = arith.constant 400 : index
    %c0_223 = arith.constant 0 : index
    %224 = vector.load %arg11[%c400_222, %c0_223] : memref<800x512xbf16, #tpu.memory_space<vmem>>, vector<80x512xbf16>
    %cst_224 = arith.constant dense<0.000000e+00> : vector<80x64xf32>
    %225 = tpu.matmul %224, %120, %cst_224 {dimension_numbers = #tpu.dot_dimension_numbers<[1], [0], [0], [1], [0, 0, 1, 1], [], []>} : vector<80x512xbf16>, vector<512x64xbf16>, vector<80x64xf32> -> vector<80x64xf32>
    %226 = arith.maximumf %223, %225 : vector<80x64xf32>
    %227 = vector.extract_strided_slice %226 {offsets = [0, 0], sizes = [8, 64], strides = [1, 1]} : vector<80x64xf32> to vector<8x64xf32>
    %228 = vector.extract_strided_slice %226 {offsets = [8, 0], sizes = [8, 64], strides = [1, 1]} : vector<80x64xf32> to vector<8x64xf32>
    %229 = arith.maximumf %227, %228 : vector<8x64xf32>
    %230 = vector.broadcast %121 : vector<1x64xf32> to vector<8x64xf32>
    %231 = arith.addf %229, %230 : vector<8x64xf32>
    %cst_225 = arith.constant 0.000000e+00 : f32
    %232 = vector.broadcast %cst_225 : f32 to vector<8x64xf32>
    %233 = arith.maximumf %231, %232 : vector<8x64xf32>
    %234 = arith.truncf %233 : vector<8x64xf32> to vector<8x64xbf16>
    %c0_226 = arith.constant 0 : index
    %c640_227 = arith.constant 640 : index
    %235 = vector.load %arg12[%c0_226, %c640_227] : memref<8x1600xbf16, #tpu.memory_space<vmem>>, vector<8x64xbf16>
    tpu.vector_store %arg12[%c0_226, %c640_227], %234 {strides = array<i32>} : memref<8x1600xbf16, #tpu.memory_space<vmem>>, vector<8x64xbf16>,
    %236 = vector.extract_strided_slice %226 {offsets = [16, 0], sizes = [8, 64], strides = [1, 1]} : vector<80x64xf32> to vector<8x64xf32>
    %237 = vector.extract_strided_slice %226 {offsets = [24, 0], sizes = [8, 64], strides = [1, 1]} : vector<80x64xf32> to vector<8x64xf32>
    %238 = arith.maximumf %236, %237 : vector<8x64xf32>
    %239 = vector.broadcast %121 : vector<1x64xf32> to vector<8x64xf32>
    %240 = arith.addf %238, %239 : vector<8x64xf32>
    %cst_228 = arith.constant 0.000000e+00 : f32
    %241 = vector.broadcast %cst_228 : f32 to vector<8x64xf32>
    %242 = arith.maximumf %240, %241 : vector<8x64xf32>
    %243 = arith.truncf %242 : vector<8x64xf32> to vector<8x64xbf16>
    %c0_229 = arith.constant 0 : index
    %c704 = arith.constant 704 : index
    %244 = vector.load %arg12[%c0_229, %c704] : memref<8x1600xbf16, #tpu.memory_space<vmem>>, vector<8x64xbf16>
    tpu.vector_store %arg12[%c0_229, %c704], %243 {strides = array<i32>} : memref<8x1600xbf16, #tpu.memory_space<vmem>>, vector<8x64xbf16>,
    %245 = vector.extract_strided_slice %226 {offsets = [32, 0], sizes = [8, 64], strides = [1, 1]} : vector<80x64xf32> to vector<8x64xf32>
    %246 = vector.extract_strided_slice %226 {offsets = [40, 0], sizes = [8, 64], strides = [1, 1]} : vector<80x64xf32> to vector<8x64xf32>
    %247 = arith.maximumf %245, %246 : vector<8x64xf32>
    %248 = vector.broadcast %121 : vector<1x64xf32> to vector<8x64xf32>
    %249 = arith.addf %247, %248 : vector<8x64xf32>
    %cst_230 = arith.constant 0.000000e+00 : f32
    %250 = vector.broadcast %cst_230 : f32 to vector<8x64xf32>
    %251 = arith.maximumf %249, %250 : vector<8x64xf32>
    %252 = arith.truncf %251 : vector<8x64xf32> to vector<8x64xbf16>
    %c0_231 = arith.constant 0 : index
    %c768_232 = arith.constant 768 : index
    %253 = vector.load %arg12[%c0_231, %c768_232] : memref<8x1600xbf16, #tpu.memory_space<vmem>>, vector<8x64xbf16>
    tpu.vector_store %arg12[%c0_231, %c768_232], %252 {strides = array<i32>} : memref<8x1600xbf16, #tpu.memory_space<vmem>>, vector<8x64xbf16>,
    %254 = vector.extract_strided_slice %226 {offsets = [48, 0], sizes = [8, 64], strides = [1, 1]} : vector<80x64xf32> to vector<8x64xf32>
    %255 = vector.extract_strided_slice %226 {offsets = [56, 0], sizes = [8, 64], strides = [1, 1]} : vector<80x64xf32> to vector<8x64xf32>
    %256 = arith.maximumf %254, %255 : vector<8x64xf32>
    %257 = vector.broadcast %121 : vector<1x64xf32> to vector<8x64xf32>
    %258 = arith.addf %256, %257 : vector<8x64xf32>
    %cst_233 = arith.constant 0.000000e+00 : f32
    %259 = vector.broadcast %cst_233 : f32 to vector<8x64xf32>
    %260 = arith.maximumf %258, %259 : vector<8x64xf32>
    %261 = arith.truncf %260 : vector<8x64xf32> to vector<8x64xbf16>
    %c0_234 = arith.constant 0 : index
    %c832 = arith.constant 832 : index
    %262 = vector.load %arg12[%c0_234, %c832] : memref<8x1600xbf16, #tpu.memory_space<vmem>>, vector<8x64xbf16>
    tpu.vector_store %arg12[%c0_234, %c832], %261 {strides = array<i32>} : memref<8x1600xbf16, #tpu.memory_space<vmem>>, vector<8x64xbf16>,
    %263 = vector.extract_strided_slice %226 {offsets = [64, 0], sizes = [8, 64], strides = [1, 1]} : vector<80x64xf32> to vector<8x64xf32>
    %264 = vector.extract_strided_slice %226 {offsets = [72, 0], sizes = [8, 64], strides = [1, 1]} : vector<80x64xf32> to vector<8x64xf32>
    %265 = arith.maximumf %263, %264 : vector<8x64xf32>
    %266 = vector.broadcast %121 : vector<1x64xf32> to vector<8x64xf32>
    %267 = arith.addf %265, %266 : vector<8x64xf32>
    %cst_235 = arith.constant 0.000000e+00 : f32
    %268 = vector.broadcast %cst_235 : f32 to vector<8x64xf32>
    %269 = arith.maximumf %267, %268 : vector<8x64xf32>
    %270 = arith.truncf %269 : vector<8x64xf32> to vector<8x64xbf16>
    %c0_236 = arith.constant 0 : index
    %c896 = arith.constant 896 : index
    %271 = vector.load %arg12[%c0_236, %c896] : memref<8x1600xbf16, #tpu.memory_space<vmem>>, vector<8x64xbf16>
    tpu.vector_store %arg12[%c0_236, %c896], %270 {strides = array<i32>} : memref<8x1600xbf16, #tpu.memory_space<vmem>>, vector<8x64xbf16>,
    %c480_237 = arith.constant 480 : index
    %c0_238 = arith.constant 0 : index
    %272 = vector.load %arg11[%c480_237, %c0_238] : memref<800x512xbf16, #tpu.memory_space<vmem>>, vector<80x512xbf16>
    %cst_239 = arith.constant dense<0.000000e+00> : vector<80x64xf32>
    %273 = tpu.matmul %272, %120, %cst_239 {dimension_numbers = #tpu.dot_dimension_numbers<[1], [0], [0], [1], [0, 0, 1, 1], [], []>} : vector<80x512xbf16>, vector<512x64xbf16>, vector<80x64xf32> -> vector<80x64xf32>
    %c560_240 = arith.constant 560 : index
    %c0_241 = arith.constant 0 : index
    %274 = vector.load %arg11[%c560_240, %c0_241] : memref<800x512xbf16, #tpu.memory_space<vmem>>, vector<80x512xbf16>
    %cst_242 = arith.constant dense<0.000000e+00> : vector<80x64xf32>
    %275 = tpu.matmul %274, %120, %cst_242 {dimension_numbers = #tpu.dot_dimension_numbers<[1], [0], [0], [1], [0, 0, 1, 1], [], []>} : vector<80x512xbf16>, vector<512x64xbf16>, vector<80x64xf32> -> vector<80x64xf32>
    %276 = arith.maximumf %273, %275 : vector<80x64xf32>
    %277 = vector.extract_strided_slice %276 {offsets = [0, 0], sizes = [8, 64], strides = [1, 1]} : vector<80x64xf32> to vector<8x64xf32>
    %278 = vector.extract_strided_slice %276 {offsets = [8, 0], sizes = [8, 64], strides = [1, 1]} : vector<80x64xf32> to vector<8x64xf32>
    %279 = arith.maximumf %277, %278 : vector<8x64xf32>
    %280 = vector.broadcast %121 : vector<1x64xf32> to vector<8x64xf32>
    %281 = arith.addf %279, %280 : vector<8x64xf32>
    %cst_243 = arith.constant 0.000000e+00 : f32
    %282 = vector.broadcast %cst_243 : f32 to vector<8x64xf32>
    %283 = arith.maximumf %281, %282 : vector<8x64xf32>
    %284 = arith.truncf %283 : vector<8x64xf32> to vector<8x64xbf16>
    %c0_244 = arith.constant 0 : index
    %c960 = arith.constant 960 : index
    %285 = vector.load %arg12[%c0_244, %c960] : memref<8x1600xbf16, #tpu.memory_space<vmem>>, vector<8x64xbf16>
    tpu.vector_store %arg12[%c0_244, %c960], %284 {strides = array<i32>} : memref<8x1600xbf16, #tpu.memory_space<vmem>>, vector<8x64xbf16>,
    %286 = vector.extract_strided_slice %276 {offsets = [16, 0], sizes = [8, 64], strides = [1, 1]} : vector<80x64xf32> to vector<8x64xf32>
    %287 = vector.extract_strided_slice %276 {offsets = [24, 0], sizes = [8, 64], strides = [1, 1]} : vector<80x64xf32> to vector<8x64xf32>
    %288 = arith.maximumf %286, %287 : vector<8x64xf32>
    %289 = vector.broadcast %121 : vector<1x64xf32> to vector<8x64xf32>
    %290 = arith.addf %288, %289 : vector<8x64xf32>
    %cst_245 = arith.constant 0.000000e+00 : f32
    %291 = vector.broadcast %cst_245 : f32 to vector<8x64xf32>
    %292 = arith.maximumf %290, %291 : vector<8x64xf32>
    %293 = arith.truncf %292 : vector<8x64xf32> to vector<8x64xbf16>
    %c0_246 = arith.constant 0 : index
    %c1024 = arith.constant 1024 : index
    %294 = vector.load %arg12[%c0_246, %c1024] : memref<8x1600xbf16, #tpu.memory_space<vmem>>, vector<8x64xbf16>
    tpu.vector_store %arg12[%c0_246, %c1024], %293 {strides = array<i32>} : memref<8x1600xbf16, #tpu.memory_space<vmem>>, vector<8x64xbf16>,
    %295 = vector.extract_strided_slice %276 {offsets = [32, 0], sizes = [8, 64], strides = [1, 1]} : vector<80x64xf32> to vector<8x64xf32>
    %296 = vector.extract_strided_slice %276 {offsets = [40, 0], sizes = [8, 64], strides = [1, 1]} : vector<80x64xf32> to vector<8x64xf32>
    %297 = arith.maximumf %295, %296 : vector<8x64xf32>
    %298 = vector.broadcast %121 : vector<1x64xf32> to vector<8x64xf32>
    %299 = arith.addf %297, %298 : vector<8x64xf32>
    %cst_247 = arith.constant 0.000000e+00 : f32
    %300 = vector.broadcast %cst_247 : f32 to vector<8x64xf32>
    %301 = arith.maximumf %299, %300 : vector<8x64xf32>
    %302 = arith.truncf %301 : vector<8x64xf32> to vector<8x64xbf16>
    %c0_248 = arith.constant 0 : index
    %c1088 = arith.constant 1088 : index
    %303 = vector.load %arg12[%c0_248, %c1088] : memref<8x1600xbf16, #tpu.memory_space<vmem>>, vector<8x64xbf16>
    tpu.vector_store %arg12[%c0_248, %c1088], %302 {strides = array<i32>} : memref<8x1600xbf16, #tpu.memory_space<vmem>>, vector<8x64xbf16>,
    %304 = vector.extract_strided_slice %276 {offsets = [48, 0], sizes = [8, 64], strides = [1, 1]} : vector<80x64xf32> to vector<8x64xf32>
    %305 = vector.extract_strided_slice %276 {offsets = [56, 0], sizes = [8, 64], strides = [1, 1]} : vector<80x64xf32> to vector<8x64xf32>
    %306 = arith.maximumf %304, %305 : vector<8x64xf32>
    %307 = vector.broadcast %121 : vector<1x64xf32> to vector<8x64xf32>
    %308 = arith.addf %306, %307 : vector<8x64xf32>
    %cst_249 = arith.constant 0.000000e+00 : f32
    %309 = vector.broadcast %cst_249 : f32 to vector<8x64xf32>
    %310 = arith.maximumf %308, %309 : vector<8x64xf32>
    %311 = arith.truncf %310 : vector<8x64xf32> to vector<8x64xbf16>
    %c0_250 = arith.constant 0 : index
    %c1152 = arith.constant 1152 : index
    %312 = vector.load %arg12[%c0_250, %c1152] : memref<8x1600xbf16, #tpu.memory_space<vmem>>, vector<8x64xbf16>
    tpu.vector_store %arg12[%c0_250, %c1152], %311 {strides = array<i32>} : memref<8x1600xbf16, #tpu.memory_space<vmem>>, vector<8x64xbf16>,
    %313 = vector.extract_strided_slice %276 {offsets = [64, 0], sizes = [8, 64], strides = [1, 1]} : vector<80x64xf32> to vector<8x64xf32>
    %314 = vector.extract_strided_slice %276 {offsets = [72, 0], sizes = [8, 64], strides = [1, 1]} : vector<80x64xf32> to vector<8x64xf32>
    %315 = arith.maximumf %313, %314 : vector<8x64xf32>
    %316 = vector.broadcast %121 : vector<1x64xf32> to vector<8x64xf32>
    %317 = arith.addf %315, %316 : vector<8x64xf32>
    %cst_251 = arith.constant 0.000000e+00 : f32
    %318 = vector.broadcast %cst_251 : f32 to vector<8x64xf32>
    %319 = arith.maximumf %317, %318 : vector<8x64xf32>
    %320 = arith.truncf %319 : vector<8x64xf32> to vector<8x64xbf16>
    %c0_252 = arith.constant 0 : index
    %c1216 = arith.constant 1216 : index
    %321 = vector.load %arg12[%c0_252, %c1216] : memref<8x1600xbf16, #tpu.memory_space<vmem>>, vector<8x64xbf16>
    tpu.vector_store %arg12[%c0_252, %c1216], %320 {strides = array<i32>} : memref<8x1600xbf16, #tpu.memory_space<vmem>>, vector<8x64xbf16>,
    %c640_253 = arith.constant 640 : index
    %c0_254 = arith.constant 0 : index
    %322 = vector.load %arg11[%c640_253, %c0_254] : memref<800x512xbf16, #tpu.memory_space<vmem>>, vector<80x512xbf16>
    %cst_255 = arith.constant dense<0.000000e+00> : vector<80x64xf32>
    %323 = tpu.matmul %322, %120, %cst_255 {dimension_numbers = #tpu.dot_dimension_numbers<[1], [0], [0], [1], [0, 0, 1, 1], [], []>} : vector<80x512xbf16>, vector<512x64xbf16>, vector<80x64xf32> -> vector<80x64xf32>
    %c720_256 = arith.constant 720 : index
    %c0_257 = arith.constant 0 : index
    %324 = vector.load %arg11[%c720_256, %c0_257] : memref<800x512xbf16, #tpu.memory_space<vmem>>, vector<80x512xbf16>
    %cst_258 = arith.constant dense<0.000000e+00> : vector<80x64xf32>
    %325 = tpu.matmul %324, %120, %cst_258 {dimension_numbers = #tpu.dot_dimension_numbers<[1], [0], [0], [1], [0, 0, 1, 1], [], []>} : vector<80x512xbf16>, vector<512x64xbf16>, vector<80x64xf32> -> vector<80x64xf32>
    %326 = arith.maximumf %323, %325 : vector<80x64xf32>
    %327 = vector.extract_strided_slice %326 {offsets = [0, 0], sizes = [8, 64], strides = [1, 1]} : vector<80x64xf32> to vector<8x64xf32>
    %328 = vector.extract_strided_slice %326 {offsets = [8, 0], sizes = [8, 64], strides = [1, 1]} : vector<80x64xf32> to vector<8x64xf32>
    %329 = arith.maximumf %327, %328 : vector<8x64xf32>
    %330 = vector.broadcast %121 : vector<1x64xf32> to vector<8x64xf32>
    %331 = arith.addf %329, %330 : vector<8x64xf32>
    %cst_259 = arith.constant 0.000000e+00 : f32
    %332 = vector.broadcast %cst_259 : f32 to vector<8x64xf32>
    %333 = arith.maximumf %331, %332 : vector<8x64xf32>
    %334 = arith.truncf %333 : vector<8x64xf32> to vector<8x64xbf16>
    %c0_260 = arith.constant 0 : index
    %c1280 = arith.constant 1280 : index
    %335 = vector.load %arg12[%c0_260, %c1280] : memref<8x1600xbf16, #tpu.memory_space<vmem>>, vector<8x64xbf16>
    tpu.vector_store %arg12[%c0_260, %c1280], %334 {strides = array<i32>} : memref<8x1600xbf16, #tpu.memory_space<vmem>>, vector<8x64xbf16>,
    %336 = vector.extract_strided_slice %326 {offsets = [16, 0], sizes = [8, 64], strides = [1, 1]} : vector<80x64xf32> to vector<8x64xf32>
    %337 = vector.extract_strided_slice %326 {offsets = [24, 0], sizes = [8, 64], strides = [1, 1]} : vector<80x64xf32> to vector<8x64xf32>
    %338 = arith.maximumf %336, %337 : vector<8x64xf32>
    %339 = vector.broadcast %121 : vector<1x64xf32> to vector<8x64xf32>
    %340 = arith.addf %338, %339 : vector<8x64xf32>
    %cst_261 = arith.constant 0.000000e+00 : f32
    %341 = vector.broadcast %cst_261 : f32 to vector<8x64xf32>
    %342 = arith.maximumf %340, %341 : vector<8x64xf32>
    %343 = arith.truncf %342 : vector<8x64xf32> to vector<8x64xbf16>
    %c0_262 = arith.constant 0 : index
    %c1344 = arith.constant 1344 : index
    %344 = vector.load %arg12[%c0_262, %c1344] : memref<8x1600xbf16, #tpu.memory_space<vmem>>, vector<8x64xbf16>
    tpu.vector_store %arg12[%c0_262, %c1344], %343 {strides = array<i32>} : memref<8x1600xbf16, #tpu.memory_space<vmem>>, vector<8x64xbf16>,
    %345 = vector.extract_strided_slice %326 {offsets = [32, 0], sizes = [8, 64], strides = [1, 1]} : vector<80x64xf32> to vector<8x64xf32>
    %346 = vector.extract_strided_slice %326 {offsets = [40, 0], sizes = [8, 64], strides = [1, 1]} : vector<80x64xf32> to vector<8x64xf32>
    %347 = arith.maximumf %345, %346 : vector<8x64xf32>
    %348 = vector.broadcast %121 : vector<1x64xf32> to vector<8x64xf32>
    %349 = arith.addf %347, %348 : vector<8x64xf32>
    %cst_263 = arith.constant 0.000000e+00 : f32
    %350 = vector.broadcast %cst_263 : f32 to vector<8x64xf32>
    %351 = arith.maximumf %349, %350 : vector<8x64xf32>
    %352 = arith.truncf %351 : vector<8x64xf32> to vector<8x64xbf16>
    %c0_264 = arith.constant 0 : index
    %c1408 = arith.constant 1408 : index
    %353 = vector.load %arg12[%c0_264, %c1408] : memref<8x1600xbf16, #tpu.memory_space<vmem>>, vector<8x64xbf16>
    tpu.vector_store %arg12[%c0_264, %c1408], %352 {strides = array<i32>} : memref<8x1600xbf16, #tpu.memory_space<vmem>>, vector<8x64xbf16>,
    %354 = vector.extract_strided_slice %326 {offsets = [48, 0], sizes = [8, 64], strides = [1, 1]} : vector<80x64xf32> to vector<8x64xf32>
    %355 = vector.extract_strided_slice %326 {offsets = [56, 0], sizes = [8, 64], strides = [1, 1]} : vector<80x64xf32> to vector<8x64xf32>
    %356 = arith.maximumf %354, %355 : vector<8x64xf32>
    %357 = vector.broadcast %121 : vector<1x64xf32> to vector<8x64xf32>
    %358 = arith.addf %356, %357 : vector<8x64xf32>
    %cst_265 = arith.constant 0.000000e+00 : f32
    %359 = vector.broadcast %cst_265 : f32 to vector<8x64xf32>
    %360 = arith.maximumf %358, %359 : vector<8x64xf32>
    %361 = arith.truncf %360 : vector<8x64xf32> to vector<8x64xbf16>
    %c0_266 = arith.constant 0 : index
    %c1472 = arith.constant 1472 : index
    %362 = vector.load %arg12[%c0_266, %c1472] : memref<8x1600xbf16, #tpu.memory_space<vmem>>, vector<8x64xbf16>
    tpu.vector_store %arg12[%c0_266, %c1472], %361 {strides = array<i32>} : memref<8x1600xbf16, #tpu.memory_space<vmem>>, vector<8x64xbf16>,
    %363 = vector.extract_strided_slice %326 {offsets = [64, 0], sizes = [8, 64], strides = [1, 1]} : vector<80x64xf32> to vector<8x64xf32>
    %364 = vector.extract_strided_slice %326 {offsets = [72, 0], sizes = [8, 64], strides = [1, 1]} : vector<80x64xf32> to vector<8x64xf32>
    %365 = arith.maximumf %363, %364 : vector<8x64xf32>
    %366 = vector.broadcast %121 : vector<1x64xf32> to vector<8x64xf32>
    %367 = arith.addf %365, %366 : vector<8x64xf32>
    %cst_267 = arith.constant 0.000000e+00 : f32
    %368 = vector.broadcast %cst_267 : f32 to vector<8x64xf32>
    %369 = arith.maximumf %367, %368 : vector<8x64xf32>
    %370 = arith.truncf %369 : vector<8x64xf32> to vector<8x64xbf16>
    %c0_268 = arith.constant 0 : index
    %c1536 = arith.constant 1536 : index
    %371 = vector.load %arg12[%c0_268, %c1536] : memref<8x1600xbf16, #tpu.memory_space<vmem>>, vector<8x64xbf16>
    tpu.vector_store %arg12[%c0_268, %c1536], %370 {strides = array<i32>} : memref<8x1600xbf16, #tpu.memory_space<vmem>>, vector<8x64xbf16>,
    %c0_269 = arith.constant 0 : index
    %c0_270 = arith.constant 0 : index
    %372 = vector.load %arg12[%c0_269, %c0_270] : memref<8x1600xbf16, #tpu.memory_space<vmem>>, vector<8x1600xbf16>
    %c0_271 = arith.constant 0 : index
    %c0_272 = arith.constant 0 : index
    %373 = vector.load %arg7[%c0_271, %c0_272] : memref<1600x128xbf16, #tpu.memory_space<vmem>>, vector<1600x128xbf16>
    %cst_273 = arith.constant dense<0.000000e+00> : vector<8x128xf32>
    %374 = tpu.matmul %372, %373, %cst_273 {dimension_numbers = #tpu.dot_dimension_numbers<[1], [0], [0], [1], [0, 0, 1, 1], [], []>} : vector<8x1600xbf16>, vector<1600x128xbf16>, vector<8x128xf32> -> vector<8x128xf32>
    %c0_274 = arith.constant 0 : index
    %c0_275 = arith.constant 0 : index
    %375 = vector.load %arg8[%c0_274, %c0_275] : memref<1x128xf32, #tpu.memory_space<vmem>>, vector<1x128xf32>
    %376 = vector.broadcast %375 : vector<1x128xf32> to vector<8x128xf32>
    %377 = arith.addf %374, %376 : vector<8x128xf32>
    %c0_276 = arith.constant 0 : index
    %c0_277 = arith.constant 0 : index
    %378 = vector.load %arg9[%c0_276, %c0_277] : memref<8x128xf32, #tpu.memory_space<vmem>>, vector<8x128xf32>
    tpu.vector_store %arg9[%c0_276, %c0_277], %377 {strides = array<i32>} : memref<8x128xf32, #tpu.memory_space<vmem>>, vector<8x128xf32>,
    return
  }
  func.func @transform_0(%arg0: i32) -> (i32, i32, i32) {
    %c0_i32 = arith.constant 0 : i32
    %c0_i32_0 = arith.constant 0 : i32
    %c0_i32_1 = arith.constant 0 : i32
    return %arg0, %c0_i32, %c0_i32_0 : i32, i32, i32
  }
  func.func @transform_1(%arg0: i32) -> (i32, i32, i32) {
    %c0_i32 = arith.constant 0 : i32
    %c0_i32_0 = arith.constant 0 : i32
    %c0_i32_1 = arith.constant 0 : i32
    return %arg0, %c0_i32, %c0_i32_0 : i32, i32, i32
  }
  func.func @transform_2(%arg0: i32) -> (i32, i32) {
    %c0_i32 = arith.constant 0 : i32
    %c0_i32_0 = arith.constant 0 : i32
    %c0_i32_1 = arith.constant 0 : i32
    return %c0_i32, %c0_i32_0 : i32, i32
  }
  func.func @transform_3(%arg0: i32) -> (i32, i32) {
    %c0_i32 = arith.constant 0 : i32
    %c0_i32_0 = arith.constant 0 : i32
    %c0_i32_1 = arith.constant 0 : i32
    return %c0_i32, %c0_i32_0 : i32, i32
  }
  func.func @transform_4(%arg0: i32) -> (i32, i32) {
    %c0_i32 = arith.constant 0 : i32
    %c0_i32_0 = arith.constant 0 : i32
    %c0_i32_1 = arith.constant 0 : i32
    return %c0_i32, %c0_i32_0 : i32, i32
  }
  func.func @transform_5(%arg0: i32) -> (i32, i32) {
    %c0_i32 = arith.constant 0 : i32
    %c0_i32_0 = arith.constant 0 : i32
    %c0_i32_1 = arith.constant 0 : i32
    return %c0_i32, %c0_i32_0 : i32, i32
  }
  func.func @transform_6(%arg0: i32) -> (i32, i32) {
    %c0_i32 = arith.constant 0 : i32
    %c0_i32_0 = arith.constant 0 : i32
    %c0_i32_1 = arith.constant 0 : i32
    return %c0_i32, %c0_i32_0 : i32, i32
  }
  func.func @transform_7(%arg0: i32) -> (i32, i32) {
    %c0_i32 = arith.constant 0 : i32
    %c0_i32_0 = arith.constant 0 : i32
    %c0_i32_1 = arith.constant 0 : i32
    return %c0_i32, %c0_i32_0 : i32, i32
  }
  func.func @transform_8(%arg0: i32) -> (i32, i32) {
    %c0_i32 = arith.constant 0 : i32
    %c0_i32_0 = arith.constant 0 : i32
    return %arg0, %c0_i32 : i32, i32
  }
}

</mosaic_0001>

<bundles_post_ra>
// kernel: cnn_forward.1
= control target key start
LH: loop header
LB: loop body
LE: loop exit
PB: predicated region body
PF: predicated region fallthrough
CT: control target
= control target key end

     0   :  { %13 = vsyncpa [#allocation6], 0  ;;  %s14575_s0 = inlined_call_operand.vmem [shape: bf16[2,104,84], index: 0, kind: input, shape index: {}]   ;;  %s14576_s1 = inlined_call_operand.vmem [shape: bf16[2,104,84], index: 1, kind: input, shape index: {}]   ;;  %s14577_s2 = inlined_call_operand.vmem [shape: bf16[84,1024], index: 2, kind: input, shape index: {}]   ;;  %s14578_s3 = inlined_call_operand.vmem [shape: f32[1,512], index: 3, kind: input, shape index: {}]   ;;  %s14579_s4 = inlined_call_operand.vmem [shape: bf16[512,64], index: 4, kind: input, shape index: {}]   ;;  %s14580_s5 = inlined_call_operand.vmem [shape: f32[1,64], index: 5, kind: input, shape index: {}]   ;;  %s14581_s6 = inlined_call_operand.vmem [shape: bf16[1600,128], index: 6, kind: input, shape index: {}]   ;;  %s14582_s7 = inlined_call_operand.vmem [shape: f32[1,128], index: 7, kind: input, shape index: {}]   ;;  %s14583_s8 = inlined_call_operand.hbm [shape: f32[16,128], index: 8, kind: output, shape index: {}]  }
   0x1   :  { %15 = vsyncpa [#allocation6 + $0x1], 0  ;;  %s10745_s27 = smov 0   ;;  %s10747_s28 = smov 0  }
   0x2   :  { %s10749_s29 = smov 0   ;;  %s10751_s30 = smov 0  }
   0x3 LB: > { %s10766_s9 = sadd.s32 4294967295, %s10695_s30   ;;  %s8406_s10 = sadd.s32 4294967294, %s10695_s30   ;;  %s10695_s30 = sphi %s10751_s30, %s14806_s30   ;;  %s10691_s29 = sphi %s10749_s29, %s14805_s29   ;;  %s10687_s28 = sphi %s10747_s28, %s14804_s28   ;;  %s10683_s27 = sphi %s10745_s27, %s14803_s27  }
   0x4   : > { %s10770_s11 = sadd.s32 1, %s10695_s30   ;;  %s206_s12 = sadd.s32 1, %s10691_s29 }
   0x5   : > { %s203_s13 = ssub.s32 %s10695_s30, %s10770_s11  ;;  %p216_p0 = scmp.ne.s32.totalorder %s10691_s29, %s10687_s28 }
   0x6   : > { %p204_p1 = scmp.eq.s32.totalorder %s203_s13, 0  ;;  %p217_p2 = scmp.eq.s32.totalorder %s10766_s9, 1 }
   0x7   : > { %p222_p3 = scmp.ne.s32.totalorder %s10687_s28, %s10683_s27  ;;  %p223_p4 = scmp.eq.s32.totalorder %s8406_s10, 1 }
   0x8   : > { %s10781_s14 = scalar_select %p204_p1, %s10691_s29, %s206_s12  }
   0x9   : > { %p10783_p5 = por %p217_p2, %p216_p0  ;;  %p10787_p6 = por %p223_p4, %p222_p3 }
   0xa   : > { %p8409_p7 = scmp.ge.s32.totalorder %s10695_s30, 1  ;;  %p275_p8 = scmp.lt.s32.totalorder %s10695_s30, 3 }
   0xc   : > { %p276_p9 = pnand %p8409_p7, %p275_p8 }
   0xe   : > { %279 = sbr.rel (%p276_p9) target bundleno = 1689 (0x699), region = 52 }
  0x13   : > { %v361_v0 = vld [vmem:[%s14577_s2 + $0x140] sm:$0x33]  ;;  %v575_v1 = vld [vmem:[%s14577_s2 + $0x150] sm:$0x33]  ;;  %vm472_vm0 = vcmask 1041408   ;;  %p314_p10 = scmp.lt.s32.totalorder %s10766_s9, 1 }
  0x14   : > { %v426_v2 = vunpack.c.l.b16 %v361_v0  ;;  %v427_v3 = vunpack.c.h.b16 %v361_v0  ;;  %v607_v4 = vunpack.c.l.b16 %v575_v1  ;;  %v608_v5 = vunpack.c.h.b16 %v575_v1  ;;  %v8471_v6 = vld [vmem:[%s14577_s2 + $0x100] sm:$0xf]  ;;  %v10086_v12 = vld [vmem:[%s14577_s2 + $0x104] sm:$0xf]  ;;  %v8525_v14 = vld [vmem:[%s14577_s2 + $0x110] sm:$0xf] }
  0x15   : > { %v10087_v7 = vld [vmem:[%s14577_s2 + $0x11c] sm:$0xf0]  ;;  %v8473_v13 = vld [vmem:[%s14577_s2 + $0x120] sm:$0xf0]  ;;  %v10097_v15 = vld [vmem:[%s14577_s2 + $0x12c] sm:$0xf0] }
  0x16   : > { %v438_v8 = vpack.c.b16 %v426_v2, %v426_v2  ;;  %v439_v9 = vpack.c.b16 %v427_v3, %v427_v3  ;;  %v619_v10 = vpack.c.b16 %v607_v4, %v607_v4  ;;  %v620_v11 = vpack.c.b16 %v608_v5, %v608_v5  ;;  %v10096_v16 = vld [vmem:[%s14577_s2 + $0x114] sm:$0xf]  ;;  %v8463_v24 = vld [vmem:[%s14577_s2 + $0xc0] sm:$0xf]  ;;  %v10084_v28 = vld [vmem:[%s14577_s2 + $0xc4] sm:$0xf] }
  0x17   : > { %v8527_v17 = vld [vmem:[%s14577_s2 + $0x130] sm:$0xf0]  ;;  %v10837_v22 = vor.u32 %v10087_v7, %v8471_v6  ;;  %v10839_v23 = vor.u32 %v10086_v12, %v8473_v13  ;;  %v10085_v25 = vld [vmem:[%s14577_s2 + $0xdc] sm:$0xf0]  ;;  %v10849_v26 = vor.u32 %v10097_v15, %v8525_v14  ;;  %v8465_v29 = vld [vmem:[%s14577_s2 + $0xe0] sm:$0xf0] }
  0x18   : > { %v10824_v18 = vsel %vm472_vm0, %v438_v8, 0  ;;  %v10827_v19 = vsel %vm472_vm0, %v439_v9, 0  ;;  %v10830_v20 = vsel %vm472_vm0, %v619_v10, 0  ;;  %v10833_v21 = vsel %vm472_vm0, %v620_v11, 0  ;;  %v8517_v30 = vld [vmem:[%s14577_s2 + $0xd0] sm:$0xf] }
  0x19   : > { %481 = vmatpush.bf16.msra.mxu0 %v10824_v18  ;;  %524 = vmatpush.bf16.msra.mxu1 %v10827_v19  ;;  %v10851_v27 = vor.u32 %v10096_v16, %v8527_v17  ;;  %v10095_v31 = vld [vmem:[%s14577_s2 + $0xec] sm:$0xf0]  ;;  %v10094_v32 = vld [vmem:[%s14577_s2 + $0xd4] sm:$0xf]  ;;  %v10873_v34 = vor.u32 %v10085_v25, %v8463_v24  ;;  %v10875_v35 = vor.u32 %v10084_v28, %v8465_v29  ;;  %v8455_v36 = vld [vmem:[%s14577_s2 + $0x80] sm:$0xf] }
  0x1a   : > { %639 = vmatpush.bf16.msra.mxu2 %v10830_v20  ;;  %682 = vmatpush.bf16.msra.mxu3 %v10833_v21  ;;  %v8519_v33 = vld [vmem:[%s14577_s2 + $0xf0] sm:$0xf0]  ;;  %v10083_v37 = vld [vmem:[%s14577_s2 + $0x9c] sm:$0xf0]  ;;  %v10886_v38 = vor.u32 %v10095_v31, %v8517_v30  ;;  %v10082_v40 = vld [vmem:[%s14577_s2 + $0x84] sm:$0xf] }
  0x1b   : > { %v10888_v39 = vor.u32 %v10094_v32, %v8519_v33  ;;  %v8457_v41 = vld [vmem:[%s14577_s2 + $0xa0] sm:$0xf0]  ;;  %v8509_v42 = vld [vmem:[%s14577_s2 + $0x90] sm:$0xf]  ;;  %v10092_v44 = vld [vmem:[%s14577_s2 + $0x94] sm:$0xf]  ;;  %v10916_v48 = vor.u32 %v10083_v37, %v8455_v36 }
  0x1c   : > { %v10093_v43 = vld [vmem:[%s14577_s2 + $0xac] sm:$0xf0]  ;;  %v8511_v45 = vld [vmem:[%s14577_s2 + $0xb0] sm:$0xf0]  ;;  %v8447_v46 = vld [vmem:[%s14577_s2 + $0x40] sm:$0xf]  ;;  %v10918_v49 = vor.u32 %v10082_v40, %v8457_v41 }
  0x1d   : > { %482 = vmatpush.bf16.msra.mxu0 %v10837_v22  ;;  %525 = vmatpush.bf16.msra.mxu1 %v10839_v23  ;;  %v10081_v47 = vld [vmem:[%s14577_s2 + $0x5c] sm:$0xf0]  ;;  %v10080_v50 = vld [vmem:[%s14577_s2 + $0x44] sm:$0xf]  ;;  %v8501_v52 = vld [vmem:[%s14577_s2 + $0x50] sm:$0xf]  ;;  %v8510_v53 = vor.u32 %v10093_v43, %v8509_v42  ;;  %v8514_v54 = vor.u32 %v10092_v44, %v8511_v45 }
  0x1e   : > { %640 = vmatpush.bf16.msra.mxu2 %v10849_v26  ;;  %683 = vmatpush.bf16.msra.mxu3 %v10851_v27  ;;  %v8449_v51 = vld [vmem:[%s14577_s2 + $0x60] sm:$0xf0]  ;;  %s10934_s10 = scalar_select %p314_p10, %s10766_s9, 1  ;;  %v10091_v55 = vld [vmem:[%s14577_s2 + $0x6c] sm:$0xf0]  ;;  %v8448_v58 = vor.u32 %v10081_v47, %v8447_v46  ;;  %vm450_vm1 = vcmask 687104  }
  0x1f   : > { %v10090_v56 = vld [vmem:[%s14577_s2 + $0x54] sm:$0xf]  ;;  %v8452_v59 = vor.u32 %v10080_v50, %v8449_v51  ;;  %v8439_v60 = vld [vmem:[%s14577_s2] sm:$0xf]  ;;  %v8502_v62 = vor.u32 %v10091_v55, %v8501_v52  ;;  %v10078_v0 = vld [vmem:[%s14577_s2 + $0x4] sm:$0xf] }
  0x20   : > { %v8503_v57 = vld [vmem:[%s14577_s2 + $0x70] sm:$0xf0]  ;;  %v10079_v61 = vld [vmem:[%s14577_s2 + $0x1c] sm:$0xf0]  ;;  %v8441_v1 = vld [vmem:[%s14577_s2 + $0x20] sm:$0xf0] }
  0x21   : > { %483 = vmatpush.bf16.msra.mxu0 %v10873_v34  ;;  %526 = vmatpush.bf16.msra.mxu1 %v10875_v35  ;;  %v8506_v63 = vor.u32 %v10090_v56, %v8503_v57  ;;  %v8493_v2 = vld [vmem:[%s14577_s2 + $0x10] sm:$0xf]  ;;  %v10088_v4 = vld [vmem:[%s14577_s2 + $0x14] sm:$0xf]  ;;  %v8440_v6 = vor.u32 %v10079_v61, %v8439_v60  ;;  %v8444_v7 = vor.u32 %v10078_v0, %v8441_v1  ;;  %s14643_s26 = smul.u32 52, %s10934_s10  ;;  %s10697_s22 = smov 96  }
  0x22   : > { %641 = vmatpush.bf16.msra.mxu2 %v10886_v38  ;;  %684 = vmatpush.bf16.msra.mxu3 %v10888_v39  ;;  %v10089_v3 = vld [vmem:[%s14577_s2 + $0x2c] sm:$0xf0]  ;;  %v8495_v5 = vld [vmem:[%s14577_s2 + $0x30] sm:$0xf0]  ;;  %v1279_v16 = vld [vmem:[%s14577_s2 + $0x158] sm:$0x33] }
  0x23   : > { %s10977_s17 = scalar_lea.vmem %s14575_s0, %s14643_s26  ;;  %v8494_v8 = vor.u32 %v10089_v3, %v8493_v2  ;;  %v8498_v9 = vor.u32 %v10088_v4, %v8495_v5  ;;  %v1121_v17 = vld [vmem:[%s14577_s2 + $0x148] sm:$0x33]  ;;  %v8685_v33 = vld [vmem:[%s14577_s2 + $0x118] sm:$0xf]  ;;  %v8687_v37 = vld [vmem:[%s14577_s2 + $0x138] sm:$0xf0] }
  0x24   : > { %v10980_v10 = vld [vmem:[%s10977_s17] sm:$0xff]  ;;  %v11003_v11 = vld [vmem:[%s10977_s17 + $0x8] sm:$0xff]  ;;  %v11016_v12 = vld [vmem:[%s10977_s17 + $0x10] sm:$0xff]  ;;  %s14647_s26 = smul.u32 52, %s10934_s10  ;;  %s10698_s23 = smov 64   ;;  %vm1891_vm2 = vcmask 785408  }
  0x25   : > { %484 = vmatpush.bf16.msra.mxu0 %v10916_v48  ;;  %527 = vmatpush.bf16.msra.mxu1 %v10918_v49  ;;  %v11027_v13 = vld [vmem:[%s10977_s17 + $0x18] sm:$0xff]  ;;  %v11038_v14 = vld [vmem:[%s10977_s17 + $0x20] sm:$0xff]  ;;  %v11049_v15 = vld [vmem:[%s10977_s17 + $0x28] sm:$0xff]  ;;  %vm2212_vm3 = vcmask 523264   ;;  %s10699_s20 = smov 32   ;;  %vm2533_vm4 = vcmask 261120  }
  0x26   : > { %642 = vmatpush.bf16.msra.mxu2 %v8510_v53  ;;  %685 = vmatpush.bf16.msra.mxu3 %v8514_v54  ;;  %14644 = vst [vmem:[#allocation8_spill] sm:$0xff] %v11038_v14  ;;  %v10106_v42 = vld [vmem:[%s14577_s2 + $0x10c] sm:$0xf]  ;;  %v8677_v46 = vld [vmem:[%s14577_s2 + $0xd8] sm:$0xf]  ;;  %vm5030_vm5 = vcmask 519168  }
  0x27   : > { %14645 = vst [vmem:[#allocation9_spill] sm:$0xff] %v11049_v15  ;;  %v8633_v43 = vld [vmem:[%s14577_s2 + $0x128] sm:$0xf0]  ;;  %v10115_v47 = vld [vmem:[%s14577_s2 + $0xf4] sm:$0xf0]  ;;  %vm5040_vm6 = vcmask 1043968  }
  0x28   : > { %v11123_v44 = vor.u32 %v10106_v42, %v8633_v43  ;;  %v8679_v50 = vld [vmem:[%s14577_s2 + $0xf8] sm:$0xf0]  ;;  %v8623_v51 = vld [vmem:[%s14577_s2 + $0xc8] sm:$0xf]  ;;  %v10104_v55 = vld [vmem:[%s14577_s2 + $0xcc] sm:$0xf] }
  0x29   : > { %485 = vmatpush.bf16.msra.mxu0 %v8448_v58  ;;  %528 = vmatpush.bf16.msra.mxu1 %v8452_v59  ;;  %v10105_v52 = vld [vmem:[%s14577_s2 + $0xe4] sm:$0xf0]  ;;  %v8625_v56 = vld [vmem:[%s14577_s2 + $0xe8] sm:$0xf0]  ;;  %v8669_v3 = vld [vmem:[%s14577_s2 + $0x98] sm:$0xf] }
  0x2a   : > { %643 = vmatpush.bf16.msra.mxu2 %v8502_v62  ;;  %686 = vmatpush.bf16.msra.mxu3 %v8506_v63  ;;  %v11171_v57 = vor.u32 %v10104_v55, %v8625_v56  ;;  %v10113_v4 = vld [vmem:[%s14577_s2 + $0xb4] sm:$0xf0]  ;;  %v10112_v5 = vld [vmem:[%s14577_s2 + $0x9c] sm:$0xf]  ;;  %s311_s25 = sand.u32 1, %s10687_s28   ;;  %s10063_s18 = sshll.u32 %s10766_s9, 3 }
  0x2b   : > { %v10110_v55 = vld [vmem:[%s14577_s2 + $0x5c] sm:$0xf]  ;;  %s8330_s24 = scalar_lea.hbm %s14583_s8, %s10063_s18  ;;  %s8320_s12 = scalar_lea.sflag [#allocation6], %s311_s25 }
  0x2d   : > { %486 = vmatpush.bf16.msra.mxu0 %v8440_v6  ;;  %529 = vmatpush.bf16.msra.mxu1 %v8444_v7 }
  0x2e   : > { %644 = vmatpush.bf16.msra.mxu2 %v8494_v8  ;;  %687 = vmatpush.bf16.msra.mxu3 %v8498_v9 }
  0x30   : > { %8477 = vmatmul.msk.bf16.vlgmr.msra.gmra.mxu0 %vm450_vm1, %v10980_v10  ;;  %8484 = vmatmul.msk.bf16.vlgmr.msra.gmra.mxu1 %vm450_vm1, %v10980_v10 }
  0x31   : > { %8531 = vmatmul.msk.bf16.vlgmr.msra.gmra.mxu2 %vm450_vm1, %v10980_v10  ;;  %8538 = vmatmul.msk.bf16.vlgmr.msra.gmra.mxu3 %vm450_vm1, %v10980_v10 }
  0x32   : > { %917 = vmatpush.bf16.msrb.mxu2 %v10830_v20  ;;  %960 = vmatpush.bf16.msrb.mxu3 %v10833_v21  ;;  %v1153_v20 = vunpack.c.l.b16 %v1121_v17  ;;  %v1154_v21 = vunpack.c.h.b16 %v1121_v17 }
  0x33   : > { %805 = vmatpush.bf16.msrb.mxu0 %v10824_v18  ;;  %848 = vmatpush.bf16.msrb.mxu1 %v10827_v19  ;;  %v1311_v18 = vunpack.c.l.b16 %v1279_v16  ;;  %v1312_v19 = vunpack.c.h.b16 %v1279_v16 }
  0x34   : > { %v1165_v24 = vpack.c.b16 %v1153_v20, %v1153_v20  ;;  %v1166_v25 = vpack.c.b16 %v1154_v21, %v1154_v21 }
  0x36   : > { %918 = vmatpush.bf16.msrb.mxu2 %v10849_v26  ;;  %961 = vmatpush.bf16.msrb.mxu3 %v10851_v27  ;;  %v337_v26 = vld [vmem:[%s10977_s17 + $0x30] sm:$0xf]  ;;  %v11073_v29 = vsel %vm472_vm0, %v1165_v24, 0  ;;  %v11076_v30 = vsel %vm472_vm0, %v1166_v25, 0  ;;  %s11130_s17 = scalar_lea.vmem %s14576_s1, %s14647_s26  ;;  %v10102_v24 = vld [vmem:[%s14577_s2 + $0x8c] sm:$0xf] }
  0x37   : > { %806 = vmatpush.bf16.msrb.mxu0 %v10837_v22  ;;  %849 = vmatpush.bf16.msrb.mxu1 %v10839_v23  ;;  %v1323_v22 = vpack.c.b16 %v1311_v18, %v1311_v18  ;;  %v1324_v23 = vpack.c.b16 %v1312_v19, %v1312_v19  ;;  %v387_v31 = vunpack.c.l.b16 %v337_v26  ;;  %v10072_v45 = vld [vmem:[%s11130_s17] sm:$0xff]  ;;  %v10074_v17 = vld [vmem:[%s11130_s17 + $0x10] sm:$0xff]  ;;  %v8617_v26 = vld [vmem:[%s14577_s2 + $0xa8] sm:$0xf0]  ;;  %s8334_s26 = sshll.u32 %s8330_s24, 4  ;;  %s8335_s26 = int_to_ptr.hbm [resolvable:$true] %s8334_s26 }
  0x38   : > { %v8601_v19 = vld [vmem:[%s14577_s2 + $0x28] sm:$0xf0]  ;;  %s10647_s9 = sshra.s32 %s8335_s26, 4  ;;  %s10648_s9 = int_to_ptr.hbm [resolvable:$true] %s10647_s9 }
  0x39   : > { %v11067_v27 = vsel %vm472_vm0, %v1323_v22, 0  ;;  %v11070_v28 = vsel %vm472_vm0, %v1324_v23, 0  ;;  %v11082_v32 = vpack.c.b16 %v387_v31, %v387_v31  ;;  %v8615_v22 = vld [vmem:[%s14577_s2 + $0x88] sm:$0xf]  ;;  %v11242_v31 = vor.u32 %v10102_v24, %v8617_v26  ;;  %s10649_s13 = scalar_lea.hbm %s10648_s9, 8  ;;  %p10654_p0 = scmp.lt.s32.totalorder %s10648_s9, %s14583_s8 }
  0x3a   : > { %919 = vmatpush.bf16.msrb.mxu2 %v10886_v38  ;;  %962 = vmatpush.bf16.msrb.mxu3 %v10888_v39  ;;  %v8631_v38 = vld [vmem:[%s14577_s2 + $0x108] sm:$0xf]  ;;  %p10650_p11 = scmp.ne.s32.totalorder %s10648_s9, %s10649_s13 }
  0x3b   : > { %807 = vmatpush.bf16.msrb.mxu0 %v10873_v34  ;;  %850 = vmatpush.bf16.msrb.mxu1 %v10875_v35  ;;  %14646 = vst [vmem:[#allocation10_spill] sm:$0xff] %v11082_v32  ;;  %v10117_v34 = vld [vmem:[%s14577_s2 + $0x134] sm:$0xf0]  ;;  %v10116_v35 = vld [vmem:[%s14577_s2 + $0x11c] sm:$0xf] }
  0x3c   : > { %v11101_v36 = vor.u32 %v10117_v34, %v8685_v33  ;;  %v10107_v39 = vld [vmem:[%s14577_s2 + $0x124] sm:$0xf0]  ;;  %v11112_v40 = vor.u32 %v10116_v35, %v8687_v37  ;;  %p10651_p12 = pnand %p10650_p11, %p10783_p5 }
  0x3d   : > { %v11114_v41 = vor.u32 %v10107_v39, %v8631_v38  ;;  %v10103_v23 = vld [vmem:[%s14577_s2 + $0xa4] sm:$0xf0] }
  0x3e   : > { %920 = vmatpush.bf16.msrb.mxu2 %v8510_v53  ;;  %963 = vmatpush.bf16.msrb.mxu3 %v8514_v54  ;;  %v11162_v54 = vor.u32 %v10105_v52, %v8623_v51  ;;  %v11237_v25 = vor.u32 %v10103_v23, %v8615_v22  ;;  %v8661_v51 = vld [vmem:[%s14577_s2 + $0x58] sm:$0xf]  ;;  %v8609_v22 = vld [vmem:[%s14577_s2 + $0x68] sm:$0xf0]  ;;  %v10099_v35 = vld [vmem:[%s14577_s2 + $0x24] sm:$0xf0]  ;;  %p10652_p13 = pneg %p10651_p12 }
  0x3f   : > { %808 = vmatpush.bf16.msrb.mxu0 %v10916_v48  ;;  %851 = vmatpush.bf16.msrb.mxu1 %v10918_v49  ;;  %v10114_v48 = vld [vmem:[%s14577_s2 + $0xdc] sm:$0xf]  ;;  %v11149_v49 = vor.u32 %v10115_v47, %v8677_v46  ;;  %v10111_v52 = vld [vmem:[%s14577_s2 + $0x74] sm:$0xf0] }
  0x40   : > { %8478 = vmatmul.msk.bf16.gmra.mxu0 %vm450_vm1, %v11003_v11  ;;  %8485 = vmatmul.msk.bf16.gmra.mxu1 %vm450_vm1, %v11003_v11  ;;  %v11160_v53 = vor.u32 %v10114_v48, %v8679_v50  ;;  %v11284_v56 = vor.u32 %v10111_v52, %v8661_v51  ;;  %v8653_v52 = vld [vmem:[%s14577_s2 + $0x18] sm:$0xf] }
  0x41   : > { %8532 = vmatmul.msk.bf16.gmra.mxu2 %vm450_vm1, %v11003_v11  ;;  %8539 = vmatmul.msk.bf16.gmra.mxu3 %vm450_vm1, %v11003_v11  ;;  %v10109_v46 = vld [vmem:[%s14577_s2 + $0x34] sm:$0xf0] }
  0x42   : > { %921 = vmatpush.bf16.msrb.mxu2 %v8502_v62  ;;  %964 = vmatpush.bf16.msrb.mxu3 %v8506_v63  ;;  %v8654_v37 = vor.u32 %v10109_v46, %v8653_v52  ;;  %v8599_v46 = vld [vmem:[%s14577_s2 + $0x8] sm:$0xf] }
  0x43   : > { %809 = vmatpush.bf16.msrb.mxu0 %v8448_v58  ;;  %852 = vmatpush.bf16.msrb.mxu1 %v8452_v59  ;;  %v10073_v58 = vld [vmem:[%s11130_s17 + $0x8] sm:$0xff]  ;;  %v8600_v18 = vor.u32 %v10099_v35, %v8599_v46 }
  0x44   : > { %v10077_v35 = vld [vmem:[%s11130_s17 + $0x28] sm:$0xff] }
  0x46   : > { %922 = vmatpush.bf16.msrb.mxu2 %v8494_v8  ;;  %965 = vmatpush.bf16.msrb.mxu3 %v8498_v9 }
  0x47   : > { %810 = vmatpush.bf16.msrb.mxu0 %v8440_v6  ;;  %853 = vmatpush.bf16.msrb.mxu1 %v8444_v7  ;;  %v11206_v6 = vor.u32 %v10113_v4, %v8669_v3  ;;  %v8671_v7 = vld [vmem:[%s14577_s2 + $0xb8] sm:$0xf0]  ;;  %v8607_v3 = vld [vmem:[%s14577_s2 + $0x48] sm:$0xf] }
  0x48   : > { %v11211_v8 = vor.u32 %v10112_v5, %v8671_v7  ;;  %v10101_v4 = vld [vmem:[%s14577_s2 + $0x64] sm:$0xf0] }
  0x49   : > { %v11297_v7 = vor.u32 %v10101_v4, %v8607_v3  ;;  %v10076_v4 = vld [vmem:[%s11130_s17 + $0x20] sm:$0xff] }
  0x4a   : > { %1343 = vmatpush.bf16.msra.mxu2 %v11067_v27  ;;  %1386 = vmatpush.bf16.msra.mxu3 %v11070_v28 }
  0x4b   : > { %1185 = vmatpush.bf16.msra.mxu0 %v11073_v29  ;;  %1228 = vmatpush.bf16.msra.mxu1 %v11076_v30 }
  0x4e   : > { %1344 = vmatpush.bf16.msra.mxu2 %v11101_v36  ;;  %1387 = vmatpush.bf16.msra.mxu3 %v11112_v40 }
  0x4f   : > { %1186 = vmatpush.bf16.msra.mxu0 %v11114_v41  ;;  %1229 = vmatpush.bf16.msra.mxu1 %v11123_v44 }
  0x50   : > { %8479 = vmatmul.msk.bf16.gmra.mxu0 %vm450_vm1, %v11016_v12  ;;  %8486 = vmatmul.msk.bf16.gmra.mxu1 %vm450_vm1, %v11016_v12 }
  0x51   : > { %8533 = vmatmul.msk.bf16.gmra.mxu2 %vm450_vm1, %v11016_v12  ;;  %8540 = vmatmul.msk.bf16.gmra.mxu3 %vm450_vm1, %v11016_v12 }
  0x52   : > { %1345 = vmatpush.bf16.msra.mxu2 %v11149_v49  ;;  %1388 = vmatpush.bf16.msra.mxu3 %v11160_v53 }
  0x53   : > { %1187 = vmatpush.bf16.msra.mxu0 %v11162_v54  ;;  %1230 = vmatpush.bf16.msra.mxu1 %v11171_v57 }
  0x56   : > { %1346 = vmatpush.bf16.msra.mxu2 %v11206_v6  ;;  %1389 = vmatpush.bf16.msra.mxu3 %v11211_v8 }
  0x57   : > { %1188 = vmatpush.bf16.msra.mxu0 %v11237_v25  ;;  %1231 = vmatpush.bf16.msra.mxu1 %v11242_v31 }
  0x5a   : > { %1347 = vmatpush.bf16.msra.mxu2 %v11284_v56 }
  0x5b   : > { %1189 = vmatpush.bf16.msra.mxu0 %v11297_v7 }
  0x5e   : > { %1348 = vmatpush.bf16.msra.mxu2 %v8654_v37 }
  0x5f   : > { %1190 = vmatpush.bf16.msra.mxu0 %v8600_v18 }
  0x60   : > { %8480 = vmatmul.msk.bf16.gmra.mxu0 %vm450_vm1, %v11027_v13  ;;  %8487 = vmatmul.msk.bf16.gmra.mxu1 %vm450_vm1, %v11027_v13 }
  0x61   : > { %8534 = vmatmul.msk.bf16.gmra.mxu2 %vm450_vm1, %v11027_v13  ;;  %8541 = vmatmul.msk.bf16.gmra.mxu3 %vm450_vm1, %v11027_v13 }
  0x70   : > { %8481 = vmatmul.msk.bf16.gmra.mxu0 %vm450_vm1, %v11038_v14  ;;  %8488 = vmatmul.msk.bf16.gmra.mxu1 %vm450_vm1, %v11038_v14 }
  0x71   : > { %8535 = vmatmul.msk.bf16.gmra.mxu2 %vm450_vm1, %v11038_v14  ;;  %8542 = vmatmul.msk.bf16.gmra.mxu3 %vm450_vm1, %v11038_v14 }
  0x80   : > { %8482 = vmatmul.msk.bf16.gmra.mxu0 %vm450_vm1, %v11049_v15  ;;  %8489 = vmatmul.msk.bf16.gmra.mxu1 %vm450_vm1, %v11049_v15 }
  0x81   : > { %8536 = vmatmul.msk.bf16.gmra.mxu2 %vm450_vm1, %v11049_v15  ;;  %8543 = vmatmul.msk.bf16.gmra.mxu3 %vm450_vm1, %v11049_v15 }
  0x90   : > { %8483 = vmatmul.msk.bf16.gmra.mxu0 %vm450_vm1, %v11082_v32  ;;  %8490 = vmatmul.msk.bf16.gmra.mxu1 %vm450_vm1, %v11082_v32 }
  0x91   : > { %8537 = vmatmul.msk.bf16.gmra.mxu2 %vm450_vm1, %v11082_v32  ;;  %8544 = vmatmul.msk.bf16.gmra.mxu3 %vm450_vm1, %v11082_v32 }
  0xa0   : > { %8569 = vmatmul.msk.bf16.vlgmr.msrb.gmra.mxu0 %vm450_vm1, %v10072_v45  ;;  %8576 = vmatmul.msk.bf16.vlgmr.msrb.gmra.mxu1 %vm450_vm1, %v10072_v45 }
  0xa1   : > { %8583 = vmatmul.msk.bf16.vlgmr.msrb.gmra.mxu2 %vm450_vm1, %v10072_v45  ;;  %8590 = vmatmul.msk.bf16.vlgmr.msrb.gmra.mxu3 %vm450_vm1, %v10072_v45  ;;  %v10075_v45 = vld [vmem:[%s11130_s17 + $0x18] sm:$0xff] }
  0xa2   : > { %1567 = vmatpush.bf16.msrb.mxu2 %v11067_v27  ;;  %1455 = vmatpush.bf16.msrb.mxu0 %v11073_v29 }
  0xa6   : > { %1568 = vmatpush.bf16.msrb.mxu2 %v11101_v36  ;;  %1456 = vmatpush.bf16.msrb.mxu0 %v11114_v41 }
  0xaa   : > { %1569 = vmatpush.bf16.msrb.mxu2 %v11149_v49  ;;  %1457 = vmatpush.bf16.msrb.mxu0 %v11162_v54 }
  0xad   : > { %v11177_v59 = vpop.f32.mrf.mxu0  ;;  %v11179_v60 = vpop.f32.mrf.mxu1 }
  0xae   : > { %1570 = vmatpush.bf16.msrb.mxu2 %v11206_v6  ;;  %1458 = vmatpush.bf16.msrb.mxu0 %v11237_v25 }
  0xb0   : > { %8570 = vmatmul.msk.bf16.gmra.mxu0 %vm450_vm1, %v10073_v58  ;;  %8577 = vmatmul.msk.bf16.gmra.mxu1 %vm450_vm1, %v10073_v58 }
  0xb1   : > { %8584 = vmatmul.msk.bf16.gmra.mxu2 %vm450_vm1, %v10073_v58  ;;  %8591 = vmatmul.msk.bf16.gmra.mxu3 %vm450_vm1, %v10073_v58  ;;  %v8663_v58 = vld [vmem:[%s14577_s2 + $0x78] sm:$0xf0] }
  0xb2   : > { %v11295_v5 = vor.u32 %v10110_v55, %v8663_v58  ;;  %1571 = vmatpush.bf16.msrb.mxu2 %v11284_v56  ;;  %1459 = vmatpush.bf16.msrb.mxu0 %v11297_v7 }
  0xb4   : > { %v11185_v61 = vpop.f32.mrf.mxu2  ;;  %v11187_v62 = vpop.f32.mrf.mxu3  ;;  %1390 = vmatpush.bf16.msra.mxu3 %v11295_v5 }
  0xb5   : > { %v11193_v1 = vpop.f32.mrf.mxu0  ;;  %v11195_v2 = vpop.f32.mrf.mxu1 }
  0xb6   : > { %1572 = vmatpush.bf16.msrb.mxu2 %v8654_v37  ;;  %1460 = vmatpush.bf16.msrb.mxu0 %v8600_v18 }
  0xbc   : > { %v11215_v9 = vpop.f32.mrf.mxu2  ;;  %v11217_v16 = vpop.f32.mrf.mxu3 }
  0xbd   : > { %v11224_v20 = vpop.f32.mrf.mxu0  ;;  %v11226_v21 = vpop.f32.mrf.mxu1 }
  0xc0   : > { %8571 = vmatmul.msk.bf16.gmra.mxu0 %vm450_vm1, %v10074_v17  ;;  %8578 = vmatmul.msk.bf16.gmra.mxu1 %vm450_vm1, %v10074_v17 }
  0xc1   : > { %8585 = vmatmul.msk.bf16.gmra.mxu2 %vm450_vm1, %v10074_v17  ;;  %8592 = vmatmul.msk.bf16.gmra.mxu3 %vm450_vm1, %v10074_v17  ;;  %v10100_v17 = vld [vmem:[%s14577_s2 + $0x4c] sm:$0xf] }
  0xc2   : > { %v11307_v23 = vor.u32 %v10100_v17, %v8609_v22  ;;  %v10108_v22 = vld [vmem:[%s14577_s2 + $0x1c] sm:$0xf] }
  0xc3   : > { %v8655_v17 = vld [vmem:[%s14577_s2 + $0x38] sm:$0xf0] }
  0xc4   : > { %v11250_v33 = vpop.f32.mrf.mxu2  ;;  %v11252_v34 = vpop.f32.mrf.mxu3  ;;  %1232 = vmatpush.bf16.msra.mxu1 %v11307_v23  ;;  %v8658_v52 = vor.u32 %v10108_v22, %v8655_v17 }
  0xc5   : > { %v11258_v38 = vpop.f32.mrf.mxu0  ;;  %v11260_v39 = vpop.f32.mrf.mxu1 }
  0xc6   : > { %1391 = vmatpush.bf16.msra.mxu3 %v8658_v52 }
  0xca   : > { %1610 = vmatpush.bf16.msrb.mxu3 %v11070_v28 }
  0xcc   : > { %v11262_v42 = vpop.f32.mrf.mxu2  ;;  %v11264_v43 = vpop.f32.mrf.mxu3 }
  0xcd   : > { %v11271_v48 = vpop.f32.mrf.mxu0  ;;  %v11273_v50 = vpop.f32.mrf.mxu1 }
  0xce   : > { %1611 = vmatpush.bf16.msrb.mxu3 %v11112_v40 }
  0xd0   : > { %8572 = vmatmul.msk.bf16.gmra.mxu0 %vm450_vm1, %v10075_v45  ;;  %8579 = vmatmul.msk.bf16.gmra.mxu1 %vm450_vm1, %v10075_v45 }
  0xd1   : > { %8586 = vmatmul.msk.bf16.gmra.mxu2 %vm450_vm1, %v10075_v45  ;;  %8593 = vmatmul.msk.bf16.gmra.mxu3 %vm450_vm1, %v10075_v45 }
  0xd2   : > { %1612 = vmatpush.bf16.msrb.mxu3 %v11160_v53 }
  0xd4   : > { %v11315_v24 = vpop.f32.mrf.mxu2  ;;  %v11317_v26 = vpop.f32.mrf.mxu3 }
  0xd5   : > { %v11323_v55 = vpop.f32.mrf.mxu0  ;;  %v11325_v45 = vpop.f32.mrf.mxu1 }
  0xd6   : > { %1613 = vmatpush.bf16.msrb.mxu3 %v11211_v8 }
  0xda   : > { %1614 = vmatpush.bf16.msrb.mxu3 %v11295_v5 }
  0xdc   : > { %v11327_v58 = vpop.f32.mrf.mxu2  ;;  %v11329_v3 = vpop.f32.mrf.mxu3 }
  0xdd   : > { %v11336_v47 = vpop.f32.mrf.mxu0  ;;  %v11338_v51 = vpop.f32.mrf.mxu1 }
  0xde   : > { %1615 = vmatpush.bf16.msrb.mxu3 %v8658_v52 }
  0xe0   : > { %8573 = vmatmul.msk.bf16.gmra.mxu0 %vm450_vm1, %v10076_v4  ;;  %8580 = vmatmul.msk.bf16.gmra.mxu1 %vm450_vm1, %v10076_v4 }
  0xe1   : > { %8587 = vmatmul.msk.bf16.gmra.mxu2 %vm450_vm1, %v10076_v4  ;;  %8594 = vmatmul.msk.bf16.gmra.mxu3 %vm450_vm1, %v10076_v4  ;;  %v10098_v4 = vld [vmem:[%s14577_s2 + $0xc] sm:$0xf] }
  0xe2   : > { %v8604_v0 = vor.u32 %v10098_v4, %v8601_v19 }
  0xe4   : > { %v11369_v63 = vpop.f32.mrf.mxu2  ;;  %v11371_v32 = vpop.f32.mrf.mxu3  ;;  %1233 = vmatpush.bf16.msra.mxu1 %v8604_v0 }
  0xe5   : > { %v11377_v15 = vpop.f32.mrf.mxu0  ;;  %v11379_v14 = vpop.f32.mrf.mxu1 }
  0xe8   : > { %1498 = vmatpush.bf16.msrb.mxu1 %v11076_v30 }
  0xec   : > { %1499 = vmatpush.bf16.msrb.mxu1 %v11123_v44  ;;  %v11389_v27 = vpop.f32.mrf.mxu2  ;;  %v11391_v19 = vpop.f32.mrf.mxu3 }
  0xed   : > { %v11398_v30 = vpop.f32.mrf.mxu0  ;;  %v11400_v36 = vpop.f32.mrf.mxu1 }
  0xf0   : > { %1500 = vmatpush.bf16.msrb.mxu1 %v11171_v57  ;;  %8574 = vmatmul.msk.bf16.gmra.mxu0 %vm450_vm1, %v10077_v35  ;;  %v350_v57 = vld [vmem:[%s11130_s17 + $0x30] sm:$0xf] }
  0xf1   : > { %8581 = vmatmul.msk.bf16.gmra.mxu1 %vm450_vm1, %v10077_v35  ;;  %8588 = vmatmul.msk.bf16.gmra.mxu2 %vm450_vm1, %v10077_v35  ;;  %v774_v6 = vunpack.c.l.b16 %v350_v57 }
  0xf2   : > { %8595 = vmatmul.msk.bf16.gmra.mxu3 %vm450_vm1, %v10077_v35 }
  0xf4   : > { %1501 = vmatpush.bf16.msrb.mxu1 %v11242_v31  ;;  %v11414_v40 = vpop.f32.mrf.mxu2  ;;  %v11416_v41 = vpop.f32.mrf.mxu3  ;;  %v11434_v31 = vpack.c.b16 %v774_v6, %v774_v6 }
  0xf5   : > { %v11422_v53 = vpop.f32.mrf.mxu0  ;;  %v11424_v54 = vpop.f32.mrf.mxu1 }
  0xf6   : > { %14648 = vst [vmem:[#allocation11_spill] sm:$0xff] %v11434_v31 }
  0xf8   : > { %1502 = vmatpush.bf16.msrb.mxu1 %v11307_v23 }
  0xfc   : > { %1503 = vmatpush.bf16.msrb.mxu1 %v8604_v0  ;;  %v11430_v8 = vpop.f32.mrf.mxu2  ;;  %v11432_v25 = vpop.f32.mrf.mxu3 }
  0xfd   : > { %v11440_v7 = vpop.f32.mrf.mxu0  ;;  %v11442_v23 = vpop.f32.mrf.mxu1 }
 0x100   : > { %8575 = vmatmul.msk.bf16.gmra.mxu0 %vm450_vm1, %v11434_v31 }
 0x101   : > { %8582 = vmatmul.msk.bf16.gmra.mxu1 %vm450_vm1, %v11434_v31  ;;  %8589 = vmatmul.msk.bf16.gmra.mxu2 %vm450_vm1, %v11434_v31 }
 0x102   : > { %8596 = vmatmul.msk.bf16.gmra.mxu3 %vm450_vm1, %v11434_v31 }
 0x104   : > { %v11452_v0 = vpop.f32.mrf.mxu2  ;;  %v11454_v18 = vpop.f32.mrf.mxu3 }
 0x105   : > { %v11460_v52 = vpop.f32.mrf.mxu0  ;;  %v11462_v4 = vpop.f32.mrf.mxu1 }
 0x106   : > { %14649 = vst [vmem:[#allocation12_spill] sm:$0xff] %v11462_v4 }
 0x10c   : > { %v11464_v35 = vpop.f32.mrf.mxu2  ;;  %v11466_v57 = vpop.f32.mrf.mxu3 }
 0x10d   : > { %14650 = vst [vmem:[#allocation13_spill] sm:$0xff] %v11464_v35  ;;  %v11472_v56 = vpop.f32.mrf.mxu0  ;;  %v11474_v37 = vpop.f32.mrf.mxu1 }
 0x10e   : > { %14651 = vst [vmem:[#allocation14_spill] sm:$0xff] %v11466_v57 }
 0x10f   : > { %14652 = vst [vmem:[#allocation15_spill] sm:$0xff] %v11472_v56 }
 0x110   : > { %14653 = vst [vmem:[#allocation16_spill] sm:$0xff] %v11474_v37  ;;  %8637 = vmatmul.msk.bf16.vlgmr.msra.gmra.mxu0 %vm450_vm1, %v10980_v10 }
 0x111   : > { %8644 = vmatmul.msk.bf16.vlgmr.msra.gmra.mxu1 %vm450_vm1, %v10980_v10  ;;  %8691 = vmatmul.msk.bf16.vlgmr.msra.gmra.mxu2 %vm450_vm1, %v10980_v10 }
 0x112   : > { %8698 = vmatmul.msk.bf16.vlgmr.msra.gmra.mxu3 %vm450_vm1, %v10980_v10  ;;  %v1027_v10 = vld [vmem:[%s14578_s3] sm:$0x3] }
 0x113   : > { %v11509_v49 = vperm.slane %v1027_v10, 0  ;;  %v11511_v5 = vperm.slane %v1027_v10, 1 }
 0x114   : > { %v11484_v6 = vpop.f32.mrf.mxu2  ;;  %v11486_v46 = vpop.f32.mrf.mxu3 }
 0x115   : > { %14654 = vst [vmem:[#allocation17_spill] sm:$0xff] %v11484_v6  ;;  %v520_v44 = vpop.f32.mrf.mxu0  ;;  %v563_v29 = vpop.f32.mrf.mxu1 }
 0x116   : > { %14655 = vst [vmem:[#allocation18_spill] sm:$0xff] %v11486_v46  ;;  %v14657_v29 = vmax.f32 %v11179_v60, %v11187_v62  ;;  %v14658_v60 = vmax.f32 %v11193_v1, %v11215_v9 }
 0x11c   : > { %v678_v28 = vpop.f32.mrf.mxu2  ;;  %v721_v22 = vpop.f32.mrf.mxu3 }
 0x11d   : > { %v812_v17 = vpop.f32.mrf.mxu0  ;;  %v855_v31 = vpop.f32.mrf.mxu1  ;;  %v14656_v22 = vmax.f32 %v11177_v59, %v11185_v61 }
 0x11e   : > { %v890_v44 = vmax.f32 %v14657_v29, %v855_v31  ;;  %v14659_v31 = vmax.f32 %v11195_v2, %v11217_v16  ;;  %v14660_v16 = vmax.f32 %v11224_v20, %v11250_v33 }
 0x11f   : > { %v889_v28 = vmax.f32 %v14656_v22, %v812_v17 }
 0x120   : > { %8638 = vmatmul.msk.bf16.gmra.mxu0 %vm450_vm1, %v11003_v11 }
 0x121   : > { %8645 = vmatmul.msk.bf16.gmra.mxu1 %vm450_vm1, %v11003_v11  ;;  %8692 = vmatmul.msk.bf16.gmra.mxu2 %vm450_vm1, %v11003_v11 }
 0x122   : > { %8699 = vmatmul.msk.bf16.gmra.mxu3 %vm450_vm1, %v11003_v11 }
 0x124   : > { %v924_v46 = vpop.f32.mrf.mxu2  ;;  %v967_v37 = vpop.f32.mrf.mxu3 }
 0x125   : > { %v1001_v6 = vmax.f32 %v889_v28, %v924_v46  ;;  %v1002_v56 = vmax.f32 %v890_v44, %v967_v37  ;;  %v814_v57 = vpop.f32.mrf.mxu0  ;;  %v857_v4 = vpop.f32.mrf.mxu1 }
 0x126   : > { %v891_v62 = vmax.f32 %v14658_v60, %v814_v57  ;;  %v892_v10 = vmax.f32 %v14659_v31, %v857_v4  ;;  %v14661_v57 = vmax.f32 %v11226_v21, %v11252_v34 }
 0x127   : > { %v1033_v11 = vadd.f32 %v11509_v49, %v1001_v6  ;;  %v1034_v35 = vadd.f32 %v11511_v5, %v1002_v56 }
 0x129   : > { %v1059_v59 = vmax.f32 %v1033_v11, 0.0  ;;  %v1060_v61 = vmax.f32 %v1034_v35, 0.0 }
 0x12b   : > { %v1085_v17 = vpack.c.bf16 %v1060_v61, %v1059_v59 }
 0x12c   : > { %v926_v22 = vpop.f32.mrf.mxu2  ;;  %v969_v46 = vpop.f32.mrf.mxu3 }
 0x12d   : > { %1098 = vst [vmem:[#allocation2] sm:$0xff] %v1085_v17  ;;  %v1003_v37 = vmax.f32 %v891_v62, %v926_v22  ;;  %v1004_v28 = vmax.f32 %v892_v10, %v969_v46  ;;  %v817_v29 = vpop.f32.mrf.mxu0  ;;  %v860_v6 = vpop.f32.mrf.mxu1  ;;  %1861 = vrot.lane.b32.xlu2 %v1085_v17, %s10697_s22  ;;  %v14662_v46 = vmax.f32 %v11258_v38, %v11262_v42 }
 0x12e   : > { %v893_v4 = vmax.f32 %v14660_v16, %v817_v29  ;;  %v894_v44 = vmax.f32 %v14661_v57, %v860_v6 }
 0x12f   : > { %v1035_v56 = vadd.f32 %v11509_v49, %v1003_v37  ;;  %v1036_v35 = vadd.f32 %v11511_v5, %v1004_v28 }
 0x130   : > { %8639 = vmatmul.msk.bf16.gmra.mxu0 %vm450_vm1, %v11016_v12 }
 0x131   : > { %8646 = vmatmul.msk.bf16.gmra.mxu1 %vm450_vm1, %v11016_v12  ;;  %v1061_v1 = vmax.f32 %v1035_v56, 0.0  ;;  %v1062_v2 = vmax.f32 %v1036_v35, 0.0  ;;  %8693 = vmatmul.msk.bf16.gmra.mxu2 %vm450_vm1, %v11016_v12 }
 0x132   : > { %8700 = vmatmul.msk.bf16.gmra.mxu3 %vm450_vm1, %v11016_v12 }
 0x133   : > { %v1086_v9 = vpack.c.bf16 %v1062_v2, %v1061_v1 }
 0x134   : > { %v1761_v11 = vld [vmem:[#allocation2] sm:$0xf]  ;;  %v2804_v59 = vld [vmem:[#allocation2 + $0x4] sm:$0xf]  ;;  %v929_v61 = vpop.f32.mrf.mxu2  ;;  %v972_v60 = vpop.f32.mrf.mxu3 }
 0x135   : > { %1771 = vst [vmem:[#allocation3] sm:$0xf] %v1761_v11  ;;  %v1005_v62 = vmax.f32 %v893_v4, %v929_v61  ;;  %v1006_v31 = vmax.f32 %v894_v44, %v972_v60  ;;  %v819_v10 = vpop.f32.mrf.mxu0  ;;  %v862_v22 = vpop.f32.mrf.mxu1  ;;  %2182 = vrot.lane.b32.xlu2 %v1085_v17, %s10698_s23  ;;  %2263 = vrot.lane.b32.xlu1 %v1086_v9, %s10698_s23 }
 0x136   : > { %2814 = vst [vmem:[#allocation3 + $0x280] sm:$0xf] %v2804_v59  ;;  %1942 = vrot.lane.b32.xlu0 %v1086_v9, %s10697_s22  ;;  %v895_v37 = vmax.f32 %v14662_v46, %v819_v10  ;;  %v14663_v17 = vmax.f32 %v11260_v39, %v11264_v43  ;;  %v14664_v11 = vmax.f32 %v11271_v48, %v11315_v24 }
 0x137   : > { %1099 = vst [vmem:[#allocation2 + $0x10] sm:$0xff] %v1086_v9  ;;  %v1037_v12 = vadd.f32 %v11509_v49, %v1005_v62  ;;  %v1038_v20 = vadd.f32 %v11511_v5, %v1006_v31  ;;  %v14665_v61 = vmax.f32 %v11273_v50, %v11317_v26 }
 0x138   : > { %v896_v28 = vmax.f32 %v14663_v17, %v862_v22 }
 0x139   : > { %v1063_v21 = vmax.f32 %v1037_v12, 0.0  ;;  %v1064_v33 = vmax.f32 %v1038_v20, 0.0 }
 0x13b   : > { %v11543_v34 = vpack.c.bf16 %v1064_v33, %v1063_v21 }
 0x13c   : > { %v931_v29 = vpop.f32.mrf.mxu2  ;;  %v974_v6 = vpop.f32.mrf.mxu3 }
 0x13d   : > { %1100 = vst [vmem:[#allocation2 + $0x20] sm:$0xff] %v11543_v34  ;;  %v1007_v56 = vmax.f32 %v895_v37, %v931_v29  ;;  %v1008_v35 = vmax.f32 %v896_v28, %v974_v6  ;;  %v822_v1 = vpop.f32.mrf.mxu0  ;;  %v865_v2 = vpop.f32.mrf.mxu1  ;;  %1863 = vrot.lane.b32.xlu2 %v1086_v9, %s10697_s22  ;;  %1944 = vrot.lane.b32.xlu1 %v11543_v34, %s10697_s22 }
 0x13e   : > { %v1762_v16 = vld [vmem:[#allocation2 + $0x10] sm:$0xf]  ;;  %v2805_v42 = vld [vmem:[#allocation2 + $0x14] sm:$0xf]  ;;  %2184 = vrot.lane.b32.xlu0 %v1086_v9, %s10698_s23  ;;  %v897_v59 = vmax.f32 %v14664_v11, %v822_v1  ;;  %v898_v60 = vmax.f32 %v14665_v61, %v865_v2  ;;  %v14666_v29 = vmax.f32 %v11323_v55, %v11327_v58  ;;  %v14669_v11 = vmax.f32 %v11336_v47, %v11369_v63 }
 0x13f   : > { %v1781_v38 = vld [vmem:[#allocation2 + $0x10] sm:$0xf]  ;;  %1772 = vst [vmem:[#allocation3 + $0x10] sm:$0xf] %v1762_v16  ;;  %v2824_v39 = vld [vmem:[#allocation2 + $0x14] sm:$0xf]  ;;  %v1039_v43 = vadd.f32 %v11509_v49, %v1007_v56  ;;  %v1040_v4 = vadd.f32 %v11511_v5, %v1008_v35  ;;  %v14667_v56 = vmax.f32 %v11325_v45, %v11329_v3  ;;  %v14670_v61 = vmax.f32 %v11338_v51, %v11371_v32 }
 0x140   : > { %1791 = vst [vmem:[#allocation3 + $0x4] sm:$0xf] %v1781_v38  ;;  %8640 = vmatmul.msk.bf16.gmra.mxu0 %vm450_vm1, %v11027_v13  ;;  %v14668_v58 = vld [vmem:[#allocation8_spill] sm:$0xff] }
 0x141   : > { %8647 = vmatmul.msk.bf16.gmra.mxu1 %vm450_vm1, %v11027_v13  ;;  %2815 = vst [vmem:[#allocation3 + $0x290] sm:$0xf] %v2805_v42  ;;  %v1065_v57 = vmax.f32 %v1039_v43, 0.0  ;;  %v1066_v44 = vmax.f32 %v1040_v4, 0.0  ;;  %8694 = vmatmul.msk.bf16.gmra.mxu2 %vm450_vm1, %v11027_v13 }
 0x142   : > { %8701 = vmatmul.msk.bf16.gmra.mxu3 %vm450_vm1, %v11027_v13  ;;  %2834 = vst [vmem:[#allocation3 + $0x284] sm:$0xf] %v2824_v39 }
 0x143   : > { %v11566_v9 = vpack.c.bf16 %v1066_v44, %v1065_v57 }
 0x144   : > { %v1782_v62 = vld [vmem:[#allocation2 + $0x20] sm:$0xf]  ;;  %v2825_v10 = vld [vmem:[#allocation2 + $0x24] sm:$0xf]  ;;  %v934_v22 = vpop.f32.mrf.mxu2  ;;  %v977_v12 = vpop.f32.mrf.mxu3 }
 0x145   : > { %v1801_v31 = vld [vmem:[#allocation2 + $0x20] sm:$0xf]  ;;  %1792 = vst [vmem:[#allocation3 + $0x14] sm:$0xf] %v1782_v62  ;;  %v2844_v20 = vld [vmem:[#allocation2 + $0x24] sm:$0xf]  ;;  %v1009_v21 = vmax.f32 %v897_v59, %v934_v22  ;;  %v1010_v13 = vmax.f32 %v898_v60, %v977_v12  ;;  %v824_v33 = vpop.f32.mrf.mxu0  ;;  %v867_v46 = vpop.f32.mrf.mxu1  ;;  %2265 = vrot.lane.b32.xlu2 %v11543_v34, %s10698_s23  ;;  %2343 = vrot.lane.b32.xlu1 %v11543_v34, %s10698_s23 }
 0x146   : > { %1811 = vst [vmem:[#allocation3 + $0x8] sm:$0xf] %v1801_v31  ;;  %2022 = vrot.lane.b32.xlu0 %v11543_v34, %s10697_s22  ;;  %v1763_v24 = vld [vmem:[#allocation2 + $0x20] sm:$0xf]  ;;  %v2806_v26 = vld [vmem:[#allocation2 + $0x24] sm:$0xf]  ;;  %v899_v6 = vmax.f32 %v14666_v29, %v824_v33  ;;  %v900_v35 = vmax.f32 %v14667_v56, %v867_v46 }
 0x147   : > { %2835 = vst [vmem:[#allocation3 + $0x294] sm:$0xf] %v2825_v10  ;;  %v1041_v48 = vadd.f32 %v11509_v49, %v1009_v21  ;;  %v1042_v50 = vadd.f32 %v11511_v5, %v1010_v13 }
 0x148   : > { %2854 = vst [vmem:[#allocation3 + $0x288] sm:$0xf] %v2844_v20 }
 0x149   : > { %1101 = vst [vmem:[#allocation2 + $0x30] sm:$0xff] %v11566_v9  ;;  %v1067_v37 = vmax.f32 %v1041_v48, 0.0  ;;  %v1068_v17 = vmax.f32 %v1042_v50, 0.0 }
 0x14a   : > { %1773 = vst [vmem:[#allocation3 + $0x20] sm:$0xf] %v1763_v24 }
 0x14b   : > { %v11583_v28 = vpack.c.bf16 %v1068_v17, %v1067_v37  ;;  %2816 = vst [vmem:[#allocation3 + $0x2a0] sm:$0xf] %v2806_v26  ;;  %v14671_v26 = vmax.f32 %v11377_v15, %v11389_v27  ;;  %v14672_v17 = vmax.f32 %v11379_v14, %v11391_v19 }
 0x14c   : > { %v936_v1 = vpop.f32.mrf.mxu2  ;;  %v979_v2 = vpop.f32.mrf.mxu3 }
 0x14d   : > { %1102 = vst [vmem:[#allocation2 + $0x40] sm:$0xff] %v11583_v28  ;;  %v1011_v16 = vmax.f32 %v899_v6, %v936_v1  ;;  %v1012_v38 = vmax.f32 %v900_v35, %v979_v2  ;;  %v827_v42 = vpop.f32.mrf.mxu0  ;;  %v870_v39 = vpop.f32.mrf.mxu1  ;;  %2186 = vrot.lane.b32.xlu1 %v11543_v34, %s10698_s23  ;;  %1946 = vrot.lane.b32.xlu2 %v11566_v9, %s10697_s22 }
 0x14e   : > { %1865 = vrot.lane.b32.xlu0 %v11543_v34, %s10697_s22  ;;  %v901_v59 = vmax.f32 %v14669_v11, %v827_v42  ;;  %v902_v60 = vmax.f32 %v14670_v61, %v870_v39 }
 0x14f   : > { %v1043_v55 = vadd.f32 %v11509_v49, %v1011_v16  ;;  %v1044_v45 = vadd.f32 %v11511_v5, %v1012_v38 }
 0x150   : > { %8641 = vmatmul.msk.bf16.gmra.mxu0 %vm450_vm1, %v14668_v58  ;;  %v1802_v3 = vld [vmem:[#allocation2 + $0x30] sm:$0xf]  ;;  %v2845_v46 = vld [vmem:[#allocation2 + $0x34] sm:$0xf] }
 0x151   : > { %8648 = vmatmul.msk.bf16.gmra.mxu1 %vm450_vm1, %v14668_v58  ;;  %v1821_v43 = vld [vmem:[#allocation2 + $0x30] sm:$0xf]  ;;  %v1069_v57 = vmax.f32 %v1043_v55, 0.0  ;;  %v1070_v44 = vmax.f32 %v1044_v45, 0.0  ;;  %8695 = vmatmul.msk.bf16.gmra.mxu2 %vm450_vm1, %v14668_v58  ;;  %1812 = vst [vmem:[#allocation3 + $0x18] sm:$0xf] %v1802_v3 }
 0x152   : > { %v1764_v4 = vld [vmem:[#allocation2 + $0x30] sm:$0xf]  ;;  %8702 = vmatmul.msk.bf16.gmra.mxu3 %vm450_vm1, %v14668_v58  ;;  %1831 = vst [vmem:[#allocation3 + $0xc] sm:$0xf] %v1821_v43  ;;  %v2864_v39 = vld [vmem:[#allocation2 + $0x34] sm:$0xf] }
 0x153   : > { %v11608_v34 = vpack.c.bf16 %v1070_v44, %v1069_v57  ;;  %1774 = vst [vmem:[#allocation3 + $0x30] sm:$0xf] %v1764_v4  ;;  %v1783_v22 = vld [vmem:[#allocation2 + $0x30] sm:$0xf]  ;;  %v14673_v55 = vld [vmem:[#allocation9_spill] sm:$0xff]  ;;  %v14674_v4 = vmax.f32 %v11398_v30, %v11414_v40  ;;  %v14675_v44 = vmax.f32 %v11400_v36, %v11416_v41 }
 0x154   : > { %v939_v62 = vpop.f32.mrf.mxu2  ;;  %v982_v31 = vpop.f32.mrf.mxu3  ;;  %v1822_v10 = vld [vmem:[#allocation2 + $0x40] sm:$0xf]  ;;  %1793 = vst [vmem:[#allocation3 + $0x24] sm:$0xf] %v1783_v22  ;;  %v2865_v45 = vld [vmem:[#allocation2 + $0x44] sm:$0xf] }
 0x155   : > { %1103 = vst [vmem:[#allocation2 + $0x50] sm:$0xff] %v11608_v34  ;;  %v1013_v12 = vmax.f32 %v901_v59, %v939_v62  ;;  %v1014_v20 = vmax.f32 %v902_v60, %v982_v31  ;;  %v829_v21 = vpop.f32.mrf.mxu0  ;;  %v872_v13 = vpop.f32.mrf.mxu1  ;;  %2102 = vrot.lane.b32.xlu1 %v11566_v9, %s10697_s22  ;;  %2345 = vrot.lane.b32.xlu2 %v11566_v9, %s10698_s23  ;;  %v1784_v63 = vld [vmem:[#allocation2 + $0x40] sm:$0xf]  ;;  %v11666_v30 = vld [vmem:[%s14579_s4 + $0xb8] sm:$0xff] }
 0x156   : > { %2024 = vrot.lane.b32.xlu0 %v11566_v9, %s10697_s22  ;;  %1832 = vst [vmem:[#allocation3 + $0x1c] sm:$0xf] %v1822_v10  ;;  %v1803_v32 = vld [vmem:[#allocation2 + $0x40] sm:$0xf]  ;;  %v903_v37 = vmax.f32 %v14671_v26, %v829_v21  ;;  %v904_v29 = vmax.f32 %v14672_v17, %v872_v13  ;;  %v11671_v36 = vld [vmem:[%s14579_s4 + $0xf8] sm:$0xff]  ;;  %4689 = vmatpush.bf16.msra.mxu2 %v11666_v30 }
 0x157   : > { %v1045_v47 = vadd.f32 %v11509_v49, %v1013_v12  ;;  %v1046_v51 = vadd.f32 %v11511_v5, %v1014_v20  ;;  %v1765_v33 = vld [vmem:[#allocation2 + $0x40] sm:$0xf]  ;;  %1794 = vst [vmem:[#allocation3 + $0x34] sm:$0xf] %v1784_v63  ;;  %4723 = vmatpush.bf16.msra.mxu3 %v11671_v36  ;;  %v2807_v13 = vld [vmem:[#allocation2 + $0x34] sm:$0xf] }
 0x158   : > { %1813 = vst [vmem:[#allocation3 + $0x28] sm:$0xf] %v1803_v32  ;;  %v2826_v63 = vld [vmem:[#allocation2 + $0x34] sm:$0xf] }
 0x159   : > { %v1071_v48 = vmax.f32 %v1045_v47, 0.0  ;;  %v1072_v50 = vmax.f32 %v1046_v51, 0.0  ;;  %1775 = vst [vmem:[#allocation3 + $0x40] sm:$0xf] %v1765_v33  ;;  %v14676_v51 = vmax.f32 %v11422_v53, %v11430_v8  ;;  %v11695_v53 = vld [vmem:[%s14579_s4 + $0x38] sm:$0xff]  ;;  %v11707_v8 = vld [vmem:[%s14579_s4 + $0xb0] sm:$0xff] }
 0x15a   : > { %2855 = vst [vmem:[#allocation3 + $0x298] sm:$0xf] %v2845_v46  ;;  %v14677_v46 = vmax.f32 %v11424_v54, %v11432_v25  ;;  %v11700_v54 = vld [vmem:[%s14579_s4 + $0x78] sm:$0xff]  ;;  %4621 = vmatpush.bf16.msra.mxu0 %v11695_v53  ;;  %4690 = vmatpush.bf16.msra.mxu2 %v11707_v8 }
 0x15b   : > { %v11625_v24 = vpack.c.bf16 %v1072_v50, %v1071_v48  ;;  %2874 = vst [vmem:[#allocation3 + $0x28c] sm:$0xf] %v2864_v39  ;;  %4655 = vmatpush.bf16.msra.mxu1 %v11700_v54  ;;  %v11734_v39 = vld [vmem:[%s14579_s4 + $0x70] sm:$0xff] }
 0x15c   : > { %v941_v6 = vpop.f32.mrf.mxu2  ;;  %v984_v56 = vpop.f32.mrf.mxu3  ;;  %v1804_v35 = vld [vmem:[#allocation2 + $0x50] sm:$0xf]  ;;  %2875 = vst [vmem:[#allocation3 + $0x29c] sm:$0xf] %v2865_v45  ;;  %v14679_v45 = vmax.f32 %v11440_v7, %v11452_v0 }
 0x15d   : > { %v1823_v1 = vld [vmem:[#allocation2 + $0x50] sm:$0xf]  ;;  %1104 = vst [vmem:[#allocation2 + $0x60] sm:$0xff] %v11625_v24  ;;  %v1015_v2 = vmax.f32 %v903_v37, %v941_v6  ;;  %v1016_v16 = vmax.f32 %v904_v29, %v984_v56  ;;  %v832_v38 = vpop.f32.mrf.mxu0  ;;  %v875_v42 = vpop.f32.mrf.mxu1  ;;  %2188 = vrot.lane.b32.xlu2 %v11566_v9, %s10698_s23  ;;  %1867 = vrot.lane.b32.xlu1 %v11566_v9, %s10697_s22 }
 0x15e   : > { %v1766_v15 = vld [vmem:[#allocation2 + $0x50] sm:$0xf]  ;;  %2423 = vrot.lane.b32.xlu0 %v11566_v9, %s10698_s23  ;;  %1814 = vst [vmem:[#allocation3 + $0x38] sm:$0xf] %v1804_v35  ;;  %v905_v57 = vmax.f32 %v14674_v4, %v832_v38  ;;  %v906_v11 = vmax.f32 %v14675_v44, %v875_v42  ;;  %v2827_v42 = vld [vmem:[#allocation2 + $0x44] sm:$0xf] }
 0x15f   : > { %v1785_v14 = vld [vmem:[#allocation2 + $0x50] sm:$0xf]  ;;  %v1047_v27 = vadd.f32 %v11509_v49, %v1015_v2  ;;  %v1048_v19 = vadd.f32 %v11511_v5, %v1016_v16  ;;  %1833 = vst [vmem:[#allocation3 + $0x2c] sm:$0xf] %v1823_v1  ;;  %v14678_v16 = vld [vmem:[#allocation10_spill] sm:$0xff]  ;;  %4656 = vmatpush.bf16.msra.mxu1 %v11734_v39 }
 0x160   : > { %8642 = vmatmul.msk.bf16.gmra.mxu0 %vm450_vm1, %v14673_v55  ;;  %1776 = vst [vmem:[#allocation3 + $0x50] sm:$0xf] %v1766_v15 }
 0x161   : > { %8649 = vmatmul.msk.bf16.gmra.mxu1 %vm450_vm1, %v14673_v55  ;;  %v1073_v58 = vmax.f32 %v1047_v27, 0.0  ;;  %v1074_v3 = vmax.f32 %v1048_v19, 0.0  ;;  %8696 = vmatmul.msk.bf16.gmra.mxu2 %vm450_vm1, %v14673_v55  ;;  %1795 = vst [vmem:[#allocation3 + $0x44] sm:$0xf] %v1785_v14  ;;  %v11724_v27 = vld [vmem:[%s14579_s4 + $0xf0] sm:$0xff] }
 0x162   : > { %8703 = vmatmul.msk.bf16.gmra.mxu3 %vm450_vm1, %v14673_v55  ;;  %2817 = vst [vmem:[#allocation3 + $0x2b0] sm:$0xf] %v2807_v13  ;;  %v11729_v19 = vld [vmem:[%s14579_s4 + $0x30] sm:$0xff] }
 0x163   : > { %v11650_v43 = vpack.c.bf16 %v1074_v3, %v1073_v58  ;;  %2836 = vst [vmem:[#allocation3 + $0x2a4] sm:$0xf] %v2826_v63  ;;  %v14680_v3 = vmax.f32 %v11442_v23, %v11454_v18  ;;  %4724 = vmatpush.bf16.msra.mxu3 %v11724_v27  ;;  %4622 = vmatpush.bf16.msra.mxu0 %v11729_v19  ;;  %v14683_v13 = vld [vmem:[#allocation12_spill] sm:$0xff]  ;;  %v14684_v63 = vld [vmem:[#allocation14_spill] sm:$0xff] }
 0x164   : > { %v944_v59 = vpop.f32.mrf.mxu2  ;;  %v987_v61 = vpop.f32.mrf.mxu3  ;;  %v1824_v60 = vld [vmem:[#allocation2 + $0x60] sm:$0xf]  ;;  %2837 = vst [vmem:[#allocation3 + $0x2b4] sm:$0xf] %v2827_v42 }
 0x165   : > { %v1786_v62 = vld [vmem:[#allocation2 + $0x60] sm:$0xf]  ;;  %1105 = vst [vmem:[#allocation2 + $0x70] sm:$0xff] %v11650_v43  ;;  %v1017_v31 = vmax.f32 %v905_v57, %v944_v59  ;;  %v1018_v10 = vmax.f32 %v906_v11, %v987_v61  ;;  %v834_v22 = vpop.f32.mrf.mxu0  ;;  %v877_v12 = vpop.f32.mrf.mxu1  ;;  %2104 = vrot.lane.b32.xlu1 %v11583_v28, %s10697_s22  ;;  %2026 = vrot.lane.b32.xlu2 %v11583_v28, %s10697_s22 }
 0x166   : > { %2267 = vrot.lane.b32.xlu0 %v11566_v9, %s10698_s23  ;;  %1834 = vst [vmem:[#allocation3 + $0x3c] sm:$0xf] %v1824_v60  ;;  %v1805_v40 = vld [vmem:[#allocation2 + $0x60] sm:$0xf]  ;;  %v907_v33 = vmax.f32 %v14676_v51, %v834_v22  ;;  %v908_v48 = vmax.f32 %v14677_v46, %v877_v12  ;;  %v2847_v22 = vld [vmem:[#allocation2 + $0x54] sm:$0xf] }
 0x167   : > { %v1049_v41 = vadd.f32 %v11509_v49, %v1017_v31  ;;  %v1050_v20 = vadd.f32 %v11511_v5, %v1018_v10  ;;  %1796 = vst [vmem:[#allocation3 + $0x54] sm:$0xf] %v1786_v62  ;;  %v1767_v21 = vld [vmem:[#allocation2 + $0x60] sm:$0xf]  ;;  %v2846_v10 = vld [vmem:[#allocation2 + $0x44] sm:$0xf] }
 0x168   : > { %1815 = vst [vmem:[#allocation3 + $0x48] sm:$0xf] %v1805_v40 }
 0x169   : > { %v1075_v32 = vmax.f32 %v1049_v41, 0.0  ;;  %v1076_v47 = vmax.f32 %v1050_v20, 0.0  ;;  %1777 = vst [vmem:[#allocation3 + $0x60] sm:$0xf] %v1767_v21  ;;  %v14681_v20 = vld [vmem:[#allocation13_spill] sm:$0xff] }
 0x16a   : > { %2856 = vst [vmem:[#allocation3 + $0x2a8] sm:$0xf] %v2846_v10  ;;  %v14682_v21 = vmax.f32 %v11460_v52, %v14681_v20  ;;  %v11773_v52 = vld [vmem:[%s14579_s4 + $0xa8] sm:$0xff] }
 0x16b   : > { %v11679_v9 = vpack.c.bf16 %v1076_v47, %v1075_v32  ;;  %v14685_v32 = vmax.f32 %v14683_v13, %v14684_v63  ;;  %2857 = vst [vmem:[#allocation3 + $0x2b8] sm:$0xf] %v2847_v22  ;;  %4691 = vmatpush.bf16.msra.mxu2 %v11773_v52  ;;  %v11819_v22 = vld [vmem:[%s14579_s4 + $0xa0] sm:$0xff]  ;;  %v2809_v13 = vld [vmem:[#allocation2 + $0x54] sm:$0xf] }
 0x16c   : > { %v946_v50 = vpop.f32.mrf.mxu2  ;;  %v989_v26 = vpop.f32.mrf.mxu3  ;;  %v1806_v37 = vld [vmem:[#allocation2 + $0x70] sm:$0xf]  ;;  %2819 = vst [vmem:[#allocation3 + $0x2d0] sm:$0xf] %v2809_v13 }
 0x16d   : > { %v1825_v17 = vld [vmem:[#allocation2 + $0x70] sm:$0xf]  ;;  %1106 = vst [vmem:[#allocation2 + $0x80] sm:$0xff] %v11679_v9  ;;  %v1019_v29 = vmax.f32 %v907_v33, %v946_v50  ;;  %v1020_v6 = vmax.f32 %v908_v48, %v989_v26  ;;  %v837_v56 = vpop.f32.mrf.mxu0  ;;  %2425 = vrot.lane.b32.xlu1 %v11583_v28, %s10698_s23  ;;  %1869 = vrot.lane.b32.xlu2 %v11583_v28, %s10697_s22 }
 0x16e   : > { %v880_v35 = vpop.f32.mrf.mxu1  ;;  %1948 = vrot.lane.b32.xlu0 %v11583_v28, %s10697_s22  ;;  %1816 = vst [vmem:[#allocation3 + $0x58] sm:$0xf] %v1806_v37  ;;  %v1768_v2 = vld [vmem:[#allocation2 + $0x70] sm:$0xf]  ;;  %v909_v58 = vmax.f32 %v14679_v45, %v837_v56 }
 0x16f   : > { %v1051_v25 = vadd.f32 %v11509_v49, %v1019_v29  ;;  %v1052_v1 = vadd.f32 %v11511_v5, %v1020_v6  ;;  %1835 = vst [vmem:[#allocation3 + $0x4c] sm:$0xf] %v1825_v17  ;;  %v1787_v38 = vld [vmem:[#allocation2 + $0x70] sm:$0xf]  ;;  %v910_v4 = vmax.f32 %v14680_v3, %v880_v35  ;;  %v11778_v29 = vld [vmem:[%s14579_s4 + $0xe8] sm:$0xff]  ;;  %v14687_v3 = vld [vmem:[#allocation17_spill] sm:$0xff]  ;;  %4692 = vmatpush.bf16.msra.mxu2 %v11819_v22 }
 0x170   : > { %8643 = vmatmul.msk.bf16.gmra.mxu0 %vm450_vm1, %v14678_v16  ;;  %1778 = vst [vmem:[#allocation3 + $0x70] sm:$0xf] %v1768_v2  ;;  %4725 = vmatpush.bf16.msra.mxu3 %v11778_v29  ;;  %v10495_v2 = vld [vmem:[%s11130_s17] sm:$0xff] }
 0x171   : > { %8650 = vmatmul.msk.bf16.gmra.mxu1 %vm450_vm1, %v14678_v16  ;;  %v1077_v15 = vmax.f32 %v1051_v25, 0.0  ;;  %v1078_v14 = vmax.f32 %v1052_v1, 0.0  ;;  %8697 = vmatmul.msk.bf16.gmra.mxu2 %vm450_vm1, %v14678_v16  ;;  %1797 = vst [vmem:[#allocation3 + $0x64] sm:$0xf] %v1787_v38  ;;  %v2866_v1 = vld [vmem:[#allocation2 + $0x54] sm:$0xf] }
 0x172   : > { %8704 = vmatmul.msk.bf16.gmra.mxu3 %vm450_vm1, %v14678_v16  ;;  %v2867_v16 = vld [vmem:[#allocation2 + $0x64] sm:$0xf]  ;;  %2876 = vst [vmem:[#allocation3 + $0x2ac] sm:$0xf] %v2866_v1 }
 0x173   : > { %v11737_v55 = vpack.c.bf16 %v1078_v14, %v1077_v15  ;;  %v11794_v15 = vld [vmem:[%s14579_s4 + $0x28] sm:$0xff]  ;;  %2877 = vst [vmem:[#allocation3 + $0x2bc] sm:$0xf] %v2867_v16  ;;  %v2848_v1 = vld [vmem:[#allocation2 + $0x64] sm:$0xf] }
 0x174   : > { %v949_v57 = vpop.f32.mrf.mxu2  ;;  %v1826_v11 = vld [vmem:[#allocation2 + $0x80] sm:$0xf]  ;;  %v11799_v14 = vld [vmem:[%s14579_s4 + $0x68] sm:$0xff]  ;;  %4623 = vmatpush.bf16.msra.mxu0 %v11794_v15  ;;  %2858 = vst [vmem:[#allocation3 + $0x2c8] sm:$0xf] %v2848_v1 }
 0x175   : > { %v992_v44 = vpop.f32.mrf.mxu3  ;;  %v1788_v59 = vld [vmem:[#allocation2 + $0x80] sm:$0xf]  ;;  %1107 = vst [vmem:[#allocation2 + $0x90] sm:$0xff] %v11737_v55  ;;  %v1021_v61 = vmax.f32 %v909_v58, %v949_v57  ;;  %v839_v0 = vpop.f32.mrf.mxu0  ;;  %2269 = vrot.lane.b32.xlu1 %v11583_v28, %s10698_s23  ;;  %2427 = vrot.lane.b32.xlu2 %v11608_v34, %s10698_s23  ;;  %v14686_v58 = vld [vmem:[#allocation15_spill] sm:$0xff] }
 0x176   : > { %v1022_v7 = vmax.f32 %v910_v4, %v992_v44  ;;  %v882_v60 = vpop.f32.mrf.mxu1  ;;  %v1807_v23 = vld [vmem:[#allocation2 + $0x80] sm:$0xf]  ;;  %2347 = vrot.lane.b32.xlu0 %v11583_v28, %s10698_s23  ;;  %1836 = vst [vmem:[#allocation3 + $0x5c] sm:$0xf] %v1826_v11  ;;  %v911_v28 = vmax.f32 %v14682_v21, %v839_v0  ;;  %v14688_v4 = vmax.f32 %v14686_v58, %v14687_v3  ;;  %v14689_v44 = vld [vmem:[#allocation16_spill] sm:$0xff]  ;;  %v14690_v11 = vld [vmem:[#allocation18_spill] sm:$0xff] }
 0x177   : > { %v1769_v18 = vld [vmem:[#allocation2 + $0x80] sm:$0xf]  ;;  %v1053_v62 = vadd.f32 %v11509_v49, %v1021_v61  ;;  %1798 = vst [vmem:[#allocation3 + $0x74] sm:$0xf] %v1788_v59  ;;  %v912_v47 = vmax.f32 %v14685_v32, %v882_v60  ;;  %v14691_v59 = vmax.f32 %v14689_v44, %v14690_v11  ;;  %4657 = vmatpush.bf16.msra.mxu1 %v11799_v14  ;;  %v2868_v58 = vld [vmem:[#allocation2 + $0x74] sm:$0xf] }
 0x178   : > { %v1054_v31 = vadd.f32 %v11511_v5, %v1022_v7  ;;  %1817 = vst [vmem:[#allocation3 + $0x68] sm:$0xf] %v1807_v23  ;;  %v2869_v44 = vld [vmem:[#allocation2 + $0x84] sm:$0xf] }
 0x179   : > { %v1079_v12 = vmax.f32 %v1053_v62, 0.0  ;;  %1779 = vst [vmem:[#allocation3 + $0x80] sm:$0xf] %v1769_v18 }
 0x17a   : > { %v1080_v40 = vmax.f32 %v1054_v31, 0.0  ;;  %2878 = vst [vmem:[#allocation3 + $0x2cc] sm:$0xf] %v2868_v58 }
 0x17b   : > { %2879 = vst [vmem:[#allocation3 + $0x2dc] sm:$0xf] %v2869_v44 }
 0x17c   : > { %v11757_v41 = vpack.c.bf16 %v1080_v40, %v1079_v12  ;;  %v951_v51 = vpop.f32.mrf.mxu2  ;;  %v1808_v46 = vld [vmem:[#allocation2 + $0x90] sm:$0xf]  ;;  %v2808_v40 = vld [vmem:[#allocation2 + $0x44] sm:$0xf] }
 0x17d   : > { %v994_v33 = vpop.f32.mrf.mxu3  ;;  %v1827_v48 = vld [vmem:[#allocation2 + $0x90] sm:$0xf]  ;;  %v1023_v50 = vmax.f32 %v911_v28, %v951_v51  ;;  %v842_v37 = vpop.f32.mrf.mxu0  ;;  %2106 = vrot.lane.b32.xlu1 %v11608_v34, %s10697_s22  ;;  %2108 = vrot.lane.b32.xlu2 %v11625_v24, %s10697_s22  ;;  %1818 = vst [vmem:[#allocation3 + $0x78] sm:$0xf] %v1808_v46 }
 0x17e   : > { %1108 = vst [vmem:[#allocation2 + $0xa0] sm:$0xff] %v11757_v41  ;;  %v1024_v26 = vmax.f32 %v912_v47, %v994_v33  ;;  %v885_v17 = vpop.f32.mrf.mxu1  ;;  %2028 = vrot.lane.b32.xlu0 %v11608_v34, %s10697_s22  ;;  %v1770_v6 = vld [vmem:[#allocation2 + $0x90] sm:$0xf]  ;;  %v913_v57 = vmax.f32 %v14688_v4, %v842_v37  ;;  %v11841_v37 = vld [vmem:[%s14579_s4 + $0xe0] sm:$0xff] }
 0x17f   : > { %v1055_v56 = vadd.f32 %v11509_v49, %v1023_v50  ;;  %1837 = vst [vmem:[#allocation3 + $0x6c] sm:$0xf] %v1827_v48  ;;  %v1789_v25 = vld [vmem:[#allocation2 + $0x90] sm:$0xf]  ;;  %v914_v61 = vmax.f32 %v14691_v59, %v885_v17  ;;  %v11846_v17 = vld [vmem:[%s14579_s4 + $0x20] sm:$0xff]  ;;  %4726 = vmatpush.bf16.msra.mxu3 %v11841_v37 }
 0x180   : > { %v1056_v35 = vadd.f32 %v11511_v5, %v1024_v26  ;;  %8705 = vmatmul.msk.bf16.vlgmr.msrb.gmra.mxu0 %vm450_vm1, %v10495_v2  ;;  %1780 = vst [vmem:[#allocation3 + $0x90] sm:$0xf] %v1770_v6  ;;  %v2828_v6 = vld [vmem:[#allocation2 + $0x54] sm:$0xf] }
 0x181   : > { %8712 = vmatmul.msk.bf16.vlgmr.msrb.gmra.mxu1 %vm450_vm1, %v10495_v2  ;;  %v1081_v38 = vmax.f32 %v1055_v56, 0.0  ;;  %8719 = vmatmul.msk.bf16.vlgmr.msrb.gmra.mxu2 %vm450_vm1, %v10495_v2  ;;  %1799 = vst [vmem:[#allocation3 + $0x84] sm:$0xf] %v1789_v25  ;;  %v11853_v56 = vld [vmem:[%s14579_s4 + $0x60] sm:$0xff] }
 0x182   : > { %v1082_v42 = vmax.f32 %v1056_v35, 0.0  ;;  %8726 = vmatmul.msk.bf16.vlgmr.msrb.gmra.mxu3 %vm450_vm1, %v10495_v2  ;;  %2818 = vst [vmem:[#allocation3 + $0x2c0] sm:$0xf] %v2808_v40  ;;  %v2829_v35 = vld [vmem:[#allocation2 + $0x64] sm:$0xf]  ;;  %4624 = vmatpush.bf16.msra.mxu0 %v11846_v17  ;;  %v10496_v2 = vld [vmem:[%s11130_s17 + $0x8] sm:$0xff] }
 0x183   : > { %2838 = vst [vmem:[#allocation3 + $0x2c4] sm:$0xf] %v2828_v6  ;;  %4658 = vmatpush.bf16.msra.mxu1 %v11853_v56 }
 0x184   : > { %v11801_v45 = vpack.c.bf16 %v1082_v42, %v1081_v38  ;;  %v954_v7 = vpop.f32.mrf.mxu2  ;;  %2839 = vst [vmem:[#allocation3 + $0x2d4] sm:$0xf] %v2829_v35  ;;  %v2849_v38 = vld [vmem:[#allocation2 + $0x74] sm:$0xf] }
 0x185   : > { %v997_v0 = vpop.f32.mrf.mxu3  ;;  %v1828_v60 = vld [vmem:[#allocation2 + $0xa0] sm:$0xf]  ;;  %v1025_v18 = vmax.f32 %v913_v57, %v954_v7  ;;  %v844_v31 = vpop.f32.mrf.mxu0  ;;  %1950 = vrot.lane.b32.xlu1 %v11608_v34, %s10697_s22  ;;  %1952 = vrot.lane.b32.xlu2 %v11625_v24, %s10697_s22  ;;  %2859 = vst [vmem:[#allocation3 + $0x2d8] sm:$0xf] %v2849_v38  ;;  %v2813_v35 = vld [vmem:[#allocation2 + $0x94] sm:$0xf] }
 0x186   : > { %v1790_v23 = vld [vmem:[#allocation2 + $0xa0] sm:$0xf]  ;;  %1109 = vst [vmem:[#allocation2 + $0xb0] sm:$0xff] %v11801_v45  ;;  %v1026_v62 = vmax.f32 %v914_v61, %v997_v0  ;;  %v887_v10 = vpop.f32.mrf.mxu1  ;;  %1871 = vrot.lane.b32.xlu0 %v11608_v34, %s10697_s22  ;;  %v11883_v0 = vld [vmem:[%s14579_s4 + $0x98] sm:$0xff]  ;;  %v2830_v31 = vld [vmem:[#allocation2 + $0x74] sm:$0xf] }
 0x187   : > { %v1809_v12 = vld [vmem:[#allocation2 + $0xa0] sm:$0xf]  ;;  %1838 = vst [vmem:[#allocation3 + $0x7c] sm:$0xf] %v1828_v60  ;;  %v1057_v20 = vadd.f32 %v11509_v49, %v1025_v18  ;;  %v1862_v28 = vpop.permute.xlu2 %1861  ;;  %v11888_v60 = vld [vmem:[%s14579_s4 + $0xd8] sm:$0xff]  ;;  %4693 = vmatpush.bf16.msra.mxu2 %v11883_v0 }
 0x188   : > { %v1058_v21 = vadd.f32 %v11511_v5, %v1026_v62  ;;  %1800 = vst [vmem:[#allocation3 + $0x94] sm:$0xf] %v1790_v23  ;;  %v1881_v63 = vrot.slane %v1862_v28, 4  ;;  %v2810_v23 = vld [vmem:[#allocation2 + $0x64] sm:$0xf]  ;;  %4727 = vmatpush.bf16.msra.mxu3 %v11888_v60 }
 0x189   : > { %1819 = vst [vmem:[#allocation3 + $0x88] sm:$0xf] %v1809_v12  ;;  %v1083_v32 = vmax.f32 %v1057_v20, 0.0  ;;  %v2811_v18 = vld [vmem:[#allocation2 + $0x74] sm:$0xf] }
 0x18a   : > { %v1084_v47 = vmax.f32 %v1058_v21, 0.0  ;;  %v1892_v51 = vsel %vm1891_vm2, %v1862_v28, %v1881_v63  ;;  %2820 = vst [vmem:[#allocation3 + $0x2e0] sm:$0xf] %v2810_v23  ;;  %v2831_v12 = vld [vmem:[#allocation2 + $0x84] sm:$0xf] }
 0x18b   : > { %1912 = vst [vmem:[#allocation3 + $0xa0] sm:$0xf] %v1892_v51  ;;  %v2850_v20 = vld [vmem:[#allocation2 + $0x84] sm:$0xf]  ;;  %v2851_v21 = vld [vmem:[#allocation2 + $0x94] sm:$0xf] }
 0x18c   : > { %v11827_v33 = vpack.c.bf16 %v1084_v47, %v1083_v32  ;;  %v956_v49 = vpop.f32.mrf.mxu2  ;;  %2821 = vst [vmem:[#allocation3 + $0x2f0] sm:$0xf] %v2811_v18  ;;  %v2870_v63 = vld [vmem:[#allocation2 + $0x94] sm:$0xf]  ;;  %v2833_v38 = vld [vmem:[#allocation2 + $0xa4] sm:$0xf] }
 0x18d   : > { %v999_v46 = vpop.f32.mrf.mxu3  ;;  %v1810_v5 = vld [vmem:[#allocation2 + $0xb0] sm:$0xf]  ;;  %v11830_v50 = vpop.f32.mrf.mxu0  ;;  %2349 = vrot.lane.b32.xlu1 %v11608_v34, %s10698_s23  ;;  %2351 = vrot.lane.b32.xlu2 %v11625_v24, %s10698_s23  ;;  %2840 = vst [vmem:[#allocation3 + $0x2e4] sm:$0xf] %v2830_v31  ;;  %v2853_v44 = vld [vmem:[#allocation2 + $0xb4] sm:$0xf] }
 0x18e   : > { %v1829_v48 = vld [vmem:[#allocation2 + $0xb0] sm:$0xf]  ;;  %1110 = vst [vmem:[#allocation2 + $0xc0] sm:$0xff] %v11827_v33  ;;  %v11832_v26 = vpop.f32.mrf.mxu1  ;;  %2429 = vrot.lane.b32.xlu0 %v11625_v24, %s10698_s23  ;;  %v11914_v46 = vld [vmem:[%s14579_s4 + $0x18] sm:$0xff] }
 0x18f   : > { %1820 = vst [vmem:[#allocation3 + $0x98] sm:$0xf] %v1810_v5  ;;  %v2183_v25 = vpop.permute.xlu2 %2182  ;;  %v11919_v5 = vld [vmem:[%s14579_s4 + $0x58] sm:$0xff]  ;;  %4625 = vmatpush.bf16.msra.mxu0 %v11914_v46 }
 0x190   : > { %1839 = vst [vmem:[#allocation3 + $0x8c] sm:$0xf] %v1829_v48  ;;  %8706 = vmatmul.msk.bf16.gmra.mxu0 %vm450_vm1, %v10496_v2  ;;  %v2202_v16 = vrot.slane %v2183_v25, 4  ;;  %v2871_v48 = vld [vmem:[#allocation2 + $0xa4] sm:$0xf]  ;;  %4659 = vmatpush.bf16.msra.mxu1 %v11919_v5 }
 0x191   : > { %8713 = vmatmul.msk.bf16.gmra.mxu1 %vm450_vm1, %v10496_v2  ;;  %8720 = vmatmul.msk.bf16.gmra.mxu2 %vm450_vm1, %v10496_v2  ;;  %2841 = vst [vmem:[#allocation3 + $0x2f4] sm:$0xf] %v2831_v12  ;;  %v11955_v12 = vld [vmem:[%s14579_s4 + $0xd0] sm:$0xff] }
 0x192   : > { %8727 = vmatmul.msk.bf16.gmra.mxu3 %vm450_vm1, %v10496_v2  ;;  %v2213_v42 = vsel %vm2212_vm3, %v2183_v25, %v2202_v16  ;;  %2860 = vst [vmem:[#allocation3 + $0x2e8] sm:$0xf] %v2850_v20  ;;  %v10497_v25 = vld [vmem:[%s11130_s17 + $0x10] sm:$0xff] }
 0x193   : > { %2233 = vst [vmem:[#allocation3 + $0x140] sm:$0xf] %v2213_v42  ;;  %v2832_v2 = vld [vmem:[#allocation2 + $0x94] sm:$0xf]  ;;  %v2852_v42 = vld [vmem:[#allocation2 + $0xa4] sm:$0xf]  ;;  %4728 = vmatpush.bf16.msra.mxu3 %v11955_v12 }
 0x194   : > { %v11864_v3 = vpop.f32.mrf.mxu2  ;;  %2861 = vst [vmem:[#allocation3 + $0x2f8] sm:$0xf] %v2851_v21  ;;  %v11967_v20 = vld [vmem:[%s14579_s4 + $0x50] sm:$0xff] }
 0x195   : > { %v11866_v4 = vpop.f32.mrf.mxu3  ;;  %v1830_v57 = vld [vmem:[#allocation2 + $0xc0] sm:$0xf]  ;;  %v11872_v61 = vpop.f32.mrf.mxu0  ;;  %2030 = vrot.lane.b32.xlu1 %v11625_v24, %s10697_s22  ;;  %2032 = vrot.lane.b32.xlu2 %v11650_v43, %s10697_s22  ;;  %2880 = vst [vmem:[#allocation3 + $0x2ec] sm:$0xf] %v2870_v63  ;;  %v2872_v21 = vld [vmem:[#allocation2 + $0xb4] sm:$0xf] }
 0x196   : > { %v11874_v7 = vpop.f32.mrf.mxu1  ;;  %1840 = vst [vmem:[#allocation3 + $0x9c] sm:$0xf] %v1830_v57  ;;  %2110 = vrot.lane.b32.xlu0 %v11650_v43, %s10697_s22  ;;  %4660 = vmatpush.bf16.msra.mxu1 %v11967_v20 }
 0x197   : > { %v1864_v62 = vpop.permute.xlu2 %1863  ;;  %2881 = vst [vmem:[#allocation3 + $0x2fc] sm:$0xf] %v2871_v48 }
 0x198   : > { %v1882_v10 = vrot.slane %v1864_v62, 4  ;;  %2823 = vst [vmem:[#allocation3 + $0x310] sm:$0xf] %v2813_v35 }
 0x199   : > { %2842 = vst [vmem:[#allocation3 + $0x304] sm:$0xf] %v2832_v2 }
 0x19a   : > { %v1893_v40 = vsel %vm1891_vm2, %v1864_v62, %v1882_v10  ;;  %v11950_v10 = vld [vmem:[%s14579_s4 + $0x90] sm:$0xff]  ;;  %2843 = vst [vmem:[#allocation3 + $0x314] sm:$0xf] %v2833_v38 }
 0x19b   : > { %1913 = vst [vmem:[#allocation3 + $0xb0] sm:$0xf] %v1893_v40  ;;  %v11962_v40 = vld [vmem:[%s14579_s4 + $0x10] sm:$0xff]  ;;  %4694 = vmatpush.bf16.msra.mxu2 %v11950_v10 }
 0x19c   : > { %v11895_v28 = vpop.f32.mrf.mxu2  ;;  %2862 = vst [vmem:[#allocation3 + $0x308] sm:$0xf] %v2852_v42  ;;  %4626 = vmatpush.bf16.msra.mxu0 %v11962_v40 }
 0x19d   : > { %v11897_v13 = vpop.f32.mrf.mxu3  ;;  %v11903_v51 = vpop.f32.mrf.mxu0  ;;  %1873 = vrot.lane.b32.xlu1 %v11625_v24, %s10697_s22  ;;  %1875 = vrot.lane.b32.xlu2 %v11650_v43, %s10697_s22  ;;  %v2812_v24 = vld [vmem:[#allocation2 + $0x84] sm:$0xf]  ;;  %2863 = vst [vmem:[#allocation3 + $0x318] sm:$0xf] %v2853_v44 }
 0x19e   : > { %v11905_v49 = vpop.f32.mrf.mxu1  ;;  %1954 = vrot.lane.b32.xlu0 %v11650_v43, %s10697_s22  ;;  %2822 = vst [vmem:[#allocation3 + $0x300] sm:$0xf] %v2812_v24 }
 0x19f   : > { %v2266_v6 = vpop.permute.xlu2 %2265  ;;  %2882 = vst [vmem:[#allocation3 + $0x30c] sm:$0xf] %v2872_v21 }
 0x1a0   : > { %8707 = vmatmul.msk.bf16.gmra.mxu0 %vm450_vm1, %v10497_v25  ;;  %v2284_v1 = vrot.slane %v2266_v6, 4 }
 0x1a1   : > { %8714 = vmatmul.msk.bf16.gmra.mxu1 %vm450_vm1, %v10497_v25  ;;  %8721 = vmatmul.msk.bf16.gmra.mxu2 %vm450_vm1, %v10497_v25 }
 0x1a2   : > { %8728 = vmatmul.msk.bf16.gmra.mxu3 %vm450_vm1, %v10497_v25  ;;  %v2294_v16 = vsel %vm2212_vm3, %v2266_v6, %v2284_v1  ;;  %v2873_v25 = vld [vmem:[#allocation2 + $0xc4] sm:$0xf] }
 0x1a3   : > { %2314 = vst [vmem:[#allocation3 + $0x154] sm:$0xf] %v2294_v16 }
 0x1a4   : > { %v11931_v58 = vpop.f32.mrf.mxu2  ;;  %2883 = vst [vmem:[#allocation3 + $0x31c] sm:$0xf] %v2873_v25 }
 0x1a5   : > { %v11933_v57 = vpop.f32.mrf.mxu3  ;;  %v11939_v62 = vpop.f32.mrf.mxu0  ;;  %2112 = vrot.lane.b32.xlu1 %v11679_v9, %s10697_s22  ;;  %2114 = vrot.lane.b32.xlu2 %v11737_v55, %s10697_s22 }
 0x1a6   : > { %v11941_v31 = vpop.f32.mrf.mxu1  ;;  %2034 = vrot.lane.b32.xlu0 %v11679_v9, %s10697_s22 }
 0x1a7   : > { %14692 = vst [vmem:[#allocation8_spill] sm:$0xff] %v11941_v31  ;;  %v2264_v63 = vpop.permute.xlu1 %2263  ;;  %v1947_v48 = vpop.permute.xlu2 %1946 }
 0x1a8   : > { %v2283_v24 = vrot.slane %v2264_v63, 4  ;;  %v1943_v6 = vpop.permute.xlu0 %1942  ;;  %v1964_v35 = vrot.slane %v1947_v48, 4 }
 0x1a9   : > { %v1962_v1 = vrot.slane %v1943_v6, 4 }
 0x1aa   : > { %v2293_v2 = vsel %vm2212_vm3, %v2264_v63, %v2283_v24  ;;  %v1974_v16 = vsel %vm1891_vm2, %v1947_v48, %v1964_v35 }
 0x1ab   : > { %2313 = vst [vmem:[#allocation3 + $0x144] sm:$0xf] %v2293_v2  ;;  %v1972_v38 = vsel %vm1891_vm2, %v1943_v6, %v1962_v1  ;;  %v10498_v6 = vld [vmem:[%s11130_s17 + $0x18] sm:$0xff] }
 0x1ac   : > { %v11976_v42 = vpop.f32.mrf.mxu2  ;;  %1992 = vst [vmem:[#allocation3 + $0xa4] sm:$0xf] %v1972_v38 }
 0x1ad   : > { %14693 = vst [vmem:[#allocation9_spill] sm:$0xff] %v11976_v42  ;;  %v11978_v44 = vpop.f32.mrf.mxu3  ;;  %v11984_v23 = vpop.f32.mrf.mxu0  ;;  %1956 = vrot.lane.b32.xlu1 %v11679_v9, %s10697_s22  ;;  %1958 = vrot.lane.b32.xlu2 %v11737_v55, %s10697_s22 }
 0x1ae   : > { %14694 = vst [vmem:[#allocation10_spill] sm:$0xff] %v11978_v44  ;;  %v11986_v63 = vpop.f32.mrf.mxu1  ;;  %1877 = vrot.lane.b32.xlu0 %v11679_v9, %s10697_s22 }
 0x1af   : > { %14695 = vst [vmem:[#allocation13_spill] sm:$0xff] %v11984_v23  ;;  %v1945_v48 = vpop.permute.xlu1 %1944  ;;  %v2346_v24 = vpop.permute.xlu2 %2345 }
 0x1b0   : > { %14696 = vst [vmem:[#allocation12_spill] sm:$0xff] %v11986_v63  ;;  %8708 = vmatmul.msk.bf16.gmra.mxu0 %vm450_vm1, %v10498_v6  ;;  %v2185_v35 = vpop.permute.xlu0 %2184  ;;  %v1963_v25 = vrot.slane %v1945_v48, 4  ;;  %v2364_v1 = vrot.slane %v2346_v24, 4 }
 0x1b1   : > { %1994 = vst [vmem:[#allocation3 + $0xc4] sm:$0xf] %v1974_v16  ;;  %8715 = vmatmul.msk.bf16.gmra.mxu1 %vm450_vm1, %v10498_v6  ;;  %8722 = vmatmul.msk.bf16.gmra.mxu2 %vm450_vm1, %v10498_v6  ;;  %v2203_v2 = vrot.slane %v2185_v35, 4 }
 0x1b2   : > { %8729 = vmatmul.msk.bf16.gmra.mxu3 %vm450_vm1, %v10498_v6  ;;  %v1973_v16 = vsel %vm1891_vm2, %v1945_v48, %v1963_v25  ;;  %v2374_v38 = vsel %vm2212_vm3, %v2346_v24, %v2364_v1  ;;  %v12026_v48 = vld [vmem:[%s14579_s4 + $0xc8] sm:$0xff] }
 0x1b3   : > { %v2214_v21 = vsel %vm2212_vm3, %v2185_v35, %v2203_v2  ;;  %1993 = vst [vmem:[#allocation3 + $0xb4] sm:$0xf] %v1973_v16  ;;  %v12033_v24 = vld [vmem:[%s14579_s4 + $0x8] sm:$0xff]  ;;  %4729 = vmatpush.bf16.msra.mxu3 %v12026_v48 }
 0x1b4   : > { %v12002_v18 = vpop.f32.mrf.mxu2  ;;  %2234 = vst [vmem:[#allocation3 + $0x150] sm:$0xf] %v2214_v21  ;;  %v12021_v21 = vld [vmem:[%s14579_s4 + $0x88] sm:$0xff]  ;;  %4627 = vmatpush.bf16.msra.mxu0 %v12033_v24 }
 0x1b5   : > { %14697 = vst [vmem:[#allocation14_spill] sm:$0xff] %v12002_v18  ;;  %v12004_v47 = vpop.f32.mrf.mxu3  ;;  %v12010_v6 = vpop.f32.mrf.mxu0  ;;  %2036 = vrot.lane.b32.xlu1 %v11737_v55, %s10697_s22  ;;  %2038 = vrot.lane.b32.xlu2 %v11757_v41, %s10697_s22  ;;  %v12038_v35 = vld [vmem:[%s14579_s4 + $0x48] sm:$0xff] }
 0x1b6   : > { %14698 = vst [vmem:[#allocation15_spill] sm:$0xff] %v12004_v47  ;;  %v12012_v11 = vpop.f32.mrf.mxu1  ;;  %2116 = vrot.lane.b32.xlu0 %v11757_v41, %s10697_s22  ;;  %4695 = vmatpush.bf16.msra.mxu2 %v12021_v21 }
 0x1b7   : > { %14699 = vst [vmem:[#allocation17_spill] sm:$0xff] %v12012_v11  ;;  %v2344_v25 = vpop.permute.xlu1 %2343  ;;  %v2189_v1 = vpop.permute.xlu2 %2188  ;;  %4661 = vmatpush.bf16.msra.mxu1 %v12038_v35 }
 0x1b8   : > { %2394 = vst [vmem:[#allocation3 + $0x158] sm:$0xf] %v2374_v38  ;;  %v2023_v2 = vpop.permute.xlu0 %2022  ;;  %v2363_v16 = vrot.slane %v2344_v25, 4  ;;  %v2205_v38 = vrot.slane %v2189_v1, 4 }
 0x1b9   : > { %v2042_v59 = vrot.slane %v2023_v2, 4 }
 0x1ba   : > { %v2373_v32 = vsel %vm2212_vm3, %v2344_v25, %v2363_v16  ;;  %v2216_v47 = vsel %vm2212_vm3, %v2189_v1, %v2205_v38 }
 0x1bb   : > { %v2052_v63 = vsel %vm1891_vm2, %v2023_v2, %v2042_v59  ;;  %2393 = vst [vmem:[#allocation3 + $0x148] sm:$0xf] %v2373_v32 }
 0x1bc   : > { %v12047_v18 = vpop.f32.mrf.mxu2  ;;  %2072 = vst [vmem:[#allocation3 + $0xa8] sm:$0xf] %v2052_v63  ;;  %v10499_v63 = vld [vmem:[%s11130_s17 + $0x20] sm:$0xff] }
 0x1bd   : > { %14700 = vst [vmem:[#allocation16_spill] sm:$0xff] %v12047_v18  ;;  %v12049_v23 = vpop.f32.mrf.mxu3  ;;  %v12055_v42 = vpop.f32.mrf.mxu0  ;;  %1879 = vrot.lane.b32.xlu1 %v11737_v55, %s10697_s22  ;;  %2120 = vrot.lane.b32.xlu2 %v11827_v33, %s10697_s22  ;;  %v12073_v33 = vld [vmem:[%s14579_s4 + $0x80] sm:$0xff] }
 0x1be   : > { %14701 = vst [vmem:[#allocation18_spill] sm:$0xff] %v12049_v23  ;;  %v12057_v25 = vpop.f32.mrf.mxu1  ;;  %1960 = vrot.lane.b32.xlu0 %v11757_v41, %s10697_s22  ;;  %4696 = vmatpush.bf16.msra.mxu2 %v12073_v33 }
 0x1bf   : > { %14702 = vst [vmem:[#allocation19_spill] sm:$0xff] %v12055_v42  ;;  %v2187_v59 = vpop.permute.xlu1 %2186  ;;  %v2027_v32 = vpop.permute.xlu2 %2026 }
 0x1c0   : > { %14703 = vst [vmem:[#allocation20_spill] sm:$0xff] %v12057_v25  ;;  %8709 = vmatmul.msk.bf16.gmra.mxu0 %vm450_vm1, %v10499_v63  ;;  %v2204_v1 = vrot.slane %v2187_v59, 4  ;;  %v1866_v2 = vpop.permute.xlu0 %1865  ;;  %v2044_v16 = vrot.slane %v2027_v32, 4 }
 0x1c1   : > { %2236 = vst [vmem:[#allocation3 + $0x170] sm:$0xf] %v2216_v47  ;;  %8716 = vmatmul.msk.bf16.gmra.mxu1 %vm450_vm1, %v10499_v63  ;;  %8723 = vmatmul.msk.bf16.gmra.mxu2 %vm450_vm1, %v10499_v63  ;;  %v1883_v47 = vrot.slane %v1866_v2, 4 }
 0x1c2   : > { %8730 = vmatmul.msk.bf16.gmra.mxu3 %vm450_vm1, %v10499_v63  ;;  %v2215_v38 = vsel %vm2212_vm3, %v2187_v59, %v2204_v1  ;;  %v2054_v31 = vsel %vm1891_vm2, %v2027_v32, %v2044_v16  ;;  %4945 = vmatpush.bf16.msrb.mxu2 %v11666_v30  ;;  %v12099_v30 = vld [vmem:[%s14579_s4 + $0xc0] sm:$0xff] }
 0x1c3   : > { %2235 = vst [vmem:[#allocation3 + $0x160] sm:$0xf] %v2215_v38  ;;  %v1894_v44 = vsel %vm1891_vm2, %v1866_v2, %v1883_v47  ;;  %4730 = vmatpush.bf16.msra.mxu3 %v12099_v30 }
 0x1c4   : > { %v12079_v23 = vpop.f32.mrf.mxu2  ;;  %1914 = vst [vmem:[#allocation3 + $0xc0] sm:$0xf] %v1894_v44  ;;  %v12104_v44 = vld [vmem:[%s14579_s4] sm:$0xff] }
 0x1c5   : > { %14704 = vst [vmem:[#allocation21_spill] sm:$0xff] %v12079_v23  ;;  %v12081_v11 = vpop.f32.mrf.mxu3  ;;  %v12088_v1 = vpop.f32.mrf.mxu0  ;;  %2118 = vrot.lane.b32.xlu1 %v11801_v45, %s10697_s22  ;;  %2433 = vrot.lane.b32.xlu2 %v11679_v9, %s10698_s23 }
 0x1c6   : > { %14705 = vst [vmem:[#allocation22_spill] sm:$0xff] %v12081_v11  ;;  %v12090_v32 = vpop.f32.mrf.mxu1  ;;  %2040 = vrot.lane.b32.xlu0 %v11801_v45, %s10697_s22  ;;  %4628 = vmatpush.bf16.msra.mxu0 %v12104_v44 }
 0x1c7   : > { %14706 = vst [vmem:[#allocation23_spill] sm:$0xff] %v12088_v1  ;;  %v2103_v2 = vpop.permute.xlu1 %2102  ;;  %v1870_v16 = vpop.permute.xlu2 %1869  ;;  %4979 = vmatpush.bf16.msrb.mxu3 %v11671_v36  ;;  %4946 = vmatpush.bf16.msrb.mxu2 %v11707_v8 }
 0x1c8   : > { %14707 = vst [vmem:[#allocation24_spill] sm:$0xff] %v12090_v32  ;;  %v2122_v47 = vrot.slane %v2103_v2, 4  ;;  %v2025_v38 = vpop.permute.xlu0 %2024  ;;  %v1885_v59 = vrot.slane %v1870_v16, 4  ;;  %v10151_v32 = vld [vmem:[#allocation3 + $0xc] sm:$0xf] }
 0x1c9   : > { %2074 = vst [vmem:[#allocation3 + $0xc8] sm:$0xf] %v2054_v31  ;;  %v12111_v31 = vld [vmem:[%s14579_s4 + $0x40] sm:$0xff]  ;;  %v2043_v63 = vrot.slane %v2025_v38, 4 }
 0x1ca   : > { %4662 = vmatpush.bf16.msra.mxu1 %v12111_v31  ;;  %4877 = vmatpush.bf16.msrb.mxu0 %v11695_v53  ;;  %v2132_v11 = vsel %vm1891_vm2, %v2103_v2, %v2122_v47  ;;  %v1896_v25 = vsel %vm1891_vm2, %v1870_v16, %v1885_v59  ;;  %v12161_v47 = vld [vmem:[#allocation2 + $0x50] sm:$0xff] }
 0x1cb   : > { %2152 = vst [vmem:[#allocation3 + $0xac] sm:$0xf] %v2132_v11  ;;  %v2053_v23 = vsel %vm1891_vm2, %v2025_v38, %v2043_v63  ;;  %4980 = vmatpush.bf16.msrb.mxu3 %v11724_v27  ;;  %4947 = vmatpush.bf16.msrb.mxu2 %v11773_v52 }
 0x1cc   : > { %v12123_v42 = vpop.f32.mrf.mxu2  ;;  %2073 = vst [vmem:[#allocation3 + $0xb8] sm:$0xf] %v2053_v23  ;;  %v10500_v23 = vld [vmem:[%s11130_s17 + $0x28] sm:$0xff] }
 0x1cd   : > { %14708 = vst [vmem:[#allocation25_spill] sm:$0xff] %v12123_v42  ;;  %v12125_v18 = vpop.f32.mrf.mxu3  ;;  %2431 = vrot.lane.b32.xlu1 %v11650_v43, %s10698_s23  ;;  %2271 = vrot.lane.b32.xlu2 %v11608_v34, %s10698_s23 }
 0x1ce   : > { %4911 = vmatpush.bf16.msrb.mxu1 %v11700_v54  ;;  %14709 = vst [vmem:[#allocation26_spill] sm:$0xff] %v12125_v18  ;;  %v12132_v54 = vpop.f32.mrf.mxu0  ;;  %v12134_v8 = vpop.f32.mrf.mxu1  ;;  %2353 = vrot.lane.b32.xlu0 %v11650_v43, %s10698_s23  ;;  %v12259_v18 = vld [vmem:[#allocation2 + $0x70] sm:$0xff] }
 0x1cf   : > { %14710 = vst [vmem:[#allocation27_spill] sm:$0xff] %v12132_v54  ;;  %4878 = vmatpush.bf16.msrb.mxu0 %v11729_v19  ;;  %v1868_v27 = vpop.permute.xlu1 %1867  ;;  %v2428_v11 = vpop.permute.xlu2 %2427  ;;  %4981 = vmatpush.bf16.msrb.mxu3 %v11778_v29  ;;  %v8745_v54 = vld [vmem:[#allocation3 + $0x18] sm:$0xf0] }
 0x1d0   : > { %14711 = vst [vmem:[#allocation28_spill] sm:$0xff] %v12134_v8  ;;  %8710 = vmatmul.msk.bf16.gmra.mxu0 %vm450_vm1, %v10500_v23  ;;  %v1884_v63 = vrot.slane %v1868_v27, 4  ;;  %v2445_v59 = vrot.slane %v2428_v11, 4  ;;  %4948 = vmatpush.bf16.msrb.mxu2 %v11819_v22  ;;  %v12193_v8 = vld [vmem:[#allocation2 + $0x60] sm:$0xff] }
 0x1d1   : > { %1916 = vst [vmem:[#allocation3 + $0xe0] sm:$0xf] %v1896_v25  ;;  %8717 = vmatmul.msk.bf16.gmra.mxu1 %vm450_vm1, %v10500_v23  ;;  %v2424_v25 = vpop.permute.xlu0 %2423  ;;  %8724 = vmatmul.msk.bf16.gmra.mxu2 %vm450_vm1, %v10500_v23 }
 0x1d2   : > { %4912 = vmatpush.bf16.msrb.mxu1 %v11734_v39  ;;  %8731 = vmatmul.msk.bf16.gmra.mxu3 %vm450_vm1, %v10500_v23  ;;  %v2443_v34 = vrot.slane %v2424_v25, 4  ;;  %v1895_v43 = vsel %vm1891_vm2, %v1868_v27, %v1884_v63  ;;  %v2455_v19 = vsel %vm2212_vm3, %v2428_v11, %v2445_v59 }
 0x1d3   : > { %4879 = vmatpush.bf16.msrb.mxu0 %v11794_v15  ;;  %1915 = vst [vmem:[#allocation3 + $0xd0] sm:$0xf] %v1895_v43  ;;  %4982 = vmatpush.bf16.msrb.mxu3 %v11841_v37 }
 0x1d4   : > { %v2453_v39 = vsel %vm2212_vm3, %v2424_v25, %v2443_v34  ;;  %v12157_v2 = vpop.f32.mrf.mxu2  ;;  %2475 = vst [vmem:[#allocation3 + $0x16c] sm:$0xf] %v2455_v19  ;;  %v12173_v25 = vld [vmem:[#allocation2 + $0x40] sm:$0xff]  ;;  %4949 = vmatpush.bf16.msrb.mxu2 %v11883_v0 }
 0x1d5   : > { %14712 = vst [vmem:[#allocation29_spill] sm:$0xff] %v12157_v2  ;;  %v12159_v16 = vpop.f32.mrf.mxu3  ;;  %2192 = vrot.lane.b32.xlu1 %v12161_v47, %s10698_s23  ;;  %2357 = vrot.lane.b32.xlu2 %v11737_v55, %s10698_s23 }
 0x1d6   : > { %4913 = vmatpush.bf16.msrb.mxu1 %v11799_v14  ;;  %14713 = vst [vmem:[#allocation30_spill] sm:$0xff] %v12159_v16  ;;  %v12167_v11 = vpop.f32.mrf.mxu0  ;;  %v12169_v23 = vpop.f32.mrf.mxu1  ;;  %2190 = vrot.lane.b32.xlu0 %v12173_v25, %s10698_s23 }
 0x1d7   : > { %2473 = vst [vmem:[#allocation3 + $0x14c] sm:$0xf] %v2453_v39  ;;  %v2105_v63 = vpop.permute.xlu1 %2104  ;;  %v2109_v59 = vpop.permute.xlu2 %2108  ;;  %4880 = vmatpush.bf16.msrb.mxu0 %v11846_v17  ;;  %4983 = vmatpush.bf16.msrb.mxu3 %v11888_v60 }
 0x1d8   : > { %14714 = vst [vmem:[#allocation31_spill] sm:$0xff] %v12167_v11  ;;  %v2123_v43 = vrot.slane %v2105_v63, 4  ;;  %v2125_v19 = vrot.slane %v2109_v59, 4  ;;  %4950 = vmatpush.bf16.msrb.mxu2 %v11950_v10 }
 0x1d9   : > { %14715 = vst [vmem:[#allocation32_spill] sm:$0xff] %v12169_v23  ;;  %v2268_v34 = vpop.permute.xlu0 %2267 }
 0x1da   : > { %4914 = vmatpush.bf16.msrb.mxu1 %v11853_v56  ;;  %v2285_v39 = vrot.slane %v2268_v34, 4  ;;  %v2133_v27 = vsel %vm1891_vm2, %v2105_v63, %v2123_v43  ;;  %v2135_v38 = vsel %vm1891_vm2, %v2109_v59, %v2125_v19  ;;  %v14720_v19 = vld [vmem:[#allocation11_spill] sm:$0xff] }
 0x1db   : > { %2153 = vst [vmem:[#allocation3 + $0xbc] sm:$0xf] %v2133_v27  ;;  %4881 = vmatpush.bf16.msrb.mxu0 %v11914_v46  ;;  %4984 = vmatpush.bf16.msrb.mxu3 %v11955_v12 }
 0x1dc   : > { %v2295_v53 = vsel %vm2212_vm3, %v2268_v34, %v2285_v39  ;;  %v12189_v36 = vpop.f32.mrf.mxu2  ;;  %2155 = vst [vmem:[#allocation3 + $0xdc] sm:$0xf] %v2135_v38  ;;  %4951 = vmatpush.bf16.msrb.mxu2 %v12021_v21 }
 0x1dd   : > { %14716 = vst [vmem:[#allocation33_spill] sm:$0xff] %v12189_v36  ;;  %v12191_v16 = vpop.f32.mrf.mxu3  ;;  %2355 = vrot.lane.b32.xlu1 %v11679_v9, %s10698_s23  ;;  %2194 = vrot.lane.b32.xlu2 %v12193_v8, %s10698_s23 }
 0x1de   : > { %4915 = vmatpush.bf16.msrb.mxu1 %v11919_v5  ;;  %14717 = vst [vmem:[#allocation34_spill] sm:$0xff] %v12191_v16  ;;  %v12200_v27 = vpop.f32.mrf.mxu0  ;;  %v12202_v34 = vpop.f32.mrf.mxu1  ;;  %2273 = vrot.lane.b32.xlu0 %v12193_v8, %s10698_s23 }
 0x1df   : > { %2315 = vst [vmem:[#allocation3 + $0x164] sm:$0xf] %v2295_v53  ;;  %v2426_v53 = vpop.permute.xlu1 %2425  ;;  %v1953_v43 = vpop.permute.xlu2 %1952  ;;  %4882 = vmatpush.bf16.msrb.mxu0 %v11962_v40  ;;  %4985 = vmatpush.bf16.msrb.mxu3 %v12026_v48 }
 0x1e0   : > { %14718 = vst [vmem:[#allocation35_spill] sm:$0xff] %v12200_v27  ;;  %8711 = vmatmul.msk.bf16.gmra.mxu0 %vm450_vm1, %v14720_v19  ;;  %v2444_v9 = vrot.slane %v2426_v53, 4  ;;  %v1967_v39 = vrot.slane %v1953_v43, 4  ;;  %4952 = vmatpush.bf16.msrb.mxu2 %v12073_v33 }
 0x1e1   : > { %14719 = vst [vmem:[#allocation36_spill] sm:$0xff] %v12202_v34  ;;  %8718 = vmatmul.msk.bf16.gmra.mxu1 %vm450_vm1, %v14720_v19  ;;  %v1949_v38 = vpop.permute.xlu0 %1948  ;;  %8725 = vmatmul.msk.bf16.gmra.mxu2 %vm450_vm1, %v14720_v19  ;;  %v8737_v34 = vld [vmem:[#allocation3 + $0x10] sm:$0xf0] }
 0x1e2   : > { %4916 = vmatpush.bf16.msrb.mxu1 %v11967_v20  ;;  %8732 = vmatmul.msk.bf16.gmra.mxu3 %vm450_vm1, %v14720_v19  ;;  %v1965_v59 = vrot.slane %v1949_v38, 4  ;;  %v2454_v63 = vsel %vm2212_vm3, %v2426_v53, %v2444_v9  ;;  %v1977_v16 = vsel %vm1891_vm2, %v1953_v43, %v1967_v39  ;;  %v12232_v19 = vld [vmem:[#allocation2 + $0x80] sm:$0xff] }
 0x1e3   : > { %2474 = vst [vmem:[#allocation3 + $0x15c] sm:$0xf] %v2454_v63  ;;  %4883 = vmatpush.bf16.msrb.mxu0 %v12033_v24  ;;  %4986 = vmatpush.bf16.msrb.mxu3 %v12099_v30 }
 0x1e4   : > { %v1975_v23 = vsel %vm1891_vm2, %v1949_v38, %v1965_v59  ;;  %v12228_v36 = vpop.f32.mrf.mxu2  ;;  %1997 = vst [vmem:[#allocation3 + $0xf4] sm:$0xf] %v1977_v16 }
 0x1e5   : > { %14721 = vst [vmem:[#allocation11_spill] sm:$0xff] %v12228_v36  ;;  %v12230_v11 = vpop.f32.mrf.mxu3  ;;  %2437 = vrot.lane.b32.xlu1 %v11757_v41, %s10698_s23  ;;  %2277 = vrot.lane.b32.xlu2 %v12232_v19, %s10698_s23  ;;  %v10153_v36 = vld [vmem:[#allocation3 + $0x14] sm:$0xf0] }
 0x1e6   : > { %4917 = vmatpush.bf16.msrb.mxu1 %v12038_v35  ;;  %14722 = vst [vmem:[#allocation37_spill] sm:$0xff] %v12230_v11  ;;  %v12238_v63 = vpop.f32.mrf.mxu0  ;;  %v12240_v59 = vpop.f32.mrf.mxu1  ;;  %2435 = vrot.lane.b32.xlu0 %v11737_v55, %s10698_s23  ;;  %v10152_v11 = vld [vmem:[#allocation3 + $0xc] sm:$0xf0] }
 0x1e7   : > { %1995 = vst [vmem:[#allocation3 + $0xd4] sm:$0xf] %v1975_v23  ;;  %v2270_v23 = vpop.permute.xlu1 %2269  ;;  %v2352_v9 = vpop.permute.xlu2 %2351  ;;  %4884 = vmatpush.bf16.msrb.mxu0 %v12104_v44 }
 0x1e8   : > { %14723 = vst [vmem:[#allocation38_spill] sm:$0xff] %v12238_v63  ;;  %v2286_v38 = vrot.slane %v2270_v23, 4  ;;  %v2367_v16 = vrot.slane %v2352_v9, 4 }
 0x1e9   : > { %14724 = vst [vmem:[#allocation39_spill] sm:$0xff] %v12240_v59  ;;  %v2348_v39 = vpop.permute.xlu0 %2347 }
 0x1ea   : > { %4918 = vmatpush.bf16.msrb.mxu1 %v12111_v31  ;;  %v2365_v41 = vrot.slane %v2348_v39, 4  ;;  %v2296_v43 = vsel %vm2212_vm3, %v2270_v23, %v2286_v38  ;;  %v2377_v53 = vsel %vm2212_vm3, %v2352_v9, %v2367_v16  ;;  %v8735_v38 = vld [vmem:[#allocation3] sm:$0xf] }
 0x1eb   : > { %2316 = vst [vmem:[#allocation3 + $0x174] sm:$0xf] %v2296_v43  ;;  %v8736_v16 = vor.u32 %v10152_v11, %v8735_v38 }
 0x1ec   : > { %v2375_v55 = vsel %vm2212_vm3, %v2348_v39, %v2365_v41  ;;  %v12255_v27 = vpop.f32.mrf.mxu2  ;;  %2397 = vst [vmem:[#allocation3 + $0x188] sm:$0xf] %v2377_v53  ;;  %v10150_v39 = vld [vmem:[#allocation3 + $0x4] sm:$0xf] }
 0x1ed   : > { %14725 = vst [vmem:[#allocation40_spill] sm:$0xff] %v12255_v27  ;;  %v12257_v2 = vpop.f32.mrf.mxu3  ;;  %2275 = vrot.lane.b32.xlu1 %v12259_v18, %s10698_s23  ;;  %2439 = vrot.lane.b32.xlu2 %v11801_v45, %s10698_s23  ;;  %v8740_v41 = vor.u32 %v10150_v39, %v8737_v34  ;;  %v12280_v34 = vld [vmem:[%s14579_s4 + $0xb8] sm:$0xff] }
 0x1ee   : > { %14726 = vst [vmem:[#allocation41_spill] sm:$0xff] %v12257_v2  ;;  %v12265_v9 = vpop.f32.mrf.mxu0  ;;  %v12267_v43 = vpop.f32.mrf.mxu1  ;;  %2196 = vrot.lane.b32.xlu0 %v12259_v18, %s10698_s23  ;;  %v8748_v2 = vor.u32 %v10151_v32, %v8745_v54  ;;  %v12286_v32 = vld [vmem:[%s14579_s4 + $0xf8] sm:$0xff] }
 0x1ef   : > { %2395 = vst [vmem:[#allocation3 + $0x168] sm:$0xf] %v2375_v55  ;;  %v8743_v55 = vld [vmem:[#allocation3 + $0x8] sm:$0xf]  ;;  %v2107_v59 = vpop.permute.xlu1 %2106  ;;  %v2033_v27 = vpop.permute.xlu2 %2032 }
 0x1f0   : > { %14727 = vst [vmem:[#allocation42_spill] sm:$0xff] %v12265_v9  ;;  %v8744_v23 = vor.u32 %v10153_v36, %v8743_v55  ;;  %4629 = vmatmul.bf16.vlgmr.msra.gmra.mxu0 %v8736_v16  ;;  %v2124_v53 = vrot.slane %v2107_v59, 4  ;;  %v2047_v42 = vrot.slane %v2033_v27, 4  ;;  %v12299_v54 = vld [vmem:[%s14579_s4 + $0x38] sm:$0xff]  ;;  %v12311_v16 = vld [vmem:[#allocation2 + $0xa0] sm:$0xff] }
 0x1f1   : > { %14728 = vst [vmem:[#allocation43_spill] sm:$0xff] %v12267_v43  ;;  %4663 = vmatmul.bf16.vlgmr.msra.gmra.mxu1 %v8740_v41  ;;  %v2029_v63 = vpop.permute.xlu0 %2028  ;;  %5181 = vmatpush.bf16.msra.mxu0 %v12299_v54  ;;  %v12319_v41 = vld [vmem:[%s14579_s4 + $0xb0] sm:$0xff]  ;;  %v12342_v43 = vld [vmem:[#allocation2 + $0x20] sm:$0xff] }
 0x1f2   : > { %4697 = vmatmul.bf16.vlgmr.msra.gmra.mxu2 %v8744_v23  ;;  %4731 = vmatmul.bf16.vlgmr.msra.gmra.mxu3 %v8748_v2  ;;  %v2045_v1 = vrot.slane %v2029_v63, 4  ;;  %v2134_v45 = vsel %vm1891_vm2, %v2107_v59, %v2124_v53  ;;  %v2057_v11 = vsel %vm1891_vm2, %v2033_v27, %v2047_v42  ;;  %v12293_v42 = vld [vmem:[%s14579_s4 + $0x78] sm:$0xff]  ;;  %14731 = vst [vmem:[#allocation46_spill] sm:$0xff] %v12319_v41  ;;  %v10156_v9 = vld [vmem:[#allocation3 + $0x2c] sm:$0xf0] }
 0x1f3   : > { %5249 = vmatpush.bf16.msra.mxu2 %v12280_v34  ;;  %5283 = vmatpush.bf16.msra.mxu3 %v12286_v32  ;;  %2154 = vst [vmem:[#allocation3 + $0xcc] sm:$0xf] %v2134_v45  ;;  %v12325_v45 = vld [vmem:[%s14579_s4 + $0xf0] sm:$0xff] }
 0x1f4   : > { %v2055_v36 = vsel %vm1891_vm2, %v2029_v63, %v2045_v1  ;;  %5215 = vmatpush.bf16.msra.mxu1 %v12293_v42  ;;  %v12302_v2 = vpop.f32.mrf.mxu2  ;;  %v2332_v1 = vld [vmem:[#allocation2 + $0xb0] sm:$0xff]  ;;  %2077 = vst [vmem:[#allocation3 + $0xf8] sm:$0xf] %v2057_v11 }
 0x1f5   : > { %14729 = vst [vmem:[#allocation44_spill] sm:$0xff] %v12302_v2  ;;  %v12304_v27 = vpop.f32.mrf.mxu3  ;;  %v2171_v63 = vld [vmem:[#allocation2 + $0x90] sm:$0xff]  ;;  %2361 = vrot.lane.b32.xlu1 %v2332_v1, %s10698_s23 }
 0x1f6   : > { %14730 = vst [vmem:[#allocation45_spill] sm:$0xff] %v12304_v27  ;;  %v1224_v38 = vpop.f32.mrf.mxu0  ;;  %v1267_v39 = vpop.f32.mrf.mxu1  ;;  %2200 = vrot.lane.b32.xlu2 %v2171_v63, %s10698_s23  ;;  %2359 = vrot.lane.b32.xlu0 %v12311_v16, %s10698_s23  ;;  %v12331_v11 = vld [vmem:[%s14579_s4 + $0x70] sm:$0xff] }
 0x1f7   : > { %2075 = vst [vmem:[#allocation3 + $0xd8] sm:$0xf] %v2055_v36  ;;  %5250 = vmatpush.bf16.msra.mxu2 %v12319_v41  ;;  %v1951_v55 = vpop.permute.xlu1 %1950  ;;  %v1876_v53 = vpop.permute.xlu2 %1875  ;;  %5284 = vmatpush.bf16.msra.mxu3 %v12325_v45  ;;  %v12337_v39 = vld [vmem:[%s14579_s4 + $0x30] sm:$0xff]  ;;  %v10157_v41 = vld [vmem:[#allocation3 + $0x34] sm:$0xf0] }
 0x1f8   : > { %14732 = vst [vmem:[#allocation47_spill] sm:$0xff] %v12325_v45  ;;  %5216 = vmatpush.bf16.msra.mxu1 %v12331_v11  ;;  %v1966_v36 = vrot.slane %v1951_v55, 4  ;;  %v1888_v38 = vrot.slane %v1876_v53, 4  ;;  %5182 = vmatpush.bf16.msra.mxu0 %v12337_v39 }
 0x1f9   : > { %14733 = vst [vmem:[#allocation48_spill] sm:$0xff] %v12331_v11  ;;  %v1872_v1 = vpop.permute.xlu0 %1871  ;;  %v8753_v11 = vld [vmem:[#allocation3 + $0x30] sm:$0xf0] }
 0x1fa   : > { %14734 = vst [vmem:[#allocation49_spill] sm:$0xff] %v12337_v39  ;;  %v1886_v23 = vrot.slane %v1872_v1, 4  ;;  %v1976_v59 = vsel %vm1891_vm2, %v1951_v55, %v1966_v36  ;;  %v1899_v27 = vsel %vm1891_vm2, %v1876_v53, %v1888_v38  ;;  %v8761_v55 = vld [vmem:[#allocation3 + $0x38] sm:$0xf0] }
 0x1fb   : > { %5251 = vmatpush.bf16.msra.mxu2 %v11773_v52  ;;  %1996 = vst [vmem:[#allocation3 + $0xe4] sm:$0xf] %v1976_v59  ;;  %5285 = vmatpush.bf16.msra.mxu3 %v11778_v29  ;;  %v8751_v52 = vld [vmem:[#allocation3 + $0x20] sm:$0xf]  ;;  %v10154_v59 = vld [vmem:[#allocation3 + $0x24] sm:$0xf] }
 0x1fc   : > { %v1897_v2 = vsel %vm1891_vm2, %v1872_v1, %v1886_v23  ;;  %5217 = vmatpush.bf16.msra.mxu1 %v11799_v14  ;;  %v1382_v45 = vpop.f32.mrf.mxu2  ;;  %5183 = vmatpush.bf16.msra.mxu0 %v11794_v15  ;;  %1919 = vst [vmem:[#allocation3 + $0x110] sm:$0xf] %v1899_v27  ;;  %v8752_v29 = vor.u32 %v10156_v9, %v8751_v52  ;;  %v8759_v23 = vld [vmem:[#allocation3 + $0x28] sm:$0xf]  ;;  %v1677_v27 = vld [vmem:[%s14578_s3 + $0x2] sm:$0x3] }
 0x1fd   : > { %v1425_v39 = vpop.f32.mrf.mxu3  ;;  %1917 = vst [vmem:[#allocation3 + $0xf0] sm:$0xf] %v1897_v2  ;;  %2198 = vrot.lane.b32.xlu1 %v12232_v19, %s10698_s23  ;;  %v8756_v14 = vor.u32 %v10154_v59, %v8753_v11  ;;  %v10155_v2 = vld [vmem:[#allocation3 + $0x2c] sm:$0xf]  ;;  %v8760_v15 = vor.u32 %v10157_v41, %v8759_v23  ;;  %v12362_v41 = vperm.slane %v1677_v27, 1  ;;  %v14736_v52 = vmax.f32 %v11832_v26, %v11866_v4 }
 0x1fe   : > { %v1462_v53 = vpop.f32.mrf.mxu0  ;;  %v1505_v36 = vpop.f32.mrf.mxu1  ;;  %2664 = vrot.lane.b32.xlu2 %v12342_v43, %s10699_s20  ;;  %2279 = vrot.lane.b32.xlu0 %v2171_v63, %s10698_s23  ;;  %v8764_v45 = vor.u32 %v10155_v2, %v8761_v55  ;;  %v12360_v63 = vperm.slane %v1677_v27, 0 }
 0x1ff   : > { %5252 = vmatpush.bf16.msra.mxu2 %v11819_v22  ;;  %v2350_v1 = vpop.permute.xlu1 %2349  ;;  %v2115_v19 = vpop.permute.xlu2 %2114  ;;  %5286 = vmatpush.bf16.msra.mxu3 %v11841_v37  ;;  %v14735_v37 = vmax.f32 %v11830_v50, %v11864_v3  ;;  %v1540_v59 = vmax.f32 %v14736_v52, %v1505_v36  ;;  %v12379_v50 = vld [vmem:[#allocation2 + $0x30] sm:$0xff] }
 0x200   : > { %5218 = vmatpush.bf16.msra.mxu1 %v11853_v56  ;;  %4634 = vmatmul.bf16.gmra.mxu0 %v8752_v29  ;;  %v2366_v9 = vrot.slane %v2350_v1, 4  ;;  %v2128_v38 = vrot.slane %v2115_v19, 4 }
 0x201   : > { %4668 = vmatmul.bf16.gmra.mxu1 %v8756_v14  ;;  %v2430_v11 = vpop.permute.xlu0 %2429  ;;  %5184 = vmatpush.bf16.msra.mxu0 %v11846_v17  ;;  %v1539_v56 = vmax.f32 %v14735_v37, %v1462_v53 }
 0x202   : > { %4702 = vmatmul.bf16.gmra.mxu2 %v8760_v15  ;;  %4736 = vmatmul.bf16.gmra.mxu3 %v8764_v45  ;;  %v2446_v22 = vrot.slane %v2430_v11, 4  ;;  %v2376_v39 = vsel %vm2212_vm3, %v2350_v1, %v2366_v9  ;;  %v2138_v55 = vsel %vm1891_vm2, %v2115_v19, %v2128_v38  ;;  %v14738_v19 = vmax.f32 %v11874_v7, %v11897_v13  ;;  %v8767_v13 = vld [vmem:[#allocation3 + $0x40] sm:$0xf] }
 0x203   : > { %5253 = vmatpush.bf16.msra.mxu2 %v11883_v0  ;;  %2396 = vst [vmem:[#allocation3 + $0x178] sm:$0xf] %v2376_v39  ;;  %5287 = vmatpush.bf16.msra.mxu3 %v11888_v60  ;;  %v8769_v39 = vld [vmem:[#allocation3 + $0x50] sm:$0xf0] }
 0x204   : > { %v2456_v29 = vsel %vm2212_vm3, %v2430_v11, %v2446_v22  ;;  %5219 = vmatpush.bf16.msra.mxu1 %v11919_v5  ;;  %v1574_v14 = vpop.f32.mrf.mxu2  ;;  %2158 = vst [vmem:[#allocation3 + $0x10c] sm:$0xf] %v2138_v55  ;;  %v10160_v11 = vld [vmem:[#allocation3 + $0x4c] sm:$0xf0]  ;;  %v8777_v55 = vld [vmem:[#allocation3 + $0x58] sm:$0xf0] }
 0x205   : > { %v1617_v23 = vpop.f32.mrf.mxu3  ;;  %2476 = vst [vmem:[#allocation3 + $0x17c] sm:$0xf] %v2456_v29  ;;  %v1651_v17 = vmax.f32 %v1539_v56, %v1574_v14  ;;  %2281 = vrot.lane.b32.xlu1 %v12311_v16, %s10698_s23  ;;  %5185 = vmatpush.bf16.msra.mxu0 %v11914_v46  ;;  %v14737_v46 = vmax.f32 %v11872_v61, %v11895_v28  ;;  %v10161_v61 = vld [vmem:[#allocation3 + $0x54] sm:$0xf0]  ;;  %v8775_v29 = vld [vmem:[#allocation3 + $0x48] sm:$0xf] }
 0x206   : > { %v1652_v0 = vmax.f32 %v1540_v59, %v1617_v23  ;;  %v1464_v2 = vpop.f32.mrf.mxu0  ;;  %v1507_v15 = vpop.f32.mrf.mxu1  ;;  %2746 = vrot.lane.b32.xlu2 %v12173_v25, %s10699_s20  ;;  %2666 = vrot.lane.b32.xlu0 %v12379_v50, %s10699_s20  ;;  %v10158_v59 = vld [vmem:[#allocation3 + $0x44] sm:$0xf]  ;;  %v8776_v23 = vor.u32 %v10161_v61, %v8775_v29  ;;  %v14744_v29 = vld [vmem:[#allocation10_spill] sm:$0xff] }
 0x207   : > { %v1683_v26 = vadd.f32 %v12360_v63, %v1651_v17  ;;  %v2031_v4 = vpop.permute.xlu1 %2030  ;;  %v1959_v60 = vpop.permute.xlu2 %1958  ;;  %5254 = vmatpush.bf16.msra.mxu2 %v11950_v10  ;;  %5288 = vmatpush.bf16.msra.mxu3 %v11955_v12  ;;  %v1541_v1 = vmax.f32 %v14737_v46, %v1464_v2  ;;  %v1542_v9 = vmax.f32 %v14738_v19, %v1507_v15  ;;  %v12398_v12 = vld [vmem:[#allocation2 + $0x10] sm:$0xff]  ;;  %v10159_v17 = vld [vmem:[#allocation3 + $0x4c] sm:$0xf] }
 0x208   : > { %v1684_v3 = vadd.f32 %v12362_v41, %v1652_v0  ;;  %v2046_v5 = vrot.slane %v2031_v4, 4  ;;  %v1970_v53 = vrot.slane %v1959_v60, 4  ;;  %5220 = vmatpush.bf16.msra.mxu1 %v11967_v20  ;;  %v8772_v14 = vor.u32 %v10158_v59, %v8769_v39  ;;  %v14743_v59 = vld [vmem:[#allocation8_spill] sm:$0xff] }
 0x209   : > { %v2111_v16 = vpop.permute.xlu0 %2110  ;;  %v1709_v36 = vmax.f32 %v1683_v26, 0.0  ;;  %5186 = vmatpush.bf16.msra.mxu0 %v11962_v40  ;;  %v8780_v2 = vor.u32 %v10159_v17, %v8777_v55  ;;  %v10164_v55 = vld [vmem:[#allocation3 + $0x6c] sm:$0xf0]  ;;  %v10162_v17 = vld [vmem:[#allocation3 + $0x64] sm:$0xf] }
 0x20a   : > { %v1710_v45 = vmax.f32 %v1684_v3, 0.0  ;;  %v2126_v27 = vrot.slane %v2111_v16, 4  ;;  %v2056_v10 = vsel %vm1891_vm2, %v2031_v4, %v2046_v5  ;;  %v1980_v22 = vsel %vm1891_vm2, %v1959_v60, %v1970_v53 }
 0x20b   : > { %2076 = vst [vmem:[#allocation3 + $0xe8] sm:$0xf] %v2056_v10  ;;  %5255 = vmatpush.bf16.msra.mxu2 %v12021_v21  ;;  %5289 = vmatpush.bf16.msra.mxu3 %v12026_v48  ;;  %v2483_v21 = vld [vmem:[#allocation2] sm:$0xff]  ;;  %v8768_v48 = vor.u32 %v10160_v11, %v8767_v13 }
 0x20c   : > { %v1735_v38 = vpack.c.bf16 %v1710_v45, %v1709_v36  ;;  %v2136_v20 = vsel %vm1891_vm2, %v2111_v16, %v2126_v27  ;;  %v1576_v7 = vpop.f32.mrf.mxu2  ;;  %5221 = vmatpush.bf16.msra.mxu1 %v12038_v35  ;;  %2000 = vst [vmem:[#allocation3 + $0x124] sm:$0xf] %v1980_v22  ;;  %v14740_v45 = vmax.f32 %v11905_v49, %v11933_v57 }
 0x20d   : > { %v1619_v28 = vpop.f32.mrf.mxu3  ;;  %2156 = vst [vmem:[#allocation3 + $0xec] sm:$0xf] %v2136_v20  ;;  %v1653_v40 = vmax.f32 %v1541_v1, %v1576_v7  ;;  %2744 = vrot.lane.b32.xlu1 %v12379_v50, %s10699_s20  ;;  %5187 = vmatpush.bf16.msra.mxu0 %v12033_v24 }
 0x20e   : > { %1748 = vst [vmem:[#allocation2 + $0x8] sm:$0xff] %v1735_v38  ;;  %v1654_v37 = vmax.f32 %v1542_v9, %v1619_v28  ;;  %v1467_v56 = vpop.f32.mrf.mxu0  ;;  %v1510_v52 = vpop.f32.mrf.mxu1  ;;  %2584 = vrot.lane.b32.xlu2 %v12398_v12, %s10699_s20  ;;  %2503 = vrot.lane.b32.xlu0 %v2483_v21, %s10699_s20  ;;  %v14745_v21 = vmax.f32 %v14743_v59, %v14744_v29 }
 0x20f   : > { %v1685_v35 = vadd.f32 %v12360_v63, %v1653_v40  ;;  %v1874_v15 = vpop.permute.xlu1 %1873  ;;  %v2039_v26 = vpop.permute.xlu2 %2038  ;;  %5256 = vmatpush.bf16.msra.mxu2 %v12073_v33  ;;  %5290 = vmatpush.bf16.msra.mxu3 %v12099_v30  ;;  %v14739_v33 = vmax.f32 %v11903_v51, %v11931_v58  ;;  %v1544_v27 = vmax.f32 %v14740_v45, %v1510_v52  ;;  %v12429_v51 = vld [vmem:[#allocation2 + $0xc0] sm:$0xff] }
 0x210   : > { %v1686_v0 = vadd.f32 %v12362_v41, %v1654_v37  ;;  %4639 = vmatmul.bf16.gmra.mxu0 %v8768_v48  ;;  %v1887_v3 = vrot.slane %v1874_v15, 4  ;;  %v2050_v60 = vrot.slane %v2039_v26, 4  ;;  %5222 = vmatpush.bf16.msra.mxu1 %v12111_v31  ;;  %v14741_v37 = vld [vmem:[#allocation9_spill] sm:$0xff] }
 0x211   : > { %4673 = vmatmul.bf16.gmra.mxu1 %v8772_v14  ;;  %v1955_v4 = vpop.permute.xlu0 %1954  ;;  %v1711_v5 = vmax.f32 %v1685_v35, 0.0  ;;  %5188 = vmatpush.bf16.msra.mxu0 %v12104_v44  ;;  %v1543_v30 = vmax.f32 %v14739_v33, %v1467_v56  ;;  %v14742_v56 = vmax.f32 %v11939_v62, %v14741_v37  ;;  %v8785_v35 = vld [vmem:[#allocation3 + $0x70] sm:$0xf0]  ;;  %v8791_v33 = vld [vmem:[#allocation3 + $0x68] sm:$0xf] }
 0x212   : > { %v1712_v16 = vmax.f32 %v1686_v0, 0.0  ;;  %4707 = vmatmul.bf16.gmra.mxu2 %v8776_v23  ;;  %4741 = vmatmul.bf16.gmra.mxu3 %v8780_v2  ;;  %v1968_v24 = vrot.slane %v1955_v4, 4  ;;  %v1898_v53 = vsel %vm1891_vm2, %v1874_v15, %v1887_v3  ;;  %v2060_v44 = vsel %vm1891_vm2, %v2039_v26, %v2050_v60  ;;  %v8783_v23 = vld [vmem:[#allocation3 + $0x60] sm:$0xf]  ;;  %v10165_v15 = vld [vmem:[#allocation3 + $0x74] sm:$0xf0] }
 0x213   : > { %1918 = vst [vmem:[#allocation3 + $0x100] sm:$0xf] %v1898_v53  ;;  %v8793_v26 = vld [vmem:[#allocation3 + $0x78] sm:$0xf0]  ;;  %v8784_v53 = vor.u32 %v10164_v55, %v8783_v23 }
 0x214   : > { %v1736_v36 = vpack.c.bf16 %v1712_v16, %v1711_v5  ;;  %v1978_v46 = vsel %vm1891_vm2, %v1955_v4, %v1968_v24  ;;  %v1579_v19 = vpop.f32.mrf.mxu2  ;;  %2080 = vst [vmem:[#allocation3 + $0x128] sm:$0xf] %v2060_v44 }
 0x215   : > { %v3844_v1 = vld [vmem:[#allocation2 + $0x8] sm:$0xf]  ;;  %v1622_v9 = vpop.f32.mrf.mxu3  ;;  %1998 = vst [vmem:[#allocation3 + $0x104] sm:$0xf] %v1978_v46  ;;  %v1655_v31 = vmax.f32 %v1543_v30, %v1579_v19  ;;  %2505 = vrot.lane.b32.xlu1 %v12398_v12, %s10699_s20  ;;  %v10163_v30 = vld [vmem:[#allocation3 + $0x6c] sm:$0xf]  ;;  %v8792_v46 = vor.u32 %v10165_v15, %v8791_v33 }
 0x216   : > { %3854 = vst [vmem:[#allocation3 + $0x500] sm:$0xf] %v3844_v1  ;;  %v1656_v10 = vmax.f32 %v1544_v27, %v1622_v9  ;;  %v1469_v11 = vpop.f32.mrf.mxu0  ;;  %v1512_v38 = vpop.f32.mrf.mxu1  ;;  %2670 = vrot.lane.b32.xlu2 %v12161_v47, %s10699_s20  ;;  %2441 = vrot.lane.b32.xlu0 %v12429_v51, %s10698_s23  ;;  %v8796_v1 = vor.u32 %v10163_v30, %v8793_v26 }
 0x217   : > { %1749 = vst [vmem:[#allocation2 + $0x18] sm:$0xff] %v1736_v36  ;;  %v1687_v49 = vadd.f32 %v12360_v63, %v1655_v31  ;;  %v2113_v57 = vpop.permute.xlu1 %2112  ;;  %v2121_v20 = vpop.permute.xlu2 %2120  ;;  %v1545_v52 = vmax.f32 %v14742_v56, %v1469_v11  ;;  %v1546_v48 = vmax.f32 %v14745_v21, %v1512_v38  ;;  %v8788_v36 = vor.u32 %v10162_v17, %v8785_v35 }
 0x218   : > { %v1688_v58 = vadd.f32 %v12362_v41, %v1656_v10  ;;  %v2127_v22 = vrot.slane %v2113_v57, 4  ;;  %v2131_v28 = vrot.slane %v2121_v20, 4 }
 0x219   : > { %v2035_v39 = vpop.permute.xlu0 %2034  ;;  %v1713_v61 = vmax.f32 %v1687_v49, 0.0 }
 0x21a   : > { %v1714_v12 = vmax.f32 %v1688_v58, 0.0  ;;  %v2048_v7 = vrot.slane %v2035_v39, 4  ;;  %v2137_v13 = vsel %vm1891_vm2, %v2113_v57, %v2127_v22  ;;  %v2141_v24 = vsel %vm1891_vm2, %v2121_v20, %v2131_v28  ;;  %v14746_v57 = vld [vmem:[#allocation13_spill] sm:$0xff]  ;;  %v14747_v20 = vld [vmem:[#allocation14_spill] sm:$0xff] }
 0x21b   : > { %2157 = vst [vmem:[#allocation3 + $0xfc] sm:$0xf] %v2137_v13  ;;  %v14748_v22 = vmax.f32 %v14746_v57, %v14747_v20 }
 0x21c   : > { %v1737_v40 = vpack.c.bf16 %v1714_v12, %v1713_v61  ;;  %v2058_v14 = vsel %vm1891_vm2, %v2035_v39, %v2048_v7  ;;  %v1581_v0 = vpop.f32.mrf.mxu2  ;;  %2161 = vst [vmem:[#allocation3 + $0x13c] sm:$0xf] %v2141_v24  ;;  %v14749_v61 = vld [vmem:[#allocation12_spill] sm:$0xff]  ;;  %v14750_v12 = vld [vmem:[#allocation15_spill] sm:$0xff]  ;;  %v14755_v24 = vld [vmem:[#allocation18_spill] sm:$0xff] }
 0x21d   : > { %v1624_v2 = vpop.f32.mrf.mxu3  ;;  %2078 = vst [vmem:[#allocation3 + $0x108] sm:$0xf] %v2058_v14  ;;  %v1657_v62 = vmax.f32 %v1545_v52, %v1581_v0  ;;  %2668 = vrot.lane.b32.xlu1 %v12173_v25, %s10699_s20  ;;  %v14751_v7 = vmax.f32 %v14749_v61, %v14750_v12 }
 0x21e   : > { %v3845_v3 = vld [vmem:[#allocation2 + $0x18] sm:$0xf]  ;;  %1750 = vst [vmem:[#allocation2 + $0x28] sm:$0xff] %v1737_v40  ;;  %v1658_v60 = vmax.f32 %v1546_v48, %v1624_v2  ;;  %v1472_v5 = vpop.f32.mrf.mxu0  ;;  %v1515_v16 = vpop.f32.mrf.mxu1  ;;  %2507 = vrot.lane.b32.xlu2 %v12342_v43, %s10699_s20  ;;  %2586 = vrot.lane.b32.xlu0 %v12342_v43, %s10699_s20 }
 0x21f   : > { %v3864_v4 = vld [vmem:[#allocation2 + $0x18] sm:$0xf]  ;;  %3855 = vst [vmem:[#allocation3 + $0x510] sm:$0xf] %v3845_v3  ;;  %v1689_v45 = vadd.f32 %v12360_v63, %v1657_v62  ;;  %v1957_v19 = vpop.permute.xlu1 %1956  ;;  %v2434_v9 = vpop.permute.xlu2 %2433  ;;  %v1547_v39 = vmax.f32 %v14748_v22, %v1472_v5  ;;  %v1548_v28 = vmax.f32 %v14751_v7, %v1515_v16  ;;  %v14754_v16 = vld [vmem:[#allocation17_spill] sm:$0xff] }
 0x220   : > { %3874 = vst [vmem:[#allocation3 + $0x504] sm:$0xf] %v3864_v4  ;;  %v1690_v27 = vadd.f32 %v12362_v41, %v1658_v60  ;;  %4644 = vmatmul.bf16.gmra.mxu0 %v8784_v53  ;;  %v1969_v44 = vrot.slane %v1957_v19, 4  ;;  %v2448_v43 = vrot.slane %v2434_v9, 4  ;;  %v10168_v60 = vld [vmem:[#allocation3 + $0x8c] sm:$0xf0]  ;;  %v14756_v53 = vmax.f32 %v14754_v16, %v14755_v24 }
 0x221   : > { %4678 = vmatmul.bf16.gmra.mxu1 %v8788_v36  ;;  %v1878_v31 = vpop.permute.xlu0 %1877  ;;  %v1715_v10 = vmax.f32 %v1689_v45, 0.0  ;;  %v8799_v45 = vld [vmem:[#allocation3 + $0x80] sm:$0xf] }
 0x222   : > { %v1716_v11 = vmax.f32 %v1690_v27, 0.0  ;;  %4712 = vmatmul.bf16.gmra.mxu2 %v8792_v46  ;;  %4746 = vmatmul.bf16.gmra.mxu3 %v8796_v1  ;;  %v1889_v38 = vrot.slane %v1878_v31, 4  ;;  %v1979_v49 = vsel %vm1891_vm2, %v1957_v19, %v1969_v44  ;;  %v2458_v48 = vsel %vm2212_vm3, %v2434_v9, %v2448_v43  ;;  %v10166_v27 = vld [vmem:[#allocation3 + $0x84] sm:$0xf]  ;;  %v8801_v46 = vld [vmem:[#allocation3 + $0x90] sm:$0xf0] }
 0x223   : > { %1999 = vst [vmem:[#allocation3 + $0x114] sm:$0xf] %v1979_v49  ;;  %v8809_v9 = vld [vmem:[#allocation3 + $0x98] sm:$0xf0]  ;;  %v10167_v43 = vld [vmem:[#allocation3 + $0x8c] sm:$0xf]  ;;  %v8800_v57 = vor.u32 %v10168_v60, %v8799_v45  ;;  %v8804_v20 = vor.u32 %v10166_v27, %v8801_v46 }
 0x224   : > { %v1738_v58 = vpack.c.bf16 %v1716_v11, %v1715_v10  ;;  %v1900_v13 = vsel %vm1891_vm2, %v1878_v31, %v1889_v38  ;;  %v1584_v37 = vpop.f32.mrf.mxu2  ;;  %2478 = vst [vmem:[#allocation3 + $0x19c] sm:$0xf] %v2458_v48  ;;  %v8807_v38 = vld [vmem:[#allocation3 + $0x88] sm:$0xf]  ;;  %v8812_v12 = vor.u32 %v10167_v43, %v8809_v9 }
 0x225   : > { %v3865_v55 = vld [vmem:[#allocation2 + $0x28] sm:$0xf]  ;;  %v1627_v56 = vpop.f32.mrf.mxu3  ;;  %1920 = vst [vmem:[#allocation3 + $0x120] sm:$0xf] %v1900_v13  ;;  %v1659_v52 = vmax.f32 %v1547_v39, %v1584_v37  ;;  %2750 = vrot.lane.b32.xlu1 %v12193_v8, %s10699_s20  ;;  %v14766_v43 = vld [vmem:[#allocation24_spill] sm:$0xff] }
 0x226   : > { %v3884_v40 = vld [vmem:[#allocation2 + $0x28] sm:$0xf]  ;;  %3875 = vst [vmem:[#allocation3 + $0x514] sm:$0xf] %v3865_v55  ;;  %v1660_v59 = vmax.f32 %v1548_v28, %v1627_v56  ;;  %v1474_v29 = vpop.f32.mrf.mxu0  ;;  %v1517_v21 = vpop.f32.mrf.mxu1  ;;  %2590 = vrot.lane.b32.xlu2 %v12173_v25, %s10699_s20  ;;  %2748 = vrot.lane.b32.xlu0 %v12161_v47, %s10699_s20  ;;  %v14752_v25 = vld [vmem:[#allocation16_spill] sm:$0xff] }
 0x227   : > { %3894 = vst [vmem:[#allocation3 + $0x508] sm:$0xf] %v3884_v40  ;;  %v1691_v14 = vadd.f32 %v12360_v63, %v1659_v52  ;;  %v2037_v17 = vpop.permute.xlu1 %2036  ;;  %v2272_v35 = vpop.permute.xlu2 %2271  ;;  %v14753_v4 = vmax.f32 %v12010_v6, %v14752_v25  ;;  %v1550_v36 = vmax.f32 %v14756_v53, %v1517_v21  ;;  %v10169_v6 = vld [vmem:[#allocation3 + $0x94] sm:$0xf0]  ;;  %v14758_v21 = vld [vmem:[#allocation21_spill] sm:$0xff]  ;;  %v12497_v25 = vld [vmem:[#allocation2 + $0x50] sm:$0xff] }
 0x228   : > { %1751 = vst [vmem:[#allocation2 + $0x38] sm:$0xff] %v1738_v58  ;;  %v1692_v23 = vadd.f32 %v12362_v41, %v1660_v59  ;;  %v2049_v0 = vrot.slane %v2037_v17, 4  ;;  %v2287_v15 = vrot.slane %v2272_v35, 4  ;;  %v8808_v61 = vor.u32 %v10169_v6, %v8807_v38 }
 0x229   : > { %v2117_v2 = vpop.permute.xlu0 %2116  ;;  %v1717_v26 = vmax.f32 %v1691_v14, 0.0  ;;  %v1549_v62 = vmax.f32 %v14753_v4, %v1474_v29  ;;  %v14757_v29 = vld [vmem:[#allocation19_spill] sm:$0xff] }
 0x22a   : > { %v1718_v8 = vmax.f32 %v1692_v23, 0.0  ;;  %v2129_v3 = vrot.slane %v2117_v2, 4  ;;  %v2059_v47 = vsel %vm1891_vm2, %v2037_v17, %v2049_v0  ;;  %v2297_v30 = vsel %vm2212_vm3, %v2272_v35, %v2287_v15  ;;  %v14760_v23 = vld [vmem:[#allocation20_spill] sm:$0xff]  ;;  %v14761_v17 = vld [vmem:[#allocation22_spill] sm:$0xff] }
 0x22b   : > { %2079 = vst [vmem:[#allocation3 + $0x118] sm:$0xf] %v2059_v47  ;;  %v14759_v48 = vmax.f32 %v14757_v29, %v14758_v21  ;;  %v14762_v35 = vmax.f32 %v14760_v23, %v14761_v17  ;;  %v8951_v21 = vld [vmem:[#allocation3 + $0xa8] sm:$0xf] }
 0x22c   : > { %v1739_v5 = vpack.c.bf16 %v1718_v8, %v1717_v26  ;;  %v2139_v33 = vsel %vm1891_vm2, %v2117_v2, %v2129_v3  ;;  %v1586_v1 = vpop.f32.mrf.mxu2  ;;  %2317 = vst [vmem:[#allocation3 + $0x184] sm:$0xf] %v2297_v30 }
 0x22d   : > { %v1629_v19 = vpop.f32.mrf.mxu3  ;;  %2159 = vst [vmem:[#allocation3 + $0x11c] sm:$0xf] %v2139_v33  ;;  %v1661_v44 = vmax.f32 %v1549_v62, %v1586_v1  ;;  %2588 = vrot.lane.b32.xlu1 %v12379_v50, %s10699_s20  ;;  %v14763_v1 = vld [vmem:[#allocation23_spill] sm:$0xff] }
 0x22e   : > { %1752 = vst [vmem:[#allocation2 + $0x48] sm:$0xff] %v1739_v5  ;;  %v1662_v31 = vmax.f32 %v1550_v36, %v1629_v19  ;;  %v1477_v10 = vpop.f32.mrf.mxu0  ;;  %v1520_v11 = vpop.f32.mrf.mxu1  ;;  %2752 = vrot.lane.b32.xlu2 %v12259_v18, %s10699_s20  ;;  %2509 = vrot.lane.b32.xlu0 %v12379_v50, %s10699_s20  ;;  %v12501_v5 = vld [vmem:[#allocation2 + $0x60] sm:$0xff] }
 0x22f   : > { %v3885_v49 = vld [vmem:[#allocation2 + $0x38] sm:$0xf]  ;;  %v1693_v22 = vadd.f32 %v12360_v63, %v1661_v44  ;;  %v1880_v7 = vpop.permute.xlu1 %1879  ;;  %v2358_v28 = vpop.permute.xlu2 %2357  ;;  %v1551_v14 = vmax.f32 %v14759_v48, %v1477_v10  ;;  %v1552_v0 = vmax.f32 %v14762_v35, %v1520_v11  ;;  %v14764_v19 = vld [vmem:[#allocation25_spill] sm:$0xff] }
 0x230   : > { %v3904_v58 = vld [vmem:[#allocation2 + $0x38] sm:$0xf]  ;;  %3895 = vst [vmem:[#allocation3 + $0x518] sm:$0xf] %v3885_v49  ;;  %v1694_v39 = vadd.f32 %v12362_v41, %v1662_v31  ;;  %4649 = vmatmul.bf16.gmra.mxu0 %v8800_v57  ;;  %v1890_v13 = vrot.slane %v1880_v7, 4  ;;  %v2370_v40 = vrot.slane %v2358_v28, 4  ;;  %v14765_v6 = vmax.f32 %v14763_v1, %v14764_v19 }
 0x231   : > { %3914 = vst [vmem:[#allocation3 + $0x50c] sm:$0xf] %v3904_v58  ;;  %4683 = vmatmul.bf16.gmra.mxu1 %v8804_v20  ;;  %v1961_v55 = vpop.permute.xlu0 %1960  ;;  %v1719_v37 = vmax.f32 %v1693_v22, 0.0  ;;  %v10172_v31 = vld [vmem:[#allocation3 + $0xac] sm:$0xf0]  ;;  %v14767_v49 = vld [vmem:[#allocation26_spill] sm:$0xff] }
 0x232   : > { %v1720_v56 = vmax.f32 %v1694_v39, 0.0  ;;  %4717 = vmatmul.bf16.gmra.mxu2 %v8808_v61  ;;  %4751 = vmatmul.bf16.gmra.mxu3 %v8812_v12  ;;  %v1971_v50 = vrot.slane %v1961_v55, 4  ;;  %v1901_v52 = vsel %vm1891_vm2, %v1880_v7, %v1890_v13  ;;  %v2380_v3 = vsel %vm2212_vm3, %v2358_v28, %v2370_v40  ;;  %v2487_v10 = vld [vmem:[#allocation2 + $0x40] sm:$0xff]  ;;  %v10173_v61 = vld [vmem:[#allocation3 + $0xb4] sm:$0xf0] }
 0x233   : > { %1921 = vst [vmem:[#allocation3 + $0x130] sm:$0xf] %v1901_v52  ;;  %v12513_v11 = vld [vmem:[#allocation2 + $0x80] sm:$0xff]  ;;  %v14768_v58 = vmax.f32 %v14766_v43, %v14767_v49  ;;  %v8953_v28 = vld [vmem:[#allocation3 + $0xb8] sm:$0xf0]  ;;  %v8952_v17 = vor.u32 %v10173_v61, %v8951_v21  ;;  %v12561_v21 = vld [vmem:[#allocation2 + $0x90] sm:$0xff] }
 0x234   : > { %v1740_v59 = vpack.c.bf16 %v1720_v56, %v1719_v37  ;;  %v1981_v2 = vsel %vm1891_vm2, %v1961_v55, %v1971_v50  ;;  %v1589_v26 = vpop.f32.mrf.mxu2  ;;  %2400 = vst [vmem:[#allocation3 + $0x1b8] sm:$0xf] %v2380_v3  ;;  %v8945_v39 = vld [vmem:[#allocation3 + $0xb0] sm:$0xf0]  ;;  %v3846_v13 = vld [vmem:[#allocation2 + $0x28] sm:$0xf] }
 0x235   : > { %v3905_v15 = vld [vmem:[#allocation2 + $0x48] sm:$0xf]  ;;  %v1632_v8 = vpop.f32.mrf.mxu3  ;;  %2001 = vst [vmem:[#allocation3 + $0x134] sm:$0xf] %v1981_v2  ;;  %v1663_v4 = vmax.f32 %v1551_v14, %v1589_v26  ;;  %2674 = vrot.lane.b32.xlu1 %v12259_v18, %s10699_s20  ;;  %v8943_v50 = vld [vmem:[#allocation3 + $0xa0] sm:$0xf] }
 0x236   : > { %3915 = vst [vmem:[#allocation3 + $0x51c] sm:$0xf] %v3905_v15  ;;  %v1664_v62 = vmax.f32 %v1552_v0, %v1632_v8  ;;  %v1479_v47 = vpop.f32.mrf.mxu0  ;;  %v1522_v60 = vpop.f32.mrf.mxu1  ;;  %2513 = vrot.lane.b32.xlu2 %v12497_v25, %s10699_s20  ;;  %2672 = vrot.lane.b32.xlu0 %v12501_v5, %s10699_s20  ;;  %v10170_v52 = vld [vmem:[#allocation3 + $0xa4] sm:$0xf]  ;;  %v10171_v48 = vld [vmem:[#allocation3 + $0xac] sm:$0xf] }
 0x237   : > { %1753 = vst [vmem:[#allocation2 + $0x58] sm:$0xff] %v1740_v59  ;;  %v1695_v16 = vadd.f32 %v12360_v63, %v1663_v4  ;;  %v2119_v53 = vpop.permute.xlu1 %2118  ;;  %v2195_v36 = vpop.permute.xlu2 %2194  ;;  %v1553_v9 = vmax.f32 %v14765_v6, %v1479_v47  ;;  %v1554_v57 = vmax.f32 %v14768_v58, %v1522_v60  ;;  %v8944_v59 = vor.u32 %v10172_v31, %v8943_v50  ;;  %v14769_v47 = vld [vmem:[#allocation27_spill] sm:$0xff]  ;;  %v14770_v60 = vld [vmem:[#allocation29_spill] sm:$0xff]  ;;  %v14777_v58 = vld [vmem:[#allocation48_spill] sm:$0xff] }
 0x238   : > { %v1696_v24 = vadd.f32 %v12362_v41, %v1664_v62  ;;  %v2130_v33 = vrot.slane %v2119_v53, 4  ;;  %v2208_v45 = vrot.slane %v2195_v36, 4  ;;  %v8948_v29 = vor.u32 %v10170_v52, %v8945_v39  ;;  %3856 = vst [vmem:[#allocation3 + $0x520] sm:$0xf] %v3846_v13  ;;  %v12540_v6 = vld [vmem:[#allocation2 + $0xa0] sm:$0xff]  ;;  %v14776_v49 = vld [vmem:[#allocation47_spill] sm:$0xff] }
 0x239   : > { %v2041_v30 = vpop.permute.xlu0 %2040  ;;  %v1721_v18 = vmax.f32 %v1695_v16, 0.0  ;;  %v8956_v35 = vor.u32 %v10171_v48, %v8953_v28  ;;  %v14771_v16 = vmax.f32 %v14769_v47, %v14770_v60  ;;  %v14778_v61 = vld [vmem:[#allocation49_spill] sm:$0xff]  ;;  %v14779_v28 = vld [vmem:[#allocation31_spill] sm:$0xff]  ;;  %v3867_v60 = vld [vmem:[#allocation2 + $0x48] sm:$0xf] }
 0x23a   : > { %v1722_v27 = vmax.f32 %v1696_v24, 0.0  ;;  %v2051_v46 = vrot.slane %v2041_v30, 4  ;;  %v2140_v44 = vsel %vm1891_vm2, %v2119_v53, %v2130_v33  ;;  %v2219_v22 = vsel %vm2212_vm3, %v2195_v36, %v2208_v45  ;;  %v14772_v53 = vld [vmem:[#allocation28_spill] sm:$0xff]  ;;  %v14773_v36 = vld [vmem:[#allocation30_spill] sm:$0xff]  ;;  %v14780_v13 = vld [vmem:[#allocation33_spill] sm:$0xff] }
 0x23b   : > { %2160 = vst [vmem:[#allocation3 + $0x12c] sm:$0xf] %v2140_v44  ;;  %v14774_v33 = vmax.f32 %v14772_v53, %v14773_v36  ;;  %v12563_v48 = vld [vmem:[#allocation2 + $0x70] sm:$0xff]  ;;  %v12588_v47 = vld [vmem:[%s14579_s4 + $0x28] sm:$0xff] }
 0x23c   : > { %v1741_v38 = vpack.c.bf16 %v1722_v27, %v1721_v18  ;;  %v2061_v20 = vsel %vm1891_vm2, %v2041_v30, %v2051_v46  ;;  %v1591_v12 = vpop.f32.mrf.mxu2  ;;  %2239 = vst [vmem:[#allocation3 + $0x1a0] sm:$0xf] %v2219_v22 }
 0x23d   : > { %v1634_v7 = vpop.f32.mrf.mxu3  ;;  %2081 = vst [vmem:[#allocation3 + $0x138] sm:$0xf] %v2061_v20  ;;  %v1665_v55 = vmax.f32 %v1553_v9, %v1591_v12  ;;  %2511 = vrot.lane.b32.xlu1 %v2487_v10, %s10699_s20  ;;  %v3847_v9 = vld [vmem:[#allocation2 + $0x38] sm:$0xf] }
 0x23e   : > { %1754 = vst [vmem:[#allocation2 + $0x68] sm:$0xff] %v1741_v38  ;;  %v1666_v40 = vmax.f32 %v1554_v57, %v1634_v7  ;;  %v1482_v37 = vpop.f32.mrf.mxu0  ;;  %v1525_v56 = vpop.f32.mrf.mxu1  ;;  %2676 = vrot.lane.b32.xlu2 %v12513_v11, %s10699_s20  ;;  %2754 = vrot.lane.b32.xlu0 %v12513_v11, %s10699_s20  ;;  %v3866_v57 = vld [vmem:[#allocation2 + $0x38] sm:$0xf] }
 0x23f   : > { %v1697_v14 = vadd.f32 %v12360_v63, %v1665_v55  ;;  %v2432_v0 = vpop.permute.xlu1 %2431  ;;  %v2278_v2 = vpop.permute.xlu2 %2277  ;;  %v1555_v24 = vmax.f32 %v14771_v16, %v1482_v37  ;;  %v1556_v30 = vmax.f32 %v14774_v33, %v1525_v56  ;;  %3857 = vst [vmem:[#allocation3 + $0x530] sm:$0xf] %v3847_v9  ;;  %v14781_v55 = vmax.f32 %v14779_v28, %v14780_v13  ;;  %v14782_v37 = vld [vmem:[#allocation32_spill] sm:$0xff]  ;;  %v14783_v56 = vld [vmem:[#allocation34_spill] sm:$0xff]  ;;  %v8959_v33 = vld [vmem:[#allocation3 + $0xc0] sm:$0xf] }
 0x240   : > { %v1698_v23 = vadd.f32 %v12362_v41, %v1666_v40  ;;  %4885 = vmatmul.bf16.vlgmr.msrb.gmra.mxu0 %v8944_v59  ;;  %v2447_v15 = vrot.slane %v2432_v0, 4  ;;  %v2290_v8 = vrot.slane %v2278_v2, 4  ;;  %v14784_v50 = vmax.f32 %v14782_v37, %v14783_v56  ;;  %3876 = vst [vmem:[#allocation3 + $0x524] sm:$0xf] %v3866_v57 }
 0x241   : > { %4919 = vmatmul.bf16.vlgmr.msrb.gmra.mxu1 %v8948_v29  ;;  %v2354_v26 = vpop.permute.xlu0 %2353  ;;  %v1723_v3 = vmax.f32 %v1697_v14, 0.0  ;;  %5437 = vmatpush.bf16.msrb.mxu0 %v12299_v54  ;;  %v10176_v29 = vld [vmem:[#allocation3 + $0xcc] sm:$0xf0]  ;;  %v12568_v14 = vld [vmem:[%s14579_s4 + $0xa8] sm:$0xff]  ;;  %3877 = vst [vmem:[#allocation3 + $0x534] sm:$0xf] %v3867_v60 }
 0x242   : > { %v1724_v4 = vmax.f32 %v1698_v23, 0.0  ;;  %4953 = vmatmul.bf16.vlgmr.msrb.gmra.mxu2 %v8952_v17  ;;  %4987 = vmatmul.bf16.vlgmr.msrb.gmra.mxu3 %v8956_v35  ;;  %v2368_v62 = vrot.slane %v2354_v26, 4  ;;  %v2457_v45 = vsel %vm2212_vm3, %v2432_v0, %v2447_v15  ;;  %v2300_v46 = vsel %vm2212_vm3, %v2278_v2, %v2290_v8  ;;  %v10174_v0 = vld [vmem:[#allocation3 + $0xc4] sm:$0xf]  ;;  %v8961_v2 = vld [vmem:[#allocation3 + $0xd0] sm:$0xf0] }
 0x243   : > { %5505 = vmatpush.bf16.msrb.mxu2 %v12280_v34  ;;  %5539 = vmatpush.bf16.msrb.mxu3 %v12286_v32  ;;  %2477 = vst [vmem:[#allocation3 + $0x18c] sm:$0xf] %v2457_v45  ;;  %v10175_v15 = vld [vmem:[#allocation3 + $0xcc] sm:$0xf]  ;;  %v12582_v8 = vld [vmem:[%s14579_s4 + $0x68] sm:$0xff]  ;;  %v8960_v45 = vor.u32 %v10176_v29, %v8959_v33 }
 0x244   : > { %v1742_v18 = vpack.c.bf16 %v1724_v4, %v1723_v3  ;;  %v2378_v27 = vsel %vm2212_vm3, %v2354_v26, %v2368_v62  ;;  %5471 = vmatpush.bf16.msrb.mxu1 %v12293_v42  ;;  %v1594_v1 = vpop.f32.mrf.mxu2  ;;  %2320 = vst [vmem:[#allocation3 + $0x1b4] sm:$0xf] %v2300_v46  ;;  %v14775_v42 = vld [vmem:[#allocation46_spill] sm:$0xff] }
 0x245   : > { %v1637_v19 = vpop.f32.mrf.mxu3  ;;  %2398 = vst [vmem:[#allocation3 + $0x198] sm:$0xf] %v2378_v27  ;;  %v1667_v34 = vmax.f32 %v1555_v24, %v1594_v1  ;;  %2594 = vrot.lane.b32.xlu1 %v12501_v5, %s10699_s20  ;;  %5438 = vmatpush.bf16.msrb.mxu0 %v14778_v61  ;;  %v12576_v26 = vld [vmem:[%s14579_s4 + $0xe8] sm:$0xff]  ;;  %v8967_v27 = vld [vmem:[#allocation3 + $0xc8] sm:$0xf]  ;;  %v12600_v1 = vld [vmem:[%s14579_s4 + $0xa0] sm:$0xff] }
 0x246   : > { %1755 = vst [vmem:[#allocation2 + $0x78] sm:$0xff] %v1742_v18  ;;  %v1668_v44 = vmax.f32 %v1556_v30, %v1637_v19  ;;  %v1484_v32 = vpop.f32.mrf.mxu0  ;;  %v1527_v31 = vpop.f32.mrf.mxu1  ;;  %2758 = vrot.lane.b32.xlu2 %v12540_v6, %s10699_s20  ;;  %2592 = vrot.lane.b32.xlu0 %v12497_v25, %s10699_s20  ;;  %v10177_v62 = vld [vmem:[#allocation3 + $0xd4] sm:$0xf0]  ;;  %v8969_v30 = vld [vmem:[#allocation3 + $0xd8] sm:$0xf0]  ;;  %v8964_v18 = vor.u32 %v10174_v0, %v8961_v2 }
 0x247   : > { %5506 = vmatpush.bf16.msrb.mxu2 %v14775_v42  ;;  %v1699_v54 = vadd.f32 %v12360_v63, %v1667_v34  ;;  %v2193_v38 = vpop.permute.xlu1 %2192  ;;  %v2440_v43 = vpop.permute.xlu2 %2439  ;;  %5540 = vmatpush.bf16.msrb.mxu3 %v14776_v49  ;;  %v1557_v40 = vmax.f32 %v14781_v55, %v1484_v32  ;;  %v1558_v52 = vmax.f32 %v14784_v50, %v1527_v31  ;;  %v12608_v31 = vld [vmem:[%s14579_s4 + $0xe0] sm:$0xff] }
 0x248   : > { %v1700_v10 = vadd.f32 %v12362_v41, %v1668_v44  ;;  %5472 = vmatpush.bf16.msrb.mxu1 %v14777_v58  ;;  %v2207_v20 = vrot.slane %v2193_v38, 4  ;;  %v2451_v39 = vrot.slane %v2440_v43, 4  ;;  %v8972_v46 = vor.u32 %v10175_v15, %v8969_v30  ;;  %v12614_v42 = vld [vmem:[%s14579_s4 + $0x60] sm:$0xff] }
 0x249   : > { %v2191_v22 = vpop.permute.xlu0 %2190  ;;  %v1725_v25 = vmax.f32 %v1699_v54, 0.0  ;;  %5439 = vmatpush.bf16.msrb.mxu0 %v12588_v47  ;;  %v8968_v34 = vor.u32 %v10177_v62, %v8967_v27  ;;  %v3886_v54 = vld [vmem:[#allocation2 + $0x48] sm:$0xf]  ;;  %v12627_v55 = vld [vmem:[%s14579_s4 + $0x20] sm:$0xff] }
 0x24a   : > { %v1726_v12 = vmax.f32 %v1700_v10, 0.0  ;;  %v2206_v7 = vrot.slane %v2191_v22, 4  ;;  %v2218_v59 = vsel %vm2212_vm3, %v2193_v38, %v2207_v20  ;;  %v2461_v35 = vsel %vm2212_vm3, %v2440_v43, %v2451_v39  ;;  %v14785_v20 = vld [vmem:[#allocation35_spill] sm:$0xff]  ;;  %3896 = vst [vmem:[#allocation3 + $0x528] sm:$0xf] %v3886_v54  ;;  %v14795_v54 = vld [vmem:[#allocation41_spill] sm:$0xff] }
 0x24b   : > { %5507 = vmatpush.bf16.msrb.mxu2 %v12568_v14  ;;  %2238 = vst [vmem:[#allocation3 + $0x190] sm:$0xf] %v2218_v59  ;;  %5541 = vmatpush.bf16.msrb.mxu3 %v12576_v26  ;;  %v12647_v59 = vld [vmem:[%s14579_s4 + $0x58] sm:$0xff] }
 0x24c   : > { %v1743_v23 = vpack.c.bf16 %v1726_v12, %v1725_v25  ;;  %v2217_v17 = vsel %vm2212_vm3, %v2191_v22, %v2206_v7  ;;  %5473 = vmatpush.bf16.msrb.mxu1 %v12582_v8  ;;  %v1596_v3 = vpop.f32.mrf.mxu2  ;;  %2481 = vst [vmem:[#allocation3 + $0x1cc] sm:$0xf] %v2461_v35  ;;  %v14786_v22 = vld [vmem:[#allocation11_spill] sm:$0xff]  ;;  %v14788_v25 = vld [vmem:[#allocation36_spill] sm:$0xff]  ;;  %v14789_v12 = vld [vmem:[#allocation37_spill] sm:$0xff] }
 0x24d   : > { %v1639_v4 = vpop.f32.mrf.mxu3  ;;  %2237 = vst [vmem:[#allocation3 + $0x180] sm:$0xf] %v2217_v17  ;;  %v1669_v16 = vmax.f32 %v1557_v40, %v1596_v3  ;;  %2756 = vrot.lane.b32.xlu1 %v12561_v21, %s10699_s20  ;;  %v14787_v39 = vmax.f32 %v14785_v20, %v14786_v22  ;;  %v14790_v7 = vmax.f32 %v14788_v25, %v14789_v12  ;;  %v12633_v40 = vld [vmem:[%s14579_s4 + $0x98] sm:$0xff]  ;;  %v12650_v17 = vld [vmem:[#allocation2 + $0xb0] sm:$0xff]  ;;  %v8977_v25 = vld [vmem:[#allocation3 + $0xf0] sm:$0xf0] }
 0x24e   : > { %1756 = vst [vmem:[#allocation2 + $0x88] sm:$0xff] %v1743_v23  ;;  %v1670_v24 = vmax.f32 %v1558_v52, %v1639_v4  ;;  %v1487_v53 = vpop.f32.mrf.mxu0  ;;  %v1530_v36 = vpop.f32.mrf.mxu1  ;;  %2596 = vrot.lane.b32.xlu2 %v12563_v48, %s10699_s20  ;;  %2678 = vrot.lane.b32.xlu0 %v12561_v21, %s10699_s20  ;;  %v12641_v52 = vld [vmem:[%s14579_s4 + $0xd8] sm:$0xff] }
 0x24f   : > { %5508 = vmatpush.bf16.msrb.mxu2 %v12600_v1  ;;  %v1701_v19 = vadd.f32 %v12360_v63, %v1669_v16  ;;  %v2356_v44 = vpop.permute.xlu1 %2355  ;;  %5542 = vmatpush.bf16.msrb.mxu3 %v12608_v31  ;;  %v1559_v61 = vmax.f32 %v14787_v39, %v1487_v53  ;;  %v1560_v28 = vmax.f32 %v14790_v7, %v1530_v36  ;;  %v3887_v35 = vld [vmem:[#allocation2 + $0x58] sm:$0xf]  ;;  %v8975_v39 = vld [vmem:[#allocation3 + $0xe0] sm:$0xf]  ;;  %v12702_v7 = vld [vmem:[%s14579_s4 + $0x88] sm:$0xff] }
 0x250   : > { %v1702_v9 = vadd.f32 %v12362_v41, %v1670_v24  ;;  %v2201_v32 = vpop.permute.xlu2 %2200  ;;  %5474 = vmatpush.bf16.msrb.mxu1 %v12614_v42  ;;  %4890 = vmatmul.bf16.gmra.mxu0 %v8960_v45  ;;  %v2369_v10 = vrot.slane %v2356_v44, 4  ;;  %v12661_v4 = vld [vmem:[%s14579_s4 + $0x18] sm:$0xff]  ;;  %v12669_v24 = vld [vmem:[%s14579_s4 + $0x90] sm:$0xff]  ;;  %3897 = vst [vmem:[#allocation3 + $0x538] sm:$0xf] %v3887_v35 }
 0x251   : > { %4924 = vmatmul.bf16.gmra.mxu1 %v8964_v18  ;;  %v2274_v38 = vpop.permute.xlu0 %2273  ;;  %v2211_v43 = vrot.slane %v2201_v32, 4  ;;  %v1727_v49 = vmax.f32 %v1701_v19, 0.0  ;;  %5440 = vmatpush.bf16.msrb.mxu0 %v12627_v55  ;;  %v3906_v53 = vld [vmem:[#allocation2 + $0x58] sm:$0xf]  ;;  %v12681_v45 = vld [vmem:[%s14579_s4 + $0x50] sm:$0xff]  ;;  %v14791_v19 = vld [vmem:[#allocation38_spill] sm:$0xff] }
 0x252   : > { %v1728_v58 = vmax.f32 %v1702_v9, 0.0  ;;  %4958 = vmatmul.bf16.gmra.mxu2 %v8968_v34  ;;  %4992 = vmatmul.bf16.gmra.mxu3 %v8972_v46  ;;  %v2288_v57 = vrot.slane %v2274_v38, 4  ;;  %v2379_v13 = vsel %vm2212_vm3, %v2356_v44, %v2369_v10  ;;  %v14792_v9 = vld [vmem:[#allocation40_spill] sm:$0xff]  ;;  %3916 = vst [vmem:[#allocation3 + $0x52c] sm:$0xf] %v3906_v53  ;;  %v12726_v53 = vld [vmem:[%s14579_s4 + $0x8] sm:$0xff] }
 0x253   : > { %5509 = vmatpush.bf16.msrb.mxu2 %v12633_v40  ;;  %2399 = vst [vmem:[#allocation3 + $0x1a8] sm:$0xf] %v2379_v13  ;;  %v2222_v50 = vsel %vm2212_vm3, %v2201_v32, %v2211_v43  ;;  %5543 = vmatpush.bf16.msrb.mxu3 %v12641_v52  ;;  %v14793_v34 = vmax.f32 %v14791_v19, %v14792_v9  ;;  %v14794_v32 = vld [vmem:[#allocation39_spill] sm:$0xff]  ;;  %v8983_v12 = vld [vmem:[#allocation3 + $0xe8] sm:$0xf] }
 0x254   : > { %v1744_v37 = vpack.c.bf16 %v1728_v58, %v1727_v49  ;;  %v2298_v56 = vsel %vm2212_vm3, %v2274_v38, %v2288_v57  ;;  %5475 = vmatpush.bf16.msrb.mxu1 %v12647_v59  ;;  %v1599_v29 = vpop.f32.mrf.mxu2  ;;  %2242 = vst [vmem:[#allocation3 + $0x1d0] sm:$0xf] %v2222_v50  ;;  %v14796_v10 = vmax.f32 %v14794_v32, %v14795_v54  ;;  %v10178_v49 = vld [vmem:[#allocation3 + $0xe4] sm:$0xf]  ;;  %v12714_v50 = vld [vmem:[%s14579_s4 + $0x48] sm:$0xff] }
 0x255   : > { %v1642_v23 = vpop.f32.mrf.mxu3  ;;  %2318 = vst [vmem:[#allocation3 + $0x194] sm:$0xf] %v2298_v56  ;;  %v1671_v0 = vmax.f32 %v1559_v61, %v1599_v29  ;;  %2517 = vrot.lane.b32.xlu1 %v12563_v48, %s10699_s20  ;;  %5441 = vmatpush.bf16.msrb.mxu0 %v12661_v4  ;;  %v12694_v58 = vld [vmem:[%s14579_s4 + $0x10] sm:$0xff]  ;;  %v10180_v61 = vld [vmem:[#allocation3 + $0xec] sm:$0xf0] }
 0x256   : > { %1757 = vst [vmem:[#allocation2 + $0x98] sm:$0xff] %v1744_v37  ;;  %v1672_v2 = vmax.f32 %v1560_v28, %v1642_v23  ;;  %v1489_v15 = vpop.f32.mrf.mxu0  ;;  %v1532_v3 = vpop.f32.mrf.mxu1  ;;  %2682 = vrot.lane.b32.xlu2 %v12650_v17, %s10699_s20  ;;  %2515 = vrot.lane.b32.xlu0 %v12501_v5, %s10699_s20  ;;  %v12675_v5 = vld [vmem:[%s14579_s4 + $0xd0] sm:$0xff]  ;;  %v12708_v28 = vld [vmem:[%s14579_s4 + $0xc8] sm:$0xff]  ;;  %v3849_v19 = vld [vmem:[#allocation2 + $0x58] sm:$0xf] }
 0x257   : > { %v1703_v62 = vadd.f32 %v12360_v63, %v1671_v0  ;;  %v2438_v16 = vpop.permute.xlu1 %2437  ;;  %5510 = vmatpush.bf16.msrb.mxu2 %v12669_v24  ;;  %5544 = vmatpush.bf16.msrb.mxu3 %v12675_v5  ;;  %v1561_v44 = vmax.f32 %v14793_v34, %v1489_v15  ;;  %v1562_v38 = vmax.f32 %v14796_v10, %v1532_v3  ;;  %v8985_v56 = vld [vmem:[#allocation3 + $0xf8] sm:$0xf0]  ;;  %v3907_v29 = vld [vmem:[#allocation2 + $0x68] sm:$0xf] }
 0x258   : > { %v1704_v60 = vadd.f32 %v12362_v41, %v1672_v2  ;;  %v2665_v48 = vpop.permute.xlu2 %2664  ;;  %v2450_v36 = vrot.slane %v2438_v16, 4  ;;  %5476 = vmatpush.bf16.msrb.mxu1 %v12681_v45  ;;  %v10181_v15 = vld [vmem:[#allocation3 + $0xf4] sm:$0xf0]  ;;  %3917 = vst [vmem:[#allocation3 + $0x53c] sm:$0xf] %v3907_v29 }
 0x259   : > { %v2436_v33 = vpop.permute.xlu0 %2435  ;;  %v2684_v30 = vrot.slane %v2665_v48, 4  ;;  %v1729_v18 = vmax.f32 %v1703_v62, 0.0  ;;  %5442 = vmatpush.bf16.msrb.mxu0 %v12694_v58  ;;  %v3848_v3 = vld [vmem:[#allocation2 + $0x48] sm:$0xf]  ;;  %v8976_v62 = vor.u32 %v10180_v61, %v8975_v39  ;;  %v12756_v39 = vld [vmem:[%s14579_s4 + $0x40] sm:$0xff] }
 0x25a   : > { %v1730_v27 = vmax.f32 %v1704_v60, 0.0  ;;  %v2449_v46 = vrot.slane %v2436_v33, 4  ;;  %v2460_v43 = vsel %vm2212_vm3, %v2438_v16, %v2450_v36  ;;  %v8980_v60 = vor.u32 %v10178_v49, %v8977_v25  ;;  %3858 = vst [vmem:[#allocation3 + $0x540] sm:$0xf] %v3848_v3  ;;  %v14800_v25 = vld [vmem:[#allocation43_spill] sm:$0xff] }
 0x25b   : > { %2480 = vst [vmem:[#allocation3 + $0x1bc] sm:$0xf] %v2460_v43  ;;  %v2694_v22 = vsel %vm2533_vm4, %v2665_v48, %v2684_v30  ;;  %5511 = vmatpush.bf16.msrb.mxu2 %v12702_v7  ;;  %5545 = vmatpush.bf16.msrb.mxu3 %v12708_v28  ;;  %v8984_v16 = vor.u32 %v10181_v15, %v8983_v12  ;;  %v10179_v48 = vld [vmem:[#allocation3 + $0xec] sm:$0xf]  ;;  %v14798_v43 = vld [vmem:[#allocation44_spill] sm:$0xff] }
 0x25c   : > { %v1745_v57 = vpack.c.bf16 %v1730_v27, %v1729_v18  ;;  %v2459_v20 = vsel %vm2212_vm3, %v2436_v33, %v2449_v46  ;;  %v1601_v13 = vpop.f32.mrf.mxu2  ;;  %5477 = vmatpush.bf16.msrb.mxu1 %v12714_v50  ;;  %2714 = vst [vmem:[#allocation3 + $0x1e8] sm:$0xf] %v2694_v22  ;;  %v8988_v30 = vor.u32 %v10179_v48, %v8985_v56  ;;  %v12734_v46 = vld [vmem:[%s14579_s4 + $0x80] sm:$0xff] }
 0x25d   : > { %v1644_v37 = vpop.f32.mrf.mxu3  ;;  %2479 = vst [vmem:[#allocation3 + $0x1ac] sm:$0xf] %v2459_v20  ;;  %v1673_v23 = vmax.f32 %v1561_v44, %v1601_v13  ;;  %2680 = vrot.lane.b32.xlu1 %v12540_v6, %s10699_s20  ;;  %5443 = vmatpush.bf16.msrb.mxu0 %v12726_v53  ;;  %v12750_v22 = vld [vmem:[%s14579_s4] sm:$0xff] }
 0x25e   : > { %1758 = vst [vmem:[#allocation2 + $0xa8] sm:$0xff] %v1745_v57  ;;  %v1674_v35 = vmax.f32 %v1562_v38, %v1644_v37  ;;  %v1492_v0 = vpop.f32.mrf.mxu0  ;;  %v1535_v2 = vpop.f32.mrf.mxu1  ;;  %2519 = vrot.lane.b32.xlu2 %v12513_v11, %s10699_s20  ;;  %2598 = vrot.lane.b32.xlu0 %v12513_v11, %s10699_s20  ;;  %v12740_v11 = vld [vmem:[%s14579_s4 + $0xc0] sm:$0xff] }
 0x25f   : > { %v1705_v36 = vadd.f32 %v12360_v63, %v1673_v23  ;;  %v2276_v18 = vpop.permute.xlu1 %2275  ;;  %5512 = vmatpush.bf16.msrb.mxu2 %v12734_v46  ;;  %5546 = vmatpush.bf16.msrb.mxu3 %v12740_v11  ;;  %v14797_v38 = vld [vmem:[#allocation42_spill] sm:$0xff]  ;;  %3859 = vst [vmem:[#allocation3 + $0x550] sm:$0xf] %v3849_v19  ;;  %v14801_v12 = vld [vmem:[#allocation45_spill] sm:$0xff] }
 0x260   : > { %v1706_v33 = vadd.f32 %v12362_v41, %v1674_v35  ;;  %v2747_v27 = vpop.permute.xlu2 %2746  ;;  %4895 = vmatmul.bf16.gmra.mxu0 %v8976_v62  ;;  %v2289_v9 = vrot.slane %v2276_v18, 4  ;;  %v14799_v49 = vmax.f32 %v14797_v38, %v14798_v43  ;;  %5478 = vmatpush.bf16.msrb.mxu1 %v12756_v39  ;;  %v14802_v13 = vmax.f32 %v14800_v25, %v14801_v12  ;;  %v10185_v38 = vld [vmem:[#allocation3 + $0x114] sm:$0xf0] }
 0x261   : > { %4929 = vmatmul.bf16.gmra.mxu1 %v8980_v60  ;;  %v2197_v34 = vpop.permute.xlu0 %2196  ;;  %v2765_v44 = vrot.slane %v2747_v27, 4  ;;  %v1731_v32 = vmax.f32 %v1705_v36, 0.0  ;;  %5444 = vmatpush.bf16.msrb.mxu0 %v12750_v22 }
 0x262   : > { %v1732_v54 = vmax.f32 %v1706_v33, 0.0  ;;  %4963 = vmatmul.bf16.gmra.mxu2 %v8984_v16  ;;  %4997 = vmatmul.bf16.gmra.mxu3 %v8988_v30  ;;  %v2209_v10 = vrot.slane %v2197_v34, 4  ;;  %v1563_v57 = vmax.f32 %v14799_v49, %v1492_v0  ;;  %v2299_v20 = vsel %vm2212_vm3, %v2276_v18, %v2289_v9  ;;  %v3868_v0 = vld [vmem:[#allocation2 + $0x58] sm:$0xf]  ;;  %v3888_v30 = vld [vmem:[#allocation2 + $0x68] sm:$0xf] }
 0x263   : > { %v1564_v37 = vmax.f32 %v14802_v13, %v1535_v2  ;;  %2319 = vst [vmem:[#allocation3 + $0x1a4] sm:$0xf] %v2299_v20  ;;  %v2775_v29 = vsel %vm2533_vm4, %v2747_v27, %v2765_v44  ;;  %v3869_v2 = vld [vmem:[#allocation2 + $0x68] sm:$0xf]  ;;  %v8991_v44 = vld [vmem:[#allocation3 + $0x100] sm:$0xf] }
 0x264   : > { %v1746_v61 = vpack.c.bf16 %v1732_v54, %v1731_v32  ;;  %v2220_v56 = vsel %vm2212_vm3, %v2197_v34, %v2209_v10  ;;  %v1604_v23 = vpop.f32.mrf.mxu2  ;;  %2795 = vst [vmem:[#allocation3 + $0x1fc] sm:$0xf] %v2775_v29  ;;  %v3204_v32 = vld [vmem:[#allocation2 + $0x4] sm:$0xff]  ;;  %v10184_v54 = vld [vmem:[#allocation3 + $0x10c] sm:$0xf0] }
 0x265   : > { %v1647_v35 = vpop.f32.mrf.mxu3  ;;  %2240 = vst [vmem:[#allocation3 + $0x1b0] sm:$0xf] %v2220_v56  ;;  %v1675_v15 = vmax.f32 %v1563_v57, %v1604_v23  ;;  %2762 = vrot.lane.b32.xlu1 %v12429_v51, %s10699_s20  ;;  %v8993_v10 = vld [vmem:[#allocation3 + $0x110] sm:$0xf0]  ;;  %v10183_v57 = vld [vmem:[#allocation3 + $0x10c] sm:$0xf]  ;;  %v8992_v29 = vor.u32 %v10184_v54, %v8991_v44 }
 0x266   : > { %1759 = vst [vmem:[#allocation2 + $0xb8] sm:$0xff] %v1746_v61  ;;  %v1676_v3 = vmax.f32 %v1564_v37, %v1647_v35  ;;  %v1494_v62 = vpop.f32.mrf.mxu0  ;;  %v1537_v60 = vpop.f32.mrf.mxu1  ;;  %2602 = vrot.lane.b32.xlu2 %v12540_v6, %s10699_s20  ;;  %2760 = vrot.lane.b32.xlu0 %v12650_v17, %s10699_s20  ;;  %v9001_v20 = vld [vmem:[#allocation3 + $0x118] sm:$0xf0]  ;;  %v3889_v61 = vld [vmem:[#allocation2 + $0x78] sm:$0xf] }
 0x267   : > { %v1707_v16 = vadd.f32 %v12360_v63, %v1675_v15  ;;  %v2362_v36 = vpop.permute.xlu1 %2361  ;;  %3878 = vst [vmem:[#allocation3 + $0x544] sm:$0xf] %v3868_v0  ;;  %v10182_v13 = vld [vmem:[#allocation3 + $0x104] sm:$0xf]  ;;  %v3908_v37 = vld [vmem:[#allocation2 + $0x78] sm:$0xf] }
 0x268   : > { %v1708_v48 = vadd.f32 %v12362_v41, %v1676_v3  ;;  %v2585_v33 = vpop.permute.xlu2 %2584  ;;  %v2372_v18 = vrot.slane %v2362_v36, 4  ;;  %3879 = vst [vmem:[#allocation3 + $0x554] sm:$0xf] %v3869_v2  ;;  %v8996_v23 = vor.u32 %v10182_v13, %v8993_v10  ;;  %v8999_v35 = vld [vmem:[#allocation3 + $0x108] sm:$0xf]  ;;  %v9004_v3 = vor.u32 %v10183_v57, %v9001_v20 }
 0x269   : > { %v2360_v27 = vpop.permute.xlu0 %2359  ;;  %v2604_v19 = vrot.slane %v2585_v33, 4  ;;  %v1733_v51 = vmax.f32 %v1707_v16, 0.0  ;;  %3898 = vst [vmem:[#allocation3 + $0x548] sm:$0xf] %v3888_v30  ;;  %v3909_v0 = vld [vmem:[#allocation2 + $0x88] sm:$0xf]  ;;  %v9000_v15 = vor.u32 %v10185_v38, %v8999_v35 }
 0x26a   : > { %v1734_v9 = vmax.f32 %v1708_v48, 0.0  ;;  %v2371_v6 = vrot.slane %v2360_v27, 4  ;;  %v2382_v34 = vsel %vm2212_vm3, %v2362_v36, %v2372_v18  ;;  %3899 = vst [vmem:[#allocation3 + $0x558] sm:$0xf] %v3889_v61  ;;  %v3850_v2 = vld [vmem:[#allocation2 + $0x68] sm:$0xf] }
 0x26b   : > { %2402 = vst [vmem:[#allocation3 + $0x1d8] sm:$0xf] %v2382_v34  ;;  %v2614_v41 = vsel %vm2533_vm4, %v2585_v33, %v2604_v19  ;;  %v9009_v13 = vld [vmem:[#allocation3 + $0x130] sm:$0xf0]  ;;  %v3891_v35 = vld [vmem:[#allocation2 + $0x98] sm:$0xf] }
 0x26c   : > { %v1747_v17 = vpack.c.bf16 %v1734_v9, %v1733_v51  ;;  %v2381_v63 = vsel %vm2212_vm3, %v2360_v27, %v2371_v6  ;;  %v1606_v43 = vpop.f32.mrf.mxu2  ;;  %2634 = vst [vmem:[#allocation3 + $0x1e4] sm:$0xf] %v2614_v41  ;;  %v3851_v27 = vld [vmem:[#allocation2 + $0x78] sm:$0xf]  ;;  %v3871_v41 = vld [vmem:[#allocation2 + $0x88] sm:$0xf] }
 0x26d   : > { %v1649_v49 = vpop.f32.mrf.mxu3  ;;  %2401 = vst [vmem:[#allocation3 + $0x1c8] sm:$0xf] %v2381_v63  ;;  %2600 = vrot.lane.b32.xlu1 %v12561_v21, %s10699_s20  ;;  %v2964_v9 = vld [vmem:[#allocation2 + $0x14] sm:$0xff]  ;;  %v3890_v43 = vld [vmem:[#allocation2 + $0x88] sm:$0xf] }
 0x26e   : > { %1760 = vst [vmem:[#allocation2 + $0xc8] sm:$0xff] %v1747_v17  ;;  %v4630_v25 = vpop.f32.mrf.mxu0  ;;  %v4664_v12 = vpop.f32.mrf.mxu1  ;;  %3224 = vrot.lane.b32.xlu2 %v3204_v32, %s10698_s23  ;;  %2521 = vrot.lane.b32.xlu0 %v12561_v21, %s10699_s20  ;;  %v3870_v6 = vld [vmem:[#allocation2 + $0x78] sm:$0xf] }
 0x26f   : > { %v4665_v56 = vadd.f32 %v4664_v12, %v4630_v25  ;;  %v2199_v62 = vpop.permute.xlu1 %2198  ;;  %3918 = vst [vmem:[#allocation3 + $0x54c] sm:$0xf] %v3908_v37  ;;  %v10188_v12 = vld [vmem:[#allocation3 + $0x12c] sm:$0xf0]  ;;  %v12790_v37 = vld [vmem:[#allocation2 + $0x24] sm:$0xff] }
 0x270   : > { %v2671_v60 = vpop.permute.xlu2 %2670  ;;  %4900 = vmatmul.bf16.gmra.mxu0 %v8992_v29  ;;  %v2210_v16 = vrot.slane %v2199_v62, 4  ;;  %3919 = vst [vmem:[#allocation3 + $0x55c] sm:$0xf] %v3909_v0  ;;  %v10186_v29 = vld [vmem:[#allocation3 + $0x124] sm:$0xf] }
 0x271   : > { %4934 = vmatmul.bf16.gmra.mxu1 %v8996_v23  ;;  %v2280_v48 = vpop.permute.xlu0 %2279  ;;  %v2687_v36 = vrot.slane %v2671_v60, 4  ;;  %3860 = vst [vmem:[#allocation3 + $0x560] sm:$0xf] %v3850_v2  ;;  %v10187_v23 = vld [vmem:[#allocation3 + $0x12c] sm:$0xf] }
 0x272   : > { %4968 = vmatmul.bf16.gmra.mxu2 %v9000_v15  ;;  %5002 = vmatmul.bf16.gmra.mxu3 %v9004_v3  ;;  %v2291_v33 = vrot.slane %v2280_v48, 4  ;;  %v2221_v30 = vsel %vm2212_vm3, %v2199_v62, %v2210_v16  ;;  %3861 = vst [vmem:[#allocation3 + $0x570] sm:$0xf] %v3851_v27  ;;  %v10189_v3 = vld [vmem:[#allocation3 + $0x134] sm:$0xf0] }
 0x273   : > { %v2697_v21 = vsel %vm2533_vm4, %v2671_v60, %v2687_v36  ;;  %2241 = vst [vmem:[#allocation3 + $0x1c0] sm:$0xf] %v2221_v30  ;;  %v3910_v62 = vld [vmem:[#allocation2 + $0x98] sm:$0xf]  ;;  %v3911_v27 = vld [vmem:[#allocation2 + $0xa8] sm:$0xf] }
 0x274   : > { %v2301_v18 = vsel %vm2212_vm3, %v2280_v48, %v2291_v33  ;;  %2717 = vst [vmem:[#allocation3 + $0x218] sm:$0xf] %v2697_v21  ;;  %v9007_v48 = vld [vmem:[#allocation3 + $0x120] sm:$0xf]  ;;  %v9015_v36 = vld [vmem:[#allocation3 + $0x128] sm:$0xf]  ;;  %v9012_v21 = vor.u32 %v10186_v29, %v9009_v13 }
 0x275   : > { %v4698_v19 = vpop.f32.mrf.mxu2  ;;  %v4732_v51 = vpop.f32.mrf.mxu3  ;;  %2321 = vst [vmem:[#allocation3 + $0x1c4] sm:$0xf] %v2301_v18  ;;  %2904 = vrot.lane.b32.xlu1 %v3204_v32, %s10697_s22  ;;  %v9008_v30 = vor.u32 %v10188_v12, %v9007_v48  ;;  %v9017_v18 = vld [vmem:[#allocation3 + $0x138] sm:$0xf0] }
 0x276   : > { %v4699_v34 = vadd.f32 %v4698_v19, %v4665_v56  ;;  %v4632_v44 = vpop.f32.mrf.mxu0  ;;  %v4666_v17 = vpop.f32.mrf.mxu1  ;;  %2906 = vrot.lane.b32.xlu2 %v2964_v9, %s10697_s22  ;;  %2984 = vrot.lane.b32.xlu0 %v2964_v9, %s10697_s22  ;;  %3880 = vst [vmem:[#allocation3 + $0x564] sm:$0xf] %v3870_v6  ;;  %v9020_v6 = vor.u32 %v10187_v23, %v9017_v18  ;;  %v3873_v23 = vld [vmem:[#allocation2 + $0xa8] sm:$0xf]  ;;  %v9023_v18 = vld [vmem:[#allocation3 + $0x140] sm:$0xf] }
 0x277   : > { %v4667_v63 = vadd.f32 %v4666_v17, %v4632_v44  ;;  %v2282_v10 = vpop.permute.xlu1 %2281  ;;  %3881 = vst [vmem:[#allocation3 + $0x574] sm:$0xf] %v3871_v41  ;;  %v3852_v17 = vld [vmem:[#allocation2 + $0x88] sm:$0xf] }
 0x278   : > { %v12786_v54 = vadd.f32 %v4732_v51, %v4699_v34  ;;  %v2508_v38 = vpop.permute.xlu2 %2507  ;;  %v2292_v49 = vrot.slane %v2282_v10, 4  ;;  %3900 = vst [vmem:[#allocation3 + $0x568] sm:$0xf] %v3890_v43  ;;  %v9016_v51 = vor.u32 %v10189_v3, %v9015_v36  ;;  %v3892_v3 = vld [vmem:[#allocation2 + $0xa8] sm:$0xf] }
 0x279   : > { %v2667_v57 = vpop.permute.xlu0 %2666  ;;  %v2525_v20 = vrot.slane %v2508_v38, 4  ;;  %3901 = vst [vmem:[#allocation3 + $0x578] sm:$0xf] %v3891_v35 }
 0x27a   : > { %v2685_v61 = vrot.slane %v2667_v57, 4  ;;  %v2302_v32 = vsel %vm2212_vm3, %v2282_v10, %v2292_v49  ;;  %3920 = vst [vmem:[#allocation3 + $0x56c] sm:$0xf] %v3910_v62 }
 0x27b   : > { %v2536_v25 = vsel %vm2533_vm4, %v2508_v38, %v2525_v20  ;;  %2322 = vst [vmem:[#allocation3 + $0x1d4] sm:$0xf] %v2302_v32  ;;  %v12802_v32 = vld [vmem:[#allocation2 + $0x34] sm:$0xff] }
 0x27c   : > { %v2695_v56 = vsel %vm2533_vm4, %v2667_v57, %v2685_v61  ;;  %2556 = vst [vmem:[#allocation3 + $0x200] sm:$0xf] %v2536_v25  ;;  %v3853_v57 = vld [vmem:[#allocation2 + $0x98] sm:$0xf] }
 0x27d   : > { %v4700_v0 = vpop.f32.mrf.mxu2  ;;  %v4734_v15 = vpop.f32.mrf.mxu3  ;;  %2715 = vst [vmem:[#allocation3 + $0x1f8] sm:$0xf] %v2695_v56  ;;  %3304 = vrot.lane.b32.xlu1 %v2964_v9, %s10698_s23  ;;  %v3872_v25 = vld [vmem:[#allocation2 + $0x98] sm:$0xf] }
 0x27e   : > { %v4701_v60 = vadd.f32 %v4700_v0, %v4667_v63  ;;  %v4635_v2 = vpop.f32.mrf.mxu0  ;;  %v4669_v16 = vpop.f32.mrf.mxu1  ;;  %3306 = vrot.lane.b32.xlu2 %v12790_v37, %s10698_s23  ;;  %3226 = vrot.lane.b32.xlu0 %v2964_v9, %s10698_s23  ;;  %3921 = vst [vmem:[#allocation3 + $0x57c] sm:$0xf] %v3911_v27  ;;  %v9031_v27 = vld [vmem:[#allocation3 + $0x148] sm:$0xf] }
 0x27f   : > { %v4670_v33 = vadd.f32 %v4669_v16, %v4635_v2  ;;  %v2745_v34 = vpop.permute.xlu1 %2744  ;;  %3862 = vst [vmem:[#allocation3 + $0x580] sm:$0xf] %v3852_v17  ;;  %v3912_v17 = vld [vmem:[#allocation2 + $0xb8] sm:$0xf] }
 0x280   : > { %v12797_v19 = vadd.f32 %v4734_v15, %v4701_v60  ;;  %v2591_v44 = vpop.permute.xlu2 %2590  ;;  %4905 = vmatmul.bf16.gmra.mxu0 %v9008_v30  ;;  %v2764_v63 = vrot.slane %v2745_v34, 4  ;;  %3863 = vst [vmem:[#allocation3 + $0x590] sm:$0xf] %v3853_v57  ;;  %v10190_v30 = vld [vmem:[#allocation3 + $0x144] sm:$0xf] }
 0x281   : > { %4939 = vmatmul.bf16.gmra.mxu1 %v9012_v21  ;;  %v2504_v41 = vpop.permute.xlu0 %2503  ;;  %v2607_v10 = vrot.slane %v2591_v44, 4  ;;  %3882 = vst [vmem:[#allocation3 + $0x584] sm:$0xf] %v3872_v25 }
 0x282   : > { %4973 = vmatmul.bf16.gmra.mxu2 %v9016_v51  ;;  %5007 = vmatmul.bf16.gmra.mxu3 %v9020_v6  ;;  %v2523_v38 = vrot.slane %v2504_v41, 4  ;;  %v2774_v9 = vsel %vm2533_vm4, %v2745_v34, %v2764_v63  ;;  %3883 = vst [vmem:[#allocation3 + $0x594] sm:$0xf] %v3873_v23  ;;  %v3893_v51 = vld [vmem:[#allocation2 + $0xb8] sm:$0xf] }
 0x283   : > { %v2617_v43 = vsel %vm2533_vm4, %v2591_v44, %v2607_v10  ;;  %2794 = vst [vmem:[#allocation3 + $0x1ec] sm:$0xf] %v2774_v9  ;;  %v9033_v44 = vld [vmem:[#allocation3 + $0x158] sm:$0xf0]  ;;  %v3913_v9 = vld [vmem:[#allocation2 + $0xc8] sm:$0xf] }
 0x284   : > { %v2534_v49 = vsel %vm2533_vm4, %v2504_v41, %v2523_v38  ;;  %2637 = vst [vmem:[#allocation3 + $0x214] sm:$0xf] %v2617_v43  ;;  %v9025_v38 = vld [vmem:[#allocation3 + $0x150] sm:$0xf0] }
 0x285   : > { %v4703_v20 = vpop.f32.mrf.mxu2  ;;  %v4737_v61 = vpop.f32.mrf.mxu3  ;;  %2554 = vst [vmem:[#allocation3 + $0x1e0] sm:$0xf] %v2534_v49  ;;  %2986 = vrot.lane.b32.xlu1 %v12790_v37, %s10697_s22  ;;  %v9028_v57 = vor.u32 %v10190_v30, %v9025_v38 }
 0x286   : > { %v4704_v12 = vadd.f32 %v4703_v20, %v4670_v33  ;;  %v4637_v13 = vpop.f32.mrf.mxu0  ;;  %v4671_v56 = vpop.f32.mrf.mxu1  ;;  %3144 = vrot.lane.b32.xlu2 %v12802_v32, %s10697_s22  ;;  %3064 = vrot.lane.b32.xlu0 %v12790_v37, %s10697_s22  ;;  %v10192_v33 = vld [vmem:[#allocation3 + $0x14c] sm:$0xf0]  ;;  %3902 = vst [vmem:[#allocation3 + $0x588] sm:$0xf] %v3892_v3  ;;  %v10193_v20 = vld [vmem:[#allocation3 + $0x154] sm:$0xf0] }
 0x287   : > { %v4672_v29 = vadd.f32 %v4671_v56, %v4637_v13  ;;  %v2506_v0 = vpop.permute.xlu1 %2505  ;;  %v9024_v49 = vor.u32 %v10192_v33, %v9023_v18  ;;  %3903 = vst [vmem:[#allocation3 + $0x598] sm:$0xf] %v3893_v51  ;;  %v12847_v33 = vld [vmem:[%s14579_s4 + $0x38] sm:$0xff] }
 0x288   : > { %v12810_v35 = vadd.f32 %v4737_v61, %v4704_v12  ;;  %v2753_v15 = vpop.permute.xlu2 %2752  ;;  %v2524_v62 = vrot.slane %v2506_v0, 4  ;;  %v10191_v61 = vld [vmem:[#allocation3 + $0x14c] sm:$0xf]  ;;  %v9032_v12 = vor.u32 %v10193_v20, %v9031_v27  ;;  %3922 = vst [vmem:[#allocation3 + $0x58c] sm:$0xf] %v3912_v17 }
 0x289   : > { %v2442_v60 = vpop.permute.xlu0 %2441  ;;  %v2768_v2 = vrot.slane %v2753_v15, 4  ;;  %v9036_v13 = vor.u32 %v10191_v61, %v9033_v44  ;;  %3923 = vst [vmem:[#allocation3 + $0x59c] sm:$0xf] %v3913_v9 }
 0x28a   : > { %v2452_v16 = vrot.slane %v2442_v60, 4  ;;  %v2535_v48 = vsel %vm2533_vm4, %v2506_v0, %v2524_v62 }
 0x28b   : > { %v2778_v36 = vsel %vm2533_vm4, %v2753_v15, %v2768_v2  ;;  %2555 = vst [vmem:[#allocation3 + $0x1f0] sm:$0xf] %v2535_v48  ;;  %v12828_v2 = vld [vmem:[%s14579_s4 + $0xb8] sm:$0xff] }
 0x28c   : > { %v2462_v21 = vsel %vm2212_vm3, %v2442_v60, %v2452_v16  ;;  %2798 = vst [vmem:[#allocation3 + $0x22c] sm:$0xf] %v2778_v36  ;;  %v12834_v16 = vld [vmem:[%s14579_s4 + $0xf8] sm:$0xff] }
 0x28d   : > { %v4705_v6 = vpop.f32.mrf.mxu2  ;;  %v4739_v34 = vpop.f32.mrf.mxu3  ;;  %2482 = vst [vmem:[#allocation3 + $0x1dc] sm:$0xf] %v2462_v21  ;;  %3384 = vrot.lane.b32.xlu1 %v12790_v37, %s10698_s23  ;;  %v12841_v36 = vld [vmem:[%s14579_s4 + $0x78] sm:$0xff] }
 0x28e   : > { %v4706_v63 = vadd.f32 %v4705_v6, %v4672_v29  ;;  %v4640_v41 = vpop.f32.mrf.mxu0  ;;  %v4674_v10 = vpop.f32.mrf.mxu1  ;;  %2988 = vrot.lane.b32.xlu2 %v12802_v32, %s10697_s22  ;;  %2908 = vrot.lane.b32.xlu0 %v12790_v37, %s10697_s22 }
 0x28f   : > { %v4675_v43 = vadd.f32 %v4674_v10, %v4640_v41  ;;  %v2669_v56 = vpop.permute.xlu1 %2668  ;;  %v12873_v41 = vld [vmem:[%s14579_s4 + $0x70] sm:$0xff] }
 0x290   : > { %v12821_v25 = vadd.f32 %v4739_v34, %v4706_v63  ;;  %v2514_v29 = vpop.permute.xlu2 %2513  ;;  %5189 = vmatmul.bf16.vlgmr.msra.gmra.mxu0 %v9024_v49  ;;  %v2686_v23 = vrot.slane %v2669_v56, 4  ;;  %v12859_v34 = vld [vmem:[%s14579_s4 + $0xb0] sm:$0xff] }
 0x291   : > { %5223 = vmatmul.bf16.vlgmr.msra.gmra.mxu1 %v9028_v57  ;;  %v2587_v0 = vpop.permute.xlu0 %2586  ;;  %v2528_v15 = vrot.slane %v2514_v29, 4  ;;  %5740 = vmatpush.bf16.msra.mxu0 %v12847_v33 }
 0x292   : > { %5257 = vmatmul.bf16.vlgmr.msra.gmra.mxu2 %v9032_v12  ;;  %5291 = vmatmul.bf16.vlgmr.msra.gmra.mxu3 %v9036_v13  ;;  %v2605_v3 = vrot.slane %v2587_v0, 4  ;;  %v2696_v62 = vsel %vm2533_vm4, %v2669_v56, %v2686_v23  ;;  %v9039_v12 = vld [vmem:[#allocation3 + $0x160] sm:$0xf]  ;;  %v9041_v13 = vld [vmem:[#allocation3 + $0x170] sm:$0xf0] }
 0x293   : > { %v2539_v60 = vsel %vm2533_vm4, %v2514_v29, %v2528_v15  ;;  %5808 = vmatpush.bf16.msra.mxu2 %v12828_v2  ;;  %5842 = vmatpush.bf16.msra.mxu3 %v12834_v16  ;;  %2716 = vst [vmem:[#allocation3 + $0x208] sm:$0xf] %v2696_v62  ;;  %v10197_v23 = vld [vmem:[#allocation3 + $0x174] sm:$0xf0] }
 0x294   : > { %v2615_v48 = vsel %vm2533_vm4, %v2587_v0, %v2605_v3  ;;  %5774 = vmatpush.bf16.msra.mxu1 %v12841_v36  ;;  %2559 = vst [vmem:[#allocation3 + $0x230] sm:$0xf] %v2539_v60  ;;  %v9049_v0 = vld [vmem:[#allocation3 + $0x178] sm:$0xf0]  ;;  %v10194_v60 = vld [vmem:[#allocation3 + $0x164] sm:$0xf] }
 0x295   : > { %v4708_v30 = vpop.f32.mrf.mxu2  ;;  %v4742_v21 = vpop.f32.mrf.mxu3  ;;  %2635 = vst [vmem:[#allocation3 + $0x1f4] sm:$0xf] %v2615_v48  ;;  %3228 = vrot.lane.b32.xlu1 %v12790_v37, %s10698_s23  ;;  %v12867_v37 = vld [vmem:[%s14579_s4 + $0xf0] sm:$0xff]  ;;  %v9044_v48 = vor.u32 %v10194_v60, %v9041_v13 }
 0x296   : > { %v4709_v18 = vadd.f32 %v4708_v30, %v4675_v43  ;;  %v4642_v27 = vpop.f32.mrf.mxu0  ;;  %v4676_v51 = vpop.f32.mrf.mxu1  ;;  %3386 = vrot.lane.b32.xlu2 %v12802_v32, %s10698_s23  ;;  %3464 = vrot.lane.b32.xlu0 %v12802_v32, %s10698_s23  ;;  %v12879_v43 = vld [vmem:[%s14579_s4 + $0x30] sm:$0xff]  ;;  %v9047_v30 = vld [vmem:[#allocation3 + $0x168] sm:$0xf] }
 0x297   : > { %v4677_v6 = vadd.f32 %v4676_v51, %v4642_v27  ;;  %5809 = vmatpush.bf16.msra.mxu2 %v12859_v34  ;;  %v2751_v17 = vpop.permute.xlu1 %2750  ;;  %5843 = vmatpush.bf16.msra.mxu3 %v12867_v37 }
 0x298   : > { %v12862_v44 = vadd.f32 %v4742_v21, %v4709_v18  ;;  %v2677_v63 = vpop.permute.xlu2 %2676  ;;  %5775 = vmatpush.bf16.msra.mxu1 %v12873_v41  ;;  %v2767_v10 = vrot.slane %v2751_v17, 4  ;;  %5741 = vmatpush.bf16.msra.mxu0 %v12879_v43  ;;  %v10195_v21 = vld [vmem:[#allocation3 + $0x16c] sm:$0xf]  ;;  %v9048_v18 = vor.u32 %v10197_v23, %v9047_v30  ;;  %v9063_v30 = vld [vmem:[#allocation3 + $0x188] sm:$0xf] }
 0x299   : > { %v2749_v38 = vpop.permute.xlu0 %2748  ;;  %v2690_v9 = vrot.slane %v2677_v63, 4  ;;  %v9052_v27 = vor.u32 %v10195_v21, %v9049_v0  ;;  %v9065_v21 = vld [vmem:[#allocation3 + $0x198] sm:$0xf0] }
 0x29a   : > { %v2766_v49 = vrot.slane %v2749_v38, 4  ;;  %v2777_v57 = vsel %vm2533_vm4, %v2751_v17, %v2767_v10 }
 0x29b   : > { %v2700_v20 = vsel %vm2533_vm4, %v2677_v63, %v2690_v9  ;;  %5810 = vmatpush.bf16.msra.mxu2 %v12568_v14  ;;  %2797 = vst [vmem:[#allocation3 + $0x21c] sm:$0xf] %v2777_v57  ;;  %5844 = vmatpush.bf16.msra.mxu3 %v12576_v26  ;;  %v10196_v14 = vld [vmem:[#allocation3 + $0x16c] sm:$0xf0]  ;;  %v12907_v57 = vld [vmem:[#allocation2 + $0x44] sm:$0xff] }
 0x29c   : > { %v2776_v61 = vsel %vm2533_vm4, %v2749_v38, %v2766_v49  ;;  %5776 = vmatpush.bf16.msra.mxu1 %v12582_v8  ;;  %5742 = vmatpush.bf16.msra.mxu0 %v12588_v47  ;;  %2720 = vst [vmem:[#allocation3 + $0x248] sm:$0xf] %v2700_v20  ;;  %v9040_v8 = vor.u32 %v10196_v14, %v9039_v12  ;;  %v10199_v14 = vld [vmem:[#allocation3 + $0x18c] sm:$0xf] }
 0x29d   : > { %v4710_v56 = vpop.f32.mrf.mxu2  ;;  %v4744_v29 = vpop.f32.mrf.mxu3  ;;  %2796 = vst [vmem:[#allocation3 + $0x20c] sm:$0xf] %v2776_v61  ;;  %3066 = vrot.lane.b32.xlu1 %v12802_v32, %s10697_s22 }
 0x29e   : > { %v4711_v15 = vadd.f32 %v4710_v56, %v4677_v6  ;;  %v4645_v3 = vpop.f32.mrf.mxu0  ;;  %v4679_v62 = vpop.f32.mrf.mxu1  ;;  %3230 = vrot.lane.b32.xlu2 %v12802_v32, %s10698_s23  ;;  %3308 = vrot.lane.b32.xlu0 %v12802_v32, %s10698_s23 }
 0x29f   : > { %v4680_v26 = vadd.f32 %v4679_v62, %v4645_v3  ;;  %5811 = vmatpush.bf16.msra.mxu2 %v12600_v1  ;;  %v2589_v51 = vpop.permute.xlu1 %2588  ;;  %5845 = vmatpush.bf16.msra.mxu3 %v12608_v31  ;;  %v9055_v3 = vld [vmem:[#allocation3 + $0x180] sm:$0xf] }
 0x2a0   : > { %v12896_v47 = vadd.f32 %v4744_v29, %v4711_v15  ;;  %v2759_v6 = vpop.permute.xlu2 %2758  ;;  %5777 = vmatpush.bf16.msra.mxu1 %v12614_v42  ;;  %5194 = vmatmul.bf16.gmra.mxu0 %v9040_v8  ;;  %v2606_v17 = vrot.slane %v2589_v51, 4  ;;  %v10200_v15 = vld [vmem:[#allocation3 + $0x18c] sm:$0xf0] }
 0x2a1   : > { %5228 = vmatmul.bf16.gmra.mxu1 %v9044_v48  ;;  %v2510_v63 = vpop.permute.xlu0 %2509  ;;  %v2771_v10 = vrot.slane %v2759_v6, 4  ;;  %5743 = vmatpush.bf16.msra.mxu0 %v12627_v55 }
 0x2a2   : > { %5262 = vmatmul.bf16.gmra.mxu2 %v9048_v18  ;;  %5296 = vmatmul.bf16.gmra.mxu3 %v9052_v27  ;;  %v2526_v38 = vrot.slane %v2510_v63, 4  ;;  %v2616_v1 = vsel %vm2533_vm4, %v2589_v51, %v2606_v17  ;;  %v9068_v27 = vor.u32 %v10199_v14, %v9065_v21 }
 0x2a3   : > { %v2781_v9 = vsel %vm2533_vm4, %v2759_v6, %v2771_v10  ;;  %5812 = vmatpush.bf16.msra.mxu2 %v12633_v40  ;;  %2636 = vst [vmem:[#allocation3 + $0x204] sm:$0xf] %v2616_v1  ;;  %5846 = vmatpush.bf16.msra.mxu3 %v12641_v52 }
 0x2a4   : > { %v2537_v31 = vsel %vm2533_vm4, %v2510_v63, %v2526_v38  ;;  %5778 = vmatpush.bf16.msra.mxu1 %v12647_v59  ;;  %2801 = vst [vmem:[#allocation3 + $0x25c] sm:$0xf] %v2781_v9 }
 0x2a5   : > { %v4713_v42 = vpop.f32.mrf.mxu2  ;;  %v4747_v49 = vpop.f32.mrf.mxu3  ;;  %2557 = vst [vmem:[#allocation3 + $0x210] sm:$0xf] %v2537_v31  ;;  %2910 = vrot.lane.b32.xlu1 %v12802_v32, %s10697_s22  ;;  %5744 = vmatpush.bf16.msra.mxu0 %v12661_v4  ;;  %v12944_v31 = vld [vmem:[#allocation2 + $0x54] sm:$0xff] }
 0x2a6   : > { %v4714_v20 = vadd.f32 %v4713_v42, %v4680_v26  ;;  %v4647_v61 = vpop.f32.mrf.mxu0  ;;  %v4681_v12 = vpop.f32.mrf.mxu1  ;;  %3068 = vrot.lane.b32.xlu2 %v12907_v57, %s10697_s22  ;;  %3146 = vrot.lane.b32.xlu0 %v12907_v57, %s10697_s22 }
 0x2a7   : > { %v4682_v55 = vadd.f32 %v4681_v12, %v4647_v61  ;;  %v2675_v52 = vpop.permute.xlu1 %2674  ;;  %5813 = vmatpush.bf16.msra.mxu2 %v12669_v24  ;;  %5847 = vmatpush.bf16.msra.mxu3 %v12675_v5  ;;  %v9057_v24 = vld [vmem:[#allocation3 + $0x190] sm:$0xf0] }
 0x2a8   : > { %v12916_v40 = vadd.f32 %v4747_v49, %v4714_v20  ;;  %v2597_v59 = vpop.permute.xlu2 %2596  ;;  %v2689_v13 = vrot.slane %v2675_v52, 4  ;;  %5779 = vmatpush.bf16.msra.mxu1 %v12681_v45  ;;  %v10201_v45 = vld [vmem:[#allocation3 + $0x194] sm:$0xf0] }
 0x2a9   : > { %v2673_v56 = vpop.permute.xlu0 %2672  ;;  %v2610_v32 = vrot.slane %v2597_v59, 4  ;;  %5745 = vmatpush.bf16.msra.mxu0 %v12694_v58  ;;  %v10198_v58 = vld [vmem:[#allocation3 + $0x184] sm:$0xf]  ;;  %v9064_v18 = vor.u32 %v10201_v45, %v9063_v30 }
 0x2aa   : > { %v2688_v29 = vrot.slane %v2673_v56, 4  ;;  %v2699_v23 = vsel %vm2533_vm4, %v2675_v52, %v2689_v13  ;;  %v9060_v48 = vor.u32 %v10198_v58, %v9057_v24  ;;  %v10203_v24 = vld [vmem:[#allocation3 + $0x1ac] sm:$0xf] }
 0x2ab   : > { %v2620_v0 = vsel %vm2533_vm4, %v2597_v59, %v2610_v32  ;;  %2719 = vst [vmem:[#allocation3 + $0x238] sm:$0xf] %v2699_v23  ;;  %5814 = vmatpush.bf16.msra.mxu2 %v12702_v7  ;;  %5848 = vmatpush.bf16.msra.mxu3 %v12708_v28  ;;  %v9056_v28 = vor.u32 %v10200_v15, %v9055_v3  ;;  %v12956_v23 = vld [vmem:[#allocation2 + $0x64] sm:$0xff]  ;;  %v10204_v15 = vld [vmem:[#allocation3 + $0x1ac] sm:$0xf0] }
 0x2ac   : > { %v2698_v4 = vsel %vm2533_vm4, %v2673_v56, %v2688_v29  ;;  %5780 = vmatpush.bf16.msra.mxu1 %v12714_v50  ;;  %2640 = vst [vmem:[#allocation3 + $0x244] sm:$0xf] %v2620_v0  ;;  %v9079_v29 = vld [vmem:[#allocation3 + $0x1a8] sm:$0xf] }
 0x2ad   : > { %v4715_v5 = vpop.f32.mrf.mxu2  ;;  %v4749_v62 = vpop.f32.mrf.mxu3  ;;  %2718 = vst [vmem:[#allocation3 + $0x228] sm:$0xf] %v2698_v4  ;;  %3466 = vrot.lane.b32.xlu1 %v12907_v57, %s10698_s23  ;;  %5746 = vmatpush.bf16.msra.mxu0 %v12726_v53 }
 0x2ae   : > { %v4716_v60 = vadd.f32 %v4715_v5, %v4682_v55  ;;  %v4650_v26 = vpop.f32.mrf.mxu0  ;;  %v4684_v8 = vpop.f32.mrf.mxu1  ;;  %2912 = vrot.lane.b32.xlu2 %v12907_v57, %s10697_s22  ;;  %2990 = vrot.lane.b32.xlu0 %v12907_v57, %s10697_s22  ;;  %v9081_v5 = vld [vmem:[#allocation3 + $0x1b8] sm:$0xf0] }
 0x2af   : > { %v4685_v7 = vadd.f32 %v4684_v8, %v4650_v26  ;;  %v2512_v51 = vpop.permute.xlu1 %2511  ;;  %5815 = vmatpush.bf16.msra.mxu2 %v12734_v46  ;;  %5849 = vmatpush.bf16.msra.mxu3 %v12740_v11  ;;  %v9073_v26 = vld [vmem:[#allocation3 + $0x1b0] sm:$0xf0]  ;;  %v9084_v30 = vor.u32 %v10203_v24, %v9081_v5 }
 0x2b0   : > { %v12935_v50 = vadd.f32 %v4749_v62, %v4716_v60  ;;  %v2683_v6 = vpop.permute.xlu2 %2682  ;;  %5199 = vmatmul.bf16.gmra.mxu0 %v9056_v28  ;;  %v2527_v17 = vrot.slane %v2512_v51, 4  ;;  %5781 = vmatpush.bf16.msra.mxu1 %v12756_v39  ;;  %v9071_v60 = vld [vmem:[#allocation3 + $0x1a0] sm:$0xf] }
 0x2b1   : > { %5233 = vmatmul.bf16.gmra.mxu1 %v9060_v48  ;;  %v2755_v63 = vpop.permute.xlu0 %2754  ;;  %v2693_v10 = vrot.slane %v2683_v6, 4  ;;  %5747 = vmatpush.bf16.msra.mxu0 %v12750_v22  ;;  %v9072_v8 = vor.u32 %v10204_v15, %v9071_v60  ;;  %v10206_v60 = vld [vmem:[#allocation3 + $0x1c4] sm:$0xf] }
 0x2b2   : > { %5267 = vmatmul.bf16.gmra.mxu2 %v9064_v18  ;;  %5301 = vmatmul.bf16.gmra.mxu3 %v9068_v27  ;;  %v2769_v38 = vrot.slane %v2755_v63, 4  ;;  %v2538_v53 = vsel %vm2533_vm4, %v2512_v51, %v2527_v17 }
 0x2b3   : > { %v2703_v1 = vsel %vm2533_vm4, %v2683_v6, %v2693_v10  ;;  %2558 = vst [vmem:[#allocation3 + $0x220] sm:$0xf] %v2538_v53 }
 0x2b4   : > { %v2779_v46 = vsel %vm2533_vm4, %v2755_v63, %v2769_v38  ;;  %2723 = vst [vmem:[#allocation3 + $0x278] sm:$0xf] %v2703_v1 }
 0x2b5   : > { %v4718_v11 = vpop.f32.mrf.mxu2  ;;  %v4752_v9 = vpop.f32.mrf.mxu3  ;;  %2799 = vst [vmem:[#allocation3 + $0x23c] sm:$0xf] %v2779_v46  ;;  %3310 = vrot.lane.b32.xlu1 %v12907_v57, %s10698_s23 }
 0x2b6   : > { %v4719_v42 = vadd.f32 %v4718_v11, %v4685_v7  ;;  %v4652_v49 = vpop.f32.mrf.mxu0  ;;  %v4686_v20 = vpop.f32.mrf.mxu1  ;;  %3468 = vrot.lane.b32.xlu2 %v12944_v31, %s10698_s23  ;;  %3388 = vrot.lane.b32.xlu0 %v12907_v57, %s10698_s23  ;;  %v10202_v57 = vld [vmem:[#allocation3 + $0x1a4] sm:$0xf]  ;;  %v10205_v7 = vld [vmem:[#allocation3 + $0x1b4] sm:$0xf0] }
 0x2b7   : > { %v4687_v22 = vadd.f32 %v4686_v20, %v4652_v49  ;;  %v2595_v61 = vpop.permute.xlu1 %2594  ;;  %v9076_v58 = vor.u32 %v10202_v57, %v9073_v26  ;;  %v9080_v48 = vor.u32 %v10205_v7, %v9079_v29  ;;  %v9087_v29 = vld [vmem:[#allocation3 + $0x1c0] sm:$0xf]  ;;  %v10207_v7 = vld [vmem:[#allocation3 + $0x1cc] sm:$0xf] }
 0x2b8   : > { %v12952_v39 = vadd.f32 %v4752_v9, %v4719_v42  ;;  %v2520_v12 = vpop.permute.xlu2 %2519  ;;  %v2609_v55 = vrot.slane %v2595_v61, 4 }
 0x2b9   : > { %v2593_v52 = vpop.permute.xlu0 %2592  ;;  %v2531_v59 = vrot.slane %v2520_v12, 4 }
 0x2ba   : > { %v2608_v13 = vrot.slane %v2593_v52, 4  ;;  %v2619_v56 = vsel %vm2533_vm4, %v2595_v61, %v2609_v55 }
 0x2bb   : > { %v2542_v32 = vsel %vm2533_vm4, %v2520_v12, %v2531_v59  ;;  %2639 = vst [vmem:[#allocation3 + $0x234] sm:$0xf] %v2619_v56 }
 0x2bc   : > { %v2618_v0 = vsel %vm2533_vm4, %v2593_v52, %v2608_v13  ;;  %2562 = vst [vmem:[#allocation3 + $0x260] sm:$0xf] %v2542_v32  ;;  %v10209_v13 = vld [vmem:[#allocation3 + $0x1d4] sm:$0xf0] }
 0x2bd   : > { %v4720_v4 = vpop.f32.mrf.mxu2  ;;  %v4754_v3 = vpop.f32.mrf.mxu3  ;;  %2638 = vst [vmem:[#allocation3 + $0x224] sm:$0xf] %v2618_v0  ;;  %3148 = vrot.lane.b32.xlu1 %v12944_v31, %s10697_s22  ;;  %v9089_v0 = vld [vmem:[#allocation3 + $0x1d0] sm:$0xf0] }
 0x2be   : > { %v4721_v62 = vadd.f32 %v4720_v4, %v4687_v22  ;;  %v4886_v45 = vpop.f32.mrf.mxu0  ;;  %v4920_v14 = vpop.f32.mrf.mxu1  ;;  %3150 = vrot.lane.b32.xlu2 %v12956_v23, %s10697_s22  ;;  %3070 = vrot.lane.b32.xlu0 %v12944_v31, %s10697_s22  ;;  %v9095_v4 = vld [vmem:[#allocation3 + $0x1c8] sm:$0xf] }
 0x2bf   : > { %v2757_v21 = vpop.permute.xlu1 %2756  ;;  %v4921_v9 = vadd.f32 %v4920_v14, %v4886_v45  ;;  %v10208_v14 = vld [vmem:[#allocation3 + $0x1cc] sm:$0xf0] }
 0x2c0   : > { %v12965_v28 = vadd.f32 %v4754_v3, %v4721_v62  ;;  %v2603_v18 = vpop.permute.xlu2 %2602  ;;  %5204 = vmatmul.bf16.gmra.mxu0 %v9072_v8  ;;  %v2770_v27 = vrot.slane %v2757_v21, 4  ;;  %v9097_v3 = vld [vmem:[#allocation3 + $0x1d8] sm:$0xf0]  ;;  %v9088_v8 = vor.u32 %v10208_v14, %v9087_v29 }
 0x2c1   : > { %5238 = vmatmul.bf16.gmra.mxu1 %v9076_v58  ;;  %v2679_v51 = vpop.permute.xlu0 %2678  ;;  %v2613_v6 = vrot.slane %v2603_v18, 4  ;;  %v9092_v58 = vor.u32 %v10206_v60, %v9089_v0 }
 0x2c2   : > { %5272 = vmatmul.bf16.gmra.mxu2 %v9080_v48  ;;  %5306 = vmatmul.bf16.gmra.mxu3 %v9084_v30  ;;  %v2691_v17 = vrot.slane %v2679_v51, 4  ;;  %v2780_v63 = vsel %vm2533_vm4, %v2757_v21, %v2770_v27  ;;  %v9096_v30 = vor.u32 %v10209_v13, %v9095_v4  ;;  %v9100_v21 = vor.u32 %v10207_v7, %v9097_v3  ;;  %v9105_v4 = vld [vmem:[#allocation3 + $0x1f0] sm:$0xf0]  ;;  %v9111_v7 = vld [vmem:[#allocation3 + $0x1e8] sm:$0xf] }
 0x2c3   : > { %v2623_v10 = vsel %vm2533_vm4, %v2603_v18, %v2613_v6  ;;  %2800 = vst [vmem:[#allocation3 + $0x24c] sm:$0xf] %v2780_v63 }
 0x2c4   : > { %v2701_v38 = vsel %vm2533_vm4, %v2679_v51, %v2691_v17  ;;  %2643 = vst [vmem:[#allocation3 + $0x274] sm:$0xf] %v2623_v10 }
 0x2c5   : > { %v4954_v53 = vpop.f32.mrf.mxu2  ;;  %v4988_v1 = vpop.f32.mrf.mxu3  ;;  %2721 = vst [vmem:[#allocation3 + $0x258] sm:$0xf] %v2701_v38  ;;  %2992 = vrot.lane.b32.xlu1 %v12944_v31, %s10697_s22 }
 0x2c6   : > { %v4888_v46 = vpop.f32.mrf.mxu0  ;;  %v4922_v11 = vpop.f32.mrf.mxu1  ;;  %2994 = vrot.lane.b32.xlu2 %v12956_v23, %s10697_s22  ;;  %2914 = vrot.lane.b32.xlu0 %v12944_v31, %s10697_s22  ;;  %v4955_v12 = vadd.f32 %v4954_v53, %v4921_v9 }
 0x2c7   : > { %v2518_v42 = vpop.permute.xlu1 %2517  ;;  %v4923_v56 = vadd.f32 %v4922_v11, %v4888_v46 }
 0x2c8   : > { %v3225_v49 = vpop.permute.xlu2 %3224  ;;  %v2530_v20 = vrot.slane %v2518_v42, 4  ;;  %v4989_v24 = vadd.f32 %v4988_v1, %v4955_v12 }
 0x2c9   : > { %v2516_v22 = vpop.permute.xlu0 %2515  ;;  %v3244_v61 = vrot.slane %v3225_v49, 4 }
 0x2ca   : > { %v2529_v55 = vrot.slane %v2516_v22, 4  ;;  %v2541_v52 = vsel %vm2533_vm4, %v2518_v42, %v2530_v20  ;;  %v5013_v63 = vmax.f32 %v12786_v54, %v4989_v24 }
 0x2cb   : > { %v3254_v59 = vsel %vm2212_vm3, %v3225_v49, %v3244_v61  ;;  %2561 = vst [vmem:[#allocation3 + $0x250] sm:$0xf] %v2541_v52  ;;  %v12992_v49 = vld [vmem:[#allocation2 + $0x74] sm:$0xff] }
 0x2cc   : > { %v2540_v32 = vsel %vm2533_vm4, %v2516_v22, %v2529_v55  ;;  %3274 = vst [vmem:[#allocation3 + $0x3c0] sm:$0xf] %v3254_v59 }
 0x2cd   : > { %v4956_v15 = vpop.f32.mrf.mxu2  ;;  %v4990_v57 = vpop.f32.mrf.mxu3  ;;  %2560 = vst [vmem:[#allocation3 + $0x240] sm:$0xf] %v2540_v32  ;;  %3390 = vrot.lane.b32.xlu1 %v12944_v31, %s10698_s23 }
 0x2ce   : > { %v4957_v5 = vadd.f32 %v4956_v15, %v4923_v56  ;;  %v4891_v62 = vpop.f32.mrf.mxu0  ;;  %v4925_v45 = vpop.f32.mrf.mxu1  ;;  %3392 = vrot.lane.b32.xlu2 %v12956_v23, %s10698_s23  ;;  %3470 = vrot.lane.b32.xlu0 %v12956_v23, %s10698_s23 }
 0x2cf   : > { %v4926_v26 = vadd.f32 %v4925_v45, %v4891_v62  ;;  %v2681_v18 = vpop.permute.xlu1 %2680  ;;  %v10211_v62 = vld [vmem:[#allocation3 + $0x1ec] sm:$0xf] }
 0x2d0   : > { %v4991_v48 = vadd.f32 %v4990_v57, %v4957_v5  ;;  %v2907_v27 = vpop.permute.xlu2 %2906  ;;  %5209 = vmatmul.bf16.gmra.mxu0 %v9088_v8  ;;  %v2692_v51 = vrot.slane %v2681_v18, 4  ;;  %v10212_v57 = vld [vmem:[#allocation3 + $0x1ec] sm:$0xf0]  ;;  %v10213_v5 = vld [vmem:[#allocation3 + $0x1f4] sm:$0xf0] }
 0x2d1   : > { %5243 = vmatmul.bf16.gmra.mxu1 %v9092_v58  ;;  %v2599_v6 = vpop.permute.xlu0 %2598  ;;  %v2925_v17 = vrot.slane %v2907_v27, 4 }
 0x2d2   : > { %v5014_v10 = vmax.f32 %v12797_v19, %v4991_v48  ;;  %5277 = vmatmul.bf16.gmra.mxu2 %v9096_v30  ;;  %5311 = vmatmul.bf16.gmra.mxu3 %v9100_v21  ;;  %v2611_v38 = vrot.slane %v2599_v6, 4  ;;  %v2702_v53 = vsel %vm2533_vm4, %v2681_v18, %v2692_v51  ;;  %v9113_v48 = vld [vmem:[#allocation3 + $0x1f8] sm:$0xf0]  ;;  %v9112_v21 = vor.u32 %v10213_v5, %v9111_v7 }
 0x2d3   : > { %v2935_v1 = vsel %vm1891_vm2, %v2907_v27, %v2925_v17  ;;  %2722 = vst [vmem:[#allocation3 + $0x268] sm:$0xf] %v2702_v53  ;;  %v9116_v18 = vor.u32 %v10211_v62, %v9113_v48  ;;  %v9129_v5 = vld [vmem:[#allocation3 + $0x218] sm:$0xf0] }
 0x2d4   : > { %v12989_v46 = vmax.f32 %v5013_v63, %v5014_v10  ;;  %v2621_v11 = vsel %vm2533_vm4, %v2599_v6, %v2611_v38  ;;  %2955 = vst [vmem:[#allocation3 + $0x330] sm:$0xf] %v2935_v1  ;;  %v13065_v62 = vld [vmem:[%s14579_s4 + $0x28] sm:$0xff] }
 0x2d5   : > { %v4959_v9 = vpop.f32.mrf.mxu2  ;;  %v4993_v42 = vpop.f32.mrf.mxu3  ;;  %2641 = vst [vmem:[#allocation3 + $0x254] sm:$0xf] %v2621_v11  ;;  %3072 = vrot.lane.b32.xlu1 %v12956_v23, %s10697_s22 }
 0x2d6   : > { %v4960_v54 = vadd.f32 %v4959_v9, %v4926_v26  ;;  %v4893_v20 = vpop.f32.mrf.mxu0  ;;  %v4927_v19 = vpop.f32.mrf.mxu1  ;;  %3074 = vrot.lane.b32.xlu2 %v12992_v49, %s10697_s22  ;;  %3152 = vrot.lane.b32.xlu0 %v12992_v49, %s10697_s22  ;;  %v10210_v26 = vld [vmem:[#allocation3 + $0x1e4] sm:$0xf] }
 0x2d7   : > { %v4928_v22 = vadd.f32 %v4927_v19, %v4893_v20  ;;  %v2763_v12 = vpop.permute.xlu1 %2762  ;;  %v9108_v58 = vor.u32 %v10210_v26, %v9105_v4  ;;  %v13022_v20 = vld [vmem:[#allocation2 + $0x94] sm:$0xff]  ;;  %v9119_v26 = vld [vmem:[#allocation3 + $0x200] sm:$0xf] }
 0x2d8   : > { %v4994_v61 = vadd.f32 %v4993_v42, %v4960_v54  ;;  %v3307_v55 = vpop.permute.xlu2 %3306  ;;  %v2773_v52 = vrot.slane %v2763_v12, 4  ;;  %v13020_v54 = vld [vmem:[#allocation2 + $0x84] sm:$0xff] }
 0x2d9   : > { %v2761_v59 = vpop.permute.xlu0 %2760  ;;  %v3325_v13 = vrot.slane %v3307_v55, 4 }
 0x2da   : > { %v5015_v56 = vmax.f32 %v12810_v35, %v4994_v61  ;;  %v2772_v32 = vrot.slane %v2761_v59, 4  ;;  %v2783_v29 = vsel %vm2533_vm4, %v2763_v12, %v2773_v52  ;;  %v9103_v35 = vld [vmem:[#allocation3 + $0x1e0] sm:$0xf] }
 0x2db   : > { %v3335_v0 = vsel %vm2212_vm3, %v3307_v55, %v3325_v13  ;;  %2803 = vst [vmem:[#allocation3 + $0x27c] sm:$0xf] %v2783_v29  ;;  %v9104_v8 = vor.u32 %v10212_v57, %v9103_v35  ;;  %v9127_v29 = vld [vmem:[#allocation3 + $0x208] sm:$0xf] }
 0x2dc   : > { %v2782_v15 = vsel %vm2533_vm4, %v2761_v59, %v2772_v32  ;;  %3355 = vst [vmem:[#allocation3 + $0x3d4] sm:$0xf] %v3335_v0  ;;  %v10214_v32 = vld [vmem:[#allocation3 + $0x204] sm:$0xf]  ;;  %v10216_v0 = vld [vmem:[#allocation3 + $0x20c] sm:$0xf0] }
 0x2dd   : > { %v4961_v3 = vpop.f32.mrf.mxu2  ;;  %v4995_v24 = vpop.f32.mrf.mxu3  ;;  %2802 = vst [vmem:[#allocation3 + $0x26c] sm:$0xf] %v2782_v15  ;;  %2916 = vrot.lane.b32.xlu1 %v12956_v23, %s10697_s22  ;;  %v13059_v15 = vld [vmem:[%s14579_s4 + $0x68] sm:$0xff]  ;;  %v9120_v48 = vor.u32 %v10216_v0, %v9119_v26 }
 0x2de   : > { %v4962_v45 = vadd.f32 %v4961_v3, %v4928_v22  ;;  %v4896_v14 = vpop.f32.mrf.mxu0  ;;  %v4930_v60 = vpop.f32.mrf.mxu1  ;;  %2918 = vrot.lane.b32.xlu2 %v12992_v49, %s10697_s22  ;;  %2996 = vrot.lane.b32.xlu0 %v12992_v49, %s10697_s22 }
 0x2df   : > { %v2601_v27 = vpop.permute.xlu1 %2600 }
 0x2e0   : > { %v4996_v30 = vadd.f32 %v4995_v24, %v4962_v45  ;;  %v3145_v51 = vpop.permute.xlu2 %3144  ;;  %5445 = vmatmul.bf16.vlgmr.msrb.gmra.mxu0 %v9104_v8  ;;  %v2612_v6 = vrot.slane %v2601_v27, 4  ;;  %v10215_v24 = vld [vmem:[#allocation3 + $0x20c] sm:$0xf]  ;;  %v9121_v8 = vld [vmem:[#allocation3 + $0x210] sm:$0xf0] }
 0x2e1   : > { %5479 = vmatmul.bf16.vlgmr.msrb.gmra.mxu1 %v9108_v58  ;;  %v2522_v17 = vpop.permute.xlu0 %2521  ;;  %v3164_v63 = vrot.slane %v3145_v51, 4  ;;  %5996 = vmatpush.bf16.msrb.mxu0 %v12847_v33 }
 0x2e2   : > { %v5016_v10 = vmax.f32 %v12821_v25, %v4996_v30  ;;  %5513 = vmatmul.bf16.vlgmr.msrb.gmra.mxu2 %v9112_v21  ;;  %5547 = vmatmul.bf16.vlgmr.msrb.gmra.mxu3 %v9116_v18  ;;  %v2532_v38 = vrot.slane %v2522_v17, 4  ;;  %v2622_v53 = vsel %vm2533_vm4, %v2601_v27, %v2612_v6  ;;  %v9124_v30 = vor.u32 %v10214_v32, %v9121_v8  ;;  %v10217_v21 = vld [vmem:[#allocation3 + $0x214] sm:$0xf0]  ;;  %v13077_v18 = vld [vmem:[%s14579_s4 + $0xa0] sm:$0xff]  ;;  %v9135_v8 = vld [vmem:[#allocation3 + $0x220] sm:$0xf] }
 0x2e3   : > { %v3174_v1 = vsel %vm1891_vm2, %v3145_v51, %v3164_v63  ;;  %6064 = vmatpush.bf16.msrb.mxu2 %v12828_v2  ;;  %6098 = vmatpush.bf16.msrb.mxu3 %v12834_v16  ;;  %2642 = vst [vmem:[#allocation3 + $0x264] sm:$0xf] %v2622_v53  ;;  %v13027_v2 = vld [vmem:[%s14580_s5] ss:$0 sm:$0xff]  ;;  %v9128_v51 = vor.u32 %v10217_v21, %v9127_v29  ;;  %v13135_v29 = vld [vmem:[%s14579_s4 + $0x18] sm:$0xff] }
 0x2e4   : > { %v13015_v11 = vmax.f32 %v5015_v56, %v5016_v10  ;;  %v2543_v9 = vsel %vm2533_vm4, %v2522_v17, %v2532_v38  ;;  %6030 = vmatpush.bf16.msrb.mxu1 %v12841_v36  ;;  %3194 = vst [vmem:[#allocation3 + $0x32c] sm:$0xf] %v3174_v1  ;;  %v4931_v36 = vadd.f32 %v4930_v60, %v4896_v14  ;;  %v13083_v10 = vld [vmem:[%s14579_s4 + $0xe0] sm:$0xff] }
 0x2e5   : > { %v4964_v25 = vpop.f32.mrf.mxu2  ;;  %v4998_v42 = vpop.f32.mrf.mxu3  ;;  %2563 = vst [vmem:[#allocation3 + $0x270] sm:$0xf] %v2543_v9  ;;  %3154 = vrot.lane.b32.xlu1 %v13020_v54, %s10697_s22  ;;  %5997 = vmatpush.bf16.msrb.mxu0 %v12879_v43  ;;  %v5027_v13 = vadd.f32 %v13027_v2, %v12989_v46  ;;  %v13053_v46 = vld [vmem:[%s14579_s4 + $0xe8] sm:$0xff]  ;;  %v9132_v6 = vor.u32 %v10215_v24, %v9129_v5  ;;  %v13089_v38 = vld [vmem:[%s14579_s4 + $0x60] sm:$0xff] }
 0x2e6   : > { %v4898_v16 = vpop.f32.mrf.mxu0  ;;  %v4932_v19 = vpop.f32.mrf.mxu1  ;;  %3156 = vrot.lane.b32.xlu2 %v13022_v20, %s10697_s22  ;;  %3076 = vrot.lane.b32.xlu0 %v13020_v54, %s10697_s22  ;;  %v4965_v52 = vadd.f32 %v4964_v25, %v4931_v36  ;;  %v9137_v21 = vld [vmem:[#allocation3 + $0x230] sm:$0xf0] }
 0x2e7   : > { %6065 = vmatpush.bf16.msrb.mxu2 %v12859_v34  ;;  %v2905_v33 = vpop.permute.xlu1 %2904  ;;  %6099 = vmatpush.bf16.msrb.mxu3 %v12867_v37  ;;  %v13046_v37 = vld [vmem:[%s14579_s4 + $0xa8] sm:$0xff]  ;;  %v5028_v57 = vmax.f32 %v5027_v13, 0.0 }
 0x2e8   : > { %v2989_v22 = vpop.permute.xlu2 %2988  ;;  %6031 = vmatpush.bf16.msrb.mxu1 %v12873_v41  ;;  %v2924_v61 = vrot.slane %v2905_v33, 4  ;;  %v4933_v41 = vadd.f32 %v4932_v19, %v4898_v16  ;;  %v4999_v45 = vadd.f32 %v4998_v42, %v4965_v52 }
 0x2e9   : > { %v2985_v12 = vpop.permute.xlu0 %2984  ;;  %v3006_v55 = vrot.slane %v2989_v22, 4  ;;  %5998 = vmatpush.bf16.msrb.mxu0 %v13065_v62  ;;  %v5029_v58 = vpack.c.bf16 %v5028_v57, %v5028_v57  ;;  %v13143_v57 = vld [vmem:[%s14579_s4 + $0x90] sm:$0xff] }
 0x2ea   : > { %v3004_v59 = vrot.slane %v2985_v12, 4  ;;  %v2934_v56 = vsel %vm1891_vm2, %v2905_v33, %v2924_v61  ;;  %v5017_v25 = vmax.f32 %v12862_v44, %v4999_v45  ;;  %v13100_v33 = vld [vmem:[%s14579_s4 + $0x20] sm:$0xff]  ;;  %v13106_v44 = vld [vmem:[%s14579_s4 + $0x98] sm:$0xff]  ;;  %v13155_v45 = vld [vmem:[%s14579_s4 + $0x50] sm:$0xff] }
 0x2eb   : > { %v3016_v34 = vsel %vm1891_vm2, %v2989_v22, %v3006_v55  ;;  %6066 = vmatpush.bf16.msrb.mxu2 %v13046_v37  ;;  %2954 = vst [vmem:[#allocation3 + $0x320] sm:$0xf] %v2934_v56  ;;  %6100 = vmatpush.bf16.msrb.mxu3 %v13053_v46  ;;  %v13115_v61 = vld [vmem:[%s14579_s4 + $0xd8] sm:$0xff] }
 0x2ec   : > { %v3014_v43 = vsel %vm1891_vm2, %v2985_v12, %v3004_v59  ;;  %6032 = vmatpush.bf16.msrb.mxu1 %v13059_v15  ;;  %3036 = vst [vmem:[#allocation3 + $0x344] sm:$0xf] %v3016_v34  ;;  %v13121_v12 = vld [vmem:[%s14579_s4 + $0x58] sm:$0xff]  ;;  %v13124_v59 = vld [vmem:[#allocation2 + $0xa4] sm:$0xff] }
 0x2ed   : > { %v4966_v4 = vpop.f32.mrf.mxu2  ;;  %v5000_v3 = vpop.f32.mrf.mxu3  ;;  %3034 = vst [vmem:[#allocation3 + $0x324] sm:$0xf] %v3014_v43  ;;  %2998 = vrot.lane.b32.xlu1 %v13020_v54, %s10697_s22  ;;  %5999 = vmatpush.bf16.msrb.mxu0 %v13100_v33 }
 0x2ee   : > { %v4967_v14 = vadd.f32 %v4966_v4, %v4933_v41  ;;  %v4901_v60 = vpop.f32.mrf.mxu0  ;;  %v4935_v35 = vpop.f32.mrf.mxu1  ;;  %3000 = vrot.lane.b32.xlu2 %v13022_v20, %s10697_s22  ;;  %2920 = vrot.lane.b32.xlu0 %v13020_v54, %s10697_s22  ;;  %5031 = vst.msk [vmem:[#allocation4] sm:$0xf] %vm5030_vm5, %v5029_v58  ;;  %v13149_v4 = vld [vmem:[%s14579_s4 + $0xd0] sm:$0xff]  ;;  %v10221_v58 = vld [vmem:[#allocation3 + $0x234] sm:$0xf0] }
 0x2ef   : > { %v4936_v7 = vadd.f32 %v4935_v35, %v4901_v60  ;;  %6067 = vmatpush.bf16.msrb.mxu2 %v13077_v18  ;;  %v3305_v17 = vpop.permute.xlu1 %3304  ;;  %6101 = vmatpush.bf16.msrb.mxu3 %v13083_v10 }
 0x2f0   : > { %v5001_v27 = vadd.f32 %v5000_v3, %v4967_v14  ;;  %v3387_v63 = vpop.permute.xlu2 %3386  ;;  %6033 = vmatpush.bf16.msrb.mxu1 %v13089_v38  ;;  %5450 = vmatmul.bf16.gmra.mxu0 %v9120_v48  ;;  %v3324_v53 = vrot.slane %v3305_v17, 4  ;;  %v13167_v48 = vld [vmem:[%s14579_s4 + $0x10] sm:$0xff] }
 0x2f1   : > { %5484 = vmatmul.bf16.gmra.mxu1 %v9124_v30  ;;  %v3227_v1 = vpop.permute.xlu0 %3226  ;;  %v3405_v9 = vrot.slane %v3387_v63, 4  ;;  %6000 = vmatpush.bf16.msrb.mxu0 %v13135_v29 }
 0x2f2   : > { %v5018_v42 = vmax.f32 %v12896_v47, %v5001_v27  ;;  %5518 = vmatmul.bf16.gmra.mxu2 %v9128_v51  ;;  %5552 = vmatmul.bf16.gmra.mxu3 %v9132_v6  ;;  %v3245_v16 = vrot.slane %v3227_v1, 4  ;;  %v3334_v19 = vsel %vm2212_vm3, %v3305_v17, %v3324_v53  ;;  %v13174_v27 = vld [vmem:[%s14579_s4 + $0x88] sm:$0xff] }
 0x2f3   : > { %v3415_v36 = vsel %vm2212_vm3, %v3387_v63, %v3405_v9  ;;  %6068 = vmatpush.bf16.msrb.mxu2 %v13106_v44  ;;  %3354 = vst [vmem:[#allocation3 + $0x3c4] sm:$0xf] %v3334_v19  ;;  %6102 = vmatpush.bf16.msrb.mxu3 %v13115_v61  ;;  %v13180_v51 = vld [vmem:[%s14579_s4 + $0xc8] sm:$0xff]  ;;  %v9143_v63 = vld [vmem:[#allocation3 + $0x228] sm:$0xf] }
 0x2f4   : > { %v13109_v47 = vmax.f32 %v5017_v25, %v5018_v42  ;;  %v3255_v22 = vsel %vm2212_vm3, %v3227_v1, %v3245_v16  ;;  %6034 = vmatpush.bf16.msrb.mxu1 %v13121_v12  ;;  %3435 = vst [vmem:[#allocation3 + $0x3d8] sm:$0xf] %v3415_v36  ;;  %v9145_v53 = vld [vmem:[#allocation3 + $0x238] sm:$0xf0]  ;;  %v10220_v16 = vld [vmem:[#allocation3 + $0x22c] sm:$0xf0] }
 0x2f5   : > { %v4969_v55 = vpop.f32.mrf.mxu2  ;;  %v5003_v52 = vpop.f32.mrf.mxu3  ;;  %3275 = vst [vmem:[#allocation3 + $0x3d0] sm:$0xf] %v3255_v22  ;;  %3078 = vrot.lane.b32.xlu1 %v13022_v20, %s10697_s22  ;;  %6001 = vmatpush.bf16.msrb.mxu0 %v13167_v48  ;;  %v13186_v1 = vld [vmem:[%s14579_s4 + $0x48] sm:$0xff]  ;;  %v9136_v19 = vor.u32 %v10220_v16, %v9135_v8  ;;  %v10219_v22 = vld [vmem:[#allocation3 + $0x22c] sm:$0xf]  ;;  %v13219_v8 = vld [vmem:[%s14579_s4] sm:$0xff] }
 0x2f6   : > { %v4970_v13 = vadd.f32 %v4969_v55, %v4936_v7  ;;  %v4903_v56 = vpop.f32.mrf.mxu0  ;;  %v4937_v34 = vpop.f32.mrf.mxu1  ;;  %3080 = vrot.lane.b32.xlu2 %v13124_v59, %s10697_s22  ;;  %3158 = vrot.lane.b32.xlu0 %v13124_v59, %s10697_s22  ;;  %v13162_v7 = vld [vmem:[#allocation2 + $0xc4] sm:$0xff] }
 0x2f7   : > { %v4938_v32 = vadd.f32 %v4937_v34, %v4903_v56  ;;  %v2987_v43 = vpop.permute.xlu1 %2986  ;;  %6069 = vmatpush.bf16.msrb.mxu2 %v13143_v57  ;;  %6103 = vmatpush.bf16.msrb.mxu3 %v13149_v4  ;;  %v13198_v55 = vld [vmem:[%s14579_s4 + $0x8] sm:$0xff]  ;;  %v9148_v56 = vor.u32 %v10219_v22, %v9145_v53 }
 0x2f8   : > { %v13138_v41 = vadd.f32 %v5003_v52, %v4970_v13  ;;  %v3231_v0 = vpop.permute.xlu2 %3230  ;;  %v3005_v24 = vrot.slane %v2987_v43, 4  ;;  %6035 = vmatpush.bf16.msrb.mxu1 %v13155_v45  ;;  %v9144_v13 = vor.u32 %v10221_v58, %v9143_v63  ;;  %v13225_v58 = vld [vmem:[%s14579_s4 + $0x40] sm:$0xff] }
 0x2f9   : > { %v3065_v3 = vpop.permute.xlu0 %3064  ;;  %v3247_v5 = vrot.slane %v3231_v0, 4  ;;  %6002 = vmatpush.bf16.msrb.mxu0 %v13198_v55 }
 0x2fa   : > { %v5019_v14 = vmax.f32 %v12916_v40, %v13138_v41  ;;  %v3084_v60 = vrot.slane %v3065_v3, 4  ;;  %v3015_v35 = vsel %vm1891_vm2, %v2987_v43, %v3005_v24  ;;  %v10218_v40 = vld [vmem:[#allocation3 + $0x224] sm:$0xf]  ;;  %v13204_v41 = vld [vmem:[%s14579_s4 + $0x80] sm:$0xff] }
 0x2fb   : > { %v3257_v26 = vsel %vm2212_vm3, %v3231_v0, %v3247_v5  ;;  %3035 = vst [vmem:[#allocation3 + $0x334] sm:$0xf] %v3015_v35  ;;  %6070 = vmatpush.bf16.msrb.mxu2 %v13174_v27  ;;  %6104 = vmatpush.bf16.msrb.mxu3 %v13180_v51  ;;  %v9140_v36 = vor.u32 %v10218_v40, %v9137_v21  ;;  %v13210_v43 = vld [vmem:[%s14579_s4 + $0xc0] sm:$0xff] }
 0x2fc   : > { %v3094_v30 = vsel %vm1891_vm2, %v3065_v3, %v3084_v60  ;;  %6036 = vmatpush.bf16.msrb.mxu1 %v13186_v1  ;;  %3277 = vst [vmem:[#allocation3 + $0x3f0] sm:$0xf] %v3257_v26 }
 0x2fd   : > { %v4971_v6 = vpop.f32.mrf.mxu2  ;;  %v5005_v17 = vpop.f32.mrf.mxu3  ;;  %3114 = vst [vmem:[#allocation3 + $0x328] sm:$0xf] %v3094_v30  ;;  %2922 = vrot.lane.b32.xlu1 %v13022_v20, %s10697_s22  ;;  %6003 = vmatpush.bf16.msrb.mxu0 %v13219_v8 }
 0x2fe   : > { %v4972_v9 = vadd.f32 %v4971_v6, %v4938_v32  ;;  %v4906_v25 = vpop.f32.mrf.mxu0  ;;  %v4940_v42 = vpop.f32.mrf.mxu1  ;;  %3162 = vrot.lane.b32.xlu2 %v13162_v7, %s10697_s22  ;;  %3002 = vrot.lane.b32.xlu0 %v13124_v59, %s10697_s22  ;;  %v13231_v6 = vld [vmem:[#allocation2 + $0xb4] sm:$0xff] }
 0x2ff   : > { %v3385_v34 = vpop.permute.xlu1 %3384  ;;  %6071 = vmatpush.bf16.msrb.mxu2 %v13204_v41  ;;  %6105 = vmatpush.bf16.msrb.mxu3 %v13210_v43 }
 0x300   : > { %v5006_v52 = vadd.f32 %v5005_v17, %v4972_v9  ;;  %v3069_v32 = vpop.permute.xlu2 %3068  ;;  %5455 = vmatmul.bf16.gmra.mxu0 %v9136_v19  ;;  %v3404_v0 = vrot.slane %v3385_v34, 4  ;;  %6037 = vmatpush.bf16.msrb.mxu1 %v13225_v58 }
 0x301   : > { %5489 = vmatmul.bf16.gmra.mxu1 %v9140_v36  ;;  %v2909_v3 = vpop.permute.xlu0 %2908  ;;  %v3086_v24 = vrot.slane %v3069_v32, 4 }
 0x302   : > { %v5020_v5 = vmax.f32 %v12935_v50, %v5006_v52  ;;  %5523 = vmatmul.bf16.gmra.mxu2 %v9144_v13  ;;  %5557 = vmatmul.bf16.gmra.mxu3 %v9148_v56  ;;  %v2926_v60 = vrot.slane %v2909_v3, 4  ;;  %v3414_v35 = vsel %vm2212_vm3, %v3385_v34, %v3404_v0  ;;  %v5043_v13 = vadd.f32 %v13027_v2, %v13109_v47  ;;  %v10224_v0 = vld [vmem:[#allocation3 + $0x24c] sm:$0xf0] }
 0x303   : > { %v3096_v26 = vsel %vm1891_vm2, %v3069_v32, %v3086_v24  ;;  %3434 = vst [vmem:[#allocation3 + $0x3c8] sm:$0xf] %v3414_v35  ;;  %v9151_v32 = vld [vmem:[#allocation3 + $0x240] sm:$0xf]  ;;  %v10225_v35 = vld [vmem:[#allocation3 + $0x254] sm:$0xf0] }
 0x304   : > { %v13228_v50 = vmax.f32 %v5019_v14, %v5020_v5  ;;  %v2936_v30 = vsel %vm1891_vm2, %v2909_v3, %v2926_v60  ;;  %3116 = vst [vmem:[#allocation3 + $0x348] sm:$0xf] %v3096_v26  ;;  %v4941_v14 = vadd.f32 %v4940_v42, %v4906_v25  ;;  %v9153_v42 = vld [vmem:[#allocation3 + $0x250] sm:$0xf0]  ;;  %v5044_v24 = vmax.f32 %v5043_v13, 0.0 }
 0x305   : > { %v4974_v40 = vpop.f32.mrf.mxu2  ;;  %v5008_v21 = vpop.f32.mrf.mxu3  ;;  %2956 = vst [vmem:[#allocation3 + $0x340] sm:$0xf] %v2936_v30  ;;  %3160 = vrot.lane.b32.xlu1 %v13231_v6, %s10697_s22  ;;  %v10223_v26 = vld [vmem:[#allocation3 + $0x24c] sm:$0xf] }
 0x306   : > { %v4908_v17 = vpop.f32.mrf.mxu0  ;;  %v4942_v63 = vpop.f32.mrf.mxu1  ;;  %3474 = vrot.lane.b32.xlu2 %v13020_v54, %s10698_s23  ;;  %3082 = vrot.lane.b32.xlu0 %v13231_v6, %s10697_s22  ;;  %v4975_v22 = vadd.f32 %v4974_v40, %v4941_v14 }
 0x307   : > { %v3229_v53 = vpop.permute.xlu1 %3228  ;;  %v4943_v3 = vadd.f32 %v4942_v63, %v4908_v17  ;;  %v5045_v17 = vpack.c.bf16 %v5044_v24, %v5044_v24 }
 0x308   : > { %v2913_v9 = vpop.permute.xlu2 %2912  ;;  %v3246_v16 = vrot.slane %v3229_v53, 4  ;;  %v5009_v30 = vadd.f32 %v5008_v21, %v4975_v22 }
 0x309   : > { %v3465_v19 = vpop.permute.xlu0 %3464  ;;  %v2928_v36 = vrot.slane %v2913_v9, 4  ;;  %5046 = vst.msk [vmem:[#allocation4 + $0x4] sm:$0xf] %vm5030_vm5, %v5045_v17 }
 0x30a   : > { %v3484_v52 = vrot.slane %v3465_v19, 4  ;;  %v3256_v56 = vsel %vm2212_vm3, %v3229_v53, %v3246_v16  ;;  %v10222_v53 = vld [vmem:[#allocation3 + $0x244] sm:$0xf] }
 0x30b   : > { %v2938_v34 = vsel %vm1891_vm2, %v2913_v9, %v2928_v36  ;;  %3276 = vst [vmem:[#allocation3 + $0x3e0] sm:$0xf] %v3256_v56  ;;  %v9152_v9 = vor.u32 %v10224_v0, %v9151_v32  ;;  %v9156_v16 = vor.u32 %v10222_v53, %v9153_v42  ;;  %v9161_v36 = vld [vmem:[#allocation3 + $0x258] sm:$0xf0]  ;;  %v5021_v32 = vmax.f32 %v12952_v39, %v5009_v30 }
 0x30c   : > { %v3494_v25 = vsel %vm2212_vm3, %v3465_v19, %v3484_v52  ;;  %2958 = vst [vmem:[#allocation3 + $0x360] sm:$0xf] %v2938_v34  ;;  %v9159_v19 = vld [vmem:[#allocation3 + $0x248] sm:$0xf]  ;;  %v9164_v52 = vor.u32 %v10223_v26, %v9161_v36 }
 0x30d   : > { %v4976_v5 = vpop.f32.mrf.mxu2  ;;  %v5010_v60 = vpop.f32.mrf.mxu3  ;;  %3514 = vst [vmem:[#allocation3 + $0x3cc] sm:$0xf] %v3494_v25  ;;  %3472 = vrot.lane.b32.xlu1 %v12992_v49, %s10698_s23  ;;  %v9160_v22 = vor.u32 %v10225_v35, %v9159_v19 }
 0x30e   : > { %v4977_v40 = vadd.f32 %v4976_v5, %v4943_v3  ;;  %v5190_v47 = vpop.f32.mrf.mxu0  ;;  %v5224_v14 = vpop.f32.mrf.mxu1  ;;  %3312 = vrot.lane.b32.xlu2 %v12944_v31, %s10698_s23  ;;  %3394 = vrot.lane.b32.xlu0 %v12992_v49, %s10698_s23 }
 0x30f   : > { %v5225_v63 = vadd.f32 %v5224_v14, %v5190_v47  ;;  %v3067_v13 = vpop.permute.xlu1 %3066 }
 0x310   : > { %v5011_v21 = vadd.f32 %v5010_v60, %v4977_v40  ;;  %v3469_v56 = vpop.permute.xlu2 %3468  ;;  %5460 = vmatmul.bf16.gmra.mxu0 %v9152_v9  ;;  %v3085_v3 = vrot.slane %v3067_v13, 4 }
 0x311   : > { %5494 = vmatmul.bf16.gmra.mxu1 %v9156_v16  ;;  %v3309_v34 = vpop.permute.xlu0 %3308  ;;  %v3486_v25 = vrot.slane %v3469_v56, 4 }
 0x312   : > { %v5022_v0 = vmax.f32 %v12965_v28, %v5011_v21  ;;  %5528 = vmatmul.bf16.gmra.mxu2 %v9160_v22  ;;  %5562 = vmatmul.bf16.gmra.mxu3 %v9164_v52  ;;  %v3326_v42 = vrot.slane %v3309_v34, 4  ;;  %v3095_v24 = vsel %vm1891_vm2, %v3067_v13, %v3085_v3  ;;  %v13260_v28 = vld [vmem:[#allocation2 + $0x44] sm:$0xff]  ;;  %v9175_v22 = vld [vmem:[#allocation3 + $0x268] sm:$0xf]  ;;  %v10228_v13 = vld [vmem:[#allocation3 + $0x26c] sm:$0xf0] }
 0x313   : > { %v3496_v5 = vsel %vm2212_vm3, %v3469_v56, %v3486_v25  ;;  %3115 = vst [vmem:[#allocation3 + $0x338] sm:$0xf] %v3095_v24  ;;  %v10226_v56 = vld [vmem:[#allocation3 + $0x264] sm:$0xf]  ;;  %v10227_v25 = vld [vmem:[#allocation3 + $0x26c] sm:$0xf] }
 0x314   : > { %v13255_v60 = vmax.f32 %v5021_v32, %v5022_v0  ;;  %v3336_v35 = vsel %vm2212_vm3, %v3309_v34, %v3326_v42  ;;  %3516 = vst [vmem:[#allocation3 + $0x3ec] sm:$0xf] %v3496_v5  ;;  %v9177_v32 = vld [vmem:[#allocation3 + $0x278] sm:$0xf0]  ;;  %v9167_v5 = vld [vmem:[#allocation3 + $0x260] sm:$0xf] }
 0x315   : > { %v5258_v26 = vpop.f32.mrf.mxu2  ;;  %v5292_v40 = vpop.f32.mrf.mxu3  ;;  %3356 = vst [vmem:[#allocation3 + $0x3e4] sm:$0xf] %v3336_v35  ;;  %3234 = vrot.lane.b32.xlu1 %v12944_v31, %s10698_s23  ;;  %v9169_v35 = vld [vmem:[#allocation3 + $0x270] sm:$0xf0] }
 0x316   : > { %v5259_v47 = vadd.f32 %v5258_v26, %v5225_v63  ;;  %v5192_v14 = vpop.f32.mrf.mxu0  ;;  %v5226_v39 = vpop.f32.mrf.mxu1  ;;  %3398 = vrot.lane.b32.xlu2 %v13022_v20, %s10698_s23  ;;  %3232 = vrot.lane.b32.xlu0 %v13260_v28, %s10698_s23 }
 0x317   : > { %v5227_v30 = vadd.f32 %v5226_v39, %v5192_v14  ;;  %v2911_v17 = vpop.permute.xlu1 %2910  ;;  %v10229_v14 = vld [vmem:[#allocation3 + $0x274] sm:$0xf0] }
 0x318   : > { %v13266_v53 = vadd.f32 %v5292_v40, %v5259_v47  ;;  %v3151_v9 = vpop.permute.xlu2 %3150  ;;  %v2927_v63 = vrot.slane %v2911_v17, 4  ;;  %v9168_v40 = vor.u32 %v10228_v13, %v9167_v5  ;;  %v9172_v47 = vor.u32 %v10226_v56, %v9169_v35 }
 0x319   : > { %v3147_v16 = vpop.permute.xlu0 %3146  ;;  %v3167_v19 = vrot.slane %v3151_v9, 4 }
 0x31a   : > { %v3165_v36 = vrot.slane %v3147_v16, 4  ;;  %v2937_v21 = vsel %vm1891_vm2, %v2911_v17, %v2927_v63  ;;  %v9180_v17 = vor.u32 %v10227_v25, %v9177_v32 }
 0x31b   : > { %v3177_v31 = vsel %vm1891_vm2, %v3151_v9, %v3167_v19  ;;  %2957 = vst [vmem:[#allocation3 + $0x350] sm:$0xf] %v2937_v21 }
 0x31c   : > { %v3175_v52 = vsel %vm1891_vm2, %v3147_v16, %v3165_v36  ;;  %3197 = vst [vmem:[#allocation3 + $0x35c] sm:$0xf] %v3177_v31 }
 0x31d   : > { %v5260_v34 = vpop.f32.mrf.mxu2  ;;  %v5294_v3 = vpop.f32.mrf.mxu3  ;;  %3195 = vst [vmem:[#allocation3 + $0x33c] sm:$0xf] %v3175_v52  ;;  %3396 = vrot.lane.b32.xlu1 %v13020_v54, %s10698_s23 }
 0x31e   : > { %v5261_v0 = vadd.f32 %v5260_v34, %v5227_v30  ;;  %v5195_v42 = vpop.f32.mrf.mxu0  ;;  %v5229_v24 = vpop.f32.mrf.mxu1  ;;  %3236 = vrot.lane.b32.xlu2 %v12956_v23, %s10698_s23  ;;  %3314 = vrot.lane.b32.xlu0 %v12956_v23, %s10698_s23  ;;  %v9176_v30 = vor.u32 %v10229_v14, %v9175_v22 }
 0x31f   : > { %v5230_v26 = vadd.f32 %v5229_v24, %v5195_v42  ;;  %v3467_v9 = vpop.permute.xlu1 %3466 }
 0x320   : > { %v13277_v39 = vadd.f32 %v5294_v3, %v5261_v0  ;;  %v2995_v63 = vpop.permute.xlu2 %2994  ;;  %5465 = vmatmul.bf16.gmra.mxu0 %v9168_v40  ;;  %v3485_v16 = vrot.slane %v3467_v9, 4  ;;  %v5057_v40 = vadd.f32 %v13027_v2, %v13255_v60  ;;  %v9183_v2 = vld [vmem:[#allocation3 + $0x280] sm:$0xf]  ;;  %v10230_v60 = vld [vmem:[#allocation3 + $0x284] sm:$0xf] }
 0x321   : > { %5499 = vmatmul.bf16.gmra.mxu1 %v9172_v47  ;;  %v2991_v19 = vpop.permute.xlu0 %2990  ;;  %v3009_v36 = vrot.slane %v2995_v63, 4 }
 0x322   : > { %5533 = vmatmul.bf16.gmra.mxu2 %v9176_v30  ;;  %5567 = vmatmul.bf16.gmra.mxu3 %v9180_v17  ;;  %v3007_v21 = vrot.slane %v2991_v19, 4  ;;  %v3495_v31 = vsel %vm2212_vm3, %v3467_v9, %v3485_v16  ;;  %v10232_v30 = vld [vmem:[#allocation3 + $0x28c] sm:$0xf0]  ;;  %v9185_v9 = vld [vmem:[#allocation3 + $0x290] sm:$0xf0] }
 0x323   : > { %v3019_v52 = vsel %vm1891_vm2, %v2995_v63, %v3009_v36  ;;  %3515 = vst [vmem:[#allocation3 + $0x3dc] sm:$0xf] %v3495_v31  ;;  %v5058_v63 = vmax.f32 %v5057_v40, 0.0  ;;  %v10233_v36 = vld [vmem:[#allocation3 + $0x294] sm:$0xf0] }
 0x324   : > { %v3017_v23 = vsel %vm1891_vm2, %v2991_v19, %v3007_v21  ;;  %3039 = vst [vmem:[#allocation3 + $0x374] sm:$0xf] %v3019_v52  ;;  %v9193_v21 = vld [vmem:[#allocation3 + $0x298] sm:$0xf0] }
 0x325   : > { %v5263_v13 = vpop.f32.mrf.mxu2  ;;  %v5297_v22 = vpop.f32.mrf.mxu3  ;;  %3037 = vst [vmem:[#allocation3 + $0x354] sm:$0xf] %v3017_v23  ;;  %3478 = vrot.lane.b32.xlu1 %v13124_v59, %s10698_s23 }
 0x326   : > { %v5264_v56 = vadd.f32 %v5263_v13, %v5230_v26  ;;  %v5197_v34 = vpop.f32.mrf.mxu0  ;;  %v5231_v3 = vpop.f32.mrf.mxu1  ;;  %3318 = vrot.lane.b32.xlu2 %v13020_v54, %s10698_s23  ;;  %3476 = vrot.lane.b32.xlu0 %v13022_v20, %s10698_s23  ;;  %v5059_v13 = vpack.c.bf16 %v5058_v63, %v5058_v63 }
 0x327   : > { %v5232_v25 = vadd.f32 %v5231_v3, %v5197_v34  ;;  %v3311_v0 = vpop.permute.xlu1 %3310  ;;  %v9188_v34 = vor.u32 %v10230_v60, %v9185_v9  ;;  %v9191_v3 = vld [vmem:[#allocation3 + $0x288] sm:$0xf]  ;;  %v13340_v60 = vld [vmem:[%s14579_s4 + $0xb0] sm:$0xff] }
 0x328   : > { %v13288_v32 = vadd.f32 %v5297_v22, %v5264_v56  ;;  %v3393_v42 = vpop.permute.xlu2 %3392  ;;  %v3327_v24 = vrot.slane %v3311_v0, 4  ;;  %v9184_v56 = vor.u32 %v10232_v30, %v9183_v2  ;;  %5060 = vst.msk [vmem:[#allocation4 + $0x8] sm:$0xf] %vm5030_vm5, %v5059_v13  ;;  %v13315_v9 = vld [vmem:[%s14579_s4 + $0xf8] sm:$0xff] }
 0x329   : > { %v3389_v5 = vpop.permute.xlu0 %3388  ;;  %v3408_v35 = vrot.slane %v3393_v42, 4 }
 0x32a   : > { %v3406_v26 = vrot.slane %v3389_v5, 4  ;;  %v3337_v47 = vsel %vm2212_vm3, %v3311_v0, %v3327_v24  ;;  %v10231_v0 = vld [vmem:[#allocation3 + $0x28c] sm:$0xf] }
 0x32b   : > { %v3418_v14 = vsel %vm2212_vm3, %v3393_v42, %v3408_v35  ;;  %3357 = vst [vmem:[#allocation3 + $0x3f4] sm:$0xf] %v3337_v47  ;;  %v9192_v42 = vor.u32 %v10233_v36, %v9191_v3  ;;  %v9196_v24 = vor.u32 %v10231_v0, %v9193_v21 }
 0x32c   : > { %v3416_v17 = vsel %vm2212_vm3, %v3389_v5, %v3406_v26  ;;  %3438 = vst [vmem:[#allocation3 + $0x408] sm:$0xf] %v3418_v14 }
 0x32d   : > { %v5265_v16 = vpop.f32.mrf.mxu2  ;;  %v5299_v19 = vpop.f32.mrf.mxu3  ;;  %3436 = vst [vmem:[#allocation3 + $0x3e8] sm:$0xf] %v3416_v17  ;;  %3316 = vrot.lane.b32.xlu1 %v12992_v49, %s10698_s23  ;;  %v13309_v17 = vld [vmem:[%s14579_s4 + $0xb8] sm:$0xff] }
 0x32e   : > { %v5266_v31 = vadd.f32 %v5265_v16, %v5232_v25  ;;  %v5200_v52 = vpop.f32.mrf.mxu0  ;;  %v5234_v23 = vpop.f32.mrf.mxu1  ;;  %3480 = vrot.lane.b32.xlu2 %v13231_v6, %s10698_s23  ;;  %3238 = vrot.lane.b32.xlu0 %v12992_v49, %s10698_s23  ;;  %v13322_v16 = vld [vmem:[%s14579_s4 + $0x78] sm:$0xff] }
 0x32f   : > { %v5235_v22 = vadd.f32 %v5234_v23, %v5200_v52  ;;  %v3149_v5 = vpop.permute.xlu1 %3148 }
 0x330   : > { %v13301_v25 = vadd.f32 %v5299_v19, %v5266_v31  ;;  %v3075_v35 = vpop.permute.xlu2 %3074  ;;  %5748 = vmatmul.bf16.vlgmr.msra.gmra.mxu0 %v9184_v56  ;;  %v3166_v26 = vrot.slane %v3149_v5, 4  ;;  %v13328_v19 = vld [vmem:[%s14579_s4 + $0x38] sm:$0xff] }
 0x331   : > { %5782 = vmatmul.bf16.vlgmr.msra.gmra.mxu1 %v9188_v34  ;;  %v3071_v40 = vpop.permute.xlu0 %3070  ;;  %v3089_v47 = vrot.slane %v3075_v35, 4  ;;  %6295 = vmatpush.bf16.msra.mxu0 %v13328_v19  ;;  %v13354_v34 = vld [vmem:[%s14579_s4 + $0x70] sm:$0xff] }
 0x332   : > { %5816 = vmatmul.bf16.vlgmr.msra.gmra.mxu2 %v9192_v42  ;;  %5850 = vmatmul.bf16.vlgmr.msra.gmra.mxu3 %v9196_v24  ;;  %v3087_v14 = vrot.slane %v3071_v40, 4  ;;  %v3176_v30 = vsel %vm1891_vm2, %v3149_v5, %v3166_v26  ;;  %v13360_v24 = vld [vmem:[%s14579_s4 + $0x30] sm:$0xff] }
 0x333   : > { %v3099_v49 = vsel %vm1891_vm2, %v3075_v35, %v3089_v47  ;;  %6363 = vmatpush.bf16.msra.mxu2 %v13309_v17  ;;  %6397 = vmatpush.bf16.msra.mxu3 %v13315_v9  ;;  %3196 = vst [vmem:[#allocation3 + $0x34c] sm:$0xf] %v3176_v30  ;;  %v10237_v30 = vld [vmem:[#allocation3 + $0x2b4] sm:$0xf0] }
 0x334   : > { %v3097_v63 = vsel %vm1891_vm2, %v3071_v40, %v3087_v14  ;;  %6329 = vmatpush.bf16.msra.mxu1 %v13322_v16  ;;  %3119 = vst [vmem:[#allocation3 + $0x378] sm:$0xf] %v3099_v49  ;;  %v10236_v40 = vld [vmem:[#allocation3 + $0x2ac] sm:$0xf0]  ;;  %v9201_v14 = vld [vmem:[#allocation3 + $0x2b0] sm:$0xf0] }
 0x335   : > { %v5268_v36 = vpop.f32.mrf.mxu2  ;;  %v5302_v21 = vpop.f32.mrf.mxu3  ;;  %3117 = vst [vmem:[#allocation3 + $0x358] sm:$0xf] %v3097_v63  ;;  %3402 = vrot.lane.b32.xlu1 %v13231_v6, %s10698_s23  ;;  %v13348_v6 = vld [vmem:[%s14579_s4 + $0xf0] sm:$0xff]  ;;  %6296 = vmatpush.bf16.msra.mxu0 %v13360_v24 }
 0x336   : > { %v5269_v31 = vadd.f32 %v5268_v36, %v5235_v22  ;;  %v5202_v52 = vpop.f32.mrf.mxu0  ;;  %v5236_v23 = vpop.f32.mrf.mxu1  ;;  %3242 = vrot.lane.b32.xlu2 %v13022_v20, %s10698_s23  ;;  %3400 = vrot.lane.b32.xlu0 %v13124_v59, %s10698_s23  ;;  %v9209_v36 = vld [vmem:[#allocation3 + $0x2b8] sm:$0xf0] }
 0x337   : > { %v5237_v2 = vadd.f32 %v5236_v23, %v5202_v52  ;;  %6364 = vmatpush.bf16.msra.mxu2 %v13340_v60  ;;  %v2993_v22 = vpop.permute.xlu1 %2992  ;;  %6398 = vmatpush.bf16.msra.mxu3 %v13348_v6  ;;  %v9199_v23 = vld [vmem:[#allocation3 + $0x2a0] sm:$0xf] }
 0x338   : > { %v13343_v13 = vadd.f32 %v5302_v21, %v5269_v31  ;;  %v2919_v56 = vpop.permute.xlu2 %2918  ;;  %6330 = vmatpush.bf16.msra.mxu1 %v13354_v34  ;;  %v3008_v3 = vrot.slane %v2993_v22, 4  ;;  %v13369_v21 = vld [vmem:[#allocation2 + $0x24] sm:$0xff] }
 0x339   : > { %v2915_v0 = vpop.permute.xlu0 %2914  ;;  %v2931_v42 = vrot.slane %v2919_v56, 4  ;;  %6297 = vmatpush.bf16.msra.mxu0 %v13065_v62 }
 0x33a   : > { %v2929_v5 = vrot.slane %v2915_v0, 4  ;;  %v3018_v35 = vsel %vm1891_vm2, %v2993_v22, %v3008_v3  ;;  %v10234_v22 = vld [vmem:[#allocation3 + $0x2a4] sm:$0xf]  ;;  %v9207_v3 = vld [vmem:[#allocation3 + $0x2a8] sm:$0xf] }
 0x33b   : > { %v2941_v26 = vsel %vm1891_vm2, %v2919_v56, %v2931_v42  ;;  %6365 = vmatpush.bf16.msra.mxu2 %v13046_v37  ;;  %3038 = vst [vmem:[#allocation3 + $0x364] sm:$0xf] %v3018_v35  ;;  %6399 = vmatpush.bf16.msra.mxu3 %v13053_v46  ;;  %v9204_v56 = vor.u32 %v10234_v22, %v9201_v14 }
 0x33c   : > { %v2939_v47 = vsel %vm1891_vm2, %v2915_v0, %v2929_v5  ;;  %6331 = vmatpush.bf16.msra.mxu1 %v13059_v15  ;;  %2961 = vst [vmem:[#allocation3 + $0x390] sm:$0xf] %v2941_v26  ;;  %v9200_v15 = vor.u32 %v10236_v40, %v9199_v23  ;;  %v10235_v0 = vld [vmem:[#allocation3 + $0x2ac] sm:$0xf] }
 0x33d   : > { %v5270_v49 = vpop.f32.mrf.mxu2  ;;  %v5304_v63 = vpop.f32.mrf.mxu3  ;;  %2959 = vst [vmem:[#allocation3 + $0x370] sm:$0xf] %v2939_v47  ;;  %3240 = vrot.lane.b32.xlu1 %v13020_v54, %s10698_s23  ;;  %v9212_v42 = vor.u32 %v10235_v0, %v9209_v36  ;;  %6298 = vmatpush.bf16.msra.mxu0 %v13100_v33  ;;  %v13392_v33 = vld [vmem:[#allocation2 + $0x34] sm:$0xff] }
 0x33e   : > { %v5271_v31 = vadd.f32 %v5270_v49, %v5237_v2  ;;  %v5205_v52 = vpop.f32.mrf.mxu0  ;;  %v5239_v37 = vpop.f32.mrf.mxu1  ;;  %3704 = vrot.lane.b32.xlu2 %v13369_v21, %s10699_s20  ;;  %3320 = vrot.lane.b32.xlu0 %v13022_v20, %s10698_s23  ;;  %v9208_v2 = vor.u32 %v10237_v30, %v9207_v3  ;;  %v9225_v3 = vld [vmem:[#allocation3 + $0x2d8] sm:$0xf0]  ;;  %v3604_v0 = vld [vmem:[#allocation2 + $0x14] sm:$0xff] }
 0x33f   : > { %v5240_v46 = vadd.f32 %v5239_v37, %v5205_v52  ;;  %6366 = vmatpush.bf16.msra.mxu2 %v13077_v18  ;;  %v3391_v5 = vpop.permute.xlu1 %3390  ;;  %6400 = vmatpush.bf16.msra.mxu3 %v13083_v10 }
 0x340   : > { %v13379_v62 = vadd.f32 %v5304_v63, %v5271_v31  ;;  %v3157_v35 = vpop.permute.xlu2 %3156  ;;  %6332 = vmatpush.bf16.msra.mxu1 %v13089_v38  ;;  %5753 = vmatmul.bf16.gmra.mxu0 %v9200_v15  ;;  %v3407_v54 = vrot.slane %v3391_v5, 4  ;;  %v9215_v15 = vld [vmem:[#allocation3 + $0x2c0] sm:$0xf] }
 0x341   : > { %5787 = vmatmul.bf16.gmra.mxu1 %v9204_v56  ;;  %v3471_v26 = vpop.permute.xlu0 %3470  ;;  %v3170_v40 = vrot.slane %v3157_v35, 4  ;;  %6299 = vmatpush.bf16.msra.mxu0 %v13135_v29  ;;  %v10241_v56 = vld [vmem:[#allocation3 + $0x2d4] sm:$0xf0] }
 0x342   : > { %5821 = vmatmul.bf16.gmra.mxu2 %v9208_v2  ;;  %5855 = vmatmul.bf16.gmra.mxu3 %v9212_v42  ;;  %v3487_v20 = vrot.slane %v3471_v26, 4  ;;  %v3417_v18 = vsel %vm2212_vm3, %v3391_v5, %v3407_v54  ;;  %v10238_v5 = vld [vmem:[#allocation3 + $0x2c4] sm:$0xf] }
 0x343   : > { %v3180_v47 = vsel %vm1891_vm2, %v3157_v35, %v3170_v40  ;;  %6367 = vmatpush.bf16.msra.mxu2 %v13106_v44  ;;  %3437 = vst [vmem:[#allocation3 + $0x3f8] sm:$0xf] %v3417_v18  ;;  %6401 = vmatpush.bf16.msra.mxu3 %v13115_v61  ;;  %v3524_v35 = vld [vmem:[#allocation2 + $0x4] sm:$0xff]  ;;  %v10239_v40 = vld [vmem:[#allocation3 + $0x2cc] sm:$0xf] }
 0x344   : > { %v3497_v10 = vsel %vm2212_vm3, %v3471_v26, %v3487_v20  ;;  %6333 = vmatpush.bf16.msra.mxu1 %v13121_v12  ;;  %3200 = vst [vmem:[#allocation3 + $0x38c] sm:$0xf] %v3180_v47  ;;  %v9223_v26 = vld [vmem:[#allocation3 + $0x2c8] sm:$0xf]  ;;  %v9228_v18 = vor.u32 %v10239_v40, %v9225_v3 }
 0x345   : > { %v5273_v38 = vpop.f32.mrf.mxu2  ;;  %v5307_v14 = vpop.f32.mrf.mxu3  ;;  %3517 = vst [vmem:[#allocation3 + $0x3fc] sm:$0xf] %v3497_v10  ;;  %3322 = vrot.lane.b32.xlu1 %v13124_v59, %s10698_s23  ;;  %6300 = vmatpush.bf16.msra.mxu0 %v13167_v48  ;;  %v9224_v20 = vor.u32 %v10241_v56, %v9223_v26  ;;  %v9239_v40 = vld [vmem:[#allocation3 + $0x2e8] sm:$0xf] }
 0x346   : > { %v5274_v30 = vadd.f32 %v5273_v38, %v5240_v46  ;;  %v5207_v49 = vpop.f32.mrf.mxu0  ;;  %v5241_v63 = vpop.f32.mrf.mxu1  ;;  %3786 = vrot.lane.b32.xlu2 %v13260_v28, %s10699_s20  ;;  %3706 = vrot.lane.b32.xlu0 %v13392_v33, %s10699_s20  ;;  %v10240_v46 = vld [vmem:[#allocation3 + $0x2cc] sm:$0xf0] }
 0x347   : > { %v5242_v44 = vadd.f32 %v5241_v63, %v5207_v49  ;;  %v3073_v12 = vpop.permute.xlu1 %3072  ;;  %6368 = vmatpush.bf16.msra.mxu2 %v13143_v57  ;;  %6402 = vmatpush.bf16.msra.mxu3 %v13149_v4  ;;  %v9217_v57 = vld [vmem:[#allocation3 + $0x2d0] sm:$0xf0] }
 0x348   : > { %v13399_v61 = vadd.f32 %v5307_v14, %v5274_v30  ;;  %v3001_v36 = vpop.permute.xlu2 %3000  ;;  %v3088_v59 = vrot.slane %v3073_v12, 4  ;;  %6334 = vmatpush.bf16.msra.mxu1 %v13155_v45  ;;  %v9220_v54 = vor.u32 %v10238_v5, %v9217_v57 }
 0x349   : > { %v3153_v31 = vpop.permute.xlu0 %3152  ;;  %v3012_v52 = vrot.slane %v3001_v36, 4  ;;  %6301 = vmatpush.bf16.msra.mxu0 %v13198_v55 }
 0x34a   : > { %v3168_v37 = vrot.slane %v3153_v31, 4  ;;  %v3098_v23 = vsel %vm1891_vm2, %v3073_v12, %v3088_v59  ;;  %v13425_v12 = vld [vmem:[#allocation2 + $0x54] sm:$0xff] }
 0x34b   : > { %v3022_v22 = vsel %vm1891_vm2, %v3001_v36, %v3012_v52  ;;  %3118 = vst [vmem:[#allocation3 + $0x368] sm:$0xf] %v3098_v23  ;;  %6369 = vmatpush.bf16.msra.mxu2 %v13174_v27  ;;  %6403 = vmatpush.bf16.msra.mxu3 %v13180_v51  ;;  %v9216_v51 = vor.u32 %v10240_v46, %v9215_v15 }
 0x34c   : > { %v3178_v29 = vsel %vm1891_vm2, %v3153_v31, %v3168_v37  ;;  %6335 = vmatpush.bf16.msra.mxu1 %v13186_v1  ;;  %3042 = vst [vmem:[#allocation3 + $0x3a4] sm:$0xf] %v3022_v22 }
 0x34d   : > { %v5275_v4 = vpop.f32.mrf.mxu2  ;;  %v5309_v45 = vpop.f32.mrf.mxu3  ;;  %3198 = vst [vmem:[#allocation3 + $0x36c] sm:$0xf] %v3178_v29  ;;  %3784 = vrot.lane.b32.xlu1 %v13392_v33, %s10699_s20  ;;  %6302 = vmatpush.bf16.msra.mxu0 %v13219_v8 }
 0x34e   : > { %v5276_v2 = vadd.f32 %v5275_v4, %v5242_v44  ;;  %v5210_v42 = vpop.f32.mrf.mxu0  ;;  %v5244_v48 = vpop.f32.mrf.mxu1  ;;  %3624 = vrot.lane.b32.xlu2 %v3604_v0, %s10699_s20  ;;  %3544 = vrot.lane.b32.xlu0 %v3524_v35, %s10699_s20  ;;  %v10244_v4 = vld [vmem:[#allocation3 + $0x2ec] sm:$0xf0]  ;;  %v9231_v35 = vld [vmem:[#allocation3 + $0x2e0] sm:$0xf] }
 0x34f   : > { %v5245_v27 = vadd.f32 %v5244_v48, %v5210_v42  ;;  %v2917_v47 = vpop.permute.xlu1 %2916  ;;  %6370 = vmatpush.bf16.msra.mxu2 %v13204_v41  ;;  %6404 = vmatpush.bf16.msra.mxu3 %v13210_v43 }
 0x350   : > { %v13416_v1 = vadd.f32 %v5309_v45, %v5276_v2  ;;  %v3081_v10 = vpop.permute.xlu2 %3080  ;;  %5758 = vmatmul.bf16.gmra.mxu0 %v9216_v51  ;;  %v2930_v38 = vrot.slane %v2917_v47, 4  ;;  %6336 = vmatpush.bf16.msra.mxu1 %v13225_v58  ;;  %v9233_v45 = vld [vmem:[#allocation3 + $0x2f0] sm:$0xf0]  ;;  %v9241_v2 = vld [vmem:[#allocation3 + $0x2f8] sm:$0xf0] }
 0x351   : > { %5792 = vmatmul.bf16.gmra.mxu1 %v9220_v54  ;;  %v2997_v14 = vpop.permute.xlu0 %2996  ;;  %v3092_v30 = vrot.slane %v3081_v10, 4  ;;  %v9232_v54 = vor.u32 %v10244_v4, %v9231_v35  ;;  %v13460_v35 = vld [vmem:[#allocation2 + $0x74] sm:$0xff] }
 0x352   : > { %5826 = vmatmul.bf16.gmra.mxu2 %v9224_v20  ;;  %5860 = vmatmul.bf16.gmra.mxu3 %v9228_v18  ;;  %v3010_v49 = vrot.slane %v2997_v14, 4  ;;  %v2940_v55 = vsel %vm1891_vm2, %v2917_v47, %v2930_v38  ;;  %v10243_v20 = vld [vmem:[#allocation3 + $0x2ec] sm:$0xf] }
 0x353   : > { %v3102_v63 = vsel %vm1891_vm2, %v3081_v10, %v3092_v30  ;;  %2960 = vst [vmem:[#allocation3 + $0x380] sm:$0xf] %v2940_v55  ;;  %v9244_v10 = vor.u32 %v10243_v20, %v9241_v2  ;;  %v10249_v2 = vld [vmem:[#allocation3 + $0x314] sm:$0xf0] }
 0x354   : > { %v3020_v41 = vsel %vm1891_vm2, %v2997_v14, %v3010_v49  ;;  %3122 = vst [vmem:[#allocation3 + $0x3a8] sm:$0xf] %v3102_v63 }
 0x355   : > { %v5278_v43 = vpop.f32.mrf.mxu2  ;;  %v5312_v44 = vpop.f32.mrf.mxu3  ;;  %3040 = vst [vmem:[#allocation3 + $0x384] sm:$0xf] %v3020_v41  ;;  %3546 = vrot.lane.b32.xlu1 %v3604_v0, %s10699_s20 }
 0x356   : > { %v5279_v36 = vadd.f32 %v5278_v43, %v5245_v27  ;;  %v5212_v59 = vpop.f32.mrf.mxu0  ;;  %v5246_v31 = vpop.f32.mrf.mxu1  ;;  %3710 = vrot.lane.b32.xlu2 %v13425_v12, %s10699_s20  ;;  %3482 = vrot.lane.b32.xlu0 %v13162_v7, %s10698_s23  ;;  %v10245_v7 = vld [vmem:[#allocation3 + $0x2f4] sm:$0xf0]  ;;  %v10242_v27 = vld [vmem:[#allocation3 + $0x2e4] sm:$0xf] }
 0x357   : > { %v5247_v8 = vadd.f32 %v5246_v31, %v5212_v59  ;;  %v3155_v52 = vpop.permute.xlu1 %3154  ;;  %v9236_v26 = vor.u32 %v10242_v27, %v9233_v45  ;;  %v9240_v47 = vor.u32 %v10245_v7, %v9239_v40  ;;  %v13448_v59 = vld [vmem:[#allocation2 + $0x64] sm:$0xff] }
 0x358   : > { %v13432_v58 = vadd.f32 %v5312_v44, %v5279_v36  ;;  %v3163_v37 = vpop.permute.xlu2 %3162  ;;  %v3169_v23 = vrot.slane %v3155_v52, 4  ;;  %v9249_v7 = vld [vmem:[#allocation3 + $0x310] sm:$0xf0] }
 0x359   : > { %v3077_v22 = vpop.permute.xlu0 %3076  ;;  %v3173_v46 = vrot.slane %v3163_v37, 4 }
 0x35a   : > { %v3090_v29 = vrot.slane %v3077_v22, 4  ;;  %v3179_v15 = vsel %vm1891_vm2, %v3155_v52, %v3169_v23 }
 0x35b   : > { %v3183_v57 = vsel %vm1891_vm2, %v3163_v37, %v3173_v46  ;;  %3199 = vst [vmem:[#allocation3 + $0x37c] sm:$0xf] %v3179_v15 }
 0x35c   : > { %v3100_v56 = vsel %vm1891_vm2, %v3077_v22, %v3090_v29  ;;  %3203 = vst [vmem:[#allocation3 + $0x3bc] sm:$0xf] %v3183_v57 }
 0x35d   : > { %v5280_v3 = vpop.f32.mrf.mxu2  ;;  %v5314_v0 = vpop.f32.mrf.mxu3  ;;  %3120 = vst [vmem:[#allocation3 + $0x388] sm:$0xf] %v3100_v56  ;;  %3708 = vrot.lane.b32.xlu1 %v13260_v28, %s10699_s20 }
 0x35e   : > { %v5281_v42 = vadd.f32 %v5280_v3, %v5247_v8  ;;  %v5446_v48 = vpop.f32.mrf.mxu0  ;;  %v5480_v5 = vpop.f32.mrf.mxu1  ;;  %3548 = vrot.lane.b32.xlu2 %v13369_v21, %s10699_s20  ;;  %3626 = vrot.lane.b32.xlu0 %v13369_v21, %s10699_s20 }
 0x35f   : > { %v5481_v51 = vadd.f32 %v5480_v5, %v5446_v48  ;;  %v2999_v38 = vpop.permute.xlu1 %2998  ;;  %v9257_v5 = vld [vmem:[#allocation3 + $0x318] sm:$0xf0] }
 0x360   : > { %v13443_v18 = vadd.f32 %v5314_v0, %v5281_v42  ;;  %v3475_v14 = vpop.permute.xlu2 %3474  ;;  %5763 = vmatmul.bf16.gmra.mxu0 %v9232_v54  ;;  %v3011_v30 = vrot.slane %v2999_v38, 4  ;;  %v10248_v0 = vld [vmem:[#allocation3 + $0x30c] sm:$0xf0]  ;;  %v9247_v54 = vld [vmem:[#allocation3 + $0x300] sm:$0xf] }
 0x361   : > { %5797 = vmatmul.bf16.gmra.mxu1 %v9236_v26  ;;  %v2921_v49 = vpop.permute.xlu0 %2920  ;;  %v3489_v55 = vrot.slane %v3475_v14, 4  ;;  %v10246_v26 = vld [vmem:[#allocation3 + $0x304] sm:$0xf]  ;;  %v9248_v40 = vor.u32 %v10248_v0, %v9247_v54  ;;  %v9273_v54 = vld [vmem:[#allocation3 + $0x338] sm:$0xf0] }
 0x362   : > { %5831 = vmatmul.bf16.gmra.mxu2 %v9240_v47  ;;  %5865 = vmatmul.bf16.gmra.mxu3 %v9244_v10  ;;  %v2932_v63 = vrot.slane %v2921_v49, 4  ;;  %v3021_v41 = vsel %vm1891_vm2, %v2999_v38, %v3011_v30  ;;  %v9252_v20 = vor.u32 %v10246_v26, %v9249_v7  ;;  %v9255_v47 = vld [vmem:[#allocation3 + $0x308] sm:$0xf]  ;;  %v10247_v10 = vld [vmem:[#allocation3 + $0x30c] sm:$0xf]  ;;  %v13482_v7 = vld [vmem:[#allocation2 + $0x84] sm:$0xff] }
 0x363   : > { %v3499_v43 = vsel %vm2212_vm3, %v3475_v14, %v3489_v55  ;;  %3041 = vst [vmem:[#allocation3 + $0x394] sm:$0xf] %v3021_v41  ;;  %v9256_v14 = vor.u32 %v10249_v2, %v9255_v47  ;;  %v9260_v30 = vor.u32 %v10247_v10, %v9257_v5  ;;  %v9265_v5 = vld [vmem:[#allocation3 + $0x330] sm:$0xf0]  ;;  %v10252_v10 = vld [vmem:[#allocation3 + $0x32c] sm:$0xf0] }
 0x364   : > { %v2942_v21 = vsel %vm1891_vm2, %v2921_v49, %v2932_v63  ;;  %3519 = vst [vmem:[#allocation3 + $0x41c] sm:$0xf] %v3499_v43 }
 0x365   : > { %v5514_v44 = vpop.f32.mrf.mxu2  ;;  %v5548_v36 = vpop.f32.mrf.mxu3  ;;  %2962 = vst [vmem:[#allocation3 + $0x3a0] sm:$0xf] %v2942_v21  ;;  %3790 = vrot.lane.b32.xlu1 %v13448_v59, %s10699_s20 }
 0x366   : > { %v5515_v31 = vadd.f32 %v5514_v44, %v5481_v51  ;;  %v5448_v8 = vpop.f32.mrf.mxu0  ;;  %v5482_v52 = vpop.f32.mrf.mxu1  ;;  %3630 = vrot.lane.b32.xlu2 %v13260_v28, %s10699_s20  ;;  %3788 = vrot.lane.b32.xlu0 %v13425_v12, %s10699_s20 }
 0x367   : > { %v5483_v37 = vadd.f32 %v5482_v52, %v5448_v8  ;;  %v3079_v22 = vpop.permute.xlu1 %3078 }
 0x368   : > { %v5549_v23 = vadd.f32 %v5548_v36, %v5515_v31  ;;  %v3313_v46 = vpop.permute.xlu2 %3312  ;;  %v3091_v29 = vrot.slane %v3079_v22, 4 }
 0x369   : > { %v3159_v15 = vpop.permute.xlu0 %3158  ;;  %v3328_v57 = vrot.slane %v3313_v46, 4 }
 0x36a   : > { %v5573_v56 = vmax.f32 %v13266_v53, %v5549_v23  ;;  %v3171_v4 = vrot.slane %v3159_v15, 4  ;;  %v3101_v45 = vsel %vm1891_vm2, %v3079_v22, %v3091_v29 }
 0x36b   : > { %v3338_v3 = vsel %vm2212_vm3, %v3313_v46, %v3328_v57  ;;  %3121 = vst [vmem:[#allocation3 + $0x398] sm:$0xf] %v3101_v45 }
 0x36c   : > { %v3181_v28 = vsel %vm1891_vm2, %v3159_v15, %v3171_v4  ;;  %3358 = vst [vmem:[#allocation3 + $0x404] sm:$0xf] %v3338_v3 }
 0x36d   : > { %v5516_v42 = vpop.f32.mrf.mxu2  ;;  %v5550_v48 = vpop.f32.mrf.mxu3  ;;  %3201 = vst [vmem:[#allocation3 + $0x39c] sm:$0xf] %v3181_v28  ;;  %3628 = vrot.lane.b32.xlu1 %v13392_v33, %s10699_s20  ;;  %v3528_v28 = vld [vmem:[#allocation2 + $0x44] sm:$0xff] }
 0x36e   : > { %v5517_v27 = vadd.f32 %v5516_v42, %v5483_v37  ;;  %v5451_v51 = vpop.f32.mrf.mxu0  ;;  %v5485_v53 = vpop.f32.mrf.mxu1  ;;  %3792 = vrot.lane.b32.xlu2 %v13460_v35, %s10699_s20  ;;  %3550 = vrot.lane.b32.xlu0 %v13392_v33, %s10699_s20 }
 0x36f   : > { %v2923_v49 = vpop.permute.xlu1 %2922 }
 0x370   : > { %v5551_v38 = vadd.f32 %v5550_v48, %v5517_v27  ;;  %v3399_v55 = vpop.permute.xlu2 %3398  ;;  %5768 = vmatmul.bf16.gmra.mxu0 %v9248_v40  ;;  %v2933_v63 = vrot.slane %v2923_v49, 4  ;;  %v9263_v48 = vld [vmem:[#allocation3 + $0x320] sm:$0xf] }
 0x371   : > { %5802 = vmatmul.bf16.gmra.mxu1 %v9252_v20  ;;  %v3003_v41 = vpop.permute.xlu0 %3002  ;;  %v3411_v43 = vrot.slane %v3399_v55, 4 }
 0x372   : > { %v5574_v21 = vmax.f32 %v13277_v39, %v5551_v38  ;;  %5836 = vmatmul.bf16.gmra.mxu2 %v9256_v14  ;;  %5870 = vmatmul.bf16.gmra.mxu3 %v9260_v30  ;;  %v3013_v44 = vrot.slane %v3003_v41, 4  ;;  %v2943_v36 = vsel %vm1891_vm2, %v2923_v49, %v2933_v63  ;;  %v5486_v39 = vadd.f32 %v5485_v53, %v5451_v51  ;;  %v10253_v53 = vld [vmem:[#allocation3 + $0x334] sm:$0xf0]  ;;  %v10250_v38 = vld [vmem:[#allocation3 + $0x324] sm:$0xf] }
 0x373   : > { %v3421_v31 = vsel %vm2212_vm3, %v3399_v55, %v3411_v43  ;;  %2963 = vst [vmem:[#allocation3 + $0x3b0] sm:$0xf] %v2943_v36  ;;  %v9264_v30 = vor.u32 %v10252_v10, %v9263_v48  ;;  %v9268_v49 = vor.u32 %v10250_v38, %v9265_v5  ;;  %v9271_v55 = vld [vmem:[#allocation3 + $0x328] sm:$0xf]  ;;  %v10251_v63 = vld [vmem:[#allocation3 + $0x32c] sm:$0xf] }
 0x374   : > { %v13471_v33 = vmax.f32 %v5573_v56, %v5574_v21  ;;  %v3023_v8 = vsel %vm1891_vm2, %v3003_v41, %v3013_v44  ;;  %3441 = vst [vmem:[#allocation3 + $0x438] sm:$0xf] %v3421_v31  ;;  %v9272_v43 = vor.u32 %v10253_v53, %v9271_v55  ;;  %v9276_v21 = vor.u32 %v10251_v63, %v9273_v54  ;;  %v13519_v48 = vld [vmem:[#allocation2 + $0x94] sm:$0xff]  ;;  %v9281_v5 = vld [vmem:[#allocation3 + $0x350] sm:$0xf0] }
 0x375   : > { %v5519_v52 = vpop.f32.mrf.mxu2  ;;  %v5553_v37 = vpop.f32.mrf.mxu3  ;;  %3043 = vst [vmem:[#allocation3 + $0x3b4] sm:$0xf] %v3023_v8  ;;  %3714 = vrot.lane.b32.xlu1 %v13460_v35, %s10699_s20  ;;  %v10257_v54 = vld [vmem:[#allocation3 + $0x354] sm:$0xf0]  ;;  %v9279_v38 = vld [vmem:[#allocation3 + $0x340] sm:$0xf] }
 0x376   : > { %v5453_v23 = vpop.f32.mrf.mxu0  ;;  %v5487_v22 = vpop.f32.mrf.mxu1  ;;  %3554 = vrot.lane.b32.xlu2 %v13425_v12, %s10699_s20  ;;  %3712 = vrot.lane.b32.xlu0 %v13448_v59, %s10699_s20  ;;  %v5520_v4 = vadd.f32 %v5519_v52, %v5486_v39  ;;  %v9287_v55 = vld [vmem:[#allocation3 + $0x348] sm:$0xf]  ;;  %v9289_v63 = vld [vmem:[#allocation3 + $0x358] sm:$0xf0] }
 0x377   : > { %v3161_v46 = vpop.permute.xlu1 %3160  ;;  %v5488_v2 = vadd.f32 %v5487_v22, %v5453_v23 }
 0x378   : > { %v3237_v29 = vpop.permute.xlu2 %3236  ;;  %v3172_v15 = vrot.slane %v3161_v46, 4  ;;  %v5554_v26 = vadd.f32 %v5553_v37, %v5520_v4 }
 0x379   : > { %v3083_v57 = vpop.permute.xlu0 %3082  ;;  %v3250_v56 = vrot.slane %v3237_v29, 4 }
 0x37a   : > { %v3093_v45 = vrot.slane %v3083_v57, 4  ;;  %v3182_v3 = vsel %vm1891_vm2, %v3161_v46, %v3172_v15  ;;  %v5575_v37 = vmax.f32 %v13288_v32, %v5554_v26  ;;  %v10255_v26 = vld [vmem:[#allocation3 + $0x34c] sm:$0xf] }
 0x37b   : > { %v3260_v0 = vsel %vm2212_vm3, %v3237_v29, %v3250_v56  ;;  %3202 = vst [vmem:[#allocation3 + $0x3ac] sm:$0xf] %v3182_v3 }
 0x37c   : > { %v3103_v42 = vsel %vm1891_vm2, %v3083_v57, %v3093_v45  ;;  %3280 = vst [vmem:[#allocation3 + $0x420] sm:$0xf] %v3260_v0  ;;  %v13501_v57 = vld [vmem:[#allocation2 + $0xa4] sm:$0xff] }
 0x37d   : > { %v5521_v27 = vpop.f32.mrf.mxu2  ;;  %v5555_v51 = vpop.f32.mrf.mxu3  ;;  %3123 = vst [vmem:[#allocation3 + $0x3b8] sm:$0xf] %v3103_v42  ;;  %3552 = vrot.lane.b32.xlu1 %v3528_v28, %s10699_s20 }
 0x37e   : > { %v5522_v40 = vadd.f32 %v5521_v27, %v5488_v2  ;;  %v5456_v20 = vpop.f32.mrf.mxu0  ;;  %v5490_v47 = vpop.f32.mrf.mxu1  ;;  %3716 = vrot.lane.b32.xlu2 %v13482_v7, %s10699_s20  ;;  %3794 = vrot.lane.b32.xlu0 %v13482_v7, %s10699_s20  ;;  %v13537_v27 = vld [vmem:[%s14579_s4 + $0x68] sm:$0xff] }
 0x37f   : > { %v5491_v14 = vadd.f32 %v5490_v47, %v5456_v20  ;;  %v3473_v44 = vpop.permute.xlu1 %3472 }
 0x380   : > { %v5556_v41 = vadd.f32 %v5555_v51, %v5522_v40  ;;  %v3319_v36 = vpop.permute.xlu2 %3318  ;;  %6004 = vmatmul.bf16.vlgmr.msrb.gmra.mxu0 %v9264_v30  ;;  %v3488_v31 = vrot.slane %v3473_v44, 4  ;;  %v13543_v40 = vld [vmem:[%s14579_s4 + $0x28] sm:$0xff] }
 0x381   : > { %6038 = vmatmul.bf16.vlgmr.msrb.gmra.mxu1 %v9268_v49  ;;  %v3395_v8 = vpop.permute.xlu0 %3394  ;;  %v3331_v52 = vrot.slane %v3319_v36, 4  ;;  %6551 = vmatpush.bf16.msrb.mxu0 %v13328_v19 }
 0x382   : > { %v5576_v23 = vmax.f32 %v13301_v25, %v5556_v41  ;;  %6072 = vmatmul.bf16.vlgmr.msrb.gmra.mxu2 %v9272_v43  ;;  %6106 = vmatmul.bf16.vlgmr.msrb.gmra.mxu3 %v9276_v21  ;;  %v3409_v22 = vrot.slane %v3395_v8, 4  ;;  %v3498_v39 = vsel %vm2212_vm3, %v3473_v44, %v3488_v31  ;;  %v13555_v41 = vld [vmem:[%s14579_s4 + $0xa0] sm:$0xff]  ;;  %v9288_v21 = vor.u32 %v10257_v54, %v9287_v55  ;;  %v13657_v55 = vld [vmem:[%s14579_s4 + $0xc8] sm:$0xff] }
 0x383   : > { %v3341_v46 = vsel %vm2212_vm3, %v3319_v36, %v3331_v52  ;;  %6619 = vmatpush.bf16.msrb.mxu2 %v13309_v17  ;;  %6653 = vmatpush.bf16.msrb.mxu3 %v13315_v9  ;;  %3518 = vst [vmem:[#allocation3 + $0x40c] sm:$0xf] %v3498_v39  ;;  %v9292_v44 = vor.u32 %v10255_v26, %v9289_v63  ;;  %v13567_v52 = vld [vmem:[%s14579_s4 + $0x60] sm:$0xff] }
 0x384   : > { %v13496_v29 = vmax.f32 %v5575_v37, %v5576_v23  ;;  %v3419_v15 = vsel %vm2212_vm3, %v3395_v8, %v3409_v22  ;;  %6585 = vmatpush.bf16.msrb.mxu1 %v13322_v16  ;;  %3361 = vst [vmem:[#allocation3 + $0x434] sm:$0xf] %v3341_v46  ;;  %v13561_v8 = vld [vmem:[%s14579_s4 + $0xe0] sm:$0xff] }
 0x385   : > { %v5524_v32 = vpop.f32.mrf.mxu2  ;;  %v5558_v25 = vpop.f32.mrf.mxu3  ;;  %3439 = vst [vmem:[#allocation3 + $0x418] sm:$0xf] %v3419_v15  ;;  %3634 = vrot.lane.b32.xlu1 %v13448_v59, %s10699_s20  ;;  %6552 = vmatpush.bf16.msrb.mxu0 %v13360_v24  ;;  %v10256_v24 = vld [vmem:[#allocation3 + $0x34c] sm:$0xf0] }
 0x386   : > { %v5525_v56 = vadd.f32 %v5524_v32, %v5491_v14  ;;  %v5458_v4 = vpop.f32.mrf.mxu0  ;;  %v5492_v45 = vpop.f32.mrf.mxu1  ;;  %3798 = vrot.lane.b32.xlu2 %v13501_v57, %s10699_s20  ;;  %3632 = vrot.lane.b32.xlu0 %v13425_v12, %s10699_s20  ;;  %v10254_v14 = vld [vmem:[#allocation3 + $0x344] sm:$0xf]  ;;  %v9280_v30 = vor.u32 %v10256_v24, %v9279_v38  ;;  %v13635_v54 = vld [vmem:[%s14580_s5] ss:$0 sm:$0xff] }
 0x387   : > { %v5493_v17 = vadd.f32 %v5492_v45, %v5458_v4  ;;  %6620 = vmatpush.bf16.msrb.mxu2 %v13340_v60  ;;  %v3235_v16 = vpop.permute.xlu1 %3234  ;;  %6654 = vmatpush.bf16.msrb.mxu3 %v13348_v6  ;;  %v13524_v6 = vld [vmem:[%s14579_s4 + $0xa8] sm:$0xff]  ;;  %v9284_v49 = vor.u32 %v10254_v14, %v9281_v5  ;;  %v13591_v45 = vld [vmem:[%s14579_s4 + $0xd8] sm:$0xff]  ;;  %v13629_v5 = vld [vmem:[%s14579_s4 + $0x50] sm:$0xff]  ;;  %v5593_v26 = vadd.f32 %v13635_v54, %v13496_v29 }
 0x388   : > { %v13510_v9 = vadd.f32 %v5558_v25, %v5525_v56  ;;  %v3481_v19 = vpop.permute.xlu2 %3480  ;;  %6586 = vmatpush.bf16.msrb.mxu1 %v13354_v34  ;;  %v3249_v3 = vrot.slane %v3235_v16, 4  ;;  %v13576_v25 = vld [vmem:[%s14579_s4 + $0x20] sm:$0xff]  ;;  %v13582_v56 = vld [vmem:[%s14579_s4 + $0x98] sm:$0xff]  ;;  %v13644_v38 = vld [vmem:[%s14579_s4 + $0x10] sm:$0xff] }
 0x389   : > { %v3233_v0 = vpop.permute.xlu0 %3232  ;;  %v3492_v28 = vrot.slane %v3481_v19, 4  ;;  %6553 = vmatpush.bf16.msrb.mxu0 %v13543_v40  ;;  %v13651_v29 = vld [vmem:[%s14579_s4 + $0x88] sm:$0xff]  ;;  %v5594_v63 = vmax.f32 %v5593_v26, 0.0 }
 0x38a   : > { %v5577_v2 = vmax.f32 %v13343_v13, %v13510_v9  ;;  %v3248_v42 = vrot.slane %v3233_v0, 4  ;;  %v3259_v12 = vsel %vm2212_vm3, %v3235_v16, %v3249_v3  ;;  %v13531_v13 = vld [vmem:[%s14579_s4 + $0xe8] sm:$0xff] }
 0x38b   : > { %v3502_v60 = vsel %vm2212_vm3, %v3481_v19, %v3492_v28  ;;  %6621 = vmatpush.bf16.msrb.mxu2 %v13524_v6  ;;  %3279 = vst [vmem:[#allocation3 + $0x410] sm:$0xf] %v3259_v12  ;;  %6655 = vmatpush.bf16.msrb.mxu3 %v13531_v13  ;;  %v13600_v19 = vld [vmem:[#allocation2 + $0xb4] sm:$0xff] }
 0x38c   : > { %v3258_v34 = vsel %vm2212_vm3, %v3233_v0, %v3248_v42  ;;  %6587 = vmatpush.bf16.msrb.mxu1 %v13537_v27  ;;  %3522 = vst [vmem:[#allocation3 + $0x44c] sm:$0xf] %v3502_v60  ;;  %v13611_v28 = vld [vmem:[%s14579_s4 + $0x18] sm:$0xff] }
 0x38d   : > { %v5526_v51 = vpop.f32.mrf.mxu2  ;;  %v5560_v53 = vpop.f32.mrf.mxu3  ;;  %3278 = vst [vmem:[#allocation3 + $0x400] sm:$0xf] %v3258_v34  ;;  %3796 = vrot.lane.b32.xlu1 %v13519_v48, %s10699_s20  ;;  %6554 = vmatpush.bf16.msrb.mxu0 %v13576_v25 }
 0x38e   : > { %v5527_v20 = vadd.f32 %v5526_v51, %v5493_v17  ;;  %v5461_v47 = vpop.f32.mrf.mxu0  ;;  %v5495_v10 = vpop.f32.mrf.mxu1  ;;  %3636 = vrot.lane.b32.xlu2 %v13460_v35, %s10699_s20  ;;  %3718 = vrot.lane.b32.xlu0 %v13519_v48, %s10699_s20  ;;  %v13597_v17 = vld [vmem:[%s14579_s4 + $0x58] sm:$0xff] }
 0x38f   : > { %6622 = vmatpush.bf16.msrb.mxu2 %v13555_v41  ;;  %v3397_v36 = vpop.permute.xlu1 %3396  ;;  %6656 = vmatpush.bf16.msrb.mxu3 %v13561_v8 }
 0x390   : > { %v5561_v43 = vadd.f32 %v5560_v53, %v5527_v20  ;;  %v3243_v31 = vpop.permute.xlu2 %3242  ;;  %6588 = vmatpush.bf16.msrb.mxu1 %v13567_v52  ;;  %6009 = vmatmul.bf16.gmra.mxu0 %v9280_v30  ;;  %v3410_v37 = vrot.slane %v3397_v36, 4 }
 0x391   : > { %6043 = vmatmul.bf16.gmra.mxu1 %v9284_v49  ;;  %v3315_v23 = vpop.permute.xlu0 %3314  ;;  %v3253_v22 = vrot.slane %v3243_v31, 4  ;;  %6555 = vmatpush.bf16.msrb.mxu0 %v13611_v28  ;;  %v10258_v49 = vld [vmem:[#allocation3 + $0x364] sm:$0xf] }
 0x392   : > { %v5578_v39 = vmax.f32 %v13379_v62, %v5561_v43  ;;  %6077 = vmatmul.bf16.gmra.mxu2 %v9288_v21  ;;  %6111 = vmatmul.bf16.gmra.mxu3 %v9292_v44  ;;  %v3329_v46 = vrot.slane %v3315_v23, 4  ;;  %v3420_v15 = vsel %vm2212_vm3, %v3397_v36, %v3410_v37  ;;  %v9303_v44 = vld [vmem:[#allocation3 + $0x368] sm:$0xf]  ;;  %v9305_v36 = vld [vmem:[#allocation3 + $0x378] sm:$0xf0] }
 0x393   : > { %v3263_v32 = vsel %vm2212_vm3, %v3243_v31, %v3253_v22  ;;  %6623 = vmatpush.bf16.msrb.mxu2 %v13582_v56  ;;  %3440 = vst [vmem:[#allocation3 + $0x428] sm:$0xf] %v3420_v15  ;;  %6657 = vmatpush.bf16.msrb.mxu3 %v13591_v45  ;;  %v13663_v31 = vld [vmem:[%s14579_s4 + $0x48] sm:$0xff]  ;;  %v9297_v15 = vld [vmem:[#allocation3 + $0x370] sm:$0xf0] }
 0x394   : > { %v13585_v62 = vmax.f32 %v5577_v2, %v5578_v39  ;;  %v3339_v4 = vsel %vm2212_vm3, %v3315_v23, %v3329_v46  ;;  %6589 = vmatpush.bf16.msrb.mxu1 %v13597_v17  ;;  %3283 = vst [vmem:[#allocation3 + $0x450] sm:$0xf] %v3263_v32  ;;  %v5496_v2 = vadd.f32 %v5495_v10, %v5461_v47  ;;  %v10260_v10 = vld [vmem:[#allocation3 + $0x36c] sm:$0xf0]  ;;  %v9295_v46 = vld [vmem:[#allocation3 + $0x360] sm:$0xf] }
 0x395   : > { %v5529_v9 = vpop.f32.mrf.mxu2  ;;  %v5563_v16 = vpop.f32.mrf.mxu3  ;;  %3359 = vst [vmem:[#allocation3 + $0x414] sm:$0xf] %v3339_v4  ;;  %3558 = vrot.lane.b32.xlu1 %v13460_v35, %s10699_s20  ;;  %v13617_v35 = vld [vmem:[%s14579_s4 + $0x90] sm:$0xff]  ;;  %6556 = vmatpush.bf16.msrb.mxu0 %v13644_v38  ;;  %v5595_v32 = vpack.c.bf16 %v5594_v63, %v5594_v63  ;;  %v13698_v63 = vld [vmem:[%s14579_s4] sm:$0xff] }
 0x396   : > { %v5463_v3 = vpop.f32.mrf.mxu0  ;;  %v5497_v0 = vpop.f32.mrf.mxu1  ;;  %3722 = vrot.lane.b32.xlu2 %v13600_v19, %s10699_s20  ;;  %3556 = vrot.lane.b32.xlu0 %v13448_v59, %s10699_s20  ;;  %v13623_v59 = vld [vmem:[%s14579_s4 + $0xd0] sm:$0xff]  ;;  %v5530_v51 = vadd.f32 %v5529_v9, %v5496_v2  ;;  %v9296_v9 = vor.u32 %v10260_v10, %v9295_v46  ;;  %v10259_v2 = vld [vmem:[#allocation3 + $0x36c] sm:$0xf] }
 0x397   : > { %v3479_v42 = vpop.permute.xlu1 %3478  ;;  %6624 = vmatpush.bf16.msrb.mxu2 %v13617_v35  ;;  %6658 = vmatpush.bf16.msrb.mxu3 %v13623_v59  ;;  %v5498_v14 = vadd.f32 %v5497_v0, %v5463_v3  ;;  %v9300_v3 = vor.u32 %v10258_v49, %v9297_v15  ;;  %v10261_v0 = vld [vmem:[#allocation3 + $0x374] sm:$0xf0]  ;;  %5596 = vst.msk [vmem:[#allocation4 + $0xc] sm:$0xf] %vm5030_vm5, %v5595_v32 }
 0x398   : > { %v3705_v12 = vpop.permute.xlu2 %3704  ;;  %v3491_v60 = vrot.slane %v3479_v42, 4  ;;  %6590 = vmatpush.bf16.msrb.mxu1 %v13629_v5  ;;  %v5564_v37 = vadd.f32 %v5563_v16, %v5530_v51  ;;  %v13675_v16 = vld [vmem:[%s14579_s4 + $0x8] sm:$0xff]  ;;  %v13681_v51 = vld [vmem:[%s14579_s4 + $0x80] sm:$0xff] }
 0x399   : > { %v3477_v34 = vpop.permute.xlu0 %3476  ;;  %v3724_v24 = vrot.slane %v3705_v12, 4  ;;  %6557 = vmatpush.bf16.msrb.mxu0 %v13675_v16 }
 0x39a   : > { %v3490_v53 = vrot.slane %v3477_v34, 4  ;;  %v3501_v20 = vsel %vm2212_vm3, %v3479_v42, %v3491_v60  ;;  %v9308_v60 = vor.u32 %v10259_v2, %v9305_v36  ;;  %v3773_v36 = vld [vmem:[#allocation2 + $0xc4] sm:$0xff] }
 0x39b   : > { %v3734_v47 = vsel %vm2533_vm4, %v3705_v12, %v3724_v24  ;;  %3521 = vst [vmem:[#allocation3 + $0x43c] sm:$0xf] %v3501_v20  ;;  %6625 = vmatpush.bf16.msrb.mxu2 %v13651_v29  ;;  %6659 = vmatpush.bf16.msrb.mxu3 %v13657_v55  ;;  %v9304_v12 = vor.u32 %v10261_v0, %v9303_v44 }
 0x39c   : > { %v3500_v30 = vsel %vm2212_vm3, %v3477_v34, %v3490_v53  ;;  %6591 = vmatpush.bf16.msrb.mxu1 %v13663_v31  ;;  %3754 = vst [vmem:[#allocation3 + $0x468] sm:$0xf] %v3734_v47  ;;  %v5579_v47 = vmax.f32 %v13399_v61, %v5564_v37  ;;  %v13704_v61 = vld [vmem:[%s14579_s4 + $0x40] sm:$0xff] }
 0x39d   : > { %v5531_v43 = vpop.f32.mrf.mxu2  ;;  %v5565_v21 = vpop.f32.mrf.mxu3  ;;  %3520 = vst [vmem:[#allocation3 + $0x42c] sm:$0xf] %v3500_v30  ;;  %3720 = vrot.lane.b32.xlu1 %v13501_v57, %s10699_s20  ;;  %6558 = vmatpush.bf16.msrb.mxu0 %v13698_v63 }
 0x39e   : > { %v5532_v23 = vadd.f32 %v5531_v43, %v5498_v14  ;;  %v5466_v22 = vpop.f32.mrf.mxu0  ;;  %v5500_v39 = vpop.f32.mrf.mxu1  ;;  %3560 = vrot.lane.b32.xlu2 %v13482_v7, %s10699_s20  ;;  %3638 = vrot.lane.b32.xlu0 %v13482_v7, %s10699_s20  ;;  %v13687_v7 = vld [vmem:[%s14579_s4 + $0xc0] sm:$0xff] }
 0x39f   : > { %v5501_v4 = vadd.f32 %v5500_v39, %v5466_v22  ;;  %v3317_v34 = vpop.permute.xlu1 %3316  ;;  %6626 = vmatpush.bf16.msrb.mxu2 %v13681_v51  ;;  %6660 = vmatpush.bf16.msrb.mxu3 %v13687_v7 }
 0x3a0   : > { %v5566_v42 = vadd.f32 %v5565_v21, %v5532_v23  ;;  %v3787_v24 = vpop.permute.xlu2 %3786  ;;  %6014 = vmatmul.bf16.gmra.mxu0 %v9296_v9  ;;  %v3330_v53 = vrot.slane %v3317_v34, 4  ;;  %6592 = vmatpush.bf16.msrb.mxu1 %v13704_v61 }
 0x3a1   : > { %6048 = vmatmul.bf16.gmra.mxu1 %v9300_v3  ;;  %v3239_v26 = vpop.permute.xlu0 %3238  ;;  %v3805_v20 = vrot.slane %v3787_v24, 4 }
 0x3a2   : > { %v5580_v10 = vmax.f32 %v13416_v1, %v5566_v42  ;;  %6082 = vmatmul.bf16.gmra.mxu2 %v9304_v12  ;;  %6116 = vmatmul.bf16.gmra.mxu3 %v9308_v60  ;;  %v3251_v14 = vrot.slane %v3239_v26, 4  ;;  %v3340_v30 = vsel %vm2212_vm3, %v3317_v34, %v3330_v53  ;;  %v13718_v60 = vld [vmem:[#allocation2 + $0x38] sm:$0xff]  ;;  %v9311_v34 = vld [vmem:[#allocation3 + $0x380] sm:$0xf] }
 0x3a3   : > { %v3815_v49 = vsel %vm2533_vm4, %v3787_v24, %v3805_v20  ;;  %3360 = vst [vmem:[#allocation3 + $0x424] sm:$0xf] %v3340_v30  ;;  %v9321_v20 = vld [vmem:[#allocation3 + $0x398] sm:$0xf0]  ;;  %v10262_v30 = vld [vmem:[#allocation3 + $0x384] sm:$0xf] }
 0x3a4   : > { %v13707_v1 = vmax.f32 %v5579_v47, %v5580_v10  ;;  %v3261_v43 = vsel %vm2212_vm3, %v3239_v26, %v3251_v14  ;;  %3835 = vst [vmem:[#allocation3 + $0x47c] sm:$0xf] %v3815_v49  ;;  %v10265_v26 = vld [vmem:[#allocation3 + $0x394] sm:$0xf0]  ;;  %v10264_v14 = vld [vmem:[#allocation3 + $0x38c] sm:$0xf0] }
 0x3a5   : > { %v5534_v21 = vpop.f32.mrf.mxu2  ;;  %v5568_v44 = vpop.f32.mrf.mxu3  ;;  %3281 = vst [vmem:[#allocation3 + $0x430] sm:$0xf] %v3261_v43  ;;  %3802 = vrot.lane.b32.xlu1 %v3773_v36, %s10699_s20  ;;  %v9312_v43 = vor.u32 %v10264_v14, %v9311_v34  ;;  %v10263_v36 = vld [vmem:[#allocation3 + $0x38c] sm:$0xf] }
 0x3a6   : > { %v5535_v37 = vadd.f32 %v5534_v21, %v5501_v4  ;;  %v5468_v23 = vpop.f32.mrf.mxu0  ;;  %v5502_v22 = vpop.f32.mrf.mxu1  ;;  %3642 = vrot.lane.b32.xlu2 %v13501_v57, %s10699_s20  ;;  %3800 = vrot.lane.b32.xlu0 %v13600_v19, %s10699_s20  ;;  %v9313_v19 = vld [vmem:[#allocation3 + $0x390] sm:$0xf0] }
 0x3a7   : > { %v5503_v39 = vadd.f32 %v5502_v22, %v5468_v23  ;;  %v3403_v15 = vpop.permute.xlu1 %3402  ;;  %v9316_v21 = vor.u32 %v10262_v30, %v9313_v19  ;;  %v9324_v22 = vor.u32 %v10263_v36, %v9321_v20  ;;  %v13733_v19 = vld [vmem:[#allocation2 + $0x18] sm:$0xff]  ;;  %v10268_v36 = vld [vmem:[#allocation3 + $0x3ac] sm:$0xf0] }
 0x3a8   : > { %v5569_v46 = vadd.f32 %v5568_v44, %v5535_v37  ;;  %v3625_v32 = vpop.permute.xlu2 %3624  ;;  %v3413_v9 = vrot.slane %v3403_v15, 4  ;;  %v9319_v44 = vld [vmem:[#allocation3 + $0x388] sm:$0xf] }
 0x3a9   : > { %v3401_v3 = vpop.permute.xlu0 %3400  ;;  %v3644_v0 = vrot.slane %v3625_v32, 4  ;;  %v9320_v23 = vor.u32 %v10265_v26, %v9319_v44  ;;  %v13737_v26 = vld [vmem:[#allocation2 + $0x28] sm:$0xff] }
 0x3aa   : > { %v5581_v4 = vmax.f32 %v13432_v58, %v5569_v46  ;;  %v3412_v2 = vrot.slane %v3401_v3, 4  ;;  %v3423_v42 = vsel %vm2212_vm3, %v3403_v15, %v3413_v9 }
 0x3ab   : > { %v3654_v12 = vsel %vm2533_vm4, %v3625_v32, %v3644_v0  ;;  %3443 = vst [vmem:[#allocation3 + $0x458] sm:$0xf] %v3423_v42 }
 0x3ac   : > { %v3422_v57 = vsel %vm2212_vm3, %v3401_v3, %v3412_v2  ;;  %3674 = vst [vmem:[#allocation3 + $0x464] sm:$0xf] %v3654_v12 }
 0x3ad   : > { %v5536_v24 = vpop.f32.mrf.mxu2  ;;  %v5570_v53 = vpop.f32.mrf.mxu3  ;;  %3442 = vst [vmem:[#allocation3 + $0x448] sm:$0xf] %v3422_v57  ;;  %3640 = vrot.lane.b32.xlu1 %v13519_v48, %s10699_s20 }
 0x3ae   : > { %v5537_v47 = vadd.f32 %v5536_v24, %v5503_v39  ;;  %v5749_v10 = vpop.f32.mrf.mxu0  ;;  %v5783_v58 = vpop.f32.mrf.mxu1  ;;  %4184 = vrot.lane.b32.xlu2 %v13718_v60, %s10697_s22  ;;  %3562 = vrot.lane.b32.xlu0 %v13519_v48, %s10699_s20 }
 0x3af   : > { %v5784_v49 = vadd.f32 %v5783_v58, %v5749_v10  ;;  %v3241_v39 = vpop.permute.xlu1 %3240 }
 0x3b0   : > { %v5571_v37 = vadd.f32 %v5570_v53, %v5537_v47  ;;  %v3711_v46 = vpop.permute.xlu2 %3710  ;;  %6019 = vmatmul.bf16.gmra.mxu0 %v9312_v43  ;;  %v3252_v15 = vrot.slane %v3241_v39, 4  ;;  %v5607_v43 = vadd.f32 %v13635_v54, %v13707_v1 }
 0x3b1   : > { %6053 = vmatmul.bf16.gmra.mxu1 %v9316_v21  ;;  %v3321_v32 = vpop.permute.xlu0 %3320  ;;  %v3727_v9 = vrot.slane %v3711_v46, 4 }
 0x3b2   : > { %v5582_v3 = vmax.f32 %v13443_v18, %v5571_v37  ;;  %6087 = vmatmul.bf16.gmra.mxu2 %v9320_v23  ;;  %6121 = vmatmul.bf16.gmra.mxu3 %v9324_v22  ;;  %v3332_v0 = vrot.slane %v3321_v32, 4  ;;  %v3262_v2 = vsel %vm2212_vm3, %v3241_v39, %v3252_v15  ;;  %v3924_v37 = vld [vmem:[#allocation2 + $0x8] sm:$0xff]  ;;  %v9329_v22 = vld [vmem:[#allocation3 + $0x3b0] sm:$0xf0] }
 0x3b3   : > { %v3737_v42 = vsel %vm2533_vm4, %v3711_v46, %v3727_v9  ;;  %3282 = vst [vmem:[#allocation3 + $0x440] sm:$0xf] %v3262_v2  ;;  %v13750_v39 = vld [vmem:[#allocation2 + $0x48] sm:$0xff]  ;;  %v5608_v46 = vmax.f32 %v5607_v43, 0.0 }
 0x3b4   : > { %v13730_v48 = vmax.f32 %v5581_v4, %v5582_v3  ;;  %v3342_v12 = vsel %vm2212_vm3, %v3321_v32, %v3332_v0  ;;  %3757 = vst [vmem:[#allocation3 + $0x498] sm:$0xf] %v3737_v42  ;;  %v10269_v9 = vld [vmem:[#allocation3 + $0x3b4] sm:$0xf0]  ;;  %v10267_v3 = vld [vmem:[#allocation3 + $0x3ac] sm:$0xf] }
 0x3b5   : > { %v5817_v57 = vpop.f32.mrf.mxu2  ;;  %v5851_v34 = vpop.f32.mrf.mxu3  ;;  %3362 = vst [vmem:[#allocation3 + $0x444] sm:$0xf] %v3342_v12  ;;  %4106 = vrot.lane.b32.xlu1 %v13718_v60, %s10697_s22  ;;  %v9327_v42 = vld [vmem:[#allocation3 + $0x3a0] sm:$0xf]  ;;  %v10266_v12 = vld [vmem:[#allocation3 + $0x3a4] sm:$0xf] }
 0x3b6   : > { %v5818_v24 = vadd.f32 %v5817_v57, %v5784_v49  ;;  %v5751_v53 = vpop.f32.mrf.mxu0  ;;  %v5785_v18 = vpop.f32.mrf.mxu1  ;;  %3946 = vrot.lane.b32.xlu2 %v13733_v19, %s10697_s22  ;;  %4104 = vrot.lane.b32.xlu0 %v13737_v26, %s10697_s22  ;;  %v5609_v57 = vpack.c.bf16 %v5608_v46, %v5608_v46 }
 0x3b7   : > { %v5786_v4 = vadd.f32 %v5785_v18, %v5751_v53  ;;  %v3323_v47 = vpop.permute.xlu1 %3322  ;;  %v9332_v53 = vor.u32 %v10266_v12, %v9329_v22  ;;  %v9335_v18 = vld [vmem:[#allocation3 + $0x3a8] sm:$0xf] }
 0x3b8   : > { %v13743_v20 = vadd.f32 %v5851_v34, %v5818_v24  ;;  %v3549_v10 = vpop.permute.xlu2 %3548  ;;  %v3333_v58 = vrot.slane %v3323_v47, 4  ;;  %v9328_v24 = vor.u32 %v10268_v36, %v9327_v42  ;;  %5610 = vst.msk [vmem:[#allocation4 + $0x10] sm:$0xf] %vm5030_vm5, %v5609_v57 }
 0x3b9   : > { %v3707_v14 = vpop.permute.xlu0 %3706  ;;  %v3566_v30 = vrot.slane %v3549_v10, 4 }
 0x3ba   : > { %v3725_v49 = vrot.slane %v3707_v14, 4  ;;  %v3343_v21 = vsel %vm2212_vm3, %v3323_v47, %v3333_v58  ;;  %v9337_v47 = vld [vmem:[#allocation3 + $0x3b8] sm:$0xf0] }
 0x3bb   : > { %v3576_v44 = vsel %vm2533_vm4, %v3549_v10, %v3566_v30  ;;  %3363 = vst [vmem:[#allocation3 + $0x454] sm:$0xf] %v3343_v21  ;;  %v9336_v10 = vor.u32 %v10269_v9, %v9335_v18  ;;  %v9340_v58 = vor.u32 %v10267_v3, %v9337_v47  ;;  %v13775_v47 = vld [vmem:[#allocation2 + $0x58] sm:$0xff] }
 0x3bc   : > { %v3735_v23 = vsel %vm2533_vm4, %v3707_v14, %v3725_v49  ;;  %3596 = vst [vmem:[#allocation3 + $0x480] sm:$0xf] %v3576_v44 }
 0x3bd   : > { %v5819_v15 = vpop.f32.mrf.mxu2  ;;  %v5853_v32 = vpop.f32.mrf.mxu3  ;;  %3755 = vst [vmem:[#allocation3 + $0x478] sm:$0xf] %v3735_v23  ;;  %3944 = vrot.lane.b32.xlu1 %v3924_v37, %s10697_s22 }
 0x3be   : > { %v5820_v0 = vadd.f32 %v5819_v15, %v5786_v4  ;;  %v5754_v1 = vpop.f32.mrf.mxu0  ;;  %v5788_v2 = vpop.f32.mrf.mxu1  ;;  %4108 = vrot.lane.b32.xlu2 %v13750_v39, %s10697_s22  ;;  %4186 = vrot.lane.b32.xlu0 %v13750_v39, %s10697_s22  ;;  %v13763_v15 = vld [vmem:[#allocation2 + $0x68] sm:$0xff] }
 0x3bf   : > { %v5789_v34 = vadd.f32 %v5788_v2, %v5754_v1  ;;  %v3785_v14 = vpop.permute.xlu1 %3784 }
 0x3c0   : > { %v13757_v4 = vadd.f32 %v5853_v32, %v5820_v0  ;;  %v3631_v30 = vpop.permute.xlu2 %3630  ;;  %6024 = vmatmul.bf16.gmra.mxu0 %v9328_v24  ;;  %v3804_v49 = vrot.slane %v3785_v14, 4 }
 0x3c1   : > { %6058 = vmatmul.bf16.gmra.mxu1 %v9332_v53  ;;  %v3545_v43 = vpop.permute.xlu0 %3544  ;;  %v3647_v21 = vrot.slane %v3631_v30, 4 }
 0x3c2   : > { %6092 = vmatmul.bf16.gmra.mxu2 %v9336_v10  ;;  %6126 = vmatmul.bf16.gmra.mxu3 %v9340_v58  ;;  %v3564_v44 = vrot.slane %v3545_v43, 4  ;;  %v3814_v36 = vsel %vm2533_vm4, %v3785_v14, %v3804_v49  ;;  %v10272_v58 = vld [vmem:[#allocation3 + $0x3cc] sm:$0xf0]  ;;  %v10270_v14 = vld [vmem:[#allocation3 + $0x3c4] sm:$0xf] }
 0x3c3   : > { %v3657_v37 = vsel %vm2533_vm4, %v3631_v30, %v3647_v21  ;;  %3834 = vst [vmem:[#allocation3 + $0x46c] sm:$0xf] %v3814_v36  ;;  %v9351_v49 = vld [vmem:[#allocation3 + $0x3c8] sm:$0xf] }
 0x3c4   : > { %v3574_v23 = vsel %vm2533_vm4, %v3545_v43, %v3564_v44  ;;  %3677 = vst [vmem:[#allocation3 + $0x494] sm:$0xf] %v3657_v37  ;;  %v9353_v43 = vld [vmem:[#allocation3 + $0x3d8] sm:$0xf0]  ;;  %v9343_v37 = vld [vmem:[#allocation3 + $0x3c0] sm:$0xf] }
 0x3c5   : > { %v5822_v22 = vpop.f32.mrf.mxu2  ;;  %v5856_v46 = vpop.f32.mrf.mxu3  ;;  %3594 = vst [vmem:[#allocation3 + $0x460] sm:$0xf] %v3574_v23  ;;  %4026 = vrot.lane.b32.xlu1 %v13737_v26, %s10697_s22  ;;  %v9345_v23 = vld [vmem:[#allocation3 + $0x3d0] sm:$0xf0] }
 0x3c6   : > { %v5823_v32 = vadd.f32 %v5822_v22, %v5789_v34  ;;  %v5756_v9 = vpop.f32.mrf.mxu0  ;;  %v5790_v3 = vpop.f32.mrf.mxu1  ;;  %4190 = vrot.lane.b32.xlu2 %v13763_v15, %s10697_s22  ;;  %4024 = vrot.lane.b32.xlu0 %v13733_v19, %s10697_s22 }
 0x3c7   : > { %v5791_v0 = vadd.f32 %v5790_v3, %v5756_v9  ;;  %v3547_v2 = vpop.permute.xlu1 %3546  ;;  %v10273_v9 = vld [vmem:[#allocation3 + $0x3d4] sm:$0xf0]  ;;  %v10271_v3 = vld [vmem:[#allocation3 + $0x3cc] sm:$0xf] }
 0x3c8   : > { %v13771_v1 = vadd.f32 %v5856_v46, %v5823_v32  ;;  %v3793_v42 = vpop.permute.xlu2 %3792  ;;  %v3565_v12 = vrot.slane %v3547_v2, 4  ;;  %v9344_v46 = vor.u32 %v10272_v58, %v9343_v37  ;;  %v9348_v32 = vor.u32 %v10270_v14, %v9345_v23  ;;  %v13791_v14 = vld [vmem:[%s14579_s4 + $0xb8] sm:$0xff] }
 0x3c9   : > { %v3483_v57 = vpop.permute.xlu0 %3482  ;;  %v3808_v34 = vrot.slane %v3793_v42, 4 }
 0x3ca   : > { %v3493_v24 = vrot.slane %v3483_v57, 4  ;;  %v3575_v53 = vsel %vm2533_vm4, %v3547_v2, %v3565_v12  ;;  %v9352_v2 = vor.u32 %v10273_v9, %v9351_v49  ;;  %v13804_v49 = vld [vmem:[%s14579_s4 + $0x78] sm:$0xff]  ;;  %v13824_v9 = vld [vmem:[%s14579_s4 + $0xb0] sm:$0xff] }
 0x3cb   : > { %v3818_v18 = vsel %vm2533_vm4, %v3793_v42, %v3808_v34  ;;  %3595 = vst [vmem:[#allocation3 + $0x470] sm:$0xf] %v3575_v53  ;;  %v9356_v42 = vor.u32 %v10271_v3, %v9353_v43  ;;  %v13810_v43 = vld [vmem:[%s14579_s4 + $0x38] sm:$0xff] }
 0x3cc   : > { %v3503_v10 = vsel %vm2212_vm3, %v3483_v57, %v3493_v24  ;;  %3838 = vst [vmem:[#allocation3 + $0x4ac] sm:$0xf] %v3818_v18 }
 0x3cd   : > { %v5824_v19 = vpop.f32.mrf.mxu2  ;;  %v5858_v30 = vpop.f32.mrf.mxu3  ;;  %3523 = vst [vmem:[#allocation3 + $0x45c] sm:$0xf] %v3503_v10  ;;  %4188 = vrot.lane.b32.xlu1 %v13775_v47, %s10697_s22 }
 0x3ce   : > { %v5825_v21 = vadd.f32 %v5824_v19, %v5791_v0  ;;  %v5759_v44 = vpop.f32.mrf.mxu0  ;;  %v5793_v36 = vpop.f32.mrf.mxu1  ;;  %4028 = vrot.lane.b32.xlu2 %v13718_v60, %s10697_s22  ;;  %4110 = vrot.lane.b32.xlu0 %v13775_v47, %s10697_s22  ;;  %v13797_v19 = vld [vmem:[%s14579_s4 + $0xf8] sm:$0xff] }
 0x3cf   : > { %v5794_v22 = vadd.f32 %v5793_v36, %v5759_v44  ;;  %v3709_v12 = vpop.permute.xlu1 %3708  ;;  %v13813_v36 = vld [vmem:[#allocation2 + $0x78] sm:$0xff] }
 0x3d0   : > { %v13784_v0 = vadd.f32 %v5858_v30, %v5825_v21  ;;  %v3555_v57 = vpop.permute.xlu2 %3554  ;;  %6303 = vmatmul.bf16.vlgmr.msra.gmra.mxu0 %v9344_v46  ;;  %v3726_v34 = vrot.slane %v3709_v12, 4 }
 0x3d1   : > { %6337 = vmatmul.bf16.vlgmr.msra.gmra.mxu1 %v9348_v32  ;;  %v3627_v24 = vpop.permute.xlu0 %3626  ;;  %v3569_v53 = vrot.slane %v3555_v57, 4  ;;  %6854 = vmatpush.bf16.msra.mxu0 %v13810_v43 }
 0x3d2   : > { %6371 = vmatmul.bf16.vlgmr.msra.gmra.mxu2 %v9352_v2  ;;  %6405 = vmatmul.bf16.vlgmr.msra.gmra.mxu3 %v9356_v42  ;;  %v3645_v18 = vrot.slane %v3627_v24, 4  ;;  %v3736_v10 = vsel %vm2533_vm4, %v3709_v12, %v3726_v34  ;;  %v13844_v34 = vld [vmem:[%s14579_s4 + $0x30] sm:$0xff] }
 0x3d3   : > { %v3579_v58 = vsel %vm2533_vm4, %v3555_v57, %v3569_v53  ;;  %6922 = vmatpush.bf16.msra.mxu2 %v13791_v14  ;;  %6956 = vmatpush.bf16.msra.mxu3 %v13797_v19  ;;  %3756 = vst [vmem:[#allocation3 + $0x488] sm:$0xf] %v3736_v10 }
 0x3d4   : > { %v3655_v30 = vsel %vm2533_vm4, %v3627_v24, %v3645_v18  ;;  %6888 = vmatpush.bf16.msra.mxu1 %v13804_v49  ;;  %3599 = vst [vmem:[#allocation3 + $0x4b0] sm:$0xf] %v3579_v58  ;;  %v9359_v58 = vld [vmem:[#allocation3 + $0x3e0] sm:$0xf] }
 0x3d5   : > { %v5827_v21 = vpop.f32.mrf.mxu2  ;;  %v5861_v44 = vpop.f32.mrf.mxu3  ;;  %3675 = vst [vmem:[#allocation3 + $0x474] sm:$0xf] %v3655_v30  ;;  %3950 = vrot.lane.b32.xlu1 %v13718_v60, %s10697_s22  ;;  %v13832_v60 = vld [vmem:[%s14579_s4 + $0xf0] sm:$0xff]  ;;  %6855 = vmatpush.bf16.msra.mxu0 %v13844_v34  ;;  %v9361_v30 = vld [vmem:[#allocation3 + $0x3f0] sm:$0xf0] }
 0x3d6   : > { %v5828_v37 = vadd.f32 %v5827_v21, %v5794_v22  ;;  %v5761_v23 = vpop.f32.mrf.mxu0  ;;  %v5795_v46 = vpop.f32.mrf.mxu1  ;;  %4114 = vrot.lane.b32.xlu2 %v13813_v36, %s10697_s22  ;;  %3948 = vrot.lane.b32.xlu0 %v13737_v26, %s10697_s22  ;;  %v13838_v26 = vld [vmem:[%s14579_s4 + $0x70] sm:$0xff] }
 0x3d7   : > { %v5796_v32 = vadd.f32 %v5795_v46, %v5761_v23  ;;  %6923 = vmatpush.bf16.msra.mxu2 %v13824_v9  ;;  %v3791_v3 = vpop.permute.xlu1 %3790  ;;  %6957 = vmatpush.bf16.msra.mxu3 %v13832_v60  ;;  %v9369_v23 = vld [vmem:[#allocation3 + $0x3f8] sm:$0xf0] }
 0x3d8   : > { %v13827_v22 = vadd.f32 %v5861_v44, %v5828_v37  ;;  %v3717_v2 = vpop.permute.xlu2 %3716  ;;  %6889 = vmatpush.bf16.msra.mxu1 %v13838_v26  ;;  %v3807_v42 = vrot.slane %v3791_v3, 4  ;;  %v10277_v37 = vld [vmem:[#allocation3 + $0x3f4] sm:$0xf0] }
 0x3d9   : > { %v3789_v12 = vpop.permute.xlu0 %3788  ;;  %v3730_v57 = vrot.slane %v3717_v2, 4  ;;  %6856 = vmatpush.bf16.msra.mxu0 %v13543_v40 }
 0x3da   : > { %v3806_v24 = vrot.slane %v3789_v12, 4  ;;  %v3817_v53 = vsel %vm2533_vm4, %v3791_v3, %v3807_v42  ;;  %v10274_v42 = vld [vmem:[#allocation3 + $0x3e4] sm:$0xf] }
 0x3db   : > { %v3740_v18 = vsel %vm2533_vm4, %v3717_v2, %v3730_v57  ;;  %6924 = vmatpush.bf16.msra.mxu2 %v13524_v6  ;;  %3837 = vst [vmem:[#allocation3 + $0x49c] sm:$0xf] %v3817_v53  ;;  %6958 = vmatpush.bf16.msra.mxu3 %v13531_v13  ;;  %v10276_v6 = vld [vmem:[#allocation3 + $0x3ec] sm:$0xf0]  ;;  %v9367_v57 = vld [vmem:[#allocation3 + $0x3e8] sm:$0xf] }
 0x3dc   : > { %v3816_v10 = vsel %vm2533_vm4, %v3789_v12, %v3806_v24  ;;  %6890 = vmatpush.bf16.msra.mxu1 %v13537_v27  ;;  %3760 = vst [vmem:[#allocation3 + $0x4c8] sm:$0xf] %v3740_v18  ;;  %v9360_v27 = vor.u32 %v10276_v6, %v9359_v58  ;;  %v9364_v12 = vor.u32 %v10274_v42, %v9361_v30  ;;  %v10275_v24 = vld [vmem:[#allocation3 + $0x3ec] sm:$0xf] }
 0x3dd   : > { %v5829_v21 = vpop.f32.mrf.mxu2  ;;  %v5863_v44 = vpop.f32.mrf.mxu3  ;;  %3836 = vst [vmem:[#allocation3 + $0x48c] sm:$0xf] %v3816_v10  ;;  %4112 = vrot.lane.b32.xlu1 %v13763_v15, %s10697_s22  ;;  %v9372_v53 = vor.u32 %v10275_v24, %v9369_v23  ;;  %6857 = vmatpush.bf16.msra.mxu0 %v13576_v25  ;;  %v13872_v23 = vld [vmem:[#allocation2 + $0x88] sm:$0xff]  ;;  %v9375_v24 = vld [vmem:[#allocation3 + $0x400] sm:$0xf] }
 0x3de   : > { %v5830_v46 = vadd.f32 %v5829_v21, %v5796_v32  ;;  %v5764_v3 = vpop.f32.mrf.mxu0  ;;  %v5798_v2 = vpop.f32.mrf.mxu1  ;;  %3952 = vrot.lane.b32.xlu2 %v13750_v39, %s10697_s22  ;;  %4030 = vrot.lane.b32.xlu0 %v13750_v39, %s10697_s22  ;;  %v9368_v32 = vor.u32 %v10277_v37, %v9367_v57 }
 0x3df   : > { %v5799_v13 = vadd.f32 %v5798_v2, %v5764_v3  ;;  %6925 = vmatpush.bf16.msra.mxu2 %v13555_v41  ;;  %v3629_v18 = vpop.permute.xlu1 %3628  ;;  %6959 = vmatpush.bf16.msra.mxu3 %v13561_v8 }
 0x3e0   : > { %v13861_v40 = vadd.f32 %v5863_v44, %v5830_v46  ;;  %v3799_v10 = vpop.permute.xlu2 %3798  ;;  %6891 = vmatpush.bf16.msra.mxu1 %v13567_v52  ;;  %6308 = vmatmul.bf16.gmra.mxu0 %v9360_v27  ;;  %v3646_v58 = vrot.slane %v3629_v18, 4 }
 0x3e1   : > { %6342 = vmatmul.bf16.gmra.mxu1 %v9364_v12  ;;  %v3551_v30 = vpop.permute.xlu0 %3550  ;;  %v3811_v21 = vrot.slane %v3799_v10, 4  ;;  %6858 = vmatpush.bf16.msra.mxu0 %v13611_v28  ;;  %v13888_v28 = vld [vmem:[#allocation2 + $0x98] sm:$0xff] }
 0x3e2   : > { %6376 = vmatmul.bf16.gmra.mxu2 %v9368_v32  ;;  %6410 = vmatmul.bf16.gmra.mxu3 %v9372_v53  ;;  %v3567_v39 = vrot.slane %v3551_v30, 4  ;;  %v3656_v41 = vsel %vm2533_vm4, %v3629_v18, %v3646_v58  ;;  %v10280_v32 = vld [vmem:[#allocation3 + $0x40c] sm:$0xf0]  ;;  %v10281_v18 = vld [vmem:[#allocation3 + $0x414] sm:$0xf0] }
 0x3e3   : > { %v3821_v44 = vsel %vm2533_vm4, %v3799_v10, %v3811_v21  ;;  %6926 = vmatpush.bf16.msra.mxu2 %v13582_v56  ;;  %3676 = vst [vmem:[#allocation3 + $0x484] sm:$0xf] %v3656_v41  ;;  %6960 = vmatpush.bf16.msra.mxu3 %v13591_v45  ;;  %v10279_v10 = vld [vmem:[#allocation3 + $0x40c] sm:$0xf]  ;;  %v9383_v41 = vld [vmem:[#allocation3 + $0x408] sm:$0xf] }
 0x3e4   : > { %v3577_v8 = vsel %vm2533_vm4, %v3551_v30, %v3567_v39  ;;  %6892 = vmatpush.bf16.msra.mxu1 %v13597_v17  ;;  %3841 = vst [vmem:[#allocation3 + $0x4dc] sm:$0xf] %v3821_v44  ;;  %v9385_v44 = vld [vmem:[#allocation3 + $0x418] sm:$0xf0] }
 0x3e5   : > { %v5832_v52 = vpop.f32.mrf.mxu2  ;;  %v5866_v37 = vpop.f32.mrf.mxu3  ;;  %3597 = vst [vmem:[#allocation3 + $0x490] sm:$0xf] %v3577_v8  ;;  %4194 = vrot.lane.b32.xlu1 %v13872_v23, %s10697_s22  ;;  %6859 = vmatpush.bf16.msra.mxu0 %v13644_v38  ;;  %v10278_v38 = vld [vmem:[#allocation3 + $0x404] sm:$0xf]  ;;  %v9384_v8 = vor.u32 %v10281_v18, %v9383_v41  ;;  %v13921_v18 = vld [vmem:[#allocation2 + $0xa8] sm:$0xff] }
 0x3e6   : > { %v5833_v46 = vadd.f32 %v5832_v52, %v5799_v13  ;;  %v5766_v3 = vpop.f32.mrf.mxu0  ;;  %v5800_v2 = vpop.f32.mrf.mxu1  ;;  %4034 = vrot.lane.b32.xlu2 %v13763_v15, %s10697_s22  ;;  %4192 = vrot.lane.b32.xlu0 %v13813_v36, %s10697_s22  ;;  %v9388_v52 = vor.u32 %v10279_v10, %v9385_v44 }
 0x3e7   : > { %v5801_v25 = vadd.f32 %v5800_v2, %v5766_v3  ;;  %v3715_v45 = vpop.permute.xlu1 %3714  ;;  %6927 = vmatpush.bf16.msra.mxu2 %v13617_v35  ;;  %6961 = vmatpush.bf16.msra.mxu3 %v13623_v59  ;;  %v9377_v59 = vld [vmem:[#allocation3 + $0x410] sm:$0xf0] }
 0x3e8   : > { %v13881_v56 = vadd.f32 %v5866_v37, %v5833_v46  ;;  %v3637_v17 = vpop.permute.xlu2 %3636  ;;  %v3729_v6 = vrot.slane %v3715_v45, 4  ;;  %6893 = vmatpush.bf16.msra.mxu1 %v13629_v5  ;;  %v9380_v39 = vor.u32 %v10278_v38, %v9377_v59 }
 0x3e9   : > { %v3713_v42 = vpop.permute.xlu0 %3712  ;;  %v3650_v13 = vrot.slane %v3637_v17, 4  ;;  %6860 = vmatpush.bf16.msra.mxu0 %v13675_v16 }
 0x3ea   : > { %v3728_v27 = vrot.slane %v3713_v42, 4  ;;  %v3739_v12 = vsel %vm2533_vm4, %v3715_v45, %v3729_v6 }
 0x3eb   : > { %v3660_v57 = vsel %vm2533_vm4, %v3637_v17, %v3650_v13  ;;  %3759 = vst [vmem:[#allocation3 + $0x4b8] sm:$0xf] %v3739_v12  ;;  %6928 = vmatpush.bf16.msra.mxu2 %v13651_v29  ;;  %6962 = vmatpush.bf16.msra.mxu3 %v13657_v55  ;;  %v9376_v55 = vor.u32 %v10280_v32, %v9375_v24 }
 0x3ec   : > { %v3738_v35 = vsel %vm2533_vm4, %v3713_v42, %v3728_v27  ;;  %6894 = vmatpush.bf16.msra.mxu1 %v13663_v31  ;;  %3680 = vst [vmem:[#allocation3 + $0x4c4] sm:$0xf] %v3660_v57 }
 0x3ed   : > { %v5834_v5 = vpop.f32.mrf.mxu2  ;;  %v5868_v53 = vpop.f32.mrf.mxu3  ;;  %3758 = vst [vmem:[#allocation3 + $0x4a8] sm:$0xf] %v3738_v35  ;;  %4032 = vrot.lane.b32.xlu1 %v13775_v47, %s10697_s22  ;;  %6861 = vmatpush.bf16.msra.mxu0 %v13698_v63 }
 0x3ee   : > { %v5835_v58 = vadd.f32 %v5834_v5, %v5801_v25  ;;  %v5769_v30 = vpop.f32.mrf.mxu0  ;;  %v5803_v21 = vpop.f32.mrf.mxu1  ;;  %4196 = vrot.lane.b32.xlu2 %v13888_v28, %s10697_s22  ;;  %3954 = vrot.lane.b32.xlu0 %v13775_v47, %s10697_s22 }
 0x3ef   : > { %v5804_v29 = vadd.f32 %v5803_v21, %v5769_v30  ;;  %v3553_v37 = vpop.permute.xlu1 %3552  ;;  %6929 = vmatpush.bf16.msra.mxu2 %v13681_v51  ;;  %6963 = vmatpush.bf16.msra.mxu3 %v13687_v7  ;;  %v10282_v30 = vld [vmem:[#allocation3 + $0x424] sm:$0xf] }
 0x3f0   : > { %v13902_v31 = vadd.f32 %v5868_v53, %v5835_v58  ;;  %v3723_v46 = vpop.permute.xlu2 %3722  ;;  %6313 = vmatmul.bf16.gmra.mxu0 %v9376_v55  ;;  %v3568_v3 = vrot.slane %v3553_v37, 4  ;;  %6895 = vmatpush.bf16.msra.mxu1 %v13704_v61  ;;  %v9399_v53 = vld [vmem:[#allocation3 + $0x428] sm:$0xf]  ;;  %v10284_v58 = vld [vmem:[#allocation3 + $0x42c] sm:$0xf0] }
 0x3f1   : > { %6347 = vmatmul.bf16.gmra.mxu1 %v9380_v39  ;;  %v3795_v2 = vpop.permute.xlu0 %3794  ;;  %v3733_v25 = vrot.slane %v3723_v46, 4  ;;  %v9401_v55 = vld [vmem:[#allocation3 + $0x438] sm:$0xf0] }
 0x3f2   : > { %6381 = vmatmul.bf16.gmra.mxu2 %v9384_v8  ;;  %6415 = vmatmul.bf16.gmra.mxu3 %v9388_v52  ;;  %v3809_v47 = vrot.slane %v3795_v2, 4  ;;  %v3578_v16 = vsel %vm2533_vm4, %v3553_v37, %v3568_v3  ;;  %v9391_v8 = vld [vmem:[#allocation3 + $0x420] sm:$0xf]  ;;  %v9393_v52 = vld [vmem:[#allocation3 + $0x430] sm:$0xf0] }
 0x3f3   : > { %v3743_v45 = vsel %vm2533_vm4, %v3723_v46, %v3733_v25  ;;  %3598 = vst [vmem:[#allocation3 + $0x4a0] sm:$0xf] %v3578_v16  ;;  %v9392_v37 = vor.u32 %v10284_v58, %v9391_v8  ;;  %v9396_v46 = vor.u32 %v10282_v30, %v9393_v52  ;;  %v10285_v3 = vld [vmem:[#allocation3 + $0x434] sm:$0xf0] }
 0x3f4   : > { %v3819_v51 = vsel %vm2533_vm4, %v3795_v2, %v3809_v47  ;;  %3763 = vst [vmem:[#allocation3 + $0x4f8] sm:$0xf] %v3743_v45  ;;  %v9400_v25 = vor.u32 %v10285_v3, %v9399_v53  ;;  %v9417_v3 = vld [vmem:[#allocation3 + $0x458] sm:$0xf0] }
 0x3f5   : > { %v5837_v7 = vpop.f32.mrf.mxu2  ;;  %v5871_v17 = vpop.f32.mrf.mxu3  ;;  %3839 = vst [vmem:[#allocation3 + $0x4bc] sm:$0xf] %v3819_v51  ;;  %4118 = vrot.lane.b32.xlu1 %v13888_v28, %s10697_s22 }
 0x3f6   : > { %v5838_v6 = vadd.f32 %v5837_v7, %v5804_v29  ;;  %v5771_v42 = vpop.f32.mrf.mxu0  ;;  %v5805_v13 = vpop.f32.mrf.mxu1  ;;  %3958 = vrot.lane.b32.xlu2 %v13813_v36, %s10697_s22  ;;  %4116 = vrot.lane.b32.xlu0 %v13872_v23, %s10697_s22  ;;  %v10283_v29 = vld [vmem:[#allocation3 + $0x42c] sm:$0xf] }
 0x3f7   : > { %v5806_v27 = vadd.f32 %v5805_v13, %v5771_v42  ;;  %v3635_v61 = vpop.permute.xlu1 %3634  ;;  %v9404_v47 = vor.u32 %v10283_v29, %v9401_v55  ;;  %v9415_v29 = vld [vmem:[#allocation3 + $0x448] sm:$0xf] }
 0x3f8   : > { %v13917_v63 = vadd.f32 %v5871_v17, %v5838_v6  ;;  %v3561_v12 = vpop.permute.xlu2 %3560  ;;  %v3649_v57 = vrot.slane %v3635_v61, 4  ;;  %v4172_v55 = vld [vmem:[#allocation2 + $0xb8] sm:$0xff] }
 0x3f9   : > { %v3633_v24 = vpop.permute.xlu0 %3632  ;;  %v3572_v35 = vrot.slane %v3561_v12, 4 }
 0x3fa   : > { %v3648_v32 = vrot.slane %v3633_v24, 4  ;;  %v3659_v59 = vsel %vm2533_vm4, %v3635_v61, %v3649_v57 }
 0x3fb   : > { %v3582_v5 = vsel %vm2533_vm4, %v3561_v12, %v3572_v35  ;;  %3679 = vst [vmem:[#allocation3 + $0x4b4] sm:$0xf] %v3659_v59  ;;  %v4173_v12 = vld [vmem:[#allocation2 + $0xc8] sm:$0xff] }
 0x3fc   : > { %v3658_v10 = vsel %vm2533_vm4, %v3633_v24, %v3648_v32  ;;  %3602 = vst [vmem:[#allocation3 + $0x4e0] sm:$0xf] %v3582_v5 }
 0x3fd   : > { %v5839_v21 = vpop.f32.mrf.mxu2  ;;  %v5873_v38 = vpop.f32.mrf.mxu3  ;;  %3678 = vst [vmem:[#allocation3 + $0x4a4] sm:$0xf] %v3658_v10  ;;  %3956 = vrot.lane.b32.xlu1 %v13763_v15, %s10697_s22 }
 0x3fe   : > { %v5840_v39 = vadd.f32 %v5839_v21, %v5806_v27  ;;  %v6005_v41 = vpop.f32.mrf.mxu0  ;;  %v6039_v44 = vpop.f32.mrf.mxu1  ;;  %4120 = vrot.lane.b32.xlu2 %v13921_v18, %s10697_s22  ;;  %4198 = vrot.lane.b32.xlu0 %v13921_v18, %s10697_s22 }
 0x3ff   : > { %v3797_v16 = vpop.permute.xlu1 %3796  ;;  %v6040_v35 = vadd.f32 %v6039_v44, %v6005_v41  ;;  %v9407_v41 = vld [vmem:[#allocation3 + $0x440] sm:$0xf]  ;;  %v9409_v44 = vld [vmem:[#allocation3 + $0x450] sm:$0xf0] }
 0x400   : > { %v13930_v2 = vadd.f32 %v5873_v38, %v5840_v39  ;;  %v3643_v45 = vpop.permute.xlu2 %3642  ;;  %6318 = vmatmul.bf16.gmra.mxu0 %v9392_v37  ;;  %v3810_v51 = vrot.slane %v3797_v16, 4  ;;  %v5048_v39 = vadd.f32 %v13635_v54, %v13228_v50 }
 0x401   : > { %6352 = vmatmul.bf16.gmra.mxu1 %v9396_v46  ;;  %v3719_v7 = vpop.permute.xlu0 %3718  ;;  %v3653_v15 = vrot.slane %v3643_v45, 4  ;;  %v10289_v46 = vld [vmem:[#allocation3 + $0x454] sm:$0xf0] }
 0x402   : > { %6386 = vmatmul.bf16.gmra.mxu2 %v9400_v25  ;;  %6420 = vmatmul.bf16.gmra.mxu3 %v9404_v47  ;;  %v3731_v17 = vrot.slane %v3719_v7, 4  ;;  %v3820_v6 = vsel %vm2533_vm4, %v3797_v16, %v3810_v51  ;;  %v10288_v51 = vld [vmem:[#allocation3 + $0x44c] sm:$0xf0] }
 0x403   : > { %v3663_v42 = vsel %vm2533_vm4, %v3643_v45, %v3653_v15  ;;  %3840 = vst [vmem:[#allocation3 + $0x4cc] sm:$0xf] %v3820_v6  ;;  %v9408_v50 = vor.u32 %v10288_v51, %v9407_v41  ;;  %v10287_v15 = vld [vmem:[#allocation3 + $0x44c] sm:$0xf]  ;;  %v9416_v6 = vor.u32 %v10289_v46, %v9415_v29 }
 0x404   : > { %v3741_v13 = vsel %vm2533_vm4, %v3719_v7, %v3731_v17  ;;  %3683 = vst [vmem:[#allocation3 + $0x4f4] sm:$0xf] %v3663_v42  ;;  %v10286_v7 = vld [vmem:[#allocation3 + $0x444] sm:$0xf]  ;;  %v9420_v42 = vor.u32 %v10287_v15, %v9417_v3 }
 0x405   : > { %v6073_v27 = vpop.f32.mrf.mxu2  ;;  %v6107_v61 = vpop.f32.mrf.mxu3  ;;  %3761 = vst [vmem:[#allocation3 + $0x4d8] sm:$0xf] %v3741_v13  ;;  %4038 = vrot.lane.b32.xlu1 %v13872_v23, %s10697_s22  ;;  %v9412_v54 = vor.u32 %v10286_v7, %v9409_v44 }
 0x406   : > { %v6007_v57 = vpop.f32.mrf.mxu0  ;;  %v6041_v24 = vpop.f32.mrf.mxu1  ;;  %4202 = vrot.lane.b32.xlu2 %v4173_v12, %s10697_s22  ;;  %4036 = vrot.lane.b32.xlu0 %v13813_v36, %s10697_s22  ;;  %v6074_v58 = vadd.f32 %v6073_v27, %v6040_v35 }
 0x407   : > { %v3559_v32 = vpop.permute.xlu1 %3558  ;;  %v6042_v8 = vadd.f32 %v6041_v24, %v6007_v57 }
 0x408   : > { %v4185_v59 = vpop.permute.xlu2 %4184  ;;  %v3571_v5 = vrot.slane %v3559_v32, 4  ;;  %v6108_v25 = vadd.f32 %v6107_v61, %v6074_v58  ;;  %v5049_v61 = vmax.f32 %v5048_v39, 0.0 }
 0x409   : > { %v3557_v53 = vpop.permute.xlu0 %3556  ;;  %v4204_v10 = vrot.slane %v4185_v59, 4 }
 0x40a   : > { %v3570_v30 = vrot.slane %v3557_v53, 4  ;;  %v3581_v21 = vsel %vm2533_vm4, %v3559_v32, %v3571_v5  ;;  %v6132_v35 = vmax.f32 %v13743_v20, %v6108_v25  ;;  %v13954_v5 = vld [vmem:[%s14580_s5] ss:$0 sm:$0xff] }
 0x40b   : > { %v4214_v38 = vsel %vm1891_vm2, %v4185_v59, %v4204_v10  ;;  %3601 = vst [vmem:[#allocation3 + $0x4d0] sm:$0xf] %v3581_v21  ;;  %v5612_v20 = vadd.f32 %v13954_v5, %v13730_v48  ;;  %v5050_v21 = vpack.c.bf16 %v5049_v61, %v5049_v61  ;;  %v5598_v51 = vadd.f32 %v13954_v5, %v13585_v62  ;;  %v9423_v62 = vld [vmem:[#allocation3 + $0x460] sm:$0xf] }
 0x40c   : > { %v3580_v36 = vsel %vm2533_vm4, %v3557_v53, %v3570_v30  ;;  %4234 = vst [vmem:[#allocation3 + $0x5ac] sm:$0xf] %v4214_v38  ;;  %v5033_v53 = vadd.f32 %v13954_v5, %v13015_v11 }
 0x40d   : > { %v6075_v52 = vpop.f32.mrf.mxu2  ;;  %v6109_v37 = vpop.f32.mrf.mxu3  ;;  %3600 = vst [vmem:[#allocation3 + $0x4c0] sm:$0xf] %v3580_v36  ;;  %4200 = vrot.lane.b32.xlu1 %v4172_v55, %s10697_s22  ;;  %v5613_v41 = vmax.f32 %v5612_v20, 0.0 }
 0x40e   : > { %v6076_v47 = vadd.f32 %v6075_v52, %v6042_v8  ;;  %v6010_v16 = vpop.f32.mrf.mxu0  ;;  %v6044_v45 = vpop.f32.mrf.mxu1  ;;  %4040 = vrot.lane.b32.xlu2 %v13888_v28, %s10697_s22  ;;  %4122 = vrot.lane.b32.xlu0 %v4172_v55, %s10697_s22  ;;  %v5034_v11 = vmax.f32 %v5033_v53, 0.0 }
 0x40f   : > { %v3721_v13 = vpop.permute.xlu1 %3720  ;;  %v6045_v48 = vadd.f32 %v6044_v45, %v6010_v16  ;;  %v10292_v16 = vld [vmem:[#allocation3 + $0x46c] sm:$0xf0]  ;;  %v9425_v45 = vld [vmem:[#allocation3 + $0x470] sm:$0xf0] }
 0x410   : > { %v6110_v17 = vadd.f32 %v6109_v37, %v6076_v47  ;;  %v3947_v27 = vpop.permute.xlu2 %3946  ;;  %6323 = vmatmul.bf16.gmra.mxu0 %v9408_v50  ;;  %v3732_v12 = vrot.slane %v3721_v13, 4  ;;  %v5614_v50 = vpack.c.bf16 %v5613_v41, %v5613_v41 }
 0x411   : > { %6357 = vmatmul.bf16.gmra.mxu1 %v9412_v54  ;;  %v3639_v57 = vpop.permute.xlu0 %3638  ;;  %v3965_v24 = vrot.slane %v3947_v27, 4  ;;  %v5584_v54 = vadd.f32 %v13954_v5, %v13471_v33  ;;  %v9433_v33 = vld [vmem:[#allocation3 + $0x478] sm:$0xf0] }
 0x412   : > { %v6133_v32 = vmax.f32 %v13757_v4, %v6110_v17  ;;  %6391 = vmatmul.bf16.gmra.mxu2 %v9416_v6  ;;  %6425 = vmatmul.bf16.gmra.mxu3 %v9420_v42  ;;  %v3651_v59 = vrot.slane %v3639_v57, 4  ;;  %v3742_v10 = vsel %vm2533_vm4, %v3721_v13, %v3732_v12  ;;  %v10293_v6 = vld [vmem:[#allocation3 + $0x474] sm:$0xf0]  ;;  %v10291_v42 = vld [vmem:[#allocation3 + $0x46c] sm:$0xf] }
 0x413   : > { %v3975_v58 = vsel %vm1891_vm2, %v3947_v27, %v3965_v24  ;;  %3762 = vst [vmem:[#allocation3 + $0x4e8] sm:$0xf] %v3742_v10  ;;  %v9424_v24 = vor.u32 %v10292_v16, %v9423_v62  ;;  %v9436_v10 = vor.u32 %v10291_v42, %v9433_v33  ;;  %v9441_v33 = vld [vmem:[#allocation3 + $0x490] sm:$0xf0] }
 0x414   : > { %v13962_v30 = vmax.f32 %v6132_v35, %v6133_v32  ;;  %v3661_v4 = vsel %vm2533_vm4, %v3639_v57, %v3651_v59  ;;  %3995 = vst [vmem:[#allocation3 + $0x5b0] sm:$0xf] %v3975_v58  ;;  %v10290_v57 = vld [vmem:[#allocation3 + $0x464] sm:$0xf]  ;;  %v9431_v32 = vld [vmem:[#allocation3 + $0x468] sm:$0xf] }
 0x415   : > { %v6078_v38 = vpop.f32.mrf.mxu2  ;;  %v6112_v29 = vpop.f32.mrf.mxu3  ;;  %3681 = vst [vmem:[#allocation3 + $0x4d4] sm:$0xf] %v3661_v4  ;;  %3962 = vrot.lane.b32.xlu1 %v13888_v28, %s10697_s22  ;;  %v5035_v28 = vpack.c.bf16 %v5034_v11, %v5034_v11  ;;  %v9428_v35 = vor.u32 %v10290_v57, %v9425_v45  ;;  %v9432_v53 = vor.u32 %v10293_v6, %v9431_v32  ;;  %v5599_v4 = vmax.f32 %v5598_v51, 0.0  ;;  %v10296_v45 = vld [vmem:[#allocation3 + $0x48c] sm:$0xf0] }
 0x416   : > { %v6012_v55 = vpop.f32.mrf.mxu0  ;;  %v6046_v39 = vpop.f32.mrf.mxu1  ;;  %5052 = vrot.lane.b32.xlu2 %v5050_v21, %s10698_s23  ;;  %3960 = vrot.lane.b32.xlu0 %v13872_v23, %s10697_s22  ;;  %v6079_v46 = vadd.f32 %v6078_v38, %v6045_v48  ;;  %v9439_v32 = vld [vmem:[#allocation3 + $0x480] sm:$0xf] }
 0x417   : > { %v3803_v8 = vpop.permute.xlu1 %3802  ;;  %v6047_v7 = vadd.f32 %v6046_v39, %v6012_v55  ;;  %v5585_v55 = vmax.f32 %v5584_v54, 0.0  ;;  %v10294_v54 = vld [vmem:[#allocation3 + $0x484] sm:$0xf] }
 0x418   : > { %v4109_v36 = vpop.permute.xlu2 %4108  ;;  %v3813_v44 = vrot.slane %v3803_v8, 4  ;;  %v6113_v13 = vadd.f32 %v6112_v29, %v6079_v46 }
 0x419   : > { %v3801_v52 = vpop.permute.xlu0 %3800  ;;  %v4126_v37 = vrot.slane %v4109_v36, 4 }
 0x41a   : > { %v3812_v3 = vrot.slane %v3801_v52, 4  ;;  %v3823_v25 = vsel %vm2533_vm4, %v3803_v8, %v3813_v44  ;;  %v6134_v39 = vmax.f32 %v13771_v1, %v6113_v13  ;;  %v5600_v44 = vpack.c.bf16 %v5599_v4, %v5599_v4  ;;  %v10295_v13 = vld [vmem:[#allocation3 + $0x48c] sm:$0xf] }
 0x41b   : > { %v4136_v47 = vsel %vm1891_vm2, %v4109_v36, %v4126_v37  ;;  %3843 = vst [vmem:[#allocation3 + $0x4fc] sm:$0xf] %v3823_v25 }
 0x41c   : > { %v3822_v23 = vsel %vm2533_vm4, %v3801_v52, %v3812_v3  ;;  %4156 = vst [vmem:[#allocation3 + $0x5c8] sm:$0xf] %v4136_v47  ;;  %v5586_v52 = vpack.c.bf16 %v5585_v55, %v5585_v55 }
 0x41d   : > { %v6080_v15 = vpop.f32.mrf.mxu2  ;;  %v6114_v17 = vpop.f32.mrf.mxu3  ;;  %3842 = vst [vmem:[#allocation3 + $0x4ec] sm:$0xf] %v3822_v23  ;;  %5037 = vrot.lane.b32.xlu1 %v5035_v28, %s10698_s23  ;;  %v6143_v23 = vadd.f32 %v13954_v5, %v13962_v30  ;;  %v10608_v30 = vld [vmem:[%s14579_s4 + $0xe8] sm:$0xff] }
 0x41e   : > { %v6081_v27 = vadd.f32 %v6080_v15, %v6047_v7  ;;  %v6015_v61 = vpop.f32.mrf.mxu0  ;;  %v6049_v12 = vpop.f32.mrf.mxu1  ;;  %5616 = vrot.lane.b32.xlu2 %v5614_v50, %s10698_s23  ;;  %4042 = vrot.lane.b32.xlu0 %v13921_v18, %s10697_s22  ;;  %v9447_v50 = vld [vmem:[#allocation3 + $0x488] sm:$0xf]  ;;  %v10609_v15 = vld [vmem:[%s14579_s4 + $0x28] sm:$0xff]  ;;  %s8410_s22 = sshll.u32 %s311_s25, 3 }
 0x41f   : > { %v3641_v58 = vpop.permute.xlu1 %3640  ;;  %s313_s20 = scalar_lea.vmem [#allocation5], %s8410_s22  ;;  %s10653_s22 = scalar_lea.hbm %s14583_s8, 16 }
 0x420   : > { %v6115_v59 = vadd.f32 %v6114_v17, %v6081_v27  ;;  %v4191_v20 = vpop.permute.xlu2 %4190  ;;  %6559 = vmatmul.bf16.vlgmr.msrb.gmra.mxu0 %v9424_v24  ;;  %v3652_v21 = vrot.slane %v3641_v58, 4  ;;  %v6144_v17 = vmax.f32 %v6143_v23, 0.0  ;;  %v9449_v27 = vld [vmem:[#allocation3 + $0x498] sm:$0xf0]  ;;  %v10620_v23 = vld [vmem:[%s14579_s4 + $0xd0] sm:$0xff]  ;;  %p10655_p1 = scmp.lt.s32.totalorder %s10653_s22, %s10649_s13 }
 0x421   : > { %6593 = vmatmul.bf16.vlgmr.msrb.gmra.mxu1 %v9428_v35  ;;  %v3563_v38 = vpop.permute.xlu0 %3562  ;;  %v4207_v29 = vrot.slane %v4191_v20, 4  ;;  %7110 = vmatpush.bf16.msrb.mxu0 %v13810_v43 }
 0x422   : > { %v6135_v11 = vmax.f32 %v13784_v0, %v6115_v59  ;;  %6627 = vmatmul.bf16.vlgmr.msrb.gmra.mxu2 %v9432_v53  ;;  %6661 = vmatmul.bf16.vlgmr.msrb.gmra.mxu3 %v9436_v10  ;;  %v3573_v48 = vrot.slane %v3563_v38, 4  ;;  %v3662_v18 = vsel %vm2533_vm4, %v3641_v58, %v3652_v21  ;;  %v6145_v59 = vpack.c.bf16 %v6144_v17, %v6144_v17  ;;  %v10297_v58 = vld [vmem:[#allocation3 + $0x494] sm:$0xf0]  ;;  %v10622_v17 = vld [vmem:[%s14579_s4 + $0x50] sm:$0xff]  ;;  %p10656_p2 = por %p10655_p1, %p10654_p0 }
 0x423   : > { %v4217_v8 = vsel %vm1891_vm2, %v4191_v20, %v4207_v29  ;;  %7178 = vmatpush.bf16.msrb.mxu2 %v13791_v14  ;;  %7212 = vmatpush.bf16.msrb.mxu3 %v13797_v19  ;;  %3682 = vst [vmem:[#allocation3 + $0x4e4] sm:$0xf] %v3662_v18  ;;  %v6050_v14 = vadd.f32 %v6049_v12, %v6015_v61  ;;  %v10610_v12 = vld [vmem:[%s14579_s4 + $0x68] sm:$0xff]  ;;  %v10611_v20 = vld [vmem:[%s14579_s4 + $0xa0] sm:$0xff] }
 0x424   : > { %v6147_v36 = vmax.f32 %v6134_v39, %v6135_v11  ;;  %v3583_v41 = vsel %vm2533_vm4, %v3563_v38, %v3573_v48  ;;  %7144 = vmatpush.bf16.msrb.mxu1 %v13804_v49  ;;  %4237 = vst [vmem:[#allocation3 + $0x5dc] sm:$0xf] %v4217_v8  ;;  %v9440_v53 = vor.u32 %v10296_v45, %v9439_v32  ;;  %v10612_v39 = vld [vmem:[%s14579_s4 + $0xe0] sm:$0xff]  ;;  %v9465_v32 = vld [vmem:[#allocation3 + $0x4b8] sm:$0xf0]  ;;  %p10657_p3 = pnand %p10656_p2, %p10652_p13 }
 0x425   : > { %v6083_v1 = vpop.f32.mrf.mxu2  ;;  %v6117_v0 = vpop.f32.mrf.mxu3  ;;  %3603 = vst [vmem:[#allocation3 + $0x4f0] sm:$0xf] %v3583_v41  ;;  %5602 = vrot.lane.b32.xlu1 %v5600_v44, %s10698_s23  ;;  %7111 = vmatpush.bf16.msrb.mxu0 %v13844_v34  ;;  %v9444_v10 = vor.u32 %v10294_v54, %v9441_v33  ;;  %v9448_v21 = vor.u32 %v10297_v58, %v9447_v50  ;;  %v10613_v11 = vld [vmem:[%s14579_s4 + $0x20] sm:$0xff] }
 0x426   : > { %v6148_v37 = vadd.f32 %v13954_v5, %v6147_v36  ;;  %v6017_v46 = vpop.f32.mrf.mxu0  ;;  %v6051_v3 = vpop.f32.mrf.mxu1  ;;  %5588 = vrot.lane.b32.xlu0 %v5586_v52, %s10698_s23  ;;  %v6084_v51 = vadd.f32 %v6083_v1, %v6050_v14  ;;  %v9452_v38 = vor.u32 %v10295_v13, %v9449_v27  ;;  %6146 = vst.msk [vmem:[#allocation4 + $0x14] sm:$0xf] %vm5030_vm5, %v6145_v59  ;;  %v10614_v52 = vld [vmem:[%s14579_s4 + $0x60] sm:$0xff]  ;;  %v10298_v27 = vld [vmem:[#allocation3 + $0x4a4] sm:$0xf] }
 0x427   : > { %7179 = vmatpush.bf16.msrb.mxu2 %v13824_v9  ;;  %v4107_v19 = vpop.permute.xlu1 %4106  ;;  %7213 = vmatpush.bf16.msrb.mxu3 %v13832_v60  ;;  %v10607_v60 = vld [vmem:[%s14579_s4 + $0xa8] sm:$0xff]  ;;  %v6052_v34 = vadd.f32 %v6051_v3, %v6017_v46  ;;  %v10616_v46 = vld [vmem:[%s14579_s4 + $0xd8] sm:$0xff]  ;;  %v10300_v58 = vld [vmem:[#allocation3 + $0x4ac] sm:$0xf0] }
 0x428   : > { %v4029_v43 = vpop.permute.xlu2 %4028  ;;  %v4125_v49 = vrot.slane %v4107_v19, 4  ;;  %v6149_v28 = vmax.f32 %v6148_v37, 0.0  ;;  %7145 = vmatpush.bf16.msrb.mxu1 %v13838_v26  ;;  %v6118_v62 = vadd.f32 %v6117_v0, %v6084_v51  ;;  %v10615_v37 = vld [vmem:[%s14579_s4 + $0x98] sm:$0xff] }
 0x429   : > { %v4105_v25 = vpop.permute.xlu0 %4104  ;;  %v4046_v47 = vrot.slane %v4029_v43, 4  ;;  %7112 = vmatpush.bf16.msrb.mxu0 %v10609_v15  ;;  %v10617_v3 = vld [vmem:[%s14579_s4 + $0x18] sm:$0xff] }
 0x42a   : > { %v4124_v7 = vrot.slane %v4105_v25, 4  ;;  %v4135_v9 = vsel %vm1891_vm2, %v4107_v19, %v4125_v49  ;;  %v6150_v61 = vpack.c.bf16 %v6149_v28, %v6149_v28  ;;  %v6136_v36 = vmax.f32 %v13827_v22, %v6118_v62  ;;  %v9463_v15 = vld [vmem:[#allocation3 + $0x4a8] sm:$0xf]  ;;  %v10625_v62 = vld [vmem:[%s14579_s4 + $0x8] sm:$0xff] }
 0x42b   : > { %v4056_v16 = vsel %vm1891_vm2, %v4029_v43, %v4046_v47  ;;  %7180 = vmatpush.bf16.msrb.mxu2 %v10607_v60  ;;  %4155 = vst [vmem:[#allocation3 + $0x5b8] sm:$0xf] %v4135_v9  ;;  %7214 = vmatpush.bf16.msrb.mxu3 %v10608_v30  ;;  %v10619_v47 = vld [vmem:[%s14579_s4 + $0x90] sm:$0xff] }
 0x42c   : > { %v4134_v26 = vsel %vm1891_vm2, %v4105_v25, %v4124_v7  ;;  %7146 = vmatpush.bf16.msrb.mxu1 %v10610_v12  ;;  %4076 = vst [vmem:[#allocation3 + $0x5c4] sm:$0xf] %v4056_v16  ;;  %v10618_v25 = vld [vmem:[%s14579_s4 + $0x58] sm:$0xff]  ;;  %v10621_v9 = vld [vmem:[%s14579_s4 + $0x10] sm:$0xff]  ;;  %v10624_v12 = vld [vmem:[%s14579_s4 + $0xc8] sm:$0xff] }
 0x42d   : > { %v6085_v6 = vpop.f32.mrf.mxu2  ;;  %v6119_v42 = vpop.f32.mrf.mxu3  ;;  %4154 = vst [vmem:[#allocation3 + $0x5a8] sm:$0xf] %v4134_v26  ;;  %7113 = vmatpush.bf16.msrb.mxu0 %v10613_v11  ;;  %v9455_v30 = vld [vmem:[#allocation3 + $0x4a0] sm:$0xf] }
 0x42e   : > { %v6086_v57 = vadd.f32 %v6085_v6, %v6052_v34  ;;  %v6020_v24 = vpop.f32.mrf.mxu0  ;;  %v6054_v35 = vpop.f32.mrf.mxu1  ;;  %6152 = vrot.lane.b32.xlu0 %v6150_v61, %s10698_s23  ;;  %v10623_v6 = vld [vmem:[%s14579_s4 + $0x88] sm:$0xff]  ;;  %v9457_v61 = vld [vmem:[#allocation3 + $0x4b0] sm:$0xf0] }
 0x42f   : > { %7181 = vmatpush.bf16.msrb.mxu2 %v10611_v20  ;;  %v3945_v29 = vpop.permute.xlu1 %3944  ;;  %7215 = vmatpush.bf16.msrb.mxu3 %v10612_v39  ;;  %v6055_v28 = vadd.f32 %v6054_v35, %v6020_v24  ;;  %v10301_v35 = vld [vmem:[#allocation3 + $0x4b4] sm:$0xf0]  ;;  %v9456_v20 = vor.u32 %v10300_v58, %v9455_v30  ;;  %v9471_v30 = vld [vmem:[#allocation3 + $0x4c0] sm:$0xf]  ;;  %v9479_v58 = vld [vmem:[#allocation3 + $0x4c8] sm:$0xf] }
 0x430   : > { %v6120_v4 = vadd.f32 %v6119_v42, %v6086_v57  ;;  %v4115_v55 = vpop.permute.xlu2 %4114  ;;  %6564 = vmatmul.bf16.gmra.mxu0 %v9440_v53  ;;  %v3964_v48 = vrot.slane %v3945_v29, 4  ;;  %7147 = vmatpush.bf16.msrb.mxu1 %v10614_v52  ;;  %v9464_v39 = vor.u32 %v10301_v35, %v9463_v15  ;;  %v10304_v15 = vld [vmem:[#allocation3 + $0x4cc] sm:$0xf0] }
 0x431   : > { %6598 = vmatmul.bf16.gmra.mxu1 %v9444_v10  ;;  %v4187_v18 = vpop.permute.xlu0 %4186  ;;  %v4129_v8 = vrot.slane %v4115_v55, 4  ;;  %7114 = vmatpush.bf16.msrb.mxu0 %v10617_v3  ;;  %v10630_v3 = vld [vmem:[%s14579_s4 + $0x40] sm:$0xff] }
 0x432   : > { %v6137_v41 = vmax.f32 %v13861_v40, %v6120_v4  ;;  %6632 = vmatmul.bf16.gmra.mxu2 %v9448_v21  ;;  %6666 = vmatmul.bf16.gmra.mxu3 %v9452_v38  ;;  %v4205_v44 = vrot.slane %v4187_v18, 4  ;;  %v3974_v1 = vsel %vm1891_vm2, %v3945_v29, %v3964_v48  ;;  %v9460_v4 = vor.u32 %v10298_v27, %v9457_v61  ;;  %v10299_v21 = vld [vmem:[#allocation3 + $0x4ac] sm:$0xf]  ;;  %v10626_v38 = vld [vmem:[%s14579_s4 + $0x48] sm:$0xff]  ;;  %v10627_v29 = vld [vmem:[%s14579_s4 + $0x80] sm:$0xff] }
 0x433   : > { %v4139_v0 = vsel %vm1891_vm2, %v4115_v55, %v4129_v8  ;;  %7182 = vmatpush.bf16.msrb.mxu2 %v10615_v37  ;;  %3994 = vst [vmem:[#allocation3 + $0x5a0] sm:$0xf] %v3974_v1  ;;  %7216 = vmatpush.bf16.msrb.mxu3 %v10616_v46  ;;  %v9468_v11 = vor.u32 %v10299_v21, %v9465_v32  ;;  %v10628_v8 = vld [vmem:[%s14579_s4 + $0xc0] sm:$0xff]  ;;  %v10302_v32 = vld [vmem:[#allocation3 + $0x4c4] sm:$0xf] }
 0x434   : > { %v14035_v22 = vmax.f32 %v6136_v36, %v6137_v41  ;;  %v4215_v40 = vsel %vm1891_vm2, %v4187_v18, %v4205_v44  ;;  %4159 = vst [vmem:[#allocation3 + $0x5f8] sm:$0xf] %v4139_v0  ;;  %7148 = vmatpush.bf16.msrb.mxu1 %v10618_v25  ;;  %v10629_v36 = vld [vmem:[%s14579_s4] sm:$0xff] }
 0x435   : > { %v6088_v14 = vpop.f32.mrf.mxu2  ;;  %v6122_v19 = vpop.f32.mrf.mxu3  ;;  %4235 = vst [vmem:[#allocation3 + $0x5bc] sm:$0xf] %v4215_v40  ;;  %7115 = vmatpush.bf16.msrb.mxu0 %v10621_v9 }
 0x436   : > { %v6022_v43 = vpop.f32.mrf.mxu0  ;;  %v6056_v49 = vpop.f32.mrf.mxu1  ;;  %v6089_v60 = vadd.f32 %v6088_v14, %v6055_v28 }
 0x437   : > { %7183 = vmatpush.bf16.msrb.mxu2 %v10619_v47  ;;  %v4027_v51 = vpop.permute.xlu1 %4026  ;;  %7217 = vmatpush.bf16.msrb.mxu3 %v10620_v23  ;;  %v6057_v42 = vadd.f32 %v6056_v49, %v6022_v43 }
 0x438   : > { %v3953_v7 = vpop.permute.xlu2 %3952  ;;  %v4045_v16 = vrot.slane %v4027_v51, 4  ;;  %7149 = vmatpush.bf16.msrb.mxu1 %v10622_v17  ;;  %v6123_v33 = vadd.f32 %v6122_v19, %v6089_v60 }
 0x439   : > { %v4025_v45 = vpop.permute.xlu0 %4024  ;;  %v3968_v50 = vrot.slane %v3953_v7, 4  ;;  %7116 = vmatpush.bf16.msrb.mxu0 %v10625_v62  ;;  %v10303_v62 = vld [vmem:[#allocation3 + $0x4cc] sm:$0xf] }
 0x43a   : > { %v4044_v34 = vrot.slane %v4025_v45, 4  ;;  %v4055_v26 = vsel %vm1891_vm2, %v4027_v51, %v4045_v16  ;;  %v6138_v0 = vmax.f32 %v13881_v56, %v6123_v33 }
 0x43b   : > { %v3978_v54 = vsel %vm1891_vm2, %v3953_v7, %v3968_v50  ;;  %7184 = vmatpush.bf16.msrb.mxu2 %v10623_v6  ;;  %4075 = vst [vmem:[#allocation3 + $0x5b4] sm:$0xf] %v4055_v26  ;;  %7218 = vmatpush.bf16.msrb.mxu3 %v10624_v12  ;;  %v10305_v12 = vld [vmem:[#allocation3 + $0x4d4] sm:$0xf0] }
 0x43c   : > { %v4054_v13 = vsel %vm1891_vm2, %v4025_v45, %v4044_v34  ;;  %3998 = vst [vmem:[#allocation3 + $0x5e0] sm:$0xf] %v3978_v54  ;;  %7150 = vmatpush.bf16.msrb.mxu1 %v10626_v38  ;;  %v6157_v34 = vadd.f32 %v13954_v5, %v14035_v22  ;;  %v9480_v21 = vor.u32 %v10305_v12, %v9479_v58 }
 0x43d   : > { %v6090_v57 = vpop.f32.mrf.mxu2  ;;  %v6124_v24 = vpop.f32.mrf.mxu3  ;;  %4074 = vst [vmem:[#allocation3 + $0x5a4] sm:$0xf] %v4054_v13  ;;  %7117 = vmatpush.bf16.msrb.mxu0 %v10629_v36 }
 0x43e   : > { %v6091_v59 = vadd.f32 %v6090_v57, %v6057_v42  ;;  %v6025_v53 = vpop.f32.mrf.mxu0  ;;  %v6059_v10 = vpop.f32.mrf.mxu1  ;;  %v9473_v42 = vld [vmem:[#allocation3 + $0x4d0] sm:$0xf0]  ;;  %v6158_v13 = vmax.f32 %v6157_v34, 0.0 }
 0x43f   : > { %7185 = vmatpush.bf16.msrb.mxu2 %v10627_v29  ;;  %v4189_v48 = vpop.permute.xlu1 %4188  ;;  %7219 = vmatpush.bf16.msrb.mxu3 %v10628_v8  ;;  %v6060_v47 = vadd.f32 %v6059_v10, %v6025_v53  ;;  %v9472_v53 = vor.u32 %v10304_v15, %v9471_v30  ;;  %v9476_v10 = vor.u32 %v10302_v32, %v9473_v42  ;;  %v9489_v30 = vld [vmem:[#allocation3 + $0x4f0] sm:$0xf0]  ;;  %v10309_v42 = vld [vmem:[#allocation3 + $0x4f4] sm:$0xf0] }
 0x440   : > { %v6125_v55 = vadd.f32 %v6124_v24, %v6091_v59  ;;  %v4035_v18 = vpop.permute.xlu2 %4034  ;;  %6569 = vmatmul.bf16.gmra.mxu0 %v9456_v20  ;;  %v4206_v41 = vrot.slane %v4189_v48, 4  ;;  %7151 = vmatpush.bf16.msrb.mxu1 %v10630_v3  ;;  %v6159_v33 = vpack.c.bf16 %v6158_v13, %v6158_v13  ;;  %v9481_v20 = vld [vmem:[#allocation3 + $0x4d8] sm:$0xf0] }
 0x441   : > { %6603 = vmatmul.bf16.gmra.mxu1 %v9460_v4  ;;  %v4111_v44 = vpop.permute.xlu0 %4110  ;;  %v4049_v1 = vrot.slane %v4035_v18, 4  ;;  %v9484_v38 = vor.u32 %v10303_v62, %v9481_v20 }
 0x442   : > { %v6139_v52 = vmax.f32 %v13902_v31, %v6125_v55  ;;  %6637 = vmatmul.bf16.gmra.mxu2 %v9464_v39  ;;  %6671 = vmatmul.bf16.gmra.mxu3 %v9468_v11  ;;  %v4127_v37 = vrot.slane %v4111_v44, 4  ;;  %v4216_v40 = vsel %vm1891_vm2, %v4189_v48, %v4206_v41  ;;  %6160 = vst.msk [vmem:[#allocation4 + $0x18] sm:$0xf] %vm5030_vm5, %v6159_v33 }
 0x443   : > { %v4059_v46 = vsel %vm1891_vm2, %v4035_v18, %v4049_v1  ;;  %4236 = vst [vmem:[#allocation3 + $0x5cc] sm:$0xf] %v4216_v40 }
 0x444   : > { %v6161_v14 = vmax.f32 %v6138_v0, %v6139_v52  ;;  %v4137_v19 = vsel %vm1891_vm2, %v4111_v44, %v4127_v37  ;;  %4079 = vst [vmem:[#allocation3 + $0x5f4] sm:$0xf] %v4059_v46 }
 0x445   : > { %v6093_v43 = vpop.f32.mrf.mxu2  ;;  %v6127_v56 = vpop.f32.mrf.mxu3  ;;  %4157 = vst [vmem:[#allocation3 + $0x5d8] sm:$0xf] %v4137_v19 }
 0x446   : > { %v6162_v31 = vadd.f32 %v13954_v5, %v6161_v14  ;;  %v6027_v49 = vpop.f32.mrf.mxu0  ;;  %v6061_v25 = vpop.f32.mrf.mxu1  ;;  %v6094_v45 = vadd.f32 %v6093_v43, %v6060_v47 }
 0x447   : > { %v3951_v51 = vpop.permute.xlu1 %3950  ;;  %v6062_v17 = vadd.f32 %v6061_v25, %v6027_v49 }
 0x448   : > { %v6163_v28 = vmax.f32 %v6162_v31, 0.0  ;;  %v4197_v7 = vpop.permute.xlu2 %4196  ;;  %v3967_v23 = vrot.slane %v3951_v51, 4  ;;  %v6128_v22 = vadd.f32 %v6127_v56, %v6094_v45  ;;  %v10307_v45 = vld [vmem:[#allocation3 + $0x4ec] sm:$0xf] }
 0x449   : > { %v3949_v9 = vpop.permute.xlu0 %3948  ;;  %v4210_v16 = vrot.slane %v4197_v7, 4 }
 0x44a   : > { %v6164_v50 = vpack.c.bf16 %v6163_v28, %v6163_v28  ;;  %v3966_v60 = vrot.slane %v3949_v9, 4  ;;  %v3977_v26 = vsel %vm1891_vm2, %v3951_v51, %v3967_v23  ;;  %v6140_v18 = vmax.f32 %v13917_v63, %v6128_v22  ;;  %v9495_v28 = vld [vmem:[#allocation3 + $0x4e8] sm:$0xf]  ;;  %v10306_v23 = vld [vmem:[#allocation3 + $0x4e4] sm:$0xf] }
 0x44b   : > { %v4220_v54 = vsel %vm1891_vm2, %v4197_v7, %v4210_v16  ;;  %3997 = vst [vmem:[#allocation3 + $0x5d0] sm:$0xf] %v3977_v26  ;;  %v10308_v7 = vld [vmem:[#allocation3 + $0x4ec] sm:$0xf0] }
 0x44c   : > { %6166 = vrot.lane.b32.xlu1 %v6164_v50, %s10698_s23  ;;  %v3976_v6 = vsel %vm1891_vm2, %v3949_v9, %v3966_v60  ;;  %4240 = vst [vmem:[#allocation3 + $0x60c] sm:$0xf] %v4220_v54  ;;  %v9497_v50 = vld [vmem:[#allocation3 + $0x4f8] sm:$0xf0]  ;;  %v9487_v54 = vld [vmem:[#allocation3 + $0x4e0] sm:$0xf] }
 0x44d   : > { %v6095_v27 = vpop.f32.mrf.mxu2  ;;  %v6129_v61 = vpop.f32.mrf.mxu3  ;;  %3996 = vst [vmem:[#allocation3 + $0x5c0] sm:$0xf] %v3976_v6  ;;  %v9492_v6 = vor.u32 %v10306_v23, %v9489_v30 }
 0x44e   : > { %v6096_v57 = vadd.f32 %v6095_v27, %v6062_v17  ;;  %v6304_v24 = vpop.f32.mrf.mxu0  ;;  %v6338_v35 = vpop.f32.mrf.mxu1  ;;  %v9488_v17 = vor.u32 %v10308_v7, %v9487_v54  ;;  %v9496_v27 = vor.u32 %v10309_v42, %v9495_v28  ;;  %v10311_v28 = vld [vmem:[#allocation3 + $0x50c] sm:$0xf] }
 0x44f   : > { %v6339_v59 = vadd.f32 %v6338_v35, %v6304_v24  ;;  %v4113_v29 = vpop.permute.xlu1 %4112 }
 0x450   : > { %v6130_v4 = vadd.f32 %v6129_v61, %v6096_v57  ;;  %v3959_v55 = vpop.permute.xlu2 %3958  ;;  %6574 = vmatmul.bf16.gmra.mxu0 %v9472_v53  ;;  %v4128_v39 = vrot.slane %v4113_v29, 4  ;;  %v9500_v61 = vor.u32 %v10307_v45, %v9497_v50 }
 0x451   : > { %6608 = vmatmul.bf16.gmra.mxu1 %v9476_v10  ;;  %v4031_v11 = vpop.permute.xlu0 %4030  ;;  %v3971_v48 = vrot.slane %v3959_v55, 4 }
 0x452   : > { %v6141_v8 = vmax.f32 %v13930_v2, %v6130_v4  ;;  %6642 = vmatmul.bf16.gmra.mxu2 %v9480_v21  ;;  %6676 = vmatmul.bf16.gmra.mxu3 %v9484_v38  ;;  %v4047_v36 = vrot.slane %v4031_v11, 4  ;;  %v4138_v41 = vsel %vm1891_vm2, %v4113_v29, %v4128_v39 }
 0x453   : > { %v3981_v44 = vsel %vm1891_vm2, %v3959_v55, %v3971_v48  ;;  %4158 = vst [vmem:[#allocation3 + $0x5e8] sm:$0xf] %v4138_v41 }
 0x454   : > { %v14103_v1 = vmax.f32 %v6140_v18, %v6141_v8  ;;  %v4057_v0 = vsel %vm1891_vm2, %v4031_v11, %v4047_v36  ;;  %4001 = vst [vmem:[#allocation3 + $0x610] sm:$0xf] %v3981_v44  ;;  %v10312_v44 = vld [vmem:[#allocation3 + $0x50c] sm:$0xf0] }
 0x455   : > { %v6372_v52 = vpop.f32.mrf.mxu2  ;;  %v6406_v37 = vpop.f32.mrf.mxu3  ;;  %4077 = vst [vmem:[#allocation3 + $0x5d4] sm:$0xf] %v4057_v0 }
 0x456   : > { %v6373_v40 = vadd.f32 %v6372_v52, %v6339_v59  ;;  %v6306_v46 = vpop.f32.mrf.mxu0  ;;  %v6340_v63 = vpop.f32.mrf.mxu1  ;;  %v6171_v8 = vadd.f32 %v13954_v5, %v14103_v1  ;;  %v9503_v52 = vld [vmem:[#allocation3 + $0x500] sm:$0xf]  ;;  %v10310_v5 = vld [vmem:[#allocation3 + $0x504] sm:$0xf] }
 0x457   : > { %v6341_v2 = vadd.f32 %v6340_v63, %v6306_v46  ;;  %v4195_v14 = vpop.permute.xlu1 %4194 }
 0x458   : > { %v14106_v3 = vadd.f32 %v6406_v37, %v6373_v40  ;;  %v4121_v19 = vpop.permute.xlu2 %4120  ;;  %v4209_v43 = vrot.slane %v4195_v14, 4  ;;  %v9505_v37 = vld [vmem:[#allocation3 + $0x510] sm:$0xf0]  ;;  %v6172_v40 = vmax.f32 %v6171_v8, 0.0  ;;  %v10315_v8 = vld [vmem:[#allocation3 + $0x52c] sm:$0xf] }
 0x459   : > { %v4193_v56 = vpop.permute.xlu0 %4192  ;;  %v4132_v31 = vrot.slane %v4121_v19, 4 }
 0x45a   : > { %v4208_v49 = vrot.slane %v4193_v56, 4  ;;  %v4219_v25 = vsel %vm1891_vm2, %v4195_v14, %v4209_v43  ;;  %v9513_v14 = vld [vmem:[#allocation3 + $0x518] sm:$0xf0]  ;;  %v6173_v1 = vpack.c.bf16 %v6172_v40, %v6172_v40 }
 0x45b   : > { %v4142_v47 = vsel %vm1891_vm2, %v4121_v19, %v4132_v31  ;;  %4239 = vst [vmem:[#allocation3 + $0x5fc] sm:$0xf] %v4219_v25  ;;  %v9508_v25 = vor.u32 %v10310_v5, %v9505_v37  ;;  %v9516_v23 = vor.u32 %v10311_v28, %v9513_v14 }
 0x45c   : > { %v4218_v51 = vsel %vm1891_vm2, %v4193_v56, %v4208_v49  ;;  %4162 = vst [vmem:[#allocation3 + $0x628] sm:$0xf] %v4142_v47  ;;  %v9504_v49 = vor.u32 %v10312_v44, %v9503_v52  ;;  %v9511_v47 = vld [vmem:[#allocation3 + $0x508] sm:$0xf] }
 0x45d   : > { %v6374_v9 = vpop.f32.mrf.mxu2  ;;  %v6408_v16 = vpop.f32.mrf.mxu3  ;;  %4238 = vst [vmem:[#allocation3 + $0x5ec] sm:$0xf] %v4218_v51 }
 0x45e   : > { %v6375_v60 = vadd.f32 %v6374_v9, %v6341_v2  ;;  %v6309_v34 = vpop.f32.mrf.mxu0  ;;  %v6343_v26 = vpop.f32.mrf.mxu1  ;;  %v10313_v2 = vld [vmem:[#allocation3 + $0x514] sm:$0xf0]  ;;  %6174 = vst.msk [vmem:[#allocation4 + $0x1c] sm:$0xf] %vm5030_vm5, %v6173_v1 }
 0x45f   : > { %v6344_v15 = vadd.f32 %v6343_v26, %v6309_v34  ;;  %v4033_v12 = vpop.permute.xlu1 %4032  ;;  %v9512_v7 = vor.u32 %v10313_v2, %v9511_v47 }
 0x460   : > { %v14111_v13 = vadd.f32 %v6408_v16, %v6375_v60  ;;  %v4203_v62 = vpop.permute.xlu2 %4202  ;;  %6579 = vmatmul.bf16.gmra.mxu0 %v9488_v17  ;;  %v4048_v22 = vrot.slane %v4033_v12, 4 }
 0x461   : > { %6613 = vmatmul.bf16.gmra.mxu1 %v9492_v6  ;;  %v3955_v57 = vpop.permute.xlu0 %3954  ;;  %v4213_v24 = vrot.slane %v4203_v62, 4 }
 0x462   : > { %6647 = vmatmul.bf16.gmra.mxu2 %v9496_v27  ;;  %6681 = vmatmul.bf16.gmra.mxu3 %v9500_v61  ;;  %v3969_v35 = vrot.slane %v3955_v57, 4  ;;  %v4058_v32 = vsel %vm1891_vm2, %v4033_v12, %v4048_v22 }
 0x463   : > { %v4223_v33 = vsel %vm1891_vm2, %v4203_v62, %v4213_v24  ;;  %4078 = vst [vmem:[#allocation3 + $0x5e4] sm:$0xf] %v4058_v32  ;;  %v10316_v32 = vld [vmem:[#allocation3 + $0x52c] sm:$0xf0] }
 0x464   : > { %v3979_v59 = vsel %vm1891_vm2, %v3955_v57, %v3969_v35  ;;  %4243 = vst [vmem:[#allocation3 + $0x63c] sm:$0xf] %v4223_v33  ;;  %v9521_v33 = vld [vmem:[#allocation3 + $0x530] sm:$0xf0] }
 0x465   : > { %v6377_v53 = vpop.f32.mrf.mxu2  ;;  %v6411_v10 = vpop.f32.mrf.mxu3  ;;  %3999 = vst [vmem:[#allocation3 + $0x5f0] sm:$0xf] %v3979_v59 }
 0x466   : > { %v6378_v58 = vadd.f32 %v6377_v53, %v6344_v15  ;;  %v6311_v20 = vpop.f32.mrf.mxu0  ;;  %v6345_v4 = vpop.f32.mrf.mxu1 }
 0x467   : > { %v6346_v21 = vadd.f32 %v6345_v4, %v6311_v20  ;;  %v4119_v29 = vpop.permute.xlu1 %4118 }
 0x468   : > { %v14116_v38 = vadd.f32 %v6411_v10, %v6378_v58  ;;  %v4041_v55 = vpop.permute.xlu2 %4040  ;;  %v4131_v39 = vrot.slane %v4119_v29, 4  ;;  %v10317_v10 = vld [vmem:[#allocation3 + $0x534] sm:$0xf0]  ;;  %v9529_v58 = vld [vmem:[#allocation3 + $0x538] sm:$0xf0] }
 0x469   : > { %v4117_v11 = vpop.permute.xlu0 %4116  ;;  %v4052_v48 = vrot.slane %v4041_v55, 4  ;;  %v9532_v44 = vor.u32 %v10315_v8, %v9529_v58  ;;  %v10325_v8 = vld [vmem:[#allocation3 + $0x574] sm:$0xf0] }
 0x46a   : > { %v4130_v18 = vrot.slane %v4117_v11, 4  ;;  %v4141_v36 = vsel %vm1891_vm2, %v4119_v29, %v4131_v39  ;;  %v9519_v29 = vld [vmem:[#allocation3 + $0x520] sm:$0xf] }
 0x46b   : > { %v4062_v41 = vsel %vm1891_vm2, %v4041_v55, %v4052_v48  ;;  %4161 = vst [vmem:[#allocation3 + $0x618] sm:$0xf] %v4141_v36  ;;  %v10314_v55 = vld [vmem:[#allocation3 + $0x524] sm:$0xf] }
 0x46c   : > { %v4140_v0 = vsel %vm1891_vm2, %v4117_v11, %v4130_v18  ;;  %4082 = vst [vmem:[#allocation3 + $0x624] sm:$0xf] %v4062_v41  ;;  %v9520_v11 = vor.u32 %v10316_v32, %v9519_v29  ;;  %v9524_v48 = vor.u32 %v10314_v55, %v9521_v33  ;;  %v9527_v18 = vld [vmem:[#allocation3 + $0x528] sm:$0xf] }
 0x46d   : > { %v6379_v46 = vpop.f32.mrf.mxu2  ;;  %v6413_v63 = vpop.f32.mrf.mxu3  ;;  %4160 = vst [vmem:[#allocation3 + $0x608] sm:$0xf] %v4140_v0  ;;  %v9528_v41 = vor.u32 %v10317_v10, %v9527_v18 }
 0x46e   : > { %v6380_v19 = vadd.f32 %v6379_v46, %v6346_v21  ;;  %v6314_v43 = vpop.f32.mrf.mxu0  ;;  %v6348_v56 = vpop.f32.mrf.mxu1 }
 0x46f   : > { %v6349_v31 = vadd.f32 %v6348_v56, %v6314_v43  ;;  %v3957_v9 = vpop.permute.xlu1 %3956 }
 0x470   : > { %v14123_v51 = vadd.f32 %v6413_v63, %v6380_v19  ;;  %v5053_v16 = vpop.permute.xlu2 %5052  ;;  %6862 = vmatmul.bf16.vlgmr.msra.gmra.mxu0 %v9504_v49  ;;  %v3970_v45 = vrot.slane %v3957_v9, 4 }
 0x471   : > { %6896 = vmatmul.bf16.vlgmr.msra.gmra.mxu1 %v9508_v25  ;;  %v4199_v50 = vpop.permute.xlu0 %4198  ;;  %5055 = vst.msk [vmem:[#allocation4 + $0x4] sm:$0xf] %vm5040_vm6, %v5053_v16 }
 0x472   : > { %6930 = vmatmul.bf16.vlgmr.msra.gmra.mxu2 %v9512_v7  ;;  %6964 = vmatmul.bf16.vlgmr.msra.gmra.mxu3 %v9516_v23  ;;  %v4211_v60 = vrot.slane %v4199_v50, 4  ;;  %v3980_v34 = vsel %vm1891_vm2, %v3957_v9, %v3970_v45  ;;  %v10320_v23 = vld [vmem:[#allocation3 + $0x54c] sm:$0xf0]  ;;  %v9537_v9 = vld [vmem:[#allocation3 + $0x550] sm:$0xf0] }
 0x473   : > { %4000 = vst [vmem:[#allocation3 + $0x600] sm:$0xf] %v3980_v34 }
 0x474   : > { %v4221_v26 = vsel %vm1891_vm2, %v4199_v50, %v4211_v60  ;;  %v10321_v50 = vld [vmem:[#allocation3 + $0x554] sm:$0xf0]  ;;  %v9545_v60 = vld [vmem:[#allocation3 + $0x558] sm:$0xf0] }
 0x475   : > { %v6382_v54 = vpop.f32.mrf.mxu2  ;;  %v6416_v30 = vpop.f32.mrf.mxu3  ;;  %4241 = vst [vmem:[#allocation3 + $0x61c] sm:$0xf] %v4221_v26 }
 0x476   : > { %v6383_v15 = vadd.f32 %v6382_v54, %v6349_v31  ;;  %v6316_v17 = vpop.f32.mrf.mxu0  ;;  %v6350_v6 = vpop.f32.mrf.mxu1 }
 0x477   : > { %v6351_v42 = vadd.f32 %v6350_v6, %v6316_v17  ;;  %v4039_v61 = vpop.permute.xlu1 %4038 }
 0x478   : > { %v14129_v27 = vadd.f32 %v6416_v30, %v6383_v15  ;;  %v5617_v12 = vpop.permute.xlu2 %5616  ;;  %v4051_v62 = vrot.slane %v4039_v61, 4  ;;  %v9535_v30 = vld [vmem:[#allocation3 + $0x540] sm:$0xf]  ;;  %v10318_v15 = vld [vmem:[#allocation3 + $0x544] sm:$0xf] }
 0x479   : > { %v4037_v22 = vpop.permute.xlu0 %4036  ;;  %5619 = vst.msk [vmem:[#allocation4 + $0x10] sm:$0xf] %vm5040_vm6, %v5617_v12  ;;  %v9536_v6 = vor.u32 %v10320_v23, %v9535_v30  ;;  %v10319_v12 = vld [vmem:[#allocation3 + $0x54c] sm:$0xf] }
 0x47a   : > { %v4050_v57 = vrot.slane %v4037_v22, 4  ;;  %v4061_v24 = vsel %vm1891_vm2, %v4039_v61, %v4051_v62  ;;  %v9543_v61 = vld [vmem:[#allocation3 + $0x548] sm:$0xf] }
 0x47b   : > { %4081 = vst [vmem:[#allocation3 + $0x614] sm:$0xf] %v4061_v24 }
 0x47c   : > { %v4060_v35 = vsel %vm1891_vm2, %v4037_v22, %v4050_v57  ;;  %v9544_v22 = vor.u32 %v10321_v50, %v9543_v61  ;;  %v9548_v57 = vor.u32 %v10319_v12, %v9545_v60  ;;  %v10329_v60 = vld [vmem:[#allocation3 + $0x594] sm:$0xf0]  ;;  %v9575_v12 = vld [vmem:[#allocation3 + $0x588] sm:$0xf] }
 0x47d   : > { %v6384_v59 = vpop.f32.mrf.mxu2  ;;  %v6418_v53 = vpop.f32.mrf.mxu3  ;;  %4080 = vst [vmem:[#allocation3 + $0x604] sm:$0xf] %v4060_v35 }
 0x47e   : > { %v6385_v20 = vadd.f32 %v6384_v59, %v6351_v42  ;;  %v6319_v4 = vpop.f32.mrf.mxu0  ;;  %v6353_v21 = vpop.f32.mrf.mxu1  ;;  %v9540_v42 = vor.u32 %v10318_v15, %v9537_v9  ;;  %v10328_v9 = vld [vmem:[#allocation3 + $0x58c] sm:$0xf0] }
 0x47f   : > { %v6354_v39 = vadd.f32 %v6353_v21, %v6319_v4  ;;  %v4201_v0 = vpop.permute.xlu1 %4200 }
 0x480   : > { %v14134_v36 = vadd.f32 %v6418_v53, %v6385_v20  ;;  %6867 = vmatmul.bf16.gmra.mxu0 %v9520_v11  ;;  %v4212_v52 = vrot.slane %v4201_v0, 4  ;;  %v9553_v11 = vld [vmem:[#allocation3 + $0x570] sm:$0xf0] }
 0x481   : > { %6901 = vmatmul.bf16.gmra.mxu1 %v9524_v48  ;;  %v4123_v37 = vpop.permute.xlu0 %4122 }
 0x482   : > { %6935 = vmatmul.bf16.gmra.mxu2 %v9528_v41  ;;  %6969 = vmatmul.bf16.gmra.mxu3 %v9532_v44  ;;  %v4133_v40 = vrot.slane %v4123_v37, 4  ;;  %v4222_v46 = vsel %vm1891_vm2, %v4201_v0, %v4212_v52  ;;  %v9561_v41 = vld [vmem:[#allocation3 + $0x578] sm:$0xf0] }
 0x483   : > { %4242 = vst [vmem:[#allocation3 + $0x62c] sm:$0xf] %v4222_v46 }
 0x484   : > { %v4143_v63 = vsel %vm1891_vm2, %v4123_v37, %v4133_v40  ;;  %v9551_v37 = vld [vmem:[#allocation3 + $0x560] sm:$0xf]  ;;  %v10322_v40 = vld [vmem:[#allocation3 + $0x564] sm:$0xf] }
 0x485   : > { %v6387_v2 = vpop.f32.mrf.mxu2  ;;  %v6421_v14 = vpop.f32.mrf.mxu3  ;;  %4163 = vst [vmem:[#allocation3 + $0x638] sm:$0xf] %v4143_v63  ;;  %v9556_v63 = vor.u32 %v10322_v40, %v9553_v11 }
 0x486   : > { %v6388_v19 = vadd.f32 %v6387_v2, %v6354_v39  ;;  %v6321_v43 = vpop.f32.mrf.mxu0  ;;  %v6355_v56 = vpop.f32.mrf.mxu1  ;;  %v10324_v39 = vld [vmem:[#allocation3 + $0x56c] sm:$0xf0]  ;;  %v9559_v2 = vld [vmem:[#allocation3 + $0x568] sm:$0xf] }
 0x487   : > { %v6356_v5 = vadd.f32 %v6355_v56, %v6321_v43  ;;  %v3963_v31 = vpop.permute.xlu1 %3962  ;;  %v9552_v46 = vor.u32 %v10324_v39, %v9551_v37  ;;  %v9560_v43 = vor.u32 %v10325_v8, %v9559_v2  ;;  %v9585_v8 = vld [vmem:[#allocation3 + $0x5b0] sm:$0xf0]  ;;  %v9593_v37 = vld [vmem:[#allocation3 + $0x5b8] sm:$0xf0] }
 0x488   : > { %v14138_v1 = vadd.f32 %v6421_v14, %v6388_v19  ;;  %v3973_v49 = vrot.slane %v3963_v31, 4  ;;  %v10323_v14 = vld [vmem:[#allocation3 + $0x56c] sm:$0xf] }
 0x489   : > { %v3961_v25 = vpop.permute.xlu0 %3960  ;;  %v9564_v56 = vor.u32 %v10323_v14, %v9561_v41  ;;  %v10332_v14 = vld [vmem:[#allocation3 + $0x5ac] sm:$0xf0] }
 0x48a   : > { %v3972_v47 = vrot.slane %v3961_v25, 4  ;;  %v3983_v28 = vsel %vm1891_vm2, %v3963_v31, %v3973_v49 }
 0x48b   : > { %4003 = vst [vmem:[#allocation3 + $0x630] sm:$0xf] %v3983_v28 }
 0x48c   : > { %v3982_v7 = vsel %vm1891_vm2, %v3961_v25, %v3972_v47 }
 0x48d   : > { %v6389_v16 = vpop.f32.mrf.mxu2  ;;  %v6423_v45 = vpop.f32.mrf.mxu3  ;;  %4002 = vst [vmem:[#allocation3 + $0x620] sm:$0xf] %v3982_v7 }
 0x48e   : > { %v6390_v34 = vadd.f32 %v6389_v16, %v6356_v5  ;;  %v6324_v26 = vpop.f32.mrf.mxu0  ;;  %v6358_v54 = vpop.f32.mrf.mxu1  ;;  %v9569_v16 = vld [vmem:[#allocation3 + $0x590] sm:$0xf0] }
 0x48f   : > { %v6359_v17 = vadd.f32 %v6358_v54, %v6324_v26  ;;  %v5038_v24 = vpop.permute.xlu1 %5037 }
 0x490   : > { %v14142_v62 = vadd.f32 %v6423_v45, %v6390_v34  ;;  %6872 = vmatmul.bf16.gmra.mxu0 %v9536_v6  ;;  %5041 = vst.msk [vmem:[#allocation4] sm:$0xf] %vm5040_vm6, %v5038_v24  ;;  %v9577_v34 = vld [vmem:[#allocation3 + $0x598] sm:$0xf0]  ;;  %v10326_v6 = vld [vmem:[#allocation3 + $0x584] sm:$0xf]  ;;  %v9576_v24 = vor.u32 %v10329_v60, %v9575_v12 }
 0x491   : > { %6906 = vmatmul.bf16.gmra.mxu1 %v9540_v42  ;;  %v4043_v35 = vpop.permute.xlu0 %4042  ;;  %v9572_v61 = vor.u32 %v10326_v6, %v9569_v16  ;;  %v9601_v6 = vld [vmem:[#allocation3 + $0x5d0] sm:$0xf0] }
 0x492   : > { %6940 = vmatmul.bf16.gmra.mxu2 %v9544_v22  ;;  %6974 = vmatmul.bf16.gmra.mxu3 %v9548_v57  ;;  %v4053_v32 = vrot.slane %v4043_v35, 4  ;;  %v10327_v22 = vld [vmem:[#allocation3 + $0x58c] sm:$0xf] }
 0x494   : > { %v4063_v33 = vsel %vm1891_vm2, %v4043_v35, %v4053_v32  ;;  %v9580_v35 = vor.u32 %v10327_v22, %v9577_v34 }
 0x495   : > { %v6392_v59 = vpop.f32.mrf.mxu2  ;;  %v6426_v53 = vpop.f32.mrf.mxu3  ;;  %4083 = vst [vmem:[#allocation3 + $0x634] sm:$0xf] %v4063_v33 }
 0x496   : > { %v6393_v10 = vadd.f32 %v6392_v59, %v6359_v17  ;;  %v6326_v58 = vpop.f32.mrf.mxu0  ;;  %v6360_v20 = vpop.f32.mrf.mxu1  ;;  %v9567_v17 = vld [vmem:[#allocation3 + $0x580] sm:$0xf] }
 0x497   : > { %v6361_v4 = vadd.f32 %v6360_v20, %v6326_v58  ;;  %v5603_v29 = vpop.permute.xlu1 %5602  ;;  %v9568_v42 = vor.u32 %v10328_v9, %v9567_v17  ;;  %v14158_v58 = vld [vmem:[%s14580_s5] ss:$0 sm:$0xff] }
 0x498   : > { %v14146_v21 = vadd.f32 %v6426_v53, %v6393_v10  ;;  %5605 = vst.msk [vmem:[#allocation4 + $0xc] sm:$0xf] %vm5040_vm6, %v5603_v29 }
 0x499   : > { %v5589_v55 = vpop.permute.xlu0 %5588 }
 0x49a   : > { %5591 = vst.msk [vmem:[#allocation4 + $0x8] sm:$0xf] %vm5040_vm6, %v5589_v55 }
 0x49d   : > { %v6394_v48 = vpop.f32.mrf.mxu2  ;;  %v6428_v18 = vpop.f32.mrf.mxu3 }
 0x49e   : > { %v6395_v44 = vadd.f32 %v6394_v48, %v6361_v4  ;;  %v6560_v0 = vpop.f32.mrf.mxu0  ;;  %v6594_v52 = vpop.f32.mrf.mxu1 }
 0x49f   : > { %v6595_v28 = vadd.f32 %v6594_v52, %v6560_v0  ;;  %v9591_v0 = vld [vmem:[#allocation3 + $0x5a8] sm:$0xf]  ;;  %v10333_v52 = vld [vmem:[#allocation3 + $0x5b4] sm:$0xf0] }
 0x4a0   : > { %v14150_v19 = vadd.f32 %v6428_v18, %v6395_v44  ;;  %6877 = vmatmul.bf16.gmra.mxu0 %v9552_v46  ;;  %v10330_v18 = vld [vmem:[#allocation3 + $0x5a4] sm:$0xf] }
 0x4a1   : > { %6911 = vmatmul.bf16.gmra.mxu1 %v9556_v63  ;;  %v6153_v5 = vpop.permute.xlu0 %6152 }
 0x4a2   : > { %6945 = vmatmul.bf16.gmra.mxu2 %v9560_v43  ;;  %6979 = vmatmul.bf16.gmra.mxu3 %v9564_v56  ;;  %6155 = vst.msk [vmem:[#allocation4 + $0x14] sm:$0xf] %vm5040_vm6, %v6153_v5  ;;  %v9588_v5 = vor.u32 %v10330_v18, %v9585_v8 }
 0x4a5   : > { %v6628_v31 = vpop.f32.mrf.mxu2  ;;  %v6662_v49 = vpop.f32.mrf.mxu3 }
 0x4a6   : > { %v6562_v25 = vpop.f32.mrf.mxu0  ;;  %v6596_v47 = vpop.f32.mrf.mxu1  ;;  %v6629_v7 = vadd.f32 %v6628_v31, %v6595_v28  ;;  %v10331_v31 = vld [vmem:[#allocation3 + $0x5ac] sm:$0xf] }
 0x4a7   : > { %v6597_v23 = vadd.f32 %v6596_v47, %v6562_v25  ;;  %v9592_v25 = vor.u32 %v10333_v52, %v9591_v0  ;;  %v9596_v47 = vor.u32 %v10331_v31, %v9593_v37  ;;  %v10355_v37 = vld [vmem:[%s14581_s6 + $0x28] sm:$0xff] }
 0x4a8   : > { %v6663_v26 = vadd.f32 %v6662_v49, %v6629_v7 }
 0x4aa   : > { %v6687_v32 = vmax.f32 %v14106_v3, %v6663_v26  ;;  %v10357_v26 = vld [vmem:[%s14581_s6 + $0x38] sm:$0xff] }
 0x4ab   : > { %8149 = vmatpush.bf16.msra.mxu0 %v10357_v26  ;;  %v9625_v26 = vld [vmem:[#allocation3 + $0x5f8] sm:$0xf0] }
 0x4ad   : > { %v6630_v45 = vpop.f32.mrf.mxu2  ;;  %v6664_v50 = vpop.f32.mrf.mxu3 }
 0x4ae   : > { %v6631_v54 = vadd.f32 %v6630_v45, %v6597_v23  ;;  %v6565_v30 = vpop.f32.mrf.mxu0  ;;  %v6599_v15 = vpop.f32.mrf.mxu1 }
 0x4af   : > { %v6600_v55 = vadd.f32 %v6599_v15, %v6565_v30  ;;  %v10336_v30 = vld [vmem:[#allocation3 + $0x5cc] sm:$0xf0]  ;;  %v10381_v15 = vld [vmem:[%s14581_s6 + $0xf8] sm:$0xff] }
 0x4b0   : > { %v6665_v57 = vadd.f32 %v6664_v50, %v6631_v54  ;;  %6882 = vmatmul.bf16.gmra.mxu0 %v9568_v42  ;;  %v9599_v54 = vld [vmem:[#allocation3 + $0x5c0] sm:$0xf]  ;;  %8188 = vmatpush.bf16.msra.mxu3 %v10381_v15 }
 0x4b1   : > { %6916 = vmatmul.bf16.gmra.mxu1 %v9572_v61  ;;  %v10356_v42 = vld [vmem:[%s14581_s6 + $0x30] sm:$0xff] }
 0x4b2   : > { %v6688_v33 = vmax.f32 %v14111_v13, %v6665_v57  ;;  %6950 = vmatmul.bf16.gmra.mxu2 %v9576_v24  ;;  %6984 = vmatmul.bf16.gmra.mxu3 %v9580_v35  ;;  %v9583_v13 = vld [vmem:[#allocation3 + $0x5a0] sm:$0xf]  ;;  %v10337_v57 = vld [vmem:[#allocation3 + $0x5d4] sm:$0xf0]  ;;  %v10335_v24 = vld [vmem:[#allocation3 + $0x5cc] sm:$0xf] }
 0x4b3   : > { %v9584_v56 = vor.u32 %v10332_v14, %v9583_v13  ;;  %v10364_v61 = vld [vmem:[%s14581_s6 + $0x70] sm:$0xff]  ;;  %8150 = vmatpush.bf16.msra.mxu0 %v10356_v42  ;;  %v10354_v14 = vld [vmem:[%s14581_s6 + $0x20] sm:$0xff] }
 0x4b4   : > { %v6697_v59 = vmax.f32 %v6687_v32, %v6688_v33 }
 0x4b5   : > { %v6633_v53 = vpop.f32.mrf.mxu2  ;;  %v6667_v10 = vpop.f32.mrf.mxu3 }
 0x4b6   : > { %v6698_v20 = vadd.f32 %v14158_v58, %v6697_v59  ;;  %v6567_v4 = vpop.f32.mrf.mxu0  ;;  %v6601_v29 = vpop.f32.mrf.mxu1  ;;  %v6634_v11 = vadd.f32 %v6633_v53, %v6600_v55  ;;  %v10334_v59 = vld [vmem:[#allocation3 + $0x5c4] sm:$0xf]  ;;  %v9607_v53 = vld [vmem:[#allocation3 + $0x5c8] sm:$0xf] }
 0x4b7   : > { %v6602_v48 = vadd.f32 %v6601_v29, %v6567_v4  ;;  %v9604_v4 = vor.u32 %v10334_v59, %v9601_v6  ;;  %v9609_v29 = vld [vmem:[#allocation3 + $0x5d8] sm:$0xf0]  ;;  %v10372_v55 = vld [vmem:[%s14581_s6 + $0xb0] sm:$0xff]  ;;  %8151 = vmatpush.bf16.msra.mxu0 %v10355_v37  ;;  %v10345_v37 = vld [vmem:[#allocation3 + $0x614] sm:$0xf0] }
 0x4b8   : > { %v6699_v39 = vmax.f32 %v6698_v20, 0.0  ;;  %v6668_v40 = vadd.f32 %v6667_v10, %v6634_v11  ;;  %v9600_v20 = vor.u32 %v10336_v30, %v9599_v54  ;;  %v9615_v54 = vld [vmem:[#allocation3 + $0x5e0] sm:$0xf]  ;;  %v9617_v30 = vld [vmem:[#allocation3 + $0x5f0] sm:$0xf0] }
 0x4ba   : > { %v6700_v3 = vpack.c.bf16 %v6699_v39, %v6699_v39  ;;  %v6689_v28 = vmax.f32 %v14116_v38, %v6668_v40  ;;  %v10365_v38 = vld [vmem:[%s14581_s6 + $0x78] sm:$0xff]  ;;  %v10380_v39 = vld [vmem:[%s14581_s6 + $0xf0] sm:$0xff] }
 0x4bb   : > { %8162 = vmatpush.bf16.msra.mxu1 %v10365_v38  ;;  %8189 = vmatpush.bf16.msra.mxu3 %v10380_v39 }
 0x4bc   : > { %6702 = vrot.lane.b32.xlu2 %v6700_v3, %s10698_s23  ;;  %v9608_v3 = vor.u32 %v10337_v57, %v9607_v53  ;;  %8152 = vmatpush.bf16.msra.mxu0 %v10354_v14  ;;  %v10397_v14 = vld [vmem:[%s14581_s6 + $0x178] sm:$0xff] }
 0x4bd   : > { %v6635_v41 = vpop.f32.mrf.mxu2  ;;  %v6669_v44 = vpop.f32.mrf.mxu3 }
 0x4be   : > { %v6636_v46 = vadd.f32 %v6635_v41, %v6602_v48  ;;  %v6167_v63 = vpop.permute.xlu1 %6166  ;;  %v6570_v2 = vpop.f32.mrf.mxu0  ;;  %v9612_v48 = vor.u32 %v10335_v24, %v9609_v29 }
 0x4bf   : > { %6169 = vst.msk [vmem:[#allocation4 + $0x18] sm:$0xf] %vm5040_vm6, %v6167_v63  ;;  %v6604_v43 = vpop.f32.mrf.mxu1  ;;  %8163 = vmatpush.bf16.msra.mxu1 %v10364_v61  ;;  %v10341_v61 = vld [vmem:[#allocation3 + $0x5f4] sm:$0xf0] }
 0x4c0   : > { %v6670_v49 = vadd.f32 %v6669_v44, %v6636_v46  ;;  %7118 = vmatmul.bf16.vlgmr.msrb.gmra.mxu0 %v9584_v56  ;;  %v6605_v60 = vadd.f32 %v6604_v43, %v6570_v2  ;;  %v10379_v46 = vld [vmem:[%s14581_s6 + $0xe8] sm:$0xff]  ;;  %v10362_v43 = vld [vmem:[%s14581_s6 + $0x60] sm:$0xff] }
 0x4c1   : > { %7152 = vmatmul.bf16.vlgmr.msrb.gmra.mxu1 %v9588_v5  ;;  %8190 = vmatpush.bf16.msra.mxu3 %v10379_v46  ;;  %v10370_v56 = vld [vmem:[%s14581_s6 + $0xa0] sm:$0xff] }
 0x4c2   : > { %v6690_v7 = vmax.f32 %v14123_v51, %v6670_v49  ;;  %7186 = vmatmul.bf16.vlgmr.msrb.gmra.mxu2 %v9592_v25  ;;  %7220 = vmatmul.bf16.vlgmr.msrb.gmra.mxu3 %v9596_v47  ;;  %v10373_v51 = vld [vmem:[%s14581_s6 + $0xb8] sm:$0xff]  ;;  %v10378_v49 = vld [vmem:[%s14581_s6 + $0xe0] sm:$0xff] }
 0x4c3   : > { %8175 = vmatpush.bf16.msra.mxu2 %v10373_v51 }
 0x4c4   : > { %v14165_v23 = vmax.f32 %v6689_v28, %v6690_v7  ;;  %v10340_v28 = vld [vmem:[#allocation3 + $0x5ec] sm:$0xf0]  ;;  %v10338_v7 = vld [vmem:[#allocation3 + $0x5e4] sm:$0xf] }
 0x4c5   : > { %v6638_v9 = vpop.f32.mrf.mxu2  ;;  %v6672_v16 = vpop.f32.mrf.mxu3  ;;  %8191 = vmatpush.bf16.msra.mxu3 %v10378_v49  ;;  %v9616_v6 = vor.u32 %v10340_v28, %v9615_v54  ;;  %v9620_v42 = vor.u32 %v10338_v7, %v9617_v30 }
 0x4c6   : > { %v6572_v45 = vpop.f32.mrf.mxu0  ;;  %v6639_v34 = vadd.f32 %v6638_v9, %v6605_v60  ;;  %v6707_v25 = vadd.f32 %v14158_v58, %v14165_v23  ;;  %v10353_v9 = vld [vmem:[%s14581_s6 + $0x18] sm:$0xff] }
 0x4c7   : > { %v6606_v50 = vpop.f32.mrf.mxu1  ;;  %8176 = vmatpush.bf16.msra.mxu2 %v10372_v55  ;;  %v9623_v60 = vld [vmem:[#allocation3 + $0x5e8] sm:$0xf]  ;;  %8153 = vmatpush.bf16.msra.mxu0 %v10353_v9 }
 0x4c8   : > { %v6607_v17 = vadd.f32 %v6606_v50, %v6572_v45  ;;  %v6673_v35 = vadd.f32 %v6672_v16, %v6639_v34  ;;  %v6708_v16 = vmax.f32 %v6707_v25, 0.0  ;;  %v10339_v34 = vld [vmem:[#allocation3 + $0x5ec] sm:$0xf]  ;;  %v9624_v24 = vor.u32 %v10341_v61, %v9623_v60 }
 0x4c9   : > { %v10413_v60 = vld [vmem:[%s14581_s6 + $0x1f8] sm:$0xff] }
 0x4ca   : > { %v6691_v13 = vmax.f32 %v14129_v27, %v6673_v35  ;;  %v10363_v27 = vld [vmem:[%s14581_s6 + $0x68] sm:$0xff]  ;;  %v6709_v15 = vpack.c.bf16 %v6708_v16, %v6708_v16  ;;  %v9628_v35 = vor.u32 %v10339_v34, %v9625_v26 }
 0x4cb   : > { %8164 = vmatpush.bf16.msra.mxu1 %v10363_v27  ;;  %v10342_v27 = vld [vmem:[#allocation3 + $0x604] sm:$0xf] }
 0x4cc   : > { %6710 = vst.msk [vmem:[#allocation4 + $0x20] sm:$0xf] %vm5030_vm5, %v6709_v15  ;;  %v10404_v15 = vld [vmem:[%s14581_s6 + $0x1b0] sm:$0xff] }
 0x4cd   : > { %v6640_v12 = vpop.f32.mrf.mxu2  ;;  %v6674_v22 = vpop.f32.mrf.mxu3 }
 0x4ce   : > { %v6641_v32 = vadd.f32 %v6640_v12, %v6607_v17  ;;  %v6575_v33 = vpop.f32.mrf.mxu0  ;;  %v10361_v12 = vld [vmem:[%s14581_s6 + $0x58] sm:$0xff] }
 0x4cf   : > { %v6609_v10 = vpop.f32.mrf.mxu1  ;;  %8165 = vmatpush.bf16.msra.mxu1 %v10362_v43 }
 0x4d0   : > { %v6675_v11 = vadd.f32 %v6674_v22, %v6641_v32  ;;  %7123 = vmatmul.bf16.gmra.mxu0 %v9600_v20  ;;  %v6610_v63 = vadd.f32 %v6609_v10, %v6575_v33  ;;  %v10369_v22 = vld [vmem:[%s14581_s6 + $0x98] sm:$0xff]  ;;  %v10352_v33 = vld [vmem:[%s14581_s6 + $0x10] sm:$0xff] }
 0x4d1   : > { %7157 = vmatmul.bf16.gmra.mxu1 %v9604_v4  ;;  %v10377_v32 = vld [vmem:[%s14581_s6 + $0xd8] sm:$0xff]  ;;  %v10360_v10 = vld [vmem:[%s14581_s6 + $0x50] sm:$0xff]  ;;  %8154 = vmatpush.bf16.msra.mxu0 %v10352_v33 }
 0x4d2   : > { %v6692_v18 = vmax.f32 %v14134_v36, %v6675_v11  ;;  %7191 = vmatmul.bf16.gmra.mxu2 %v9608_v3  ;;  %7225 = vmatmul.bf16.gmra.mxu3 %v9612_v48  ;;  %v10371_v36 = vld [vmem:[%s14581_s6 + $0xa8] sm:$0xff]  ;;  %v10368_v20 = vld [vmem:[%s14581_s6 + $0x90] sm:$0xff] }
 0x4d3   : > { %8177 = vmatpush.bf16.msra.mxu2 %v10371_v36  ;;  %8166 = vmatpush.bf16.msra.mxu1 %v10361_v12  ;;  %v10359_v3 = vld [vmem:[%s14581_s6 + $0x48] sm:$0xff]  ;;  %v10358_v36 = vld [vmem:[%s14581_s6 + $0x40] sm:$0xff] }
 0x4d4   : > { %v6711_v8 = vmax.f32 %v6691_v13, %v6692_v18  ;;  %8192 = vmatpush.bf16.msra.mxu3 %v10377_v32  ;;  %v10367_v48 = vld [vmem:[%s14581_s6 + $0x88] sm:$0xff] }
 0x4d5   : > { %v6643_v41 = vpop.f32.mrf.mxu2  ;;  %v6677_v44 = vpop.f32.mrf.mxu3  ;;  %v10375_v18 = vld [vmem:[%s14581_s6 + $0xc8] sm:$0xff] }
 0x4d6   : > { %v6712_v0 = vadd.f32 %v14158_v58, %v6711_v8  ;;  %v6577_v52 = vpop.f32.mrf.mxu0  ;;  %v6644_v5 = vadd.f32 %v6643_v41, %v6610_v63  ;;  %v10350_v8 = vld [vmem:[%s14581_s6] sm:$0xff]  ;;  %v10389_v41 = vld [vmem:[%s14581_s6 + $0x138] sm:$0xff]  ;;  %v10411_v32 = vld [vmem:[%s14581_s6 + $0x1e8] sm:$0xff] }
 0x4d7   : > { %v6611_v40 = vpop.f32.mrf.mxu1  ;;  %8178 = vmatpush.bf16.msra.mxu2 %v10370_v56  ;;  %8167 = vmatpush.bf16.msra.mxu1 %v10360_v10  ;;  %v9633_v63 = vld [vmem:[#allocation3 + $0x610] sm:$0xf0] }
 0x4d8   : > { %v6713_v2 = vmax.f32 %v6712_v0, 0.0  ;;  %v6612_v47 = vadd.f32 %v6611_v40, %v6577_v52  ;;  %v6678_v38 = vadd.f32 %v6677_v44, %v6644_v5  ;;  %v9631_v0 = vld [vmem:[#allocation3 + $0x600] sm:$0xf]  ;;  %v9639_v52 = vld [vmem:[#allocation3 + $0x608] sm:$0xf]  ;;  %v10366_v40 = vld [vmem:[%s14581_s6 + $0x80] sm:$0xff]  ;;  %v9636_v9 = vor.u32 %v10342_v27, %v9633_v63 }
 0x4d9   : > { %v9641_v5 = vld [vmem:[#allocation3 + $0x618] sm:$0xf0]  ;;  %v9640_v16 = vor.u32 %v10345_v37, %v9639_v52  ;;  %v10394_v10 = vld [vmem:[%s14581_s6 + $0x160] sm:$0xff]  ;;  %v10401_v63 = vld [vmem:[%s14581_s6 + $0x198] sm:$0xff] }
 0x4da   : > { %v6714_v31 = vpack.c.bf16 %v6713_v2, %v6713_v2  ;;  %v6693_v59 = vmax.f32 %v14138_v1, %v6678_v38  ;;  %v10376_v1 = vld [vmem:[%s14581_s6 + $0xd0] sm:$0xff]  ;;  %v10374_v2 = vld [vmem:[%s14581_s6 + $0xc0] sm:$0xff] }
 0x4db   : > { %8179 = vmatpush.bf16.msra.mxu2 %v10369_v22  ;;  %8193 = vmatpush.bf16.msra.mxu3 %v10376_v1 }
 0x4dc   : > { %6716 = vrot.lane.b32.xlu0 %v6714_v31, %s10698_s23  ;;  %8168 = vmatpush.bf16.msra.mxu1 %v10359_v3 }
 0x4dd   : > { %v6645_v45 = vpop.f32.mrf.mxu2  ;;  %v6679_v50 = vpop.f32.mrf.mxu3 }
 0x4de   : > { %v6646_v23 = vadd.f32 %v6645_v45, %v6612_v47  ;;  %v6580_v51 = vpop.f32.mrf.mxu0  ;;  %v10344_v47 = vld [vmem:[#allocation3 + $0x60c] sm:$0xf0]  ;;  %v10343_v45 = vld [vmem:[#allocation3 + $0x60c] sm:$0xf] }
 0x4df   : > { %v6614_v17 = vpop.f32.mrf.mxu1  ;;  %8180 = vmatpush.bf16.msra.mxu2 %v10368_v20  ;;  %8194 = vmatpush.bf16.msra.mxu3 %v10375_v18  ;;  %v9632_v7 = vor.u32 %v10344_v47, %v9631_v0  ;;  %v9644_v38 = vor.u32 %v10343_v45, %v9641_v5  ;;  %v10349_v18 = vld [vmem:[#allocation3 + $0x634] sm:$0xf0]  ;;  %v9655_v0 = vld [vmem:[#allocation3 + $0x628] sm:$0xf]  ;;  %v10384_v5 = vld [vmem:[%s14581_s6 + $0x110] sm:$0xff] }
 0x4e0   : > { %v6680_v57 = vadd.f32 %v6679_v50, %v6646_v23  ;;  %7128 = vmatmul.bf16.gmra.mxu0 %v9616_v6  ;;  %v6615_v13 = vadd.f32 %v6614_v17, %v6580_v51  ;;  %8169 = vmatpush.bf16.msra.mxu1 %v10358_v36  ;;  %v10405_v50 = vld [vmem:[%s14581_s6 + $0x1b8] sm:$0xff]  ;;  %v10388_v23 = vld [vmem:[%s14581_s6 + $0x130] sm:$0xff]  ;;  %v10383_v47 = vld [vmem:[%s14581_s6 + $0x108] sm:$0xff] }
 0x4e1   : > { %7162 = vmatmul.bf16.gmra.mxu1 %v9620_v42  ;;  %v10396_v51 = vld [vmem:[%s14581_s6 + $0x170] sm:$0xff] }
 0x4e2   : > { %v6694_v53 = vmax.f32 %v14142_v62, %v6680_v57  ;;  %7196 = vmatmul.bf16.gmra.mxu2 %v9624_v24  ;;  %7230 = vmatmul.bf16.gmra.mxu3 %v9628_v35  ;;  %v10351_v62 = vld [vmem:[%s14581_s6 + $0x8] sm:$0xff]  ;;  %v10412_v17 = vld [vmem:[%s14581_s6 + $0x1f0] sm:$0xff] }
 0x4e3   : > { %8155 = vmatpush.bf16.msra.mxu0 %v10351_v62  ;;  %8181 = vmatpush.bf16.msra.mxu2 %v10367_v48  ;;  %v10403_v35 = vld [vmem:[%s14581_s6 + $0x1a8] sm:$0xff]  ;;  %v9647_v62 = vld [vmem:[#allocation3 + $0x620] sm:$0xf] }
 0x4e4   : > { %v14245_v4 = vmax.f32 %v6693_v59, %v6694_v53  ;;  %8195 = vmatpush.bf16.msra.mxu3 %v10374_v2  ;;  %8214 = vmatpush.bf16.msrb.mxu1 %v10397_v14  ;;  %v10386_v53 = vld [vmem:[%s14581_s6 + $0x120] sm:$0xff]  ;;  %v9656_v14 = vor.u32 %v10349_v18, %v9655_v0 }
 0x4e5   : > { %v6648_v29 = vpop.f32.mrf.mxu2  ;;  %v6682_v55 = vpop.f32.mrf.mxu3 }
 0x4e6   : > { %v6582_v39 = vpop.f32.mrf.mxu0  ;;  %v6649_v44 = vadd.f32 %v6648_v29, %v6615_v13  ;;  %v6721_v1 = vadd.f32 %v14158_v58, %v14245_v4  ;;  %v10402_v29 = vld [vmem:[%s14581_s6 + $0x1a0] sm:$0xff]  ;;  %v10385_v4 = vld [vmem:[%s14581_s6 + $0x118] sm:$0xff] }
 0x4e7   : > { %v6616_v11 = vpop.f32.mrf.mxu1  ;;  %8156 = vmatpush.bf16.msra.mxu0 %v10350_v8  ;;  %8182 = vmatpush.bf16.msra.mxu2 %v10366_v40  ;;  %v10347_v8 = vld [vmem:[#allocation3 + $0x62c] sm:$0xf]  ;;  %v9657_v40 = vld [vmem:[#allocation3 + $0x638] sm:$0xf0] }
 0x4e8   : > { %v6617_v46 = vadd.f32 %v6616_v11, %v6582_v39  ;;  %v6683_v31 = vadd.f32 %v6682_v55, %v6649_v44  ;;  %8240 = vmatpush.bf16.msrb.mxu3 %v10413_v60  ;;  %8215 = vmatpush.bf16.msrb.mxu1 %v10396_v51  ;;  %v10410_v55 = vld [vmem:[%s14581_s6 + $0x1e0] sm:$0xff]  ;;  %v6722_v3 = vmax.f32 %v6721_v1, 0.0  ;;  %v10346_v44 = vld [vmem:[#allocation3 + $0x624] sm:$0xf]  ;;  %v10399_v60 = vld [vmem:[%s14581_s6 + $0x188] sm:$0xff] }
 0x4e9   : > { %v10348_v39 = vld [vmem:[#allocation3 + $0x62c] sm:$0xf0]  ;;  %v9649_v11 = vld [vmem:[#allocation3 + $0x630] sm:$0xf0]  ;;  %v7290_v51 = vld [vmem:[#allocation4 + $0x8] sm:$0xff] }
 0x4ea   : > { %v6695_v54 = vmax.f32 %v14146_v21, %v6683_v31  ;;  %v10387_v21 = vld [vmem:[%s14581_s6 + $0x128] sm:$0xff]  ;;  %v6723_v52 = vpack.c.bf16 %v6722_v3, %v6722_v3  ;;  %v9648_v27 = vor.u32 %v10348_v39, %v9647_v62  ;;  %v9652_v36 = vor.u32 %v10346_v44, %v9649_v11  ;;  %v10392_v31 = vld [vmem:[%s14581_s6 + $0x150] sm:$0xff] }
 0x4eb   : > { %8201 = vmatpush.bf16.msrb.mxu0 %v10389_v41  ;;  %8227 = vmatpush.bf16.msrb.mxu2 %v10405_v50  ;;  %v10391_v50 = vld [vmem:[%s14581_s6 + $0x148] sm:$0xff] }
 0x4ec   : > { %8241 = vmatpush.bf16.msrb.mxu3 %v10412_v17  ;;  %6724 = vst.msk [vmem:[#allocation4 + $0x24] sm:$0xf] %vm5030_vm5, %v6723_v52  ;;  %v10398_v17 = vld [vmem:[%s14581_s6 + $0x180] sm:$0xff] }
 0x4ed   : > { %v6650_v43 = vpop.f32.mrf.mxu2  ;;  %v6684_v56 = vpop.f32.mrf.mxu3 }
 0x4ee   : > { %v6651_v49 = vadd.f32 %v6650_v43, %v6617_v46  ;;  %v6863_v25 = vpop.f32.mrf.mxu0  ;;  %v10393_v46 = vld [vmem:[%s14581_s6 + $0x158] sm:$0xff]  ;;  %v9660_v43 = vor.u32 %v10347_v8, %v9657_v40 }
 0x4ef   : > { %v6897_v28 = vpop.f32.mrf.mxu1  ;;  %8202 = vmatpush.bf16.msrb.mxu0 %v10388_v23  ;;  %8228 = vmatpush.bf16.msrb.mxu2 %v10404_v15  ;;  %v10382_v23 = vld [vmem:[%s14581_s6 + $0x100] sm:$0xff] }
 0x4f0   : > { %v6685_v34 = vadd.f32 %v6684_v56, %v6651_v49  ;;  %v6898_v26 = vadd.f32 %v6897_v28, %v6863_v25  ;;  %7133 = vmatmul.bf16.gmra.mxu0 %v9632_v7  ;;  %8242 = vmatpush.bf16.msrb.mxu3 %v10411_v32  ;;  %v10409_v56 = vld [vmem:[%s14581_s6 + $0x1d8] sm:$0xff]  ;;  %v10400_v49 = vld [vmem:[%s14581_s6 + $0x190] sm:$0xff]  ;;  %v10390_v15 = vld [vmem:[%s14581_s6 + $0x140] sm:$0xff] }
 0x4f1   : > { %7167 = vmatmul.bf16.gmra.mxu1 %v9636_v9  ;;  %v10408_v25 = vld [vmem:[%s14581_s6 + $0x1d0] sm:$0xff] }
 0x4f2   : > { %v6696_v30 = vmax.f32 %v14150_v19, %v6685_v34  ;;  %7201 = vmatmul.bf16.gmra.mxu2 %v9640_v16  ;;  %7235 = vmatmul.bf16.gmra.mxu3 %v9644_v38  ;;  %v10395_v19 = vld [vmem:[%s14581_s6 + $0x168] sm:$0xff] }
 0x4f3   : > { %8203 = vmatpush.bf16.msrb.mxu0 %v10387_v21  ;;  %8216 = vmatpush.bf16.msrb.mxu1 %v10395_v19  ;;  %v10407_v38 = vld [vmem:[%s14581_s6 + $0x1c8] sm:$0xff]  ;;  %v7509_v21 = vunpack.c.l.b16 %v7290_v51  ;;  %v7510_v19 = vunpack.c.h.b16 %v7290_v51 }
 0x4f4   : > { %v6725_v6 = vmax.f32 %v6695_v54, %v6696_v30  ;;  %8229 = vmatpush.bf16.msrb.mxu2 %v10403_v35  ;;  %8243 = vmatpush.bf16.msrb.mxu3 %v10410_v55 }
 0x4f5   : > { %v6931_v42 = vpop.f32.mrf.mxu2  ;;  %v6965_v61 = vpop.f32.mrf.mxu3  ;;  %v7522_v1 = vpack.c.b16 %v7509_v21, %v7509_v21  ;;  %v7523_v62 = vpack.c.b16 %v7510_v19, %v7510_v19 }
 0x4f6   : > { %v6726_v12 = vadd.f32 %v14158_v58, %v6725_v6  ;;  %v6932_v22 = vadd.f32 %v6931_v42, %v6898_v26  ;;  %v14307_v57 = vpop.f32.mrf.mxu0  ;;  %v7289_v26 = vld [vmem:[#allocation4] sm:$0xff]  ;;  %v10406_v42 = vld [vmem:[%s14581_s6 + $0x1c0] sm:$0xff] }
 0x4f7   : > { %v14309_v24 = vpop.f32.mrf.mxu1  ;;  %8204 = vmatpush.bf16.msrb.mxu0 %v10386_v53  ;;  %8217 = vmatpush.bf16.msrb.mxu1 %v10394_v10  ;;  %v7507_v54 = vunpack.c.l.b16 %v7289_v26  ;;  %v7508_v30 = vunpack.c.h.b16 %v7289_v26 }
 0x4f8   : > { %v14317_v33 = vadd.f32 %v6965_v61, %v6932_v22  ;;  %v6727_v59 = vmax.f32 %v6726_v12, 0.0  ;;  %8230 = vmatpush.bf16.msrb.mxu2 %v10402_v29  ;;  %8244 = vmatpush.bf16.msrb.mxu3 %v10409_v56 }
 0x4f9   : > { %v7521_v53 = vpack.c.b16 %v7508_v30, %v7508_v30 }
 0x4fa   : > { %v6728_v20 = vpack.c.bf16 %v6727_v59, %v6727_v59  ;;  %v7520_v59 = vpack.c.b16 %v7507_v54, %v7507_v54 }
 0x4fb   : > { %8205 = vmatpush.bf16.msrb.mxu0 %v10385_v4  ;;  %8218 = vmatpush.bf16.msrb.mxu1 %v10393_v46 }
 0x4fc   : > { %6730 = vrot.lane.b32.xlu1 %v6728_v20, %s10698_s23  ;;  %8231 = vmatpush.bf16.msrb.mxu2 %v10401_v63 }
 0x4fd   : > { %v14337_v48 = vpop.f32.mrf.mxu2  ;;  %v14339_v13 = vpop.f32.mrf.mxu3  ;;  %8245 = vmatpush.bf16.msrb.mxu3 %v10408_v25 }
 0x4fe   : > { %v6868_v41 = vpop.f32.mrf.mxu0 }
 0x4ff   : > { %v6902_v37 = vpop.f32.mrf.mxu1  ;;  %8206 = vmatpush.bf16.msrb.mxu0 %v10384_v5  ;;  %8219 = vmatpush.bf16.msrb.mxu1 %v10392_v31 }
 0x500   : > { %v6903_v2 = vadd.f32 %v6902_v37, %v6868_v41  ;;  %7138 = vmatmul.bf16.gmra.mxu0 %v9648_v27  ;;  %8232 = vmatpush.bf16.msrb.mxu2 %v10400_v49  ;;  %v7291_v41 = vld [vmem:[#allocation4 + $0x10] sm:$0xff] }
 0x501   : > { %7172 = vmatmul.bf16.gmra.mxu1 %v9652_v36  ;;  %8246 = vmatpush.bf16.msrb.mxu3 %v10407_v38  ;;  %v7511_v44 = vunpack.c.l.b16 %v7291_v41  ;;  %v7512_v0 = vunpack.c.h.b16 %v7291_v41 }
 0x502   : > { %7206 = vmatmul.bf16.gmra.mxu2 %v9656_v14  ;;  %7240 = vmatmul.bf16.gmra.mxu3 %v9660_v43 }
 0x503   : > { %8207 = vmatpush.bf16.msrb.mxu0 %v10383_v47  ;;  %8220 = vmatpush.bf16.msrb.mxu1 %v10391_v50  ;;  %v7524_v63 = vpack.c.b16 %v7511_v44, %v7511_v44 }
 0x504   : > { %8233 = vmatpush.bf16.msrb.mxu2 %v10399_v60 }
 0x505   : > { %v6936_v28 = vpop.f32.mrf.mxu2  ;;  %v6970_v7 = vpop.f32.mrf.mxu3  ;;  %8247 = vmatpush.bf16.msrb.mxu3 %v10406_v42 }
 0x506   : > { %v6937_v9 = vadd.f32 %v6936_v28, %v6903_v2  ;;  %v6870_v16 = vpop.f32.mrf.mxu0  ;;  %v7525_v2 = vpack.c.b16 %v7512_v0, %v7512_v0 }
 0x507   : > { %v6904_v45 = vpop.f32.mrf.mxu1  ;;  %8208 = vmatpush.bf16.msrb.mxu0 %v10382_v23  ;;  %8221 = vmatpush.bf16.msrb.mxu1 %v10390_v15 }
 0x508   : > { %v14372_v34 = vadd.f32 %v6970_v7, %v6937_v9  ;;  %v6905_v6 = vadd.f32 %v6904_v45, %v6870_v16  ;;  %8234 = vmatpush.bf16.msrb.mxu2 %v10398_v17 }
 0x50d   : > { %v6938_v61 = vpop.f32.mrf.mxu2  ;;  %v6972_v12 = vpop.f32.mrf.mxu3 }
 0x50e   : > { %v6939_v22 = vadd.f32 %v6938_v61, %v6905_v6  ;;  %v6873_v35 = vpop.f32.mrf.mxu0  ;;  %v10421_v61 = vld [vmem:[%s14581_s6 + $0x238] sm:$0xff] }
 0x50f   : > { %v6907_v32 = vpop.f32.mrf.mxu1 }
 0x510   : > { %v14389_v10 = vadd.f32 %v6972_v12, %v6939_v22  ;;  %v6908_v20 = vadd.f32 %v6907_v32, %v6873_v35  ;;  %8157 = vmatmul.bf16.vlgmr.msra.gmra.mxu0 %v7520_v59  ;;  %v10429_v12 = vld [vmem:[%s14581_s6 + $0x278] sm:$0xff] }
 0x511   : > { %8170 = vmatmul.bf16.vlgmr.msra.gmra.mxu1 %v7521_v53  ;;  %8253 = vmatpush.bf16.msra.mxu0 %v10421_v61 }
 0x512   : > { %8183 = vmatmul.bf16.vlgmr.msra.gmra.mxu2 %v7522_v1  ;;  %8196 = vmatmul.bf16.vlgmr.msra.gmra.mxu3 %v7523_v62 }
 0x513   : > { %8266 = vmatpush.bf16.msra.mxu1 %v10429_v12 }
 0x515   : > { %v6941_v29 = vpop.f32.mrf.mxu2  ;;  %v6975_v55 = vpop.f32.mrf.mxu3 }
 0x516   : > { %v6942_v39 = vadd.f32 %v6941_v29, %v6908_v20  ;;  %v6703_v11 = vpop.permute.xlu2 %6702  ;;  %v6875_v4 = vpop.f32.mrf.mxu0 }
 0x517   : > { %6705 = vst.msk [vmem:[#allocation4 + $0x1c] sm:$0xf] %vm5040_vm6, %v6703_v11  ;;  %v6909_v3 = vpop.f32.mrf.mxu1  ;;  %v10428_v11 = vld [vmem:[%s14581_s6 + $0x270] sm:$0xff] }
 0x518   : > { %v14392_v18 = vadd.f32 %v6975_v55, %v6942_v39  ;;  %v6910_v8 = vadd.f32 %v6909_v3, %v6875_v4  ;;  %v10420_v39 = vld [vmem:[%s14581_s6 + $0x230] sm:$0xff]  ;;  %8267 = vmatpush.bf16.msra.mxu1 %v10428_v11  ;;  %v10419_v4 = vld [vmem:[%s14581_s6 + $0x228] sm:$0xff] }
 0x519   : > { %8254 = vmatpush.bf16.msra.mxu0 %v10420_v39  ;;  %v10427_v3 = vld [vmem:[%s14581_s6 + $0x268] sm:$0xff] }
 0x51c   : > { %8268 = vmatpush.bf16.msra.mxu1 %v10427_v3 }
 0x51d   : > { %v6943_v52 = vpop.f32.mrf.mxu2  ;;  %v6977_v37 = vpop.f32.mrf.mxu3  ;;  %8255 = vmatpush.bf16.msra.mxu0 %v10419_v4 }
 0x51e   : > { %v6944_v27 = vadd.f32 %v6943_v52, %v6910_v8  ;;  %v6878_v36 = vpop.f32.mrf.mxu0  ;;  %v7292_v40 = vld [vmem:[#allocation4 + $0x18] sm:$0xff]  ;;  %v10418_v52 = vld [vmem:[%s14581_s6 + $0x220] sm:$0xff] }
 0x51f   : > { %v6912_v46 = vpop.f32.mrf.mxu1  ;;  %v7513_v14 = vunpack.c.l.b16 %v7292_v40  ;;  %v7514_v43 = vunpack.c.h.b16 %v7292_v40  ;;  %v10425_v40 = vld [vmem:[%s14581_s6 + $0x258] sm:$0xff] }
 0x520   : > { %v14394_v56 = vadd.f32 %v6977_v37, %v6944_v27  ;;  %v6913_v5 = vadd.f32 %v6912_v46, %v6878_v36  ;;  %8209 = vmatmul.bf16.vlgmr.msrb.gmra.mxu0 %v7524_v63  ;;  %v10426_v37 = vld [vmem:[%s14581_s6 + $0x260] sm:$0xff]  ;;  %v10417_v36 = vld [vmem:[%s14581_s6 + $0x218] sm:$0xff] }
 0x521   : > { %8222 = vmatmul.bf16.vlgmr.msrb.gmra.mxu1 %v7525_v2  ;;  %v7526_v31 = vpack.c.b16 %v7513_v14, %v7513_v14  ;;  %v7527_v49 = vpack.c.b16 %v7514_v43, %v7514_v43  ;;  %8256 = vmatpush.bf16.msra.mxu0 %v10418_v52  ;;  %v10416_v43 = vld [vmem:[%s14581_s6 + $0x210] sm:$0xff] }
 0x522   : > { %8269 = vmatpush.bf16.msra.mxu1 %v10426_v37 }
 0x523   : > { %8235 = vmatmul.bf16.vlgmr.msrb.gmra.mxu2 %v7526_v31  ;;  %8248 = vmatmul.bf16.vlgmr.msrb.gmra.mxu3 %v7527_v49  ;;  %v6900_v31 = vadd.f32 %v14309_v24, %v14307_v57 }
 0x525   : > { %v6946_v25 = vpop.f32.mrf.mxu2  ;;  %v6980_v47 = vpop.f32.mrf.mxu3  ;;  %8257 = vmatpush.bf16.msra.mxu0 %v10417_v36 }
 0x526   : > { %v6947_v28 = vadd.f32 %v6946_v25, %v6913_v5  ;;  %v6880_v7 = vpop.f32.mrf.mxu0  ;;  %8270 = vmatpush.bf16.msra.mxu1 %v10425_v40  ;;  %v10424_v5 = vld [vmem:[%s14581_s6 + $0x250] sm:$0xff] }
 0x527   : > { %v6914_v9 = vpop.f32.mrf.mxu1 }
 0x528   : > { %v14396_v16 = vadd.f32 %v6980_v47, %v6947_v28  ;;  %v6915_v45 = vadd.f32 %v6914_v9, %v6880_v7  ;;  %v6934_v7 = vadd.f32 %v14337_v48, %v6900_v31 }
 0x529   : > { %8258 = vmatpush.bf16.msra.mxu0 %v10416_v43 }
 0x52a   : > { %8271 = vmatpush.bf16.msra.mxu1 %v10424_v5  ;;  %v6968_v24 = vadd.f32 %v14339_v13, %v6934_v7 }
 0x52d   : > { %v6948_v50 = vpop.f32.mrf.mxu2  ;;  %v6982_v60 = vpop.f32.mrf.mxu3 }
 0x52e   : > { %v6949_v26 = vadd.f32 %v6948_v50, %v6915_v45  ;;  %v6883_v38 = vpop.f32.mrf.mxu0  ;;  %v10415_v50 = vld [vmem:[%s14581_s6 + $0x208] sm:$0xff] }
 0x52f   : > { %v6917_v23 = vpop.f32.mrf.mxu1  ;;  %8259 = vmatpush.bf16.msra.mxu0 %v10415_v50 }
 0x530   : > { %v14398_v51 = vadd.f32 %v6982_v60, %v6949_v26  ;;  %v6918_v54 = vadd.f32 %v6917_v23, %v6883_v38  ;;  %v10423_v60 = vld [vmem:[%s14581_s6 + $0x248] sm:$0xff] }
 0x531   : > { %8272 = vmatpush.bf16.msra.mxu1 %v10423_v60 }
 0x535   : > { %v6951_v30 = vpop.f32.mrf.mxu2  ;;  %v6985_v15 = vpop.f32.mrf.mxu3 }
 0x536   : > { %v6952_v17 = vadd.f32 %v6951_v30, %v6918_v54  ;;  %v6885_v6 = vpop.f32.mrf.mxu0 }
 0x537   : > { %v6919_v21 = vpop.f32.mrf.mxu1 }
 0x538   : > { %v14400_v19 = vadd.f32 %v6985_v15, %v6952_v17  ;;  %v6920_v42 = vadd.f32 %v6919_v21, %v6885_v6  ;;  %v10414_v17 = vld [vmem:[%s14581_s6 + $0x200] sm:$0xff] }
 0x539   : > { %v10422_v6 = vld [vmem:[%s14581_s6 + $0x240] sm:$0xff]  ;;  %8260 = vmatpush.bf16.msra.mxu0 %v10414_v17 }
 0x53a   : > { %8273 = vmatpush.bf16.msra.mxu1 %v10422_v6  ;;  %v10632_v6 = vld [vmem:[%s14580_s5] ss:$0 sm:$0xff] }
 0x53d   : > { %v6953_v22 = vpop.f32.mrf.mxu2  ;;  %v6987_v35 = vpop.f32.mrf.mxu3 }
 0x53e   : > { %v6954_v32 = vadd.f32 %v6953_v22, %v6920_v42  ;;  %v7119_v59 = vpop.f32.mrf.mxu0 }
 0x53f   : > { %v7153_v53 = vpop.f32.mrf.mxu1 }
 0x540   : > { %v14408_v20 = vadd.f32 %v6987_v35, %v6954_v32  ;;  %v7154_v25 = vadd.f32 %v7153_v53, %v7119_v59 }
 0x545   : > { %v7187_v1 = vpop.f32.mrf.mxu2  ;;  %v7221_v62 = vpop.f32.mrf.mxu3 }
 0x546   : > { %v7121_v29 = vpop.f32.mrf.mxu0  ;;  %v7188_v9 = vadd.f32 %v7187_v1, %v7154_v25 }
 0x547   : > { %v7155_v55 = vpop.f32.mrf.mxu1 }
 0x548   : > { %v7156_v2 = vadd.f32 %v7155_v55, %v7121_v29  ;;  %v7222_v54 = vadd.f32 %v7221_v62, %v7188_v9 }
 0x54a   : > { %v7246_v13 = vmax.f32 %v14317_v33, %v7222_v54 }
 0x54d   : > { %v7189_v8 = vpop.f32.mrf.mxu2  ;;  %v7223_v41 = vpop.f32.mrf.mxu3 }
 0x54e   : > { %v6717_v44 = vpop.permute.xlu0 %6716  ;;  %v7124_v0 = vpop.f32.mrf.mxu0  ;;  %v7190_v47 = vadd.f32 %v7189_v8, %v7156_v2 }
 0x54f   : > { %6719 = vst.msk [vmem:[#allocation4 + $0x20] sm:$0xf] %vm5040_vm6, %v6717_v44  ;;  %v7158_v27 = vpop.f32.mrf.mxu1 }
 0x550   : > { %v7159_v28 = vadd.f32 %v7158_v27, %v7124_v0  ;;  %v7224_v26 = vadd.f32 %v7223_v41, %v7190_v47 }
 0x552   : > { %v7247_v42 = vmax.f32 %v6968_v24, %v7224_v26 }
 0x554   : > { %v7256_v35 = vmax.f32 %v7246_v13, %v7247_v42 }
 0x555   : > { %v7192_v46 = vpop.f32.mrf.mxu2  ;;  %v7226_v63 = vpop.f32.mrf.mxu3 }
 0x556   : > { %v7126_v14 = vpop.f32.mrf.mxu0  ;;  %v7193_v45 = vadd.f32 %v7192_v46, %v7159_v28  ;;  %v7257_v55 = vadd.f32 %v14158_v58, %v7256_v35 }
 0x557   : > { %v7160_v49 = vpop.f32.mrf.mxu1 }
 0x558   : > { %v7161_v57 = vadd.f32 %v7160_v49, %v7126_v14  ;;  %v7227_v48 = vadd.f32 %v7226_v63, %v7193_v45 }
 0x55a   : > { %v7248_v12 = vmax.f32 %v14372_v34, %v7227_v48  ;;  %v7258_v34 = vmax.f32 %v7257_v55, 0.0  ;;  %v10447_v48 = vld [vmem:[%s14581_s6 + $0x308] sm:$0xff] }
 0x55c   : > { %v7259_v37 = vpack.c.bf16 %v7258_v34, %v7258_v34 }
 0x55d   : > { %v7194_v38 = vpop.f32.mrf.mxu2  ;;  %v7228_v23 = vpop.f32.mrf.mxu3 }
 0x55e   : > { %v7195_v30 = vadd.f32 %v7194_v38, %v7161_v57  ;;  %v7129_v15 = vpop.f32.mrf.mxu0  ;;  %7260 = vst.msk [vmem:[#allocation4 + $0x28] sm:$0xf] %vm5030_vm5, %v7259_v37  ;;  %v10448_v57 = vld [vmem:[%s14581_s6 + $0x310] sm:$0xff] }
 0x55f   : > { %v7163_v21 = vpop.f32.mrf.mxu1 }
 0x560   : > { %v7229_v61 = vadd.f32 %v7228_v23, %v7195_v30  ;;  %v7164_v11 = vadd.f32 %v7163_v21, %v7129_v15 }
 0x562   : > { %v7249_v22 = vmax.f32 %v14389_v10, %v7229_v61 }
 0x564   : > { %v7261_v32 = vmax.f32 %v7248_v12, %v7249_v22 }
 0x565   : > { %v7197_v59 = vpop.f32.mrf.mxu2  ;;  %v7231_v53 = vpop.f32.mrf.mxu3 }
 0x566   : > { %v7262_v1 = vadd.f32 %v14158_v58, %v7261_v32  ;;  %v7131_v62 = vpop.f32.mrf.mxu0  ;;  %v7198_v4 = vadd.f32 %v7197_v59, %v7164_v11  ;;  %v10494_v32 = vld [vmem:[%s14582_s7] ss:$0 sm:$0xff] }
 0x567   : > { %v7165_v29 = vpop.f32.mrf.mxu1 }
 0x568   : > { %v7263_v39 = vmax.f32 %v7262_v1, 0.0  ;;  %v7166_v3 = vadd.f32 %v7165_v29, %v7131_v62  ;;  %v7232_v41 = vadd.f32 %v7231_v53, %v7198_v4 }
 0x56a   : > { %v7264_v33 = vpack.c.bf16 %v7263_v39, %v7263_v39  ;;  %v7250_v58 = vmax.f32 %v14392_v18, %v7232_v41  ;;  %v10449_v18 = vld [vmem:[%s14581_s6 + $0x318] sm:$0xff] }
 0x56b   : > { %8309 = vmatpush.bf16.msrb.mxu0 %v10449_v18  ;;  %v10437_v18 = vld [vmem:[%s14581_s6 + $0x2b8] sm:$0xff] }
 0x56c   : > { %7266 = vrot.lane.b32.xlu2 %v7264_v33, %s10698_s23  ;;  %8279 = vmatpush.bf16.msra.mxu2 %v10437_v18 }
 0x56d   : > { %v7199_v10 = vpop.f32.mrf.mxu2  ;;  %v7233_v8 = vpop.f32.mrf.mxu3 }
 0x56e   : > { %v7200_v44 = vadd.f32 %v7199_v10, %v7166_v3  ;;  %v6731_v0 = vpop.permute.xlu1 %6730  ;;  %v7134_v52 = vpop.f32.mrf.mxu0 }
 0x56f   : > { %6733 = vst.msk [vmem:[#allocation4 + $0x24] sm:$0xf] %vm5040_vm6, %v6731_v0  ;;  %v7168_v27 = vpop.f32.mrf.mxu1  ;;  %8310 = vmatpush.bf16.msrb.mxu0 %v10448_v57  ;;  %v10443_v57 = vld [vmem:[%s14581_s6 + $0x2e8] sm:$0xff] }
 0x570   : > { %v7234_v36 = vadd.f32 %v7233_v8, %v7200_v44  ;;  %v7169_v25 = vadd.f32 %v7168_v27, %v7134_v52 }
 0x572   : > { %v7251_v40 = vmax.f32 %v14394_v56, %v7234_v36 }
 0x573   : > { %8311 = vmatpush.bf16.msrb.mxu0 %v10447_v48  ;;  %v10442_v48 = vld [vmem:[%s14581_s6 + $0x2e0] sm:$0xff] }
 0x574   : > { %v7270_v46 = vmax.f32 %v7250_v58, %v7251_v40 }
 0x575   : > { %v7202_v63 = vpop.f32.mrf.mxu2  ;;  %v7236_v2 = vpop.f32.mrf.mxu3 }
 0x576   : > { %v7136_v14 = vpop.f32.mrf.mxu0  ;;  %v7293_v43 = vld [vmem:[#allocation4 + $0x20] sm:$0xff]  ;;  %v7203_v7 = vadd.f32 %v7202_v63, %v7169_v25  ;;  %v7271_v61 = vadd.f32 %v10632_v6, %v7270_v46 }
 0x577   : > { %v7170_v5 = vpop.f32.mrf.mxu1  ;;  %v7515_v31 = vunpack.c.l.b16 %v7293_v43  ;;  %v7516_v49 = vunpack.c.h.b16 %v7293_v43 }
 0x578   : > { %v7171_v9 = vadd.f32 %v7170_v5, %v7136_v14  ;;  %v7237_v50 = vadd.f32 %v7236_v2, %v7203_v7  ;;  %v7272_v53 = vmax.f32 %v7271_v61, 0.0 }
 0x579   : > { %v7528_v47 = vpack.c.b16 %v7515_v31, %v7515_v31  ;;  %v7529_v28 = vpack.c.b16 %v7516_v49, %v7516_v49 }
 0x57a   : > { %v7252_v23 = vmax.f32 %v14396_v16, %v7237_v50  ;;  %v10446_v16 = vld [vmem:[%s14581_s6 + $0x300] sm:$0xff]  ;;  %v7273_v11 = vpack.c.bf16 %v7272_v53, %v7272_v53  ;;  %v10436_v50 = vld [vmem:[%s14581_s6 + $0x2b0] sm:$0xff] }
 0x57b   : > { %8261 = vmatmul.bf16.vlgmr.msra.gmra.mxu0 %v7528_v47  ;;  %8274 = vmatmul.bf16.vlgmr.msra.gmra.mxu1 %v7529_v28 }
 0x57c   : > { %8312 = vmatpush.bf16.msrb.mxu0 %v10446_v16  ;;  %7274 = vst.msk [vmem:[#allocation4 + $0x2c] sm:$0xf] %vm5030_vm5, %v7273_v11  ;;  %8280 = vmatpush.bf16.msra.mxu2 %v10436_v50  ;;  %v10430_v16 = vld [vmem:[%s14581_s6 + $0x280] sm:$0xff] }
 0x57d   : > { %v7204_v56 = vpop.f32.mrf.mxu2  ;;  %v7238_v45 = vpop.f32.mrf.mxu3 }
 0x57e   : > { %v7205_v60 = vadd.f32 %v7204_v56, %v7171_v9  ;;  %v7139_v26 = vpop.f32.mrf.mxu0  ;;  %v10445_v56 = vld [vmem:[%s14581_s6 + $0x2f8] sm:$0xff] }
 0x57f   : > { %v7173_v24 = vpop.f32.mrf.mxu1  ;;  %8292 = vmatpush.bf16.msra.mxu3 %v10445_v56 }
 0x580   : > { %v7239_v38 = vadd.f32 %v7238_v45, %v7205_v60  ;;  %v7174_v12 = vadd.f32 %v7173_v24, %v7139_v26  ;;  %v10444_v60 = vld [vmem:[%s14581_s6 + $0x2f0] sm:$0xff]  ;;  %v10435_v26 = vld [vmem:[%s14581_s6 + $0x2a8] sm:$0xff] }
 0x581   : > { %8281 = vmatpush.bf16.msra.mxu2 %v10435_v26 }
 0x582   : > { %v7253_v54 = vmax.f32 %v14398_v51, %v7239_v38 }
 0x583   : > { %8293 = vmatpush.bf16.msra.mxu3 %v10444_v60 }
 0x584   : > { %v7275_v30 = vmax.f32 %v7252_v23, %v7253_v54  ;;  %v10434_v54 = vld [vmem:[%s14581_s6 + $0x2a0] sm:$0xff] }
 0x585   : > { %v7207_v15 = vpop.f32.mrf.mxu2  ;;  %v7241_v17 = vpop.f32.mrf.mxu3  ;;  %8282 = vmatpush.bf16.msra.mxu2 %v10434_v54 }
 0x586   : > { %v7276_v21 = vadd.f32 %v10632_v6, %v7275_v30  ;;  %v7141_v42 = vpop.f32.mrf.mxu0  ;;  %v7208_v22 = vadd.f32 %v7207_v15, %v7174_v12  ;;  %v10433_v30 = vld [vmem:[%s14581_s6 + $0x298] sm:$0xff] }
 0x587   : > { %v7175_v51 = vpop.f32.mrf.mxu1  ;;  %8294 = vmatpush.bf16.msra.mxu3 %v10443_v57  ;;  %v10441_v15 = vld [vmem:[%s14581_s6 + $0x2d8] sm:$0xff] }
 0x588   : > { %v7277_v13 = vmax.f32 %v7276_v21, 0.0  ;;  %v7176_v59 = vadd.f32 %v7175_v51, %v7141_v42  ;;  %v7242_v29 = vadd.f32 %v7241_v17, %v7208_v22  ;;  %v10432_v17 = vld [vmem:[%s14581_s6 + $0x290] sm:$0xff]  ;;  %v10431_v21 = vld [vmem:[%s14581_s6 + $0x288] sm:$0xff]  ;;  %v10438_v51 = vld [vmem:[%s14581_s6 + $0x2c0] sm:$0xff] }
 0x589   : > { %8283 = vmatpush.bf16.msra.mxu2 %v10433_v30  ;;  %v10439_v42 = vld [vmem:[%s14581_s6 + $0x2c8] sm:$0xff] }
 0x58a   : > { %v7278_v35 = vpack.c.bf16 %v7277_v13, %v7277_v13  ;;  %v7254_v10 = vmax.f32 %v14400_v19, %v7242_v29 }
 0x58b   : > { %8295 = vmatpush.bf16.msra.mxu3 %v10442_v48 }
 0x58c   : > { %7280 = vrot.lane.b32.xlu0 %v7278_v35, %s10698_s23  ;;  %s8332_s23 = sshll.u32 %s313_s20, 4  ;;  %s8333_s23 = int_to_ptr.vmem [resolvable:$true] %s8332_s23 }
 0x58d   : > { %v7209_v1 = vpop.f32.mrf.mxu2  ;;  %v7243_v62 = vpop.f32.mrf.mxu3  ;;  %8284 = vmatpush.bf16.msra.mxu2 %v10432_v17 }
 0x58e   : > { %v7210_v55 = vadd.f32 %v7209_v1, %v7176_v59  ;;  %v8158_v39 = vpop.f32.mrf.mxu0 }
 0x58f   : > { %v8159_v4 = vadd.f32 %v10494_v32, %v8158_v39  ;;  %v8171_v33 = vpop.f32.mrf.mxu1  ;;  %8296 = vmatpush.bf16.msra.mxu3 %v10441_v15 }
 0x590   : > { %v7244_v3 = vadd.f32 %v7243_v62, %v7210_v55 }
 0x591   : > { %v8172_v34 = vadd.f32 %v8171_v33, %v8159_v4  ;;  %8285 = vmatpush.bf16.msra.mxu2 %v10431_v21 }
 0x592   : > { %v7255_v8 = vmax.f32 %v14408_v20, %v7244_v3 }
 0x594   : > { %v7284_v41 = vmax.f32 %v7254_v10, %v7255_v8 }
 0x595   : > { %v8184_v44 = vpop.f32.mrf.mxu2  ;;  %v8197_v0 = vpop.f32.mrf.mxu3  ;;  %8286 = vmatpush.bf16.msra.mxu2 %v10430_v16 }
 0x596   : > { %v7285_v52 = vadd.f32 %v10632_v6, %v7284_v41  ;;  %v8185_v37 = vadd.f32 %v8184_v44, %v8172_v34  ;;  %v8160_v27 = vpop.f32.mrf.mxu0  ;;  %v10440_v6 = vld [vmem:[%s14581_s6 + $0x2d0] sm:$0xff] }
 0x597   : > { %v8173_v36 = vpop.f32.mrf.mxu1  ;;  %8297 = vmatpush.bf16.msra.mxu3 %v10440_v6 }
 0x598   : > { %v7286_v58 = vmax.f32 %v7285_v52, 0.0  ;;  %v8198_v40 = vadd.f32 %v8197_v0, %v8185_v37 }
 0x59a   : > { %v7287_v46 = vpack.c.bf16 %v7286_v58, %v7286_v58 }
 0x59b   : > { %8298 = vmatpush.bf16.msra.mxu3 %v10439_v42 }
 0x59c   : > { %7288 = vst.msk [vmem:[#allocation4 + $0x30] sm:$0xf] %vm5030_vm5, %v7287_v46 }
 0x59d   : > { %v8186_v63 = vpop.f32.mrf.mxu2  ;;  %v8199_v2 = vpop.f32.mrf.mxu3 }
 0x59e   : > { %v8210_v14 = vpop.f32.mrf.mxu0 }
 0x59f   : > { %v8211_v43 = vadd.f32 %v8210_v14, %v8198_v40  ;;  %v8223_v5 = vpop.f32.mrf.mxu1  ;;  %8299 = vmatpush.bf16.msra.mxu3 %v10438_v51 }
 0x5a1   : > { %v8224_v19 = vadd.f32 %v8223_v5, %v8211_v43 }
 0x5a3   : > { %v7295_v31 = vld [vmem:[#allocation4 + $0x30] sm:$0xf] }
 0x5a4   : > { %v7519_v20 = vunpack.c.l.b16 %v7295_v31 }
 0x5a6   : > { %v8236_v49 = vpop.f32.mrf.mxu2  ;;  %v8249_v25 = vpop.f32.mrf.mxu3  ;;  %v7532_v47 = vpack.c.b16 %v7519_v20, %v7519_v20 }
 0x5a7   : > { %v8237_v28 = vadd.f32 %v8236_v49, %v8224_v19  ;;  %v8212_v7 = vpop.f32.mrf.mxu0  ;;  %v8225_v9 = vpop.f32.mrf.mxu1 }
 0x5a8   : > { %10061 = vmatmul.msk.bf16.vlgmr.msrb.gmra.mxu0 %vm2212_vm3, %v7532_v47 }
 0x5a9   : > { %v8250_v45 = vadd.f32 %v8249_v25, %v8237_v28 }
 0x5ae   : > { %v8238_v24 = vpop.f32.mrf.mxu2  ;;  %v8251_v38 = vpop.f32.mrf.mxu3 }
 0x5c6   : > { %v7267_v23 = vpop.permute.xlu2 %7266 }
 0x5c7   : > { %7269 = vst.msk [vmem:[#allocation4 + $0x28] sm:$0xf] %vm5040_vm6, %v7267_v23 }
 0x5f8   : > { %v8262_v61 = vpop.f32.mrf.mxu0  ;;  %v8275_v13 = vpop.f32.mrf.mxu1 }
 0x5f9   : > { %v8263_v12 = vadd.f32 %v8262_v61, %v8250_v45 }
 0x5fb   : > { %v8276_v22 = vadd.f32 %v8275_v13, %v8263_v12 }
 0x5fe   : > { %v7281_v35 = vpop.permute.xlu0 %7280 }
 0x5ff   : > { %7283 = vst.msk [vmem:[#allocation4 + $0x2c] sm:$0xf] %vm5040_vm6, %v7281_v35 }
 0x600   : > { %v8264_v32 = vpop.f32.mrf.mxu0  ;;  %v8277_v59 = vpop.f32.mrf.mxu1 }
 0x606   : > { %v7294_v53 = vld [vmem:[#allocation4 + $0x28] sm:$0xff] }
 0x607   : > { %v7517_v1 = vunpack.c.l.b16 %v7294_v53  ;;  %v7518_v62 = vunpack.c.h.b16 %v7294_v53 }
 0x609   : > { %v7530_v29 = vpack.c.b16 %v7517_v1, %v7517_v1  ;;  %v7531_v55 = vpack.c.b16 %v7518_v62, %v7518_v62 }
 0x60b   : > { %8287 = vmatmul.bf16.vlgmr.msra.gmra.mxu2 %v7530_v29  ;;  %8300 = vmatmul.bf16.vlgmr.msra.gmra.mxu3 %v7531_v55 }
 0x625   : > { %v8314_v39 = vpop.f32.mrf.mxu0 }
 0x62d   : > { %v8316_v11 = vpop.f32.mrf.mxu0 }
 0x68e   : > { %v8288_v4 = vpop.f32.mrf.mxu2  ;;  %v8301_v33 = vpop.f32.mrf.mxu3 }
 0x68f   : > { %v8289_v3 = vadd.f32 %v8288_v4, %v8276_v22 }
 0x691   : > { %v8302_v34 = vadd.f32 %v8301_v33, %v8289_v3 }
 0x693   : > { %v8315_v10 = vadd.f32 %v8314_v39, %v8302_v34 }
 0x695   : > { %8318 = vst [vmem:[%s313_s20] sm:$0xff] %v8315_v10 }
 0x696   : > { %v8290_v8 = vpop.f32.mrf.mxu2  ;;  %v8303_v41 = vpop.f32.mrf.mxu3 }
 0x697   : > { %10660 = shalt.err (!%p10657_p3)
}
 0x698   : > { %10451 = dma.vmem_to_hbm [thread:$0]  (%p10783_p5), %s8333_s23, 128, %s8335_s26, %s8320_s12  }
 0x699 PF: > { %p10457_p4 = scmp.ge.s32.totalorder %s10695_s30, 2  ;;  %s8346_s25 = sand.u32 1, %s10683_s27  }
 0x69a   : > { %s8347_s21 = scalar_lea.sflag [#allocation6], %s8346_s25 }
 0x69b   : > { %p10454_p7 = pnand %p10457_p4, %p10787_p6 }
 0x69d   : > { %p10455_p8 = pneg %p10454_p7 }
 0x69f   : > { %10678 = dma.done.wait (%p10455_p8), %s8347_s21, 128  }
 0x6a0   : > { %10680 = vsyncadd (%p10455_p8), %s8347_s21, 4294967168  ;;  %p18_p9 = scmp.ge.s32.totalorder %s10770_s11, 4   ;;  %s14803_s27 = smov %s10687_s28 }
 0x6a1   : > { %s14804_s28 = smov %s10691_s29  ;;  %s14805_s29 = smov %s10781_s14 }
 0x6a2   : > { %s14806_s30 = smov %s10770_s11  ;;  %20 = sbr.rel (!%p18_p9) target bundleno = 3 (0x3), region = 90 }
 0x6a7   :  { %8353 = vsyncpa [#allocation6], 1 }
 0x6a8   :  { %8355 = vsyncpa [#allocation6 + $0x1], 1 }

</bundles_post_ra>
